<compile_context>
chip_gen: v6e
topology: v6e:2x2x1
jax: 0.10.0
libtpu: 0.0.40
codegen_flags: <defaults>
</compile_context>

<pallas_src>
import functools

import numpy as np
import jax
import jax.numpy as jnp
from jax import lax
from jax.experimental import pallas as pl
from jax.experimental.pallas import tpu as pltpu

N_FILTER = 8
LEAKY_SLOPE = 0.2
_TAPS = tuple((dy, dx) for dy in (-1, 0, 1) for dx in (-1, 0, 1))


# ---------------------------------------------------------------------------
# in-kernel helpers (trace into the Pallas kernel body)
# ---------------------------------------------------------------------------
def _leaky(x):
    return jnp.where(x > 0, x, LEAKY_SLOPE * x)


def _roll_last(x, s):
    """result[..., p] = x[..., (p + s) % n] for a static shift s."""
    n = x.shape[-1]
    s = s % n
    if s == 0:
        return x
    return jnp.concatenate([x[..., s:], x[..., :s]], axis=-1)


def _conv3x3(x, w_bf16, masks, W):
    """3x3 / stride-1 / pad-1 conv as a single im2col matmul.

    x      : (Cin, H*W)    f32, row-major flattened spatial
    w_bf16 : (Cout, 9*Cin) bf16, packed as w[o, (ky*3+kx)*Cin + c]
    masks  : (9, H*W)      f32 0/1 border-validity masks (tap order == _TAPS)
    """
    taps = []
    for t, (dy, dx) in enumerate(_TAPS):
        shifted = _roll_last(x, dy * W + dx)
        taps.append(shifted * masks[t:t + 1, :])
    slab = jnp.concatenate(taps, axis=0)                       # (9*Cin, H*W)
    return jnp.dot(w_bf16, slab.astype(jnp.bfloat16),
                   preferred_element_type=jnp.float32)         # (Cout, H*W)


def _conv1x1(x, w_bf16):
    return jnp.dot(w_bf16, x.astype(jnp.bfloat16),
                   preferred_element_type=jnp.float32)


def _pool_cat(x, sel_bf16, W):
    """concat([max_pool2x2, min_pool2x2]) with the 0/-999 sentinel trick, stride 2.

    x        : (C, H*W)       f32 at resolution (H, W)
    sel_bf16 : (H*W, H*W/4)   0/1 anchor-selection matrix
    returns  : (2*C, H*W/4)   f32
    """
    def win_max(a):            # max over the 2x2 window anchored at flat index p
        m = jnp.maximum(a, _roll_last(a, 1))
        return jnp.maximum(m, _roll_last(m, W))

    mx = win_max(x)
    neg = jnp.where(x == 0.0, jnp.full_like(x, -999.0), -x)
    mn = -win_max(neg)
    mn = jnp.where(mn == 999.0, jnp.zeros_like(mn), mn)
    both = jnp.concatenate([mx, mn], axis=0)                   # (2C, H*W)
    # stride-2 subsample of the window anchors via a 0/1 selection matmul
    # (bf16 0/1 weights reproduce the selected values exactly).
    return jnp.dot(both.astype(jnp.bfloat16), sel_bf16,
                   preferred_element_type=jnp.float32)         # (2C, H*W/4)


def _refine_kernel(depth_ref, image_ref,
                   wa_ref, w2_ref, w3_ref, w4_ref, w5_ref, w6_ref, w7_ref,
                   wl1_ref, wl2_ref, wl3_ref,
                   mk1_ref, mk2_ref, mk3_ref,
                   sel1_ref, sel2_ref, up1_ref, up2_ref,
                   o_ref, *, W):
    W1, W2, W3 = W, W // 2, W // 4
    d = depth_ref[...]                     # (1, H*W)
    img = image_ref[...]                   # (3, H*W)
    mk1, mk2, mk3 = mk1_ref[...], mk2_ref[...], mk3_ref[...]

    # conv_depth1(depth)  ||  conv_img([image, depth/(depth+1e-6)]) are fused into
    # one 5-input-channel 3x3 conv with a block-zero packed weight, so cnv1 comes
    # out already as cat([cnv1_d, cnv1_c], channel axis).
    mask_outer = d / (d + 1e-6)
    x5 = jnp.concatenate([d, img, mask_outer], axis=0)         # (5, H*W)
    cnv1 = _leaky(_conv3x3(x5, wa_ref[...], mk1, W1))          # (16, H*W)
    cnv2 = _leaky(_conv3x3(cnv1, w2_ref[...], mk1, W1))        # (16, H*W)
    hyper1 = jnp.concatenate([cnv1, cnv2], axis=0)             # (32, H*W)

    pool1 = _pool_cat(hyper1, sel1_ref[...], W1)               # (64, H*W/4)
    cnv3 = _leaky(_conv3x3(pool1, w3_ref[...], mk2, W2))       # (32, H*W/4)
    cnv4 = _leaky(_conv3x3(cnv3, w4_ref[...], mk2, W2))        # (32, H*W/4)
    # bilinear x2 upsample as one matmul against the precomputed interp operator
    up1 = jnp.dot(cnv4.astype(jnp.bfloat16), up1_ref[...],
                  preferred_element_type=jnp.float32)          # (32, H*W)

    hyper2 = jnp.concatenate([cnv3, cnv4], axis=0)             # (64, H*W/4)
    pool2 = _pool_cat(hyper2, sel2_ref[...], W2)               # (128, H*W/16)
    cnv5 = _leaky(_conv3x3(pool2, w5_ref[...], mk3, W3))       # (64, H*W/16)
    cnv6 = _leaky(_conv3x3(cnv5, w6_ref[...], mk3, W3))
    cnv7 = _leaky(_conv3x3(cnv6, w7_ref[...], mk3, W3))
    up2 = jnp.dot(cnv7.astype(jnp.bfloat16), up2_ref[...],
                  preferred_element_type=jnp.float32)          # (64, H*W)

    cat = jnp.concatenate([cnv2, up1, up2], axis=0)            # (112, H*W)
    cnv8 = _leaky(_conv1x1(cat, wl1_ref[...]))                 # (16, H*W)
    cnv9 = _leaky(_conv1x1(cnv8, wl2_ref[...]))                # (8, H*W)
    o_ref[...] = jnp.tanh(_conv1x1(cnv9, wl3_ref[...]))        # (8, H*W)


# ---------------------------------------------------------------------------
# wrapper: constant operators, weight packing, pallas_call
# ---------------------------------------------------------------------------
def _pack3x3(w):
    cout, cin = w.shape[0], w.shape[1]
    return jnp.transpose(w, (0, 2, 3, 1)).reshape(cout, 9 * cin).astype(jnp.bfloat16)


def _shift_masks(H, W):
    hh, ww = np.meshgrid(np.arange(H), np.arange(W), indexing="ij")
    rows = []
    for dy, dx in _TAPS:
        valid = ((hh + dy >= 0) & (hh + dy < H) & (ww + dx >= 0) & (ww + dx < W))
        rows.append(valid.reshape(-1).astype(np.float32))
    return jnp.asarray(np.stack(rows, axis=0))                 # (9, H*W)


def _pool_select(H, W):
    S = np.zeros((H * W, (H // 2) * (W // 2)), np.float32)
    for i in range(H // 2):
        for j in range(W // 2):
            S[2 * i * W + 2 * j, i * (W // 2) + j] = 1.0
    return jnp.asarray(S, dtype=jnp.bfloat16)


def _bilinear_1d(n_in, n_out):
    # PyTorch F.interpolate(mode='bilinear', align_corners=False)
    i = np.arange(n_out, dtype=np.float64)
    src = np.maximum((i + 0.5) * (n_in / n_out) - 0.5, 0.0)
    i0 = np.minimum(np.floor(src).astype(np.int64), n_in - 1)
    i1 = np.minimum(i0 + 1, n_in - 1)
    frac = src - i0
    M = np.zeros((n_out, n_in), np.float64)
    M[np.arange(n_out), i0] += 1.0 - frac
    M[np.arange(n_out), i1] += frac
    return M


def _upsample_T(h, w, H, W):
    U = np.kron(_bilinear_1d(h, H), _bilinear_1d(w, W))        # (H*W, h*w)
    return jnp.asarray(U.T.astype(np.float32), dtype=jnp.bfloat16)   # (h*w, H*W)


def refine_mesh_depth(depth, image, params):
    N, dc, H, W = depth.shape
    assert dc == 1 and H % 4 == 0 and W % 4 == 0
    F = N_FILTER
    HW1 = H * W

    # Fuse conv_depth1 (depth channel) and conv_img ([image, mask] channels) into a
    # single 5-channel conv via a block-zero weight.
    w_fused = jnp.zeros((2 * F, 5, 3, 3), jnp.float32)
    w_fused = w_fused.at[:F, 0:1].set(params["w_d1"])
    w_fused = w_fused.at[F:, 1:5].set(params["w_im"])

    weights = [
        _pack3x3(w_fused),                                     # (16, 45)
        _pack3x3(params["w_d2"]),                              # (16, 144)
        _pack3x3(params["w_p1"]),                              # (32, 576)
        _pack3x3(params["w_p2"]),                              # (32, 288)
        _pack3x3(params["w_p3"]),                              # (64, 1152)
        _pack3x3(params["w_p4"]),                              # (64, 576)
        _pack3x3(params["w_p5"]),                              # (64, 576)
        params["w_l1"].reshape(2 * F, 14 * F).astype(jnp.bfloat16),
        params["w_l2"].reshape(F, 2 * F).astype(jnp.bfloat16),
        params["w_l3"].reshape(F, F).astype(jnp.bfloat16),
    ]
    consts = [
        _shift_masks(H, W),
        _shift_masks(H // 2, W // 2),
        _shift_masks(H // 4, W // 4),
        _pool_select(H, W),
        _pool_select(H // 2, W // 2),
        _upsample_T(H // 2, W // 2, H, W),
        _upsample_T(H // 4, W // 4, H, W),
    ]

    depth_f = depth.reshape(N, 1, HW1)
    image_f = image.reshape(N, 3, HW1)

    def _resident(a):
        nd = a.ndim
        return pl.BlockSpec(a.shape, lambda b, _nd=nd: (0,) * _nd)

    out_flat = pl.pallas_call(
        functools.partial(_refine_kernel, W=W),
        out_shape=jax.ShapeDtypeStruct((N, F, HW1), jnp.float32),
        grid_spec=pltpu.PrefetchScalarGridSpec(
            num_scalar_prefetch=0,
            grid=(N,),
            in_specs=[
                pl.BlockSpec((None, 1, HW1), lambda b: (b, 0, 0)),
                pl.BlockSpec((None, 3, HW1), lambda b: (b, 0, 0)),
            ] + [_resident(a) for a in weights + consts],
            out_specs=pl.BlockSpec((None, F, HW1), lambda b: (b, 0, 0)),
        ),
        compiler_params=pltpu.CompilerParams(
            dimension_semantics=("parallel",)),
    )(depth_f, image_f, *weights, *consts)

    return out_flat.reshape(N, F, H, W)


# ---------------------------------------------------------------------------
# pure-JAX reference of the PyTorch forward pass (for correctness checking)
# ---------------------------------------------------------------------------
def _conv_ref(x, w, pad):
    # Kernel uses single-pass bf16 MXU matmuls -> cast here too so numerics match.
    return lax.conv_general_dilated(
        x.astype(jnp.bfloat16), w.astype(jnp.bfloat16),
        window_strides=(1, 1), padding=((pad, pad), (pad, pad)),
        dimension_numbers=("NCHW", "OIHW", "NCHW"),
        preferred_element_type=jnp.float32)


def _maxpool2_ref(x):
    return lax.reduce_window(x, -jnp.inf, lax.max,
                             (1, 1, 2, 2), (1, 1, 2, 2), "VALID")


def _minpool2_ref(x):
    n = jnp.where(x == 0.0, jnp.full_like(x, -999.0), -x)
    m = -_maxpool2_ref(n)
    return jnp.where(m == 999.0, jnp.zeros_like(m), m)


def _bilinear_ref(x, H_out, W_out):
    n, c, h, w = x.shape

    def coords(n_in, n_out):
        src = jnp.maximum((jnp.arange(n_out, dtype=jnp.float32) + 0.5)
                          * (n_in / n_out) - 0.5, 0.0)
        i0 = jnp.minimum(jnp.floor(src).astype(jnp.int32), n_in - 1)
        i1 = jnp.minimum(i0 + 1, n_in - 1)
        f = src - i0.astype(jnp.float32)
        return i0, i1, f

    r0, r1, fr = coords(h, H_out)
    c0, c1, fc = coords(w, W_out)
    xr = (x[:, :, r0, :] * (1.0 - fr)[None, None, :, None]
          + x[:, :, r1, :] * fr[None, None, :, None])
    return (xr[:, :, :, c0] * (1.0 - fc)[None, None, None, :]
            + xr[:, :, :, c1] * fc[None, None, None, :])


def _bf16_roundtrip(x):
    # The kernel implements bilinear upsampling as a bf16 MXU matmul; mirror that
    # input quantization so kernel and reference stay numerically comparable.
    return x.astype(jnp.bfloat16).astype(jnp.float32)


def reference(depth, image, p):
    mask_outer = depth / (depth + 1e-6)
    extend_img = jnp.concatenate([image, mask_outer], axis=1)
    cnv1_d = _leaky(_conv_ref(depth, p["w_d1"], 1))
    cnv1_c = _leaky(_conv_ref(extend_img, p["w_im"], 1))
    cnv1 = jnp.concatenate([cnv1_d, cnv1_c], axis=1)
    cnv2 = _leaky(_conv_ref(cnv1, p["w_d2"], 1))
    hyper1 = jnp.concatenate([cnv1, cnv2], axis=1)
    pool1 = jnp.concatenate([_maxpool2_ref(hyper1), _minpool2_ref(hyper1)], axis=1)
    cnv3 = _leaky(_conv_ref(pool1, p["w_p1"], 1))
    cnv4 = _leaky(_conv_ref(cnv3, p["w_p2"], 1))
    _, _, H, W = cnv2.shape
    up1 = _bilinear_ref(_bf16_roundtrip(cnv4), H, W)
    hyper2 = jnp.concatenate([cnv3, cnv4], axis=1)
    pool2 = jnp.concatenate([_maxpool2_ref(hyper2), _minpool2_ref(hyper2)], axis=1)
    cnv5 = _leaky(_conv_ref(pool2, p["w_p3"], 1))
    cnv6 = _leaky(_conv_ref(cnv5, p["w_p4"], 1))
    cnv7 = _leaky(_conv_ref(cnv6, p["w_p5"], 1))
    up2 = _bilinear_ref(_bf16_roundtrip(cnv7), H, W)
    cat = jnp.concatenate([cnv2, up1, up2], axis=1)
    cnv8 = _leaky(_conv_ref(cat, p["w_l1"], 0))
    cnv9 = _leaky(_conv_ref(cnv8, p["w_l2"], 0))
    return jnp.tanh(_conv_ref(cnv9, p["w_l3"], 0))


if __name__ == "__main__":
    key = jax.random.PRNGKey(0)
    N, H, W = 2, 16, 16
    F = N_FILTER
    keys = jax.random.split(key, 16)

    # depth: mesh-style sparse map with exact zeros (exercises the 0 / -999
    # sentinel min-pool path); image: dense RGB-like input.
    dvals = jax.random.uniform(keys[0], (N, 1, H, W), jnp.float32, 0.5, 3.0)
    dmask = (jax.random.uniform(keys[1], (N, 1, H, W)) < 0.4).astype(jnp.float32)
    depth = dvals * dmask
    image = jax.random.uniform(keys[2], (N, 3, H, W), jnp.float32, 0.0, 1.0)

    def kaiming(k, cout, cin, ks):
        bound = (6.0 / (cin * ks * ks)) ** 0.5
        return jax.random.uniform(k, (cout, cin, ks, ks), jnp.float32, -bound, bound)

    params = {
        "w_d1": kaiming(keys[3], F, 1, 3),          # conv_depth1
        "w_im": kaiming(keys[4], F, 4, 3),          # conv_img
        "w_d2": kaiming(keys[5], 2 * F, 2 * F, 3),  # conv_depth2
        "w_p1": kaiming(keys[6], 4 * F, 8 * F, 3),  # conv_pool1
        "w_p2": kaiming(keys[7], 4 * F, 4 * F, 3),  # conv_pool2
        "w_p3": kaiming(keys[8], 8 * F, 16 * F, 3),  # conv_pool3
        "w_p4": kaiming(keys[9], 8 * F, 8 * F, 3),  # conv_pool4
        "w_p5": kaiming(keys[10], 8 * F, 8 * F, 3),  # conv_pool5
        "w_l1": kaiming(keys[11], 2 * F, 14 * F, 1),  # conv_last1 (1x1)
        "w_l2": kaiming(keys[12], F, 2 * F, 1),       # conv_last2 (1x1)
        "w_l3": kaiming(keys[13], F, F, 1),           # conv_last3 (1x1, tanh)
    }

    out = jax.block_until_ready(refine_mesh_depth(depth, image, params))
    ref = reference(depth, image, params)

    assert out.shape == (N, F, H, W)
    err = float(jnp.max(jnp.abs(out - ref)))
    assert jnp.allclose(out, ref, rtol=1e-2, atol=1e-2), err
    print("KERNEL_OK")
</pallas_src>

<mosaic_0001>
module attributes {stable_mosaic.version = 11 : i64} {
  func.func @_refine_kernel(%arg0: i32, %arg1: memref<1x1x256xf32, #tpu.memory_space<vmem>>, %arg2: memref<1x3x256xf32, #tpu.memory_space<vmem>>, %arg3: memref<16x45xbf16, #tpu.memory_space<vmem>>, %arg4: memref<16x144xbf16, #tpu.memory_space<vmem>>, %arg5: memref<32x576xbf16, #tpu.memory_space<vmem>>, %arg6: memref<32x288xbf16, #tpu.memory_space<vmem>>, %arg7: memref<64x1152xbf16, #tpu.memory_space<vmem>>, %arg8: memref<64x576xbf16, #tpu.memory_space<vmem>>, %arg9: memref<64x576xbf16, #tpu.memory_space<vmem>>, %arg10: memref<16x112xbf16, #tpu.memory_space<vmem>>, %arg11: memref<8x16xbf16, #tpu.memory_space<vmem>>, %arg12: memref<8x8xbf16, #tpu.memory_space<vmem>>, %arg13: memref<9x256xf32, #tpu.memory_space<vmem>>, %arg14: memref<9x64xf32, #tpu.memory_space<vmem>>, %arg15: memref<9x16xf32, #tpu.memory_space<vmem>>, %arg16: memref<256x64xbf16, #tpu.memory_space<vmem>>, %arg17: memref<64x16xbf16, #tpu.memory_space<vmem>>, %arg18: memref<64x256xbf16, #tpu.memory_space<vmem>>, %arg19: memref<16x256xbf16, #tpu.memory_space<vmem>>, %arg20: memref<1x8x256xf32, #tpu.memory_space<vmem>>) attributes {dimension_semantics = [#tpu.dimension_semantics<parallel>], iteration_bounds = array<i64: 2>, scalar_prefetch = 0 : i64, scratch_operands = 0 : i64, tpu.core_type = #tpu.core_type<tc>, window_params = [{transform_indices = @transform_0, window_bounds = array<i64: 1, 1, 256>}, {transform_indices = @transform_1, window_bounds = array<i64: 1, 3, 256>}, {pipeline_mode = #tpu.pipeline_mode<synchronous>, transform_indices = @transform_2, window_bounds = array<i64: 16, 45>}, {pipeline_mode = #tpu.pipeline_mode<synchronous>, transform_indices = @transform_3, window_bounds = array<i64: 16, 144>}, {pipeline_mode = #tpu.pipeline_mode<synchronous>, transform_indices = @transform_4, window_bounds = array<i64: 32, 576>}, {pipeline_mode = #tpu.pipeline_mode<synchronous>, transform_indices = @transform_5, window_bounds = array<i64: 32, 288>}, {pipeline_mode = #tpu.pipeline_mode<synchronous>, transform_indices = @transform_6, window_bounds = array<i64: 64, 1152>}, {pipeline_mode = #tpu.pipeline_mode<synchronous>, transform_indices = @transform_7, window_bounds = array<i64: 64, 576>}, {pipeline_mode = #tpu.pipeline_mode<synchronous>, transform_indices = @transform_8, window_bounds = array<i64: 64, 576>}, {pipeline_mode = #tpu.pipeline_mode<synchronous>, transform_indices = @transform_9, window_bounds = array<i64: 16, 112>}, {pipeline_mode = #tpu.pipeline_mode<synchronous>, transform_indices = @transform_10, window_bounds = array<i64: 8, 16>}, {pipeline_mode = #tpu.pipeline_mode<synchronous>, transform_indices = @transform_11, window_bounds = array<i64: 8, 8>}, {pipeline_mode = #tpu.pipeline_mode<synchronous>, transform_indices = @transform_12, window_bounds = array<i64: 9, 256>}, {pipeline_mode = #tpu.pipeline_mode<synchronous>, transform_indices = @transform_13, window_bounds = array<i64: 9, 64>}, {pipeline_mode = #tpu.pipeline_mode<synchronous>, transform_indices = @transform_14, window_bounds = array<i64: 9, 16>}, {pipeline_mode = #tpu.pipeline_mode<synchronous>, transform_indices = @transform_15, window_bounds = array<i64: 256, 64>}, {pipeline_mode = #tpu.pipeline_mode<synchronous>, transform_indices = @transform_16, window_bounds = array<i64: 64, 16>}, {pipeline_mode = #tpu.pipeline_mode<synchronous>, transform_indices = @transform_17, window_bounds = array<i64: 64, 256>}, {pipeline_mode = #tpu.pipeline_mode<synchronous>, transform_indices = @transform_18, window_bounds = array<i64: 16, 256>}, {transform_indices = @transform_19, window_bounds = array<i64: 1, 8, 256>}]} {
    %c0 = arith.constant 0 : index
    %c0_0 = arith.constant 0 : index
    %c0_1 = arith.constant 0 : index
    %0 = vector.load %arg1[%c0, %c0_0, %c0_1] : memref<1x1x256xf32, #tpu.memory_space<vmem>>, vector<1x1x256xf32>
    %1 = vector.shape_cast %0 : vector<1x1x256xf32> to vector<1x256xf32>
    %c0_2 = arith.constant 0 : index
    %c0_3 = arith.constant 0 : index
    %c0_4 = arith.constant 0 : index
    %2 = vector.load %arg2[%c0_2, %c0_3, %c0_4] : memref<1x3x256xf32, #tpu.memory_space<vmem>>, vector<1x3x256xf32>
    %3 = vector.shape_cast %2 : vector<1x3x256xf32> to vector<3x256xf32>
    %c0_5 = arith.constant 0 : index
    %c0_6 = arith.constant 0 : index
    %4 = vector.load %arg13[%c0_5, %c0_6] : memref<9x256xf32, #tpu.memory_space<vmem>>, vector<9x256xf32>
    %c0_7 = arith.constant 0 : index
    %c0_8 = arith.constant 0 : index
    %5 = vector.load %arg14[%c0_7, %c0_8] : memref<9x64xf32, #tpu.memory_space<vmem>>, vector<9x64xf32>
    %c0_9 = arith.constant 0 : index
    %c0_10 = arith.constant 0 : index
    %6 = vector.load %arg15[%c0_9, %c0_10] : memref<9x16xf32, #tpu.memory_space<vmem>>, vector<9x16xf32>
    %cst = arith.constant 9.99999997E-7 : f32
    %7 = vector.broadcast %cst : f32 to vector<1x256xf32>
    %8 = arith.addf %1, %7 : vector<1x256xf32>
    %9 = arith.divf %1, %8 : vector<1x256xf32>
    %10 = tpu.concatenate %1, %3, %9 in 0 : vector<1x256xf32>, vector<3x256xf32>, vector<1x256xf32> -> vector<5x256xf32>
    %c0_11 = arith.constant 0 : index
    %c0_12 = arith.constant 0 : index
    %11 = vector.load %arg3[%c0_11, %c0_12] : memref<16x45xbf16, #tpu.memory_space<vmem>>, vector<16x45xbf16>
    %12 = vector.extract_strided_slice %10 {offsets = [0, 239], sizes = [5, 17], strides = [1, 1]} : vector<5x256xf32> to vector<5x17xf32>
    %13 = vector.extract_strided_slice %10 {offsets = [0, 0], sizes = [5, 239], strides = [1, 1]} : vector<5x256xf32> to vector<5x239xf32>
    %14 = tpu.concatenate %12, %13 in 1 : vector<5x17xf32>, vector<5x239xf32> -> vector<5x256xf32>
    %15 = vector.extract_strided_slice %4 {offsets = [0, 0], sizes = [1, 256], strides = [1, 1]} : vector<9x256xf32> to vector<1x256xf32>
    %16 = vector.broadcast %15 : vector<1x256xf32> to vector<5x256xf32>
    %17 = arith.mulf %14, %16 : vector<5x256xf32>
    %18 = vector.extract_strided_slice %10 {offsets = [0, 240], sizes = [5, 16], strides = [1, 1]} : vector<5x256xf32> to vector<5x16xf32>
    %19 = vector.extract_strided_slice %10 {offsets = [0, 0], sizes = [5, 240], strides = [1, 1]} : vector<5x256xf32> to vector<5x240xf32>
    %20 = tpu.concatenate %18, %19 in 1 : vector<5x16xf32>, vector<5x240xf32> -> vector<5x256xf32>
    %21 = vector.extract_strided_slice %4 {offsets = [1, 0], sizes = [1, 256], strides = [1, 1]} : vector<9x256xf32> to vector<1x256xf32>
    %22 = vector.broadcast %21 : vector<1x256xf32> to vector<5x256xf32>
    %23 = arith.mulf %20, %22 : vector<5x256xf32>
    %24 = vector.extract_strided_slice %10 {offsets = [0, 241], sizes = [5, 15], strides = [1, 1]} : vector<5x256xf32> to vector<5x15xf32>
    %25 = vector.extract_strided_slice %10 {offsets = [0, 0], sizes = [5, 241], strides = [1, 1]} : vector<5x256xf32> to vector<5x241xf32>
    %26 = tpu.concatenate %24, %25 in 1 : vector<5x15xf32>, vector<5x241xf32> -> vector<5x256xf32>
    %27 = vector.extract_strided_slice %4 {offsets = [2, 0], sizes = [1, 256], strides = [1, 1]} : vector<9x256xf32> to vector<1x256xf32>
    %28 = vector.broadcast %27 : vector<1x256xf32> to vector<5x256xf32>
    %29 = arith.mulf %26, %28 : vector<5x256xf32>
    %30 = vector.extract_strided_slice %10 {offsets = [0, 255], sizes = [5, 1], strides = [1, 1]} : vector<5x256xf32> to vector<5x1xf32>
    %31 = vector.extract_strided_slice %10 {offsets = [0, 0], sizes = [5, 255], strides = [1, 1]} : vector<5x256xf32> to vector<5x255xf32>
    %32 = tpu.concatenate %30, %31 in 1 : vector<5x1xf32>, vector<5x255xf32> -> vector<5x256xf32>
    %33 = vector.extract_strided_slice %4 {offsets = [3, 0], sizes = [1, 256], strides = [1, 1]} : vector<9x256xf32> to vector<1x256xf32>
    %34 = vector.broadcast %33 : vector<1x256xf32> to vector<5x256xf32>
    %35 = arith.mulf %32, %34 : vector<5x256xf32>
    %36 = vector.extract_strided_slice %4 {offsets = [4, 0], sizes = [1, 256], strides = [1, 1]} : vector<9x256xf32> to vector<1x256xf32>
    %37 = vector.broadcast %36 : vector<1x256xf32> to vector<5x256xf32>
    %38 = arith.mulf %10, %37 : vector<5x256xf32>
    %39 = vector.extract_strided_slice %10 {offsets = [0, 1], sizes = [5, 255], strides = [1, 1]} : vector<5x256xf32> to vector<5x255xf32>
    %40 = vector.extract_strided_slice %10 {offsets = [0, 0], sizes = [5, 1], strides = [1, 1]} : vector<5x256xf32> to vector<5x1xf32>
    %41 = tpu.concatenate %39, %40 in 1 : vector<5x255xf32>, vector<5x1xf32> -> vector<5x256xf32>
    %42 = vector.extract_strided_slice %4 {offsets = [5, 0], sizes = [1, 256], strides = [1, 1]} : vector<9x256xf32> to vector<1x256xf32>
    %43 = vector.broadcast %42 : vector<1x256xf32> to vector<5x256xf32>
    %44 = arith.mulf %41, %43 : vector<5x256xf32>
    %45 = vector.extract_strided_slice %10 {offsets = [0, 15], sizes = [5, 241], strides = [1, 1]} : vector<5x256xf32> to vector<5x241xf32>
    %46 = vector.extract_strided_slice %10 {offsets = [0, 0], sizes = [5, 15], strides = [1, 1]} : vector<5x256xf32> to vector<5x15xf32>
    %47 = tpu.concatenate %45, %46 in 1 : vector<5x241xf32>, vector<5x15xf32> -> vector<5x256xf32>
    %48 = vector.extract_strided_slice %4 {offsets = [6, 0], sizes = [1, 256], strides = [1, 1]} : vector<9x256xf32> to vector<1x256xf32>
    %49 = vector.broadcast %48 : vector<1x256xf32> to vector<5x256xf32>
    %50 = arith.mulf %47, %49 : vector<5x256xf32>
    %51 = vector.extract_strided_slice %10 {offsets = [0, 16], sizes = [5, 240], strides = [1, 1]} : vector<5x256xf32> to vector<5x240xf32>
    %52 = vector.extract_strided_slice %10 {offsets = [0, 0], sizes = [5, 16], strides = [1, 1]} : vector<5x256xf32> to vector<5x16xf32>
    %53 = tpu.concatenate %51, %52 in 1 : vector<5x240xf32>, vector<5x16xf32> -> vector<5x256xf32>
    %54 = vector.extract_strided_slice %4 {offsets = [7, 0], sizes = [1, 256], strides = [1, 1]} : vector<9x256xf32> to vector<1x256xf32>
    %55 = vector.broadcast %54 : vector<1x256xf32> to vector<5x256xf32>
    %56 = arith.mulf %53, %55 : vector<5x256xf32>
    %57 = vector.extract_strided_slice %10 {offsets = [0, 17], sizes = [5, 239], strides = [1, 1]} : vector<5x256xf32> to vector<5x239xf32>
    %58 = vector.extract_strided_slice %10 {offsets = [0, 0], sizes = [5, 17], strides = [1, 1]} : vector<5x256xf32> to vector<5x17xf32>
    %59 = tpu.concatenate %57, %58 in 1 : vector<5x239xf32>, vector<5x17xf32> -> vector<5x256xf32>
    %60 = vector.extract_strided_slice %4 {offsets = [8, 0], sizes = [1, 256], strides = [1, 1]} : vector<9x256xf32> to vector<1x256xf32>
    %61 = vector.broadcast %60 : vector<1x256xf32> to vector<5x256xf32>
    %62 = arith.mulf %59, %61 : vector<5x256xf32>
    %63 = tpu.concatenate %17, %23, %29, %35, %38, %44, %50, %56, %62 in 0 : vector<5x256xf32>, vector<5x256xf32>, vector<5x256xf32>, vector<5x256xf32>, vector<5x256xf32>, vector<5x256xf32>, vector<5x256xf32>, vector<5x256xf32>, vector<5x256xf32> -> vector<45x256xf32>
    %64 = arith.truncf %63 : vector<45x256xf32> to vector<45x256xbf16>
    %cst_13 = arith.constant dense<0.000000e+00> : vector<16x256xf32>
    %65 = tpu.matmul %11, %64, %cst_13 {dimension_numbers = #tpu.dot_dimension_numbers<[1], [0], [0], [1], [0, 0, 1, 1], [], []>} : vector<16x45xbf16>, vector<45x256xbf16>, vector<16x256xf32> -> vector<16x256xf32>
    %cst_14 = arith.constant 0.000000e+00 : f32
    %66 = vector.broadcast %cst_14 : f32 to vector<16x256xf32>
    %67 = arith.cmpf ogt, %65, %66 : vector<16x256xf32>
    %cst_15 = arith.constant 2.000000e-01 : f32
    %68 = vector.broadcast %cst_15 : f32 to vector<16x256xf32>
    %69 = arith.mulf %68, %65 : vector<16x256xf32>
    %70 = arith.select %67, %65, %69 : vector<16x256xi1>, vector<16x256xf32>
    %c0_16 = arith.constant 0 : index
    %c0_17 = arith.constant 0 : index
    %71 = vector.load %arg4[%c0_16, %c0_17] : memref<16x144xbf16, #tpu.memory_space<vmem>>, vector<16x144xbf16>
    %72 = vector.extract_strided_slice %70 {offsets = [0, 239], sizes = [16, 17], strides = [1, 1]} : vector<16x256xf32> to vector<16x17xf32>
    %73 = vector.extract_strided_slice %70 {offsets = [0, 0], sizes = [16, 239], strides = [1, 1]} : vector<16x256xf32> to vector<16x239xf32>
    %74 = tpu.concatenate %72, %73 in 1 : vector<16x17xf32>, vector<16x239xf32> -> vector<16x256xf32>
    %75 = vector.extract_strided_slice %4 {offsets = [0, 0], sizes = [1, 256], strides = [1, 1]} : vector<9x256xf32> to vector<1x256xf32>
    %76 = vector.broadcast %75 : vector<1x256xf32> to vector<16x256xf32>
    %77 = arith.mulf %74, %76 : vector<16x256xf32>
    %78 = vector.extract_strided_slice %70 {offsets = [0, 240], sizes = [16, 16], strides = [1, 1]} : vector<16x256xf32> to vector<16x16xf32>
    %79 = vector.extract_strided_slice %70 {offsets = [0, 0], sizes = [16, 240], strides = [1, 1]} : vector<16x256xf32> to vector<16x240xf32>
    %80 = tpu.concatenate %78, %79 in 1 : vector<16x16xf32>, vector<16x240xf32> -> vector<16x256xf32>
    %81 = vector.extract_strided_slice %4 {offsets = [1, 0], sizes = [1, 256], strides = [1, 1]} : vector<9x256xf32> to vector<1x256xf32>
    %82 = vector.broadcast %81 : vector<1x256xf32> to vector<16x256xf32>
    %83 = arith.mulf %80, %82 : vector<16x256xf32>
    %84 = vector.extract_strided_slice %70 {offsets = [0, 241], sizes = [16, 15], strides = [1, 1]} : vector<16x256xf32> to vector<16x15xf32>
    %85 = vector.extract_strided_slice %70 {offsets = [0, 0], sizes = [16, 241], strides = [1, 1]} : vector<16x256xf32> to vector<16x241xf32>
    %86 = tpu.concatenate %84, %85 in 1 : vector<16x15xf32>, vector<16x241xf32> -> vector<16x256xf32>
    %87 = vector.extract_strided_slice %4 {offsets = [2, 0], sizes = [1, 256], strides = [1, 1]} : vector<9x256xf32> to vector<1x256xf32>
    %88 = vector.broadcast %87 : vector<1x256xf32> to vector<16x256xf32>
    %89 = arith.mulf %86, %88 : vector<16x256xf32>
    %90 = vector.extract_strided_slice %70 {offsets = [0, 255], sizes = [16, 1], strides = [1, 1]} : vector<16x256xf32> to vector<16x1xf32>
    %91 = vector.extract_strided_slice %70 {offsets = [0, 0], sizes = [16, 255], strides = [1, 1]} : vector<16x256xf32> to vector<16x255xf32>
    %92 = tpu.concatenate %90, %91 in 1 : vector<16x1xf32>, vector<16x255xf32> -> vector<16x256xf32>
    %93 = vector.extract_strided_slice %4 {offsets = [3, 0], sizes = [1, 256], strides = [1, 1]} : vector<9x256xf32> to vector<1x256xf32>
    %94 = vector.broadcast %93 : vector<1x256xf32> to vector<16x256xf32>
    %95 = arith.mulf %92, %94 : vector<16x256xf32>
    %96 = vector.extract_strided_slice %4 {offsets = [4, 0], sizes = [1, 256], strides = [1, 1]} : vector<9x256xf32> to vector<1x256xf32>
    %97 = vector.broadcast %96 : vector<1x256xf32> to vector<16x256xf32>
    %98 = arith.mulf %70, %97 : vector<16x256xf32>
    %99 = vector.extract_strided_slice %70 {offsets = [0, 1], sizes = [16, 255], strides = [1, 1]} : vector<16x256xf32> to vector<16x255xf32>
    %100 = vector.extract_strided_slice %70 {offsets = [0, 0], sizes = [16, 1], strides = [1, 1]} : vector<16x256xf32> to vector<16x1xf32>
    %101 = tpu.concatenate %99, %100 in 1 : vector<16x255xf32>, vector<16x1xf32> -> vector<16x256xf32>
    %102 = vector.extract_strided_slice %4 {offsets = [5, 0], sizes = [1, 256], strides = [1, 1]} : vector<9x256xf32> to vector<1x256xf32>
    %103 = vector.broadcast %102 : vector<1x256xf32> to vector<16x256xf32>
    %104 = arith.mulf %101, %103 : vector<16x256xf32>
    %105 = vector.extract_strided_slice %70 {offsets = [0, 15], sizes = [16, 241], strides = [1, 1]} : vector<16x256xf32> to vector<16x241xf32>
    %106 = vector.extract_strided_slice %70 {offsets = [0, 0], sizes = [16, 15], strides = [1, 1]} : vector<16x256xf32> to vector<16x15xf32>
    %107 = tpu.concatenate %105, %106 in 1 : vector<16x241xf32>, vector<16x15xf32> -> vector<16x256xf32>
    %108 = vector.extract_strided_slice %4 {offsets = [6, 0], sizes = [1, 256], strides = [1, 1]} : vector<9x256xf32> to vector<1x256xf32>
    %109 = vector.broadcast %108 : vector<1x256xf32> to vector<16x256xf32>
    %110 = arith.mulf %107, %109 : vector<16x256xf32>
    %111 = vector.extract_strided_slice %70 {offsets = [0, 16], sizes = [16, 240], strides = [1, 1]} : vector<16x256xf32> to vector<16x240xf32>
    %112 = vector.extract_strided_slice %70 {offsets = [0, 0], sizes = [16, 16], strides = [1, 1]} : vector<16x256xf32> to vector<16x16xf32>
    %113 = tpu.concatenate %111, %112 in 1 : vector<16x240xf32>, vector<16x16xf32> -> vector<16x256xf32>
    %114 = vector.extract_strided_slice %4 {offsets = [7, 0], sizes = [1, 256], strides = [1, 1]} : vector<9x256xf32> to vector<1x256xf32>
    %115 = vector.broadcast %114 : vector<1x256xf32> to vector<16x256xf32>
    %116 = arith.mulf %113, %115 : vector<16x256xf32>
    %117 = vector.extract_strided_slice %70 {offsets = [0, 17], sizes = [16, 239], strides = [1, 1]} : vector<16x256xf32> to vector<16x239xf32>
    %118 = vector.extract_strided_slice %70 {offsets = [0, 0], sizes = [16, 17], strides = [1, 1]} : vector<16x256xf32> to vector<16x17xf32>
    %119 = tpu.concatenate %117, %118 in 1 : vector<16x239xf32>, vector<16x17xf32> -> vector<16x256xf32>
    %120 = vector.extract_strided_slice %4 {offsets = [8, 0], sizes = [1, 256], strides = [1, 1]} : vector<9x256xf32> to vector<1x256xf32>
    %121 = vector.broadcast %120 : vector<1x256xf32> to vector<16x256xf32>
    %122 = arith.mulf %119, %121 : vector<16x256xf32>
    %123 = tpu.concatenate %77, %83, %89, %95, %98, %104, %110, %116, %122 in 0 : vector<16x256xf32>, vector<16x256xf32>, vector<16x256xf32>, vector<16x256xf32>, vector<16x256xf32>, vector<16x256xf32>, vector<16x256xf32>, vector<16x256xf32>, vector<16x256xf32> -> vector<144x256xf32>
    %124 = arith.truncf %123 : vector<144x256xf32> to vector<144x256xbf16>
    %cst_18 = arith.constant dense<0.000000e+00> : vector<16x256xf32>
    %125 = tpu.matmul %71, %124, %cst_18 {dimension_numbers = #tpu.dot_dimension_numbers<[1], [0], [0], [1], [0, 0, 1, 1], [], []>} : vector<16x144xbf16>, vector<144x256xbf16>, vector<16x256xf32> -> vector<16x256xf32>
    %cst_19 = arith.constant 0.000000e+00 : f32
    %126 = vector.broadcast %cst_19 : f32 to vector<16x256xf32>
    %127 = arith.cmpf ogt, %125, %126 : vector<16x256xf32>
    %cst_20 = arith.constant 2.000000e-01 : f32
    %128 = vector.broadcast %cst_20 : f32 to vector<16x256xf32>
    %129 = arith.mulf %128, %125 : vector<16x256xf32>
    %130 = arith.select %127, %125, %129 : vector<16x256xi1>, vector<16x256xf32>
    %131 = tpu.concatenate %70, %130 in 0 : vector<16x256xf32>, vector<16x256xf32> -> vector<32x256xf32>
    %c0_21 = arith.constant 0 : index
    %c0_22 = arith.constant 0 : index
    %132 = vector.load %arg16[%c0_21, %c0_22] : memref<256x64xbf16, #tpu.memory_space<vmem>>, vector<256x64xbf16>
    %133 = vector.extract_strided_slice %131 {offsets = [0, 1], sizes = [32, 255], strides = [1, 1]} : vector<32x256xf32> to vector<32x255xf32>
    %134 = vector.extract_strided_slice %131 {offsets = [0, 0], sizes = [32, 1], strides = [1, 1]} : vector<32x256xf32> to vector<32x1xf32>
    %135 = tpu.concatenate %133, %134 in 1 : vector<32x255xf32>, vector<32x1xf32> -> vector<32x256xf32>
    %136 = arith.maximumf %131, %135 : vector<32x256xf32>
    %137 = vector.extract_strided_slice %136 {offsets = [0, 16], sizes = [32, 240], strides = [1, 1]} : vector<32x256xf32> to vector<32x240xf32>
    %138 = vector.extract_strided_slice %136 {offsets = [0, 0], sizes = [32, 16], strides = [1, 1]} : vector<32x256xf32> to vector<32x16xf32>
    %139 = tpu.concatenate %137, %138 in 1 : vector<32x240xf32>, vector<32x16xf32> -> vector<32x256xf32>
    %140 = arith.maximumf %136, %139 : vector<32x256xf32>
    %cst_23 = arith.constant 0.000000e+00 : f32
    %141 = vector.broadcast %cst_23 : f32 to vector<32x256xf32>
    %142 = arith.cmpf oeq, %131, %141 : vector<32x256xf32>
    %cst_24 = arith.constant -9.990000e+02 : f32
    %143 = vector.broadcast %cst_24 : f32 to vector<32x256xf32>
    %cst_25 = arith.constant 0.000000e+00 : f32
    %144 = vector.broadcast %cst_25 : f32 to vector<32x256xf32>
    %145 = arith.subf %144, %131 : vector<32x256xf32>
    %146 = arith.select %142, %143, %145 : vector<32x256xi1>, vector<32x256xf32>
    %147 = vector.extract_strided_slice %146 {offsets = [0, 1], sizes = [32, 255], strides = [1, 1]} : vector<32x256xf32> to vector<32x255xf32>
    %148 = vector.extract_strided_slice %146 {offsets = [0, 0], sizes = [32, 1], strides = [1, 1]} : vector<32x256xf32> to vector<32x1xf32>
    %149 = tpu.concatenate %147, %148 in 1 : vector<32x255xf32>, vector<32x1xf32> -> vector<32x256xf32>
    %150 = arith.maximumf %146, %149 : vector<32x256xf32>
    %151 = vector.extract_strided_slice %150 {offsets = [0, 16], sizes = [32, 240], strides = [1, 1]} : vector<32x256xf32> to vector<32x240xf32>
    %152 = vector.extract_strided_slice %150 {offsets = [0, 0], sizes = [32, 16], strides = [1, 1]} : vector<32x256xf32> to vector<32x16xf32>
    %153 = tpu.concatenate %151, %152 in 1 : vector<32x240xf32>, vector<32x16xf32> -> vector<32x256xf32>
    %154 = arith.maximumf %150, %153 : vector<32x256xf32>
    %cst_26 = arith.constant 0.000000e+00 : f32
    %155 = vector.broadcast %cst_26 : f32 to vector<32x256xf32>
    %156 = arith.subf %155, %154 : vector<32x256xf32>
    %cst_27 = arith.constant 9.990000e+02 : f32
    %157 = vector.broadcast %cst_27 : f32 to vector<32x256xf32>
    %158 = arith.cmpf oeq, %156, %157 : vector<32x256xf32>
    %cst_28 = arith.constant 0.000000e+00 : f32
    %159 = vector.broadcast %cst_28 : f32 to vector<32x256xf32>
    %160 = arith.select %158, %159, %156 : vector<32x256xi1>, vector<32x256xf32>
    %161 = tpu.concatenate %140, %160 in 0 : vector<32x256xf32>, vector<32x256xf32> -> vector<64x256xf32>
    %162 = arith.truncf %161 : vector<64x256xf32> to vector<64x256xbf16>
    %cst_29 = arith.constant dense<0.000000e+00> : vector<64x64xf32>
    %163 = tpu.matmul %162, %132, %cst_29 {dimension_numbers = #tpu.dot_dimension_numbers<[1], [0], [0], [1], [0, 0, 1, 1], [], []>} : vector<64x256xbf16>, vector<256x64xbf16>, vector<64x64xf32> -> vector<64x64xf32>
    %c0_30 = arith.constant 0 : index
    %c0_31 = arith.constant 0 : index
    %164 = vector.load %arg5[%c0_30, %c0_31] : memref<32x576xbf16, #tpu.memory_space<vmem>>, vector<32x576xbf16>
    %165 = vector.extract_strided_slice %163 {offsets = [0, 55], sizes = [64, 9], strides = [1, 1]} : vector<64x64xf32> to vector<64x9xf32>
    %166 = vector.extract_strided_slice %163 {offsets = [0, 0], sizes = [64, 55], strides = [1, 1]} : vector<64x64xf32> to vector<64x55xf32>
    %167 = tpu.concatenate %165, %166 in 1 : vector<64x9xf32>, vector<64x55xf32> -> vector<64x64xf32>
    %168 = vector.extract_strided_slice %5 {offsets = [0, 0], sizes = [1, 64], strides = [1, 1]} : vector<9x64xf32> to vector<1x64xf32>
    %169 = vector.broadcast %168 : vector<1x64xf32> to vector<64x64xf32>
    %170 = arith.mulf %167, %169 : vector<64x64xf32>
    %171 = vector.extract_strided_slice %163 {offsets = [0, 56], sizes = [64, 8], strides = [1, 1]} : vector<64x64xf32> to vector<64x8xf32>
    %172 = vector.extract_strided_slice %163 {offsets = [0, 0], sizes = [64, 56], strides = [1, 1]} : vector<64x64xf32> to vector<64x56xf32>
    %173 = tpu.concatenate %171, %172 in 1 : vector<64x8xf32>, vector<64x56xf32> -> vector<64x64xf32>
    %174 = vector.extract_strided_slice %5 {offsets = [1, 0], sizes = [1, 64], strides = [1, 1]} : vector<9x64xf32> to vector<1x64xf32>
    %175 = vector.broadcast %174 : vector<1x64xf32> to vector<64x64xf32>
    %176 = arith.mulf %173, %175 : vector<64x64xf32>
    %177 = vector.extract_strided_slice %163 {offsets = [0, 57], sizes = [64, 7], strides = [1, 1]} : vector<64x64xf32> to vector<64x7xf32>
    %178 = vector.extract_strided_slice %163 {offsets = [0, 0], sizes = [64, 57], strides = [1, 1]} : vector<64x64xf32> to vector<64x57xf32>
    %179 = tpu.concatenate %177, %178 in 1 : vector<64x7xf32>, vector<64x57xf32> -> vector<64x64xf32>
    %180 = vector.extract_strided_slice %5 {offsets = [2, 0], sizes = [1, 64], strides = [1, 1]} : vector<9x64xf32> to vector<1x64xf32>
    %181 = vector.broadcast %180 : vector<1x64xf32> to vector<64x64xf32>
    %182 = arith.mulf %179, %181 : vector<64x64xf32>
    %183 = vector.extract_strided_slice %163 {offsets = [0, 63], sizes = [64, 1], strides = [1, 1]} : vector<64x64xf32> to vector<64x1xf32>
    %184 = vector.extract_strided_slice %163 {offsets = [0, 0], sizes = [64, 63], strides = [1, 1]} : vector<64x64xf32> to vector<64x63xf32>
    %185 = tpu.concatenate %183, %184 in 1 : vector<64x1xf32>, vector<64x63xf32> -> vector<64x64xf32>
    %186 = vector.extract_strided_slice %5 {offsets = [3, 0], sizes = [1, 64], strides = [1, 1]} : vector<9x64xf32> to vector<1x64xf32>
    %187 = vector.broadcast %186 : vector<1x64xf32> to vector<64x64xf32>
    %188 = arith.mulf %185, %187 : vector<64x64xf32>
    %189 = vector.extract_strided_slice %5 {offsets = [4, 0], sizes = [1, 64], strides = [1, 1]} : vector<9x64xf32> to vector<1x64xf32>
    %190 = vector.broadcast %189 : vector<1x64xf32> to vector<64x64xf32>
    %191 = arith.mulf %163, %190 : vector<64x64xf32>
    %192 = vector.extract_strided_slice %163 {offsets = [0, 1], sizes = [64, 63], strides = [1, 1]} : vector<64x64xf32> to vector<64x63xf32>
    %193 = vector.extract_strided_slice %163 {offsets = [0, 0], sizes = [64, 1], strides = [1, 1]} : vector<64x64xf32> to vector<64x1xf32>
    %194 = tpu.concatenate %192, %193 in 1 : vector<64x63xf32>, vector<64x1xf32> -> vector<64x64xf32>
    %195 = vector.extract_strided_slice %5 {offsets = [5, 0], sizes = [1, 64], strides = [1, 1]} : vector<9x64xf32> to vector<1x64xf32>
    %196 = vector.broadcast %195 : vector<1x64xf32> to vector<64x64xf32>
    %197 = arith.mulf %194, %196 : vector<64x64xf32>
    %198 = vector.extract_strided_slice %163 {offsets = [0, 7], sizes = [64, 57], strides = [1, 1]} : vector<64x64xf32> to vector<64x57xf32>
    %199 = vector.extract_strided_slice %163 {offsets = [0, 0], sizes = [64, 7], strides = [1, 1]} : vector<64x64xf32> to vector<64x7xf32>
    %200 = tpu.concatenate %198, %199 in 1 : vector<64x57xf32>, vector<64x7xf32> -> vector<64x64xf32>
    %201 = vector.extract_strided_slice %5 {offsets = [6, 0], sizes = [1, 64], strides = [1, 1]} : vector<9x64xf32> to vector<1x64xf32>
    %202 = vector.broadcast %201 : vector<1x64xf32> to vector<64x64xf32>
    %203 = arith.mulf %200, %202 : vector<64x64xf32>
    %204 = vector.extract_strided_slice %163 {offsets = [0, 8], sizes = [64, 56], strides = [1, 1]} : vector<64x64xf32> to vector<64x56xf32>
    %205 = vector.extract_strided_slice %163 {offsets = [0, 0], sizes = [64, 8], strides = [1, 1]} : vector<64x64xf32> to vector<64x8xf32>
    %206 = tpu.concatenate %204, %205 in 1 : vector<64x56xf32>, vector<64x8xf32> -> vector<64x64xf32>
    %207 = vector.extract_strided_slice %5 {offsets = [7, 0], sizes = [1, 64], strides = [1, 1]} : vector<9x64xf32> to vector<1x64xf32>
    %208 = vector.broadcast %207 : vector<1x64xf32> to vector<64x64xf32>
    %209 = arith.mulf %206, %208 : vector<64x64xf32>
    %210 = vector.extract_strided_slice %163 {offsets = [0, 9], sizes = [64, 55], strides = [1, 1]} : vector<64x64xf32> to vector<64x55xf32>
    %211 = vector.extract_strided_slice %163 {offsets = [0, 0], sizes = [64, 9], strides = [1, 1]} : vector<64x64xf32> to vector<64x9xf32>
    %212 = tpu.concatenate %210, %211 in 1 : vector<64x55xf32>, vector<64x9xf32> -> vector<64x64xf32>
    %213 = vector.extract_strided_slice %5 {offsets = [8, 0], sizes = [1, 64], strides = [1, 1]} : vector<9x64xf32> to vector<1x64xf32>
    %214 = vector.broadcast %213 : vector<1x64xf32> to vector<64x64xf32>
    %215 = arith.mulf %212, %214 : vector<64x64xf32>
    %216 = tpu.concatenate %170, %176, %182, %188, %191, %197, %203, %209, %215 in 0 : vector<64x64xf32>, vector<64x64xf32>, vector<64x64xf32>, vector<64x64xf32>, vector<64x64xf32>, vector<64x64xf32>, vector<64x64xf32>, vector<64x64xf32>, vector<64x64xf32> -> vector<576x64xf32>
    %217 = arith.truncf %216 : vector<576x64xf32> to vector<576x64xbf16>
    %cst_32 = arith.constant dense<0.000000e+00> : vector<32x64xf32>
    %218 = tpu.matmul %164, %217, %cst_32 {dimension_numbers = #tpu.dot_dimension_numbers<[1], [0], [0], [1], [0, 0, 1, 1], [], []>} : vector<32x576xbf16>, vector<576x64xbf16>, vector<32x64xf32> -> vector<32x64xf32>
    %cst_33 = arith.constant 0.000000e+00 : f32
    %219 = vector.broadcast %cst_33 : f32 to vector<32x64xf32>
    %220 = arith.cmpf ogt, %218, %219 : vector<32x64xf32>
    %cst_34 = arith.constant 2.000000e-01 : f32
    %221 = vector.broadcast %cst_34 : f32 to vector<32x64xf32>
    %222 = arith.mulf %221, %218 : vector<32x64xf32>
    %223 = arith.select %220, %218, %222 : vector<32x64xi1>, vector<32x64xf32>
    %c0_35 = arith.constant 0 : index
    %c0_36 = arith.constant 0 : index
    %224 = vector.load %arg6[%c0_35, %c0_36] : memref<32x288xbf16, #tpu.memory_space<vmem>>, vector<32x288xbf16>
    %225 = vector.extract_strided_slice %223 {offsets = [0, 55], sizes = [32, 9], strides = [1, 1]} : vector<32x64xf32> to vector<32x9xf32>
    %226 = vector.extract_strided_slice %223 {offsets = [0, 0], sizes = [32, 55], strides = [1, 1]} : vector<32x64xf32> to vector<32x55xf32>
    %227 = tpu.concatenate %225, %226 in 1 : vector<32x9xf32>, vector<32x55xf32> -> vector<32x64xf32>
    %228 = vector.extract_strided_slice %5 {offsets = [0, 0], sizes = [1, 64], strides = [1, 1]} : vector<9x64xf32> to vector<1x64xf32>
    %229 = vector.broadcast %228 : vector<1x64xf32> to vector<32x64xf32>
    %230 = arith.mulf %227, %229 : vector<32x64xf32>
    %231 = vector.extract_strided_slice %223 {offsets = [0, 56], sizes = [32, 8], strides = [1, 1]} : vector<32x64xf32> to vector<32x8xf32>
    %232 = vector.extract_strided_slice %223 {offsets = [0, 0], sizes = [32, 56], strides = [1, 1]} : vector<32x64xf32> to vector<32x56xf32>
    %233 = tpu.concatenate %231, %232 in 1 : vector<32x8xf32>, vector<32x56xf32> -> vector<32x64xf32>
    %234 = vector.extract_strided_slice %5 {offsets = [1, 0], sizes = [1, 64], strides = [1, 1]} : vector<9x64xf32> to vector<1x64xf32>
    %235 = vector.broadcast %234 : vector<1x64xf32> to vector<32x64xf32>
    %236 = arith.mulf %233, %235 : vector<32x64xf32>
    %237 = vector.extract_strided_slice %223 {offsets = [0, 57], sizes = [32, 7], strides = [1, 1]} : vector<32x64xf32> to vector<32x7xf32>
    %238 = vector.extract_strided_slice %223 {offsets = [0, 0], sizes = [32, 57], strides = [1, 1]} : vector<32x64xf32> to vector<32x57xf32>
    %239 = tpu.concatenate %237, %238 in 1 : vector<32x7xf32>, vector<32x57xf32> -> vector<32x64xf32>
    %240 = vector.extract_strided_slice %5 {offsets = [2, 0], sizes = [1, 64], strides = [1, 1]} : vector<9x64xf32> to vector<1x64xf32>
    %241 = vector.broadcast %240 : vector<1x64xf32> to vector<32x64xf32>
    %242 = arith.mulf %239, %241 : vector<32x64xf32>
    %243 = vector.extract_strided_slice %223 {offsets = [0, 63], sizes = [32, 1], strides = [1, 1]} : vector<32x64xf32> to vector<32x1xf32>
    %244 = vector.extract_strided_slice %223 {offsets = [0, 0], sizes = [32, 63], strides = [1, 1]} : vector<32x64xf32> to vector<32x63xf32>
    %245 = tpu.concatenate %243, %244 in 1 : vector<32x1xf32>, vector<32x63xf32> -> vector<32x64xf32>
    %246 = vector.extract_strided_slice %5 {offsets = [3, 0], sizes = [1, 64], strides = [1, 1]} : vector<9x64xf32> to vector<1x64xf32>
    %247 = vector.broadcast %246 : vector<1x64xf32> to vector<32x64xf32>
    %248 = arith.mulf %245, %247 : vector<32x64xf32>
    %249 = vector.extract_strided_slice %5 {offsets = [4, 0], sizes = [1, 64], strides = [1, 1]} : vector<9x64xf32> to vector<1x64xf32>
    %250 = vector.broadcast %249 : vector<1x64xf32> to vector<32x64xf32>
    %251 = arith.mulf %223, %250 : vector<32x64xf32>
    %252 = vector.extract_strided_slice %223 {offsets = [0, 1], sizes = [32, 63], strides = [1, 1]} : vector<32x64xf32> to vector<32x63xf32>
    %253 = vector.extract_strided_slice %223 {offsets = [0, 0], sizes = [32, 1], strides = [1, 1]} : vector<32x64xf32> to vector<32x1xf32>
    %254 = tpu.concatenate %252, %253 in 1 : vector<32x63xf32>, vector<32x1xf32> -> vector<32x64xf32>
    %255 = vector.extract_strided_slice %5 {offsets = [5, 0], sizes = [1, 64], strides = [1, 1]} : vector<9x64xf32> to vector<1x64xf32>
    %256 = vector.broadcast %255 : vector<1x64xf32> to vector<32x64xf32>
    %257 = arith.mulf %254, %256 : vector<32x64xf32>
    %258 = vector.extract_strided_slice %223 {offsets = [0, 7], sizes = [32, 57], strides = [1, 1]} : vector<32x64xf32> to vector<32x57xf32>
    %259 = vector.extract_strided_slice %223 {offsets = [0, 0], sizes = [32, 7], strides = [1, 1]} : vector<32x64xf32> to vector<32x7xf32>
    %260 = tpu.concatenate %258, %259 in 1 : vector<32x57xf32>, vector<32x7xf32> -> vector<32x64xf32>
    %261 = vector.extract_strided_slice %5 {offsets = [6, 0], sizes = [1, 64], strides = [1, 1]} : vector<9x64xf32> to vector<1x64xf32>
    %262 = vector.broadcast %261 : vector<1x64xf32> to vector<32x64xf32>
    %263 = arith.mulf %260, %262 : vector<32x64xf32>
    %264 = vector.extract_strided_slice %223 {offsets = [0, 8], sizes = [32, 56], strides = [1, 1]} : vector<32x64xf32> to vector<32x56xf32>
    %265 = vector.extract_strided_slice %223 {offsets = [0, 0], sizes = [32, 8], strides = [1, 1]} : vector<32x64xf32> to vector<32x8xf32>
    %266 = tpu.concatenate %264, %265 in 1 : vector<32x56xf32>, vector<32x8xf32> -> vector<32x64xf32>
    %267 = vector.extract_strided_slice %5 {offsets = [7, 0], sizes = [1, 64], strides = [1, 1]} : vector<9x64xf32> to vector<1x64xf32>
    %268 = vector.broadcast %267 : vector<1x64xf32> to vector<32x64xf32>
    %269 = arith.mulf %266, %268 : vector<32x64xf32>
    %270 = vector.extract_strided_slice %223 {offsets = [0, 9], sizes = [32, 55], strides = [1, 1]} : vector<32x64xf32> to vector<32x55xf32>
    %271 = vector.extract_strided_slice %223 {offsets = [0, 0], sizes = [32, 9], strides = [1, 1]} : vector<32x64xf32> to vector<32x9xf32>
    %272 = tpu.concatenate %270, %271 in 1 : vector<32x55xf32>, vector<32x9xf32> -> vector<32x64xf32>
    %273 = vector.extract_strided_slice %5 {offsets = [8, 0], sizes = [1, 64], strides = [1, 1]} : vector<9x64xf32> to vector<1x64xf32>
    %274 = vector.broadcast %273 : vector<1x64xf32> to vector<32x64xf32>
    %275 = arith.mulf %272, %274 : vector<32x64xf32>
    %276 = tpu.concatenate %230, %236, %242, %248, %251, %257, %263, %269, %275 in 0 : vector<32x64xf32>, vector<32x64xf32>, vector<32x64xf32>, vector<32x64xf32>, vector<32x64xf32>, vector<32x64xf32>, vector<32x64xf32>, vector<32x64xf32>, vector<32x64xf32> -> vector<288x64xf32>
    %277 = arith.truncf %276 : vector<288x64xf32> to vector<288x64xbf16>
    %cst_37 = arith.constant dense<0.000000e+00> : vector<32x64xf32>
    %278 = tpu.matmul %224, %277, %cst_37 {dimension_numbers = #tpu.dot_dimension_numbers<[1], [0], [0], [1], [0, 0, 1, 1], [], []>} : vector<32x288xbf16>, vector<288x64xbf16>, vector<32x64xf32> -> vector<32x64xf32>
    %cst_38 = arith.constant 0.000000e+00 : f32
    %279 = vector.broadcast %cst_38 : f32 to vector<32x64xf32>
    %280 = arith.cmpf ogt, %278, %279 : vector<32x64xf32>
    %cst_39 = arith.constant 2.000000e-01 : f32
    %281 = vector.broadcast %cst_39 : f32 to vector<32x64xf32>
    %282 = arith.mulf %281, %278 : vector<32x64xf32>
    %283 = arith.select %280, %278, %282 : vector<32x64xi1>, vector<32x64xf32>
    %284 = arith.truncf %283 : vector<32x64xf32> to vector<32x64xbf16>
    %c0_40 = arith.constant 0 : index
    %c0_41 = arith.constant 0 : index
    %285 = vector.load %arg18[%c0_40, %c0_41] : memref<64x256xbf16, #tpu.memory_space<vmem>>, vector<64x256xbf16>
    %cst_42 = arith.constant dense<0.000000e+00> : vector<32x256xf32>
    %286 = tpu.matmul %284, %285, %cst_42 {dimension_numbers = #tpu.dot_dimension_numbers<[1], [0], [0], [1], [0, 0, 1, 1], [], []>} : vector<32x64xbf16>, vector<64x256xbf16>, vector<32x256xf32> -> vector<32x256xf32>
    %287 = tpu.concatenate %223, %283 in 0 : vector<32x64xf32>, vector<32x64xf32> -> vector<64x64xf32>
    %c0_43 = arith.constant 0 : index
    %c0_44 = arith.constant 0 : index
    %288 = vector.load %arg17[%c0_43, %c0_44] : memref<64x16xbf16, #tpu.memory_space<vmem>>, vector<64x16xbf16>
    %289 = vector.extract_strided_slice %287 {offsets = [0, 1], sizes = [64, 63], strides = [1, 1]} : vector<64x64xf32> to vector<64x63xf32>
    %290 = vector.extract_strided_slice %287 {offsets = [0, 0], sizes = [64, 1], strides = [1, 1]} : vector<64x64xf32> to vector<64x1xf32>
    %291 = tpu.concatenate %289, %290 in 1 : vector<64x63xf32>, vector<64x1xf32> -> vector<64x64xf32>
    %292 = arith.maximumf %287, %291 : vector<64x64xf32>
    %293 = vector.extract_strided_slice %292 {offsets = [0, 8], sizes = [64, 56], strides = [1, 1]} : vector<64x64xf32> to vector<64x56xf32>
    %294 = vector.extract_strided_slice %292 {offsets = [0, 0], sizes = [64, 8], strides = [1, 1]} : vector<64x64xf32> to vector<64x8xf32>
    %295 = tpu.concatenate %293, %294 in 1 : vector<64x56xf32>, vector<64x8xf32> -> vector<64x64xf32>
    %296 = arith.maximumf %292, %295 : vector<64x64xf32>
    %cst_45 = arith.constant 0.000000e+00 : f32
    %297 = vector.broadcast %cst_45 : f32 to vector<64x64xf32>
    %298 = arith.cmpf oeq, %287, %297 : vector<64x64xf32>
    %cst_46 = arith.constant -9.990000e+02 : f32
    %299 = vector.broadcast %cst_46 : f32 to vector<64x64xf32>
    %cst_47 = arith.constant 0.000000e+00 : f32
    %300 = vector.broadcast %cst_47 : f32 to vector<64x64xf32>
    %301 = arith.subf %300, %287 : vector<64x64xf32>
    %302 = arith.select %298, %299, %301 : vector<64x64xi1>, vector<64x64xf32>
    %303 = vector.extract_strided_slice %302 {offsets = [0, 1], sizes = [64, 63], strides = [1, 1]} : vector<64x64xf32> to vector<64x63xf32>
    %304 = vector.extract_strided_slice %302 {offsets = [0, 0], sizes = [64, 1], strides = [1, 1]} : vector<64x64xf32> to vector<64x1xf32>
    %305 = tpu.concatenate %303, %304 in 1 : vector<64x63xf32>, vector<64x1xf32> -> vector<64x64xf32>
    %306 = arith.maximumf %302, %305 : vector<64x64xf32>
    %307 = vector.extract_strided_slice %306 {offsets = [0, 8], sizes = [64, 56], strides = [1, 1]} : vector<64x64xf32> to vector<64x56xf32>
    %308 = vector.extract_strided_slice %306 {offsets = [0, 0], sizes = [64, 8], strides = [1, 1]} : vector<64x64xf32> to vector<64x8xf32>
    %309 = tpu.concatenate %307, %308 in 1 : vector<64x56xf32>, vector<64x8xf32> -> vector<64x64xf32>
    %310 = arith.maximumf %306, %309 : vector<64x64xf32>
    %cst_48 = arith.constant 0.000000e+00 : f32
    %311 = vector.broadcast %cst_48 : f32 to vector<64x64xf32>
    %312 = arith.subf %311, %310 : vector<64x64xf32>
    %cst_49 = arith.constant 9.990000e+02 : f32
    %313 = vector.broadcast %cst_49 : f32 to vector<64x64xf32>
    %314 = arith.cmpf oeq, %312, %313 : vector<64x64xf32>
    %cst_50 = arith.constant 0.000000e+00 : f32
    %315 = vector.broadcast %cst_50 : f32 to vector<64x64xf32>
    %316 = arith.select %314, %315, %312 : vector<64x64xi1>, vector<64x64xf32>
    %317 = tpu.concatenate %296, %316 in 0 : vector<64x64xf32>, vector<64x64xf32> -> vector<128x64xf32>
    %318 = arith.truncf %317 : vector<128x64xf32> to vector<128x64xbf16>
    %cst_51 = arith.constant dense<0.000000e+00> : vector<128x16xf32>
    %319 = tpu.matmul %318, %288, %cst_51 {dimension_numbers = #tpu.dot_dimension_numbers<[1], [0], [0], [1], [0, 0, 1, 1], [], []>} : vector<128x64xbf16>, vector<64x16xbf16>, vector<128x16xf32> -> vector<128x16xf32>
    %c0_52 = arith.constant 0 : index
    %c0_53 = arith.constant 0 : index
    %320 = vector.load %arg7[%c0_52, %c0_53] : memref<64x1152xbf16, #tpu.memory_space<vmem>>, vector<64x1152xbf16>
    %321 = vector.extract_strided_slice %319 {offsets = [0, 11], sizes = [128, 5], strides = [1, 1]} : vector<128x16xf32> to vector<128x5xf32>
    %322 = vector.extract_strided_slice %319 {offsets = [0, 0], sizes = [128, 11], strides = [1, 1]} : vector<128x16xf32> to vector<128x11xf32>
    %323 = tpu.concatenate %321, %322 in 1 : vector<128x5xf32>, vector<128x11xf32> -> vector<128x16xf32>
    %324 = vector.extract_strided_slice %6 {offsets = [0, 0], sizes = [1, 16], strides = [1, 1]} : vector<9x16xf32> to vector<1x16xf32>
    %325 = vector.broadcast %324 : vector<1x16xf32> to vector<128x16xf32>
    %326 = arith.mulf %323, %325 : vector<128x16xf32>
    %327 = vector.extract_strided_slice %319 {offsets = [0, 12], sizes = [128, 4], strides = [1, 1]} : vector<128x16xf32> to vector<128x4xf32>
    %328 = vector.extract_strided_slice %319 {offsets = [0, 0], sizes = [128, 12], strides = [1, 1]} : vector<128x16xf32> to vector<128x12xf32>
    %329 = tpu.concatenate %327, %328 in 1 : vector<128x4xf32>, vector<128x12xf32> -> vector<128x16xf32>
    %330 = vector.extract_strided_slice %6 {offsets = [1, 0], sizes = [1, 16], strides = [1, 1]} : vector<9x16xf32> to vector<1x16xf32>
    %331 = vector.broadcast %330 : vector<1x16xf32> to vector<128x16xf32>
    %332 = arith.mulf %329, %331 : vector<128x16xf32>
    %333 = vector.extract_strided_slice %319 {offsets = [0, 13], sizes = [128, 3], strides = [1, 1]} : vector<128x16xf32> to vector<128x3xf32>
    %334 = vector.extract_strided_slice %319 {offsets = [0, 0], sizes = [128, 13], strides = [1, 1]} : vector<128x16xf32> to vector<128x13xf32>
    %335 = tpu.concatenate %333, %334 in 1 : vector<128x3xf32>, vector<128x13xf32> -> vector<128x16xf32>
    %336 = vector.extract_strided_slice %6 {offsets = [2, 0], sizes = [1, 16], strides = [1, 1]} : vector<9x16xf32> to vector<1x16xf32>
    %337 = vector.broadcast %336 : vector<1x16xf32> to vector<128x16xf32>
    %338 = arith.mulf %335, %337 : vector<128x16xf32>
    %339 = vector.extract_strided_slice %319 {offsets = [0, 15], sizes = [128, 1], strides = [1, 1]} : vector<128x16xf32> to vector<128x1xf32>
    %340 = vector.extract_strided_slice %319 {offsets = [0, 0], sizes = [128, 15], strides = [1, 1]} : vector<128x16xf32> to vector<128x15xf32>
    %341 = tpu.concatenate %339, %340 in 1 : vector<128x1xf32>, vector<128x15xf32> -> vector<128x16xf32>
    %342 = vector.extract_strided_slice %6 {offsets = [3, 0], sizes = [1, 16], strides = [1, 1]} : vector<9x16xf32> to vector<1x16xf32>
    %343 = vector.broadcast %342 : vector<1x16xf32> to vector<128x16xf32>
    %344 = arith.mulf %341, %343 : vector<128x16xf32>
    %345 = vector.extract_strided_slice %6 {offsets = [4, 0], sizes = [1, 16], strides = [1, 1]} : vector<9x16xf32> to vector<1x16xf32>
    %346 = vector.broadcast %345 : vector<1x16xf32> to vector<128x16xf32>
    %347 = arith.mulf %319, %346 : vector<128x16xf32>
    %348 = vector.extract_strided_slice %319 {offsets = [0, 1], sizes = [128, 15], strides = [1, 1]} : vector<128x16xf32> to vector<128x15xf32>
    %349 = vector.extract_strided_slice %319 {offsets = [0, 0], sizes = [128, 1], strides = [1, 1]} : vector<128x16xf32> to vector<128x1xf32>
    %350 = tpu.concatenate %348, %349 in 1 : vector<128x15xf32>, vector<128x1xf32> -> vector<128x16xf32>
    %351 = vector.extract_strided_slice %6 {offsets = [5, 0], sizes = [1, 16], strides = [1, 1]} : vector<9x16xf32> to vector<1x16xf32>
    %352 = vector.broadcast %351 : vector<1x16xf32> to vector<128x16xf32>
    %353 = arith.mulf %350, %352 : vector<128x16xf32>
    %354 = vector.extract_strided_slice %319 {offsets = [0, 3], sizes = [128, 13], strides = [1, 1]} : vector<128x16xf32> to vector<128x13xf32>
    %355 = vector.extract_strided_slice %319 {offsets = [0, 0], sizes = [128, 3], strides = [1, 1]} : vector<128x16xf32> to vector<128x3xf32>
    %356 = tpu.concatenate %354, %355 in 1 : vector<128x13xf32>, vector<128x3xf32> -> vector<128x16xf32>
    %357 = vector.extract_strided_slice %6 {offsets = [6, 0], sizes = [1, 16], strides = [1, 1]} : vector<9x16xf32> to vector<1x16xf32>
    %358 = vector.broadcast %357 : vector<1x16xf32> to vector<128x16xf32>
    %359 = arith.mulf %356, %358 : vector<128x16xf32>
    %360 = vector.extract_strided_slice %319 {offsets = [0, 4], sizes = [128, 12], strides = [1, 1]} : vector<128x16xf32> to vector<128x12xf32>
    %361 = vector.extract_strided_slice %319 {offsets = [0, 0], sizes = [128, 4], strides = [1, 1]} : vector<128x16xf32> to vector<128x4xf32>
    %362 = tpu.concatenate %360, %361 in 1 : vector<128x12xf32>, vector<128x4xf32> -> vector<128x16xf32>
    %363 = vector.extract_strided_slice %6 {offsets = [7, 0], sizes = [1, 16], strides = [1, 1]} : vector<9x16xf32> to vector<1x16xf32>
    %364 = vector.broadcast %363 : vector<1x16xf32> to vector<128x16xf32>
    %365 = arith.mulf %362, %364 : vector<128x16xf32>
    %366 = vector.extract_strided_slice %319 {offsets = [0, 5], sizes = [128, 11], strides = [1, 1]} : vector<128x16xf32> to vector<128x11xf32>
    %367 = vector.extract_strided_slice %319 {offsets = [0, 0], sizes = [128, 5], strides = [1, 1]} : vector<128x16xf32> to vector<128x5xf32>
    %368 = tpu.concatenate %366, %367 in 1 : vector<128x11xf32>, vector<128x5xf32> -> vector<128x16xf32>
    %369 = vector.extract_strided_slice %6 {offsets = [8, 0], sizes = [1, 16], strides = [1, 1]} : vector<9x16xf32> to vector<1x16xf32>
    %370 = vector.broadcast %369 : vector<1x16xf32> to vector<128x16xf32>
    %371 = arith.mulf %368, %370 : vector<128x16xf32>
    %372 = tpu.concatenate %326, %332, %338, %344, %347, %353, %359, %365, %371 in 0 : vector<128x16xf32>, vector<128x16xf32>, vector<128x16xf32>, vector<128x16xf32>, vector<128x16xf32>, vector<128x16xf32>, vector<128x16xf32>, vector<128x16xf32>, vector<128x16xf32> -> vector<1152x16xf32>
    %373 = arith.truncf %372 : vector<1152x16xf32> to vector<1152x16xbf16>
    %cst_54 = arith.constant dense<0.000000e+00> : vector<64x16xf32>
    %374 = tpu.matmul %320, %373, %cst_54 {dimension_numbers = #tpu.dot_dimension_numbers<[1], [0], [0], [1], [0, 0, 1, 1], [], []>} : vector<64x1152xbf16>, vector<1152x16xbf16>, vector<64x16xf32> -> vector<64x16xf32>
    %cst_55 = arith.constant 0.000000e+00 : f32
    %375 = vector.broadcast %cst_55 : f32 to vector<64x16xf32>
    %376 = arith.cmpf ogt, %374, %375 : vector<64x16xf32>
    %cst_56 = arith.constant 2.000000e-01 : f32
    %377 = vector.broadcast %cst_56 : f32 to vector<64x16xf32>
    %378 = arith.mulf %377, %374 : vector<64x16xf32>
    %379 = arith.select %376, %374, %378 : vector<64x16xi1>, vector<64x16xf32>
    %c0_57 = arith.constant 0 : index
    %c0_58 = arith.constant 0 : index
    %380 = vector.load %arg8[%c0_57, %c0_58] : memref<64x576xbf16, #tpu.memory_space<vmem>>, vector<64x576xbf16>
    %381 = vector.extract_strided_slice %379 {offsets = [0, 11], sizes = [64, 5], strides = [1, 1]} : vector<64x16xf32> to vector<64x5xf32>
    %382 = vector.extract_strided_slice %379 {offsets = [0, 0], sizes = [64, 11], strides = [1, 1]} : vector<64x16xf32> to vector<64x11xf32>
    %383 = tpu.concatenate %381, %382 in 1 : vector<64x5xf32>, vector<64x11xf32> -> vector<64x16xf32>
    %384 = vector.extract_strided_slice %6 {offsets = [0, 0], sizes = [1, 16], strides = [1, 1]} : vector<9x16xf32> to vector<1x16xf32>
    %385 = vector.broadcast %384 : vector<1x16xf32> to vector<64x16xf32>
    %386 = arith.mulf %383, %385 : vector<64x16xf32>
    %387 = vector.extract_strided_slice %379 {offsets = [0, 12], sizes = [64, 4], strides = [1, 1]} : vector<64x16xf32> to vector<64x4xf32>
    %388 = vector.extract_strided_slice %379 {offsets = [0, 0], sizes = [64, 12], strides = [1, 1]} : vector<64x16xf32> to vector<64x12xf32>
    %389 = tpu.concatenate %387, %388 in 1 : vector<64x4xf32>, vector<64x12xf32> -> vector<64x16xf32>
    %390 = vector.extract_strided_slice %6 {offsets = [1, 0], sizes = [1, 16], strides = [1, 1]} : vector<9x16xf32> to vector<1x16xf32>
    %391 = vector.broadcast %390 : vector<1x16xf32> to vector<64x16xf32>
    %392 = arith.mulf %389, %391 : vector<64x16xf32>
    %393 = vector.extract_strided_slice %379 {offsets = [0, 13], sizes = [64, 3], strides = [1, 1]} : vector<64x16xf32> to vector<64x3xf32>
    %394 = vector.extract_strided_slice %379 {offsets = [0, 0], sizes = [64, 13], strides = [1, 1]} : vector<64x16xf32> to vector<64x13xf32>
    %395 = tpu.concatenate %393, %394 in 1 : vector<64x3xf32>, vector<64x13xf32> -> vector<64x16xf32>
    %396 = vector.extract_strided_slice %6 {offsets = [2, 0], sizes = [1, 16], strides = [1, 1]} : vector<9x16xf32> to vector<1x16xf32>
    %397 = vector.broadcast %396 : vector<1x16xf32> to vector<64x16xf32>
    %398 = arith.mulf %395, %397 : vector<64x16xf32>
    %399 = vector.extract_strided_slice %379 {offsets = [0, 15], sizes = [64, 1], strides = [1, 1]} : vector<64x16xf32> to vector<64x1xf32>
    %400 = vector.extract_strided_slice %379 {offsets = [0, 0], sizes = [64, 15], strides = [1, 1]} : vector<64x16xf32> to vector<64x15xf32>
    %401 = tpu.concatenate %399, %400 in 1 : vector<64x1xf32>, vector<64x15xf32> -> vector<64x16xf32>
    %402 = vector.extract_strided_slice %6 {offsets = [3, 0], sizes = [1, 16], strides = [1, 1]} : vector<9x16xf32> to vector<1x16xf32>
    %403 = vector.broadcast %402 : vector<1x16xf32> to vector<64x16xf32>
    %404 = arith.mulf %401, %403 : vector<64x16xf32>
    %405 = vector.extract_strided_slice %6 {offsets = [4, 0], sizes = [1, 16], strides = [1, 1]} : vector<9x16xf32> to vector<1x16xf32>
    %406 = vector.broadcast %405 : vector<1x16xf32> to vector<64x16xf32>
    %407 = arith.mulf %379, %406 : vector<64x16xf32>
    %408 = vector.extract_strided_slice %379 {offsets = [0, 1], sizes = [64, 15], strides = [1, 1]} : vector<64x16xf32> to vector<64x15xf32>
    %409 = vector.extract_strided_slice %379 {offsets = [0, 0], sizes = [64, 1], strides = [1, 1]} : vector<64x16xf32> to vector<64x1xf32>
    %410 = tpu.concatenate %408, %409 in 1 : vector<64x15xf32>, vector<64x1xf32> -> vector<64x16xf32>
    %411 = vector.extract_strided_slice %6 {offsets = [5, 0], sizes = [1, 16], strides = [1, 1]} : vector<9x16xf32> to vector<1x16xf32>
    %412 = vector.broadcast %411 : vector<1x16xf32> to vector<64x16xf32>
    %413 = arith.mulf %410, %412 : vector<64x16xf32>
    %414 = vector.extract_strided_slice %379 {offsets = [0, 3], sizes = [64, 13], strides = [1, 1]} : vector<64x16xf32> to vector<64x13xf32>
    %415 = vector.extract_strided_slice %379 {offsets = [0, 0], sizes = [64, 3], strides = [1, 1]} : vector<64x16xf32> to vector<64x3xf32>
    %416 = tpu.concatenate %414, %415 in 1 : vector<64x13xf32>, vector<64x3xf32> -> vector<64x16xf32>
    %417 = vector.extract_strided_slice %6 {offsets = [6, 0], sizes = [1, 16], strides = [1, 1]} : vector<9x16xf32> to vector<1x16xf32>
    %418 = vector.broadcast %417 : vector<1x16xf32> to vector<64x16xf32>
    %419 = arith.mulf %416, %418 : vector<64x16xf32>
    %420 = vector.extract_strided_slice %379 {offsets = [0, 4], sizes = [64, 12], strides = [1, 1]} : vector<64x16xf32> to vector<64x12xf32>
    %421 = vector.extract_strided_slice %379 {offsets = [0, 0], sizes = [64, 4], strides = [1, 1]} : vector<64x16xf32> to vector<64x4xf32>
    %422 = tpu.concatenate %420, %421 in 1 : vector<64x12xf32>, vector<64x4xf32> -> vector<64x16xf32>
    %423 = vector.extract_strided_slice %6 {offsets = [7, 0], sizes = [1, 16], strides = [1, 1]} : vector<9x16xf32> to vector<1x16xf32>
    %424 = vector.broadcast %423 : vector<1x16xf32> to vector<64x16xf32>
    %425 = arith.mulf %422, %424 : vector<64x16xf32>
    %426 = vector.extract_strided_slice %379 {offsets = [0, 5], sizes = [64, 11], strides = [1, 1]} : vector<64x16xf32> to vector<64x11xf32>
    %427 = vector.extract_strided_slice %379 {offsets = [0, 0], sizes = [64, 5], strides = [1, 1]} : vector<64x16xf32> to vector<64x5xf32>
    %428 = tpu.concatenate %426, %427 in 1 : vector<64x11xf32>, vector<64x5xf32> -> vector<64x16xf32>
    %429 = vector.extract_strided_slice %6 {offsets = [8, 0], sizes = [1, 16], strides = [1, 1]} : vector<9x16xf32> to vector<1x16xf32>
    %430 = vector.broadcast %429 : vector<1x16xf32> to vector<64x16xf32>
    %431 = arith.mulf %428, %430 : vector<64x16xf32>
    %432 = tpu.concatenate %386, %392, %398, %404, %407, %413, %419, %425, %431 in 0 : vector<64x16xf32>, vector<64x16xf32>, vector<64x16xf32>, vector<64x16xf32>, vector<64x16xf32>, vector<64x16xf32>, vector<64x16xf32>, vector<64x16xf32>, vector<64x16xf32> -> vector<576x16xf32>
    %433 = arith.truncf %432 : vector<576x16xf32> to vector<576x16xbf16>
    %cst_59 = arith.constant dense<0.000000e+00> : vector<64x16xf32>
    %434 = tpu.matmul %380, %433, %cst_59 {dimension_numbers = #tpu.dot_dimension_numbers<[1], [0], [0], [1], [0, 0, 1, 1], [], []>} : vector<64x576xbf16>, vector<576x16xbf16>, vector<64x16xf32> -> vector<64x16xf32>
    %cst_60 = arith.constant 0.000000e+00 : f32
    %435 = vector.broadcast %cst_60 : f32 to vector<64x16xf32>
    %436 = arith.cmpf ogt, %434, %435 : vector<64x16xf32>
    %cst_61 = arith.constant 2.000000e-01 : f32
    %437 = vector.broadcast %cst_61 : f32 to vector<64x16xf32>
    %438 = arith.mulf %437, %434 : vector<64x16xf32>
    %439 = arith.select %436, %434, %438 : vector<64x16xi1>, vector<64x16xf32>
    %c0_62 = arith.constant 0 : index
    %c0_63 = arith.constant 0 : index
    %440 = vector.load %arg9[%c0_62, %c0_63] : memref<64x576xbf16, #tpu.memory_space<vmem>>, vector<64x576xbf16>
    %441 = vector.extract_strided_slice %439 {offsets = [0, 11], sizes = [64, 5], strides = [1, 1]} : vector<64x16xf32> to vector<64x5xf32>
    %442 = vector.extract_strided_slice %439 {offsets = [0, 0], sizes = [64, 11], strides = [1, 1]} : vector<64x16xf32> to vector<64x11xf32>
    %443 = tpu.concatenate %441, %442 in 1 : vector<64x5xf32>, vector<64x11xf32> -> vector<64x16xf32>
    %444 = vector.extract_strided_slice %6 {offsets = [0, 0], sizes = [1, 16], strides = [1, 1]} : vector<9x16xf32> to vector<1x16xf32>
    %445 = vector.broadcast %444 : vector<1x16xf32> to vector<64x16xf32>
    %446 = arith.mulf %443, %445 : vector<64x16xf32>
    %447 = vector.extract_strided_slice %439 {offsets = [0, 12], sizes = [64, 4], strides = [1, 1]} : vector<64x16xf32> to vector<64x4xf32>
    %448 = vector.extract_strided_slice %439 {offsets = [0, 0], sizes = [64, 12], strides = [1, 1]} : vector<64x16xf32> to vector<64x12xf32>
    %449 = tpu.concatenate %447, %448 in 1 : vector<64x4xf32>, vector<64x12xf32> -> vector<64x16xf32>
    %450 = vector.extract_strided_slice %6 {offsets = [1, 0], sizes = [1, 16], strides = [1, 1]} : vector<9x16xf32> to vector<1x16xf32>
    %451 = vector.broadcast %450 : vector<1x16xf32> to vector<64x16xf32>
    %452 = arith.mulf %449, %451 : vector<64x16xf32>
    %453 = vector.extract_strided_slice %439 {offsets = [0, 13], sizes = [64, 3], strides = [1, 1]} : vector<64x16xf32> to vector<64x3xf32>
    %454 = vector.extract_strided_slice %439 {offsets = [0, 0], sizes = [64, 13], strides = [1, 1]} : vector<64x16xf32> to vector<64x13xf32>
    %455 = tpu.concatenate %453, %454 in 1 : vector<64x3xf32>, vector<64x13xf32> -> vector<64x16xf32>
    %456 = vector.extract_strided_slice %6 {offsets = [2, 0], sizes = [1, 16], strides = [1, 1]} : vector<9x16xf32> to vector<1x16xf32>
    %457 = vector.broadcast %456 : vector<1x16xf32> to vector<64x16xf32>
    %458 = arith.mulf %455, %457 : vector<64x16xf32>
    %459 = vector.extract_strided_slice %439 {offsets = [0, 15], sizes = [64, 1], strides = [1, 1]} : vector<64x16xf32> to vector<64x1xf32>
    %460 = vector.extract_strided_slice %439 {offsets = [0, 0], sizes = [64, 15], strides = [1, 1]} : vector<64x16xf32> to vector<64x15xf32>
    %461 = tpu.concatenate %459, %460 in 1 : vector<64x1xf32>, vector<64x15xf32> -> vector<64x16xf32>
    %462 = vector.extract_strided_slice %6 {offsets = [3, 0], sizes = [1, 16], strides = [1, 1]} : vector<9x16xf32> to vector<1x16xf32>
    %463 = vector.broadcast %462 : vector<1x16xf32> to vector<64x16xf32>
    %464 = arith.mulf %461, %463 : vector<64x16xf32>
    %465 = vector.extract_strided_slice %6 {offsets = [4, 0], sizes = [1, 16], strides = [1, 1]} : vector<9x16xf32> to vector<1x16xf32>
    %466 = vector.broadcast %465 : vector<1x16xf32> to vector<64x16xf32>
    %467 = arith.mulf %439, %466 : vector<64x16xf32>
    %468 = vector.extract_strided_slice %439 {offsets = [0, 1], sizes = [64, 15], strides = [1, 1]} : vector<64x16xf32> to vector<64x15xf32>
    %469 = vector.extract_strided_slice %439 {offsets = [0, 0], sizes = [64, 1], strides = [1, 1]} : vector<64x16xf32> to vector<64x1xf32>
    %470 = tpu.concatenate %468, %469 in 1 : vector<64x15xf32>, vector<64x1xf32> -> vector<64x16xf32>
    %471 = vector.extract_strided_slice %6 {offsets = [5, 0], sizes = [1, 16], strides = [1, 1]} : vector<9x16xf32> to vector<1x16xf32>
    %472 = vector.broadcast %471 : vector<1x16xf32> to vector<64x16xf32>
    %473 = arith.mulf %470, %472 : vector<64x16xf32>
    %474 = vector.extract_strided_slice %439 {offsets = [0, 3], sizes = [64, 13], strides = [1, 1]} : vector<64x16xf32> to vector<64x13xf32>
    %475 = vector.extract_strided_slice %439 {offsets = [0, 0], sizes = [64, 3], strides = [1, 1]} : vector<64x16xf32> to vector<64x3xf32>
    %476 = tpu.concatenate %474, %475 in 1 : vector<64x13xf32>, vector<64x3xf32> -> vector<64x16xf32>
    %477 = vector.extract_strided_slice %6 {offsets = [6, 0], sizes = [1, 16], strides = [1, 1]} : vector<9x16xf32> to vector<1x16xf32>
    %478 = vector.broadcast %477 : vector<1x16xf32> to vector<64x16xf32>
    %479 = arith.mulf %476, %478 : vector<64x16xf32>
    %480 = vector.extract_strided_slice %439 {offsets = [0, 4], sizes = [64, 12], strides = [1, 1]} : vector<64x16xf32> to vector<64x12xf32>
    %481 = vector.extract_strided_slice %439 {offsets = [0, 0], sizes = [64, 4], strides = [1, 1]} : vector<64x16xf32> to vector<64x4xf32>
    %482 = tpu.concatenate %480, %481 in 1 : vector<64x12xf32>, vector<64x4xf32> -> vector<64x16xf32>
    %483 = vector.extract_strided_slice %6 {offsets = [7, 0], sizes = [1, 16], strides = [1, 1]} : vector<9x16xf32> to vector<1x16xf32>
    %484 = vector.broadcast %483 : vector<1x16xf32> to vector<64x16xf32>
    %485 = arith.mulf %482, %484 : vector<64x16xf32>
    %486 = vector.extract_strided_slice %439 {offsets = [0, 5], sizes = [64, 11], strides = [1, 1]} : vector<64x16xf32> to vector<64x11xf32>
    %487 = vector.extract_strided_slice %439 {offsets = [0, 0], sizes = [64, 5], strides = [1, 1]} : vector<64x16xf32> to vector<64x5xf32>
    %488 = tpu.concatenate %486, %487 in 1 : vector<64x11xf32>, vector<64x5xf32> -> vector<64x16xf32>
    %489 = vector.extract_strided_slice %6 {offsets = [8, 0], sizes = [1, 16], strides = [1, 1]} : vector<9x16xf32> to vector<1x16xf32>
    %490 = vector.broadcast %489 : vector<1x16xf32> to vector<64x16xf32>
    %491 = arith.mulf %488, %490 : vector<64x16xf32>
    %492 = tpu.concatenate %446, %452, %458, %464, %467, %473, %479, %485, %491 in 0 : vector<64x16xf32>, vector<64x16xf32>, vector<64x16xf32>, vector<64x16xf32>, vector<64x16xf32>, vector<64x16xf32>, vector<64x16xf32>, vector<64x16xf32>, vector<64x16xf32> -> vector<576x16xf32>
    %493 = arith.truncf %492 : vector<576x16xf32> to vector<576x16xbf16>
    %cst_64 = arith.constant dense<0.000000e+00> : vector<64x16xf32>
    %494 = tpu.matmul %440, %493, %cst_64 {dimension_numbers = #tpu.dot_dimension_numbers<[1], [0], [0], [1], [0, 0, 1, 1], [], []>} : vector<64x576xbf16>, vector<576x16xbf16>, vector<64x16xf32> -> vector<64x16xf32>
    %cst_65 = arith.constant 0.000000e+00 : f32
    %495 = vector.broadcast %cst_65 : f32 to vector<64x16xf32>
    %496 = arith.cmpf ogt, %494, %495 : vector<64x16xf32>
    %cst_66 = arith.constant 2.000000e-01 : f32
    %497 = vector.broadcast %cst_66 : f32 to vector<64x16xf32>
    %498 = arith.mulf %497, %494 : vector<64x16xf32>
    %499 = arith.select %496, %494, %498 : vector<64x16xi1>, vector<64x16xf32>
    %500 = arith.truncf %499 : vector<64x16xf32> to vector<64x16xbf16>
    %c0_67 = arith.constant 0 : index
    %c0_68 = arith.constant 0 : index
    %501 = vector.load %arg19[%c0_67, %c0_68] : memref<16x256xbf16, #tpu.memory_space<vmem>>, vector<16x256xbf16>
    %cst_69 = arith.constant dense<0.000000e+00> : vector<64x256xf32>
    %502 = tpu.matmul %500, %501, %cst_69 {dimension_numbers = #tpu.dot_dimension_numbers<[1], [0], [0], [1], [0, 0, 1, 1], [], []>} : vector<64x16xbf16>, vector<16x256xbf16>, vector<64x256xf32> -> vector<64x256xf32>
    %503 = tpu.concatenate %130, %286, %502 in 0 : vector<16x256xf32>, vector<32x256xf32>, vector<64x256xf32> -> vector<112x256xf32>
    %c0_70 = arith.constant 0 : index
    %c0_71 = arith.constant 0 : index
    %504 = vector.load %arg10[%c0_70, %c0_71] : memref<16x112xbf16, #tpu.memory_space<vmem>>, vector<16x112xbf16>
    %505 = arith.truncf %503 : vector<112x256xf32> to vector<112x256xbf16>
    %cst_72 = arith.constant dense<0.000000e+00> : vector<16x256xf32>
    %506 = tpu.matmul %504, %505, %cst_72 {dimension_numbers = #tpu.dot_dimension_numbers<[1], [0], [0], [1], [0, 0, 1, 1], [], []>} : vector<16x112xbf16>, vector<112x256xbf16>, vector<16x256xf32> -> vector<16x256xf32>
    %cst_73 = arith.constant 0.000000e+00 : f32
    %507 = vector.broadcast %cst_73 : f32 to vector<16x256xf32>
    %508 = arith.cmpf ogt, %506, %507 : vector<16x256xf32>
    %cst_74 = arith.constant 2.000000e-01 : f32
    %509 = vector.broadcast %cst_74 : f32 to vector<16x256xf32>
    %510 = arith.mulf %509, %506 : vector<16x256xf32>
    %511 = arith.select %508, %506, %510 : vector<16x256xi1>, vector<16x256xf32>
    %c0_75 = arith.constant 0 : index
    %c0_76 = arith.constant 0 : index
    %512 = vector.load %arg11[%c0_75, %c0_76] : memref<8x16xbf16, #tpu.memory_space<vmem>>, vector<8x16xbf16>
    %513 = arith.truncf %511 : vector<16x256xf32> to vector<16x256xbf16>
    %cst_77 = arith.constant dense<0.000000e+00> : vector<8x256xf32>
    %514 = tpu.matmul %512, %513, %cst_77 {dimension_numbers = #tpu.dot_dimension_numbers<[1], [0], [0], [1], [0, 0, 1, 1], [], []>} : vector<8x16xbf16>, vector<16x256xbf16>, vector<8x256xf32> -> vector<8x256xf32>
    %cst_78 = arith.constant 0.000000e+00 : f32
    %515 = vector.broadcast %cst_78 : f32 to vector<8x256xf32>
    %516 = arith.cmpf ogt, %514, %515 : vector<8x256xf32>
    %cst_79 = arith.constant 2.000000e-01 : f32
    %517 = vector.broadcast %cst_79 : f32 to vector<8x256xf32>
    %518 = arith.mulf %517, %514 : vector<8x256xf32>
    %519 = arith.select %516, %514, %518 : vector<8x256xi1>, vector<8x256xf32>
    %c0_80 = arith.constant 0 : index
    %c0_81 = arith.constant 0 : index
    %520 = vector.load %arg12[%c0_80, %c0_81] : memref<8x8xbf16, #tpu.memory_space<vmem>>, vector<8x8xbf16>
    %521 = arith.truncf %519 : vector<8x256xf32> to vector<8x256xbf16>
    %cst_82 = arith.constant dense<0.000000e+00> : vector<8x256xf32>
    %522 = tpu.matmul %520, %521, %cst_82 {dimension_numbers = #tpu.dot_dimension_numbers<[1], [0], [0], [1], [0, 0, 1, 1], [], []>} : vector<8x8xbf16>, vector<8x256xbf16>, vector<8x256xf32> -> vector<8x256xf32>
    %523 = math.tanh %522 : vector<8x256xf32>
    %c0_83 = arith.constant 0 : index
    %c0_84 = arith.constant 0 : index
    %c0_85 = arith.constant 0 : index
    %524 = vector.load %arg20[%c0_83, %c0_84, %c0_85] : memref<1x8x256xf32, #tpu.memory_space<vmem>>, vector<1x8x256xf32>
    %525 = vector.shape_cast %524 : vector<1x8x256xf32> to vector<8x256xf32>
    %526 = vector.shape_cast %523 : vector<8x256xf32> to vector<1x8x256xf32>
    tpu.vector_store %arg20[%c0_83, %c0_84, %c0_85], %526 {strides = array<i32>} : memref<1x8x256xf32, #tpu.memory_space<vmem>>, vector<1x8x256xf32>,
    return
  }
  func.func @transform_0(%arg0: i32) -> (i32, i32, i32) {
    %c0_i32 = arith.constant 0 : i32
    %c0_i32_0 = arith.constant 0 : i32
    %c0_i32_1 = arith.constant 0 : i32
    return %arg0, %c0_i32, %c0_i32_0 : i32, i32, i32
  }
  func.func @transform_1(%arg0: i32) -> (i32, i32, i32) {
    %c0_i32 = arith.constant 0 : i32
    %c0_i32_0 = arith.constant 0 : i32
    %c0_i32_1 = arith.constant 0 : i32
    return %arg0, %c0_i32, %c0_i32_0 : i32, i32, i32
  }
  func.func @transform_2(%arg0: i32) -> (i32, i32) {
    %c0_i32 = arith.constant 0 : i32
    %c0_i32_0 = arith.constant 0 : i32
    %c0_i32_1 = arith.constant 0 : i32
    return %c0_i32, %c0_i32_0 : i32, i32
  }
  func.func @transform_3(%arg0: i32) -> (i32, i32) {
    %c0_i32 = arith.constant 0 : i32
    %c0_i32_0 = arith.constant 0 : i32
    %c0_i32_1 = arith.constant 0 : i32
    return %c0_i32, %c0_i32_0 : i32, i32
  }
  func.func @transform_4(%arg0: i32) -> (i32, i32) {
    %c0_i32 = arith.constant 0 : i32
    %c0_i32_0 = arith.constant 0 : i32
    %c0_i32_1 = arith.constant 0 : i32
    return %c0_i32, %c0_i32_0 : i32, i32
  }
  func.func @transform_5(%arg0: i32) -> (i32, i32) {
    %c0_i32 = arith.constant 0 : i32
    %c0_i32_0 = arith.constant 0 : i32
    %c0_i32_1 = arith.constant 0 : i32
    return %c0_i32, %c0_i32_0 : i32, i32
  }
  func.func @transform_6(%arg0: i32) -> (i32, i32) {
    %c0_i32 = arith.constant 0 : i32
    %c0_i32_0 = arith.constant 0 : i32
    %c0_i32_1 = arith.constant 0 : i32
    return %c0_i32, %c0_i32_0 : i32, i32
  }
  func.func @transform_7(%arg0: i32) -> (i32, i32) {
    %c0_i32 = arith.constant 0 : i32
    %c0_i32_0 = arith.constant 0 : i32
    %c0_i32_1 = arith.constant 0 : i32
    return %c0_i32, %c0_i32_0 : i32, i32
  }
  func.func @transform_8(%arg0: i32) -> (i32, i32) {
    %c0_i32 = arith.constant 0 : i32
    %c0_i32_0 = arith.constant 0 : i32
    %c0_i32_1 = arith.constant 0 : i32
    return %c0_i32, %c0_i32_0 : i32, i32
  }
  func.func @transform_9(%arg0: i32) -> (i32, i32) {
    %c0_i32 = arith.constant 0 : i32
    %c0_i32_0 = arith.constant 0 : i32
    %c0_i32_1 = arith.constant 0 : i32
    return %c0_i32, %c0_i32_0 : i32, i32
  }
  func.func @transform_10(%arg0: i32) -> (i32, i32) {
    %c0_i32 = arith.constant 0 : i32
    %c0_i32_0 = arith.constant 0 : i32
    %c0_i32_1 = arith.constant 0 : i32
    return %c0_i32, %c0_i32_0 : i32, i32
  }
  func.func @transform_11(%arg0: i32) -> (i32, i32) {
    %c0_i32 = arith.constant 0 : i32
    %c0_i32_0 = arith.constant 0 : i32
    %c0_i32_1 = arith.constant 0 : i32
    return %c0_i32, %c0_i32_0 : i32, i32
  }
  func.func @transform_12(%arg0: i32) -> (i32, i32) {
    %c0_i32 = arith.constant 0 : i32
    %c0_i32_0 = arith.constant 0 : i32
    %c0_i32_1 = arith.constant 0 : i32
    return %c0_i32, %c0_i32_0 : i32, i32
  }
  func.func @transform_13(%arg0: i32) -> (i32, i32) {
    %c0_i32 = arith.constant 0 : i32
    %c0_i32_0 = arith.constant 0 : i32
    %c0_i32_1 = arith.constant 0 : i32
    return %c0_i32, %c0_i32_0 : i32, i32
  }
  func.func @transform_14(%arg0: i32) -> (i32, i32) {
    %c0_i32 = arith.constant 0 : i32
    %c0_i32_0 = arith.constant 0 : i32
    %c0_i32_1 = arith.constant 0 : i32
    return %c0_i32, %c0_i32_0 : i32, i32
  }
  func.func @transform_15(%arg0: i32) -> (i32, i32) {
    %c0_i32 = arith.constant 0 : i32
    %c0_i32_0 = arith.constant 0 : i32
    %c0_i32_1 = arith.constant 0 : i32
    return %c0_i32, %c0_i32_0 : i32, i32
  }
  func.func @transform_16(%arg0: i32) -> (i32, i32) {
    %c0_i32 = arith.constant 0 : i32
    %c0_i32_0 = arith.constant 0 : i32
    %c0_i32_1 = arith.constant 0 : i32
    return %c0_i32, %c0_i32_0 : i32, i32
  }
  func.func @transform_17(%arg0: i32) -> (i32, i32) {
    %c0_i32 = arith.constant 0 : i32
    %c0_i32_0 = arith.constant 0 : i32
    %c0_i32_1 = arith.constant 0 : i32
    return %c0_i32, %c0_i32_0 : i32, i32
  }
  func.func @transform_18(%arg0: i32) -> (i32, i32) {
    %c0_i32 = arith.constant 0 : i32
    %c0_i32_0 = arith.constant 0 : i32
    %c0_i32_1 = arith.constant 0 : i32
    return %c0_i32, %c0_i32_0 : i32, i32
  }
  func.func @transform_19(%arg0: i32) -> (i32, i32, i32) {
    %c0_i32 = arith.constant 0 : i32
    %c0_i32_0 = arith.constant 0 : i32
    %c0_i32_1 = arith.constant 0 : i32
    return %arg0, %c0_i32, %c0_i32_0 : i32, i32, i32
  }
}

</mosaic_0001>

<bundles_post_ra>
// kernel: tpu_custom_call.1
= control target key start
LH: loop header
LB: loop body
LE: loop exit
PB: predicated region body
PF: predicated region fallthrough
CT: control target
= control target key end

     0   :  { %s14781_s0 = inlined_call_operand.hbm [shape: f32[2,1,256], index: 0, kind: input, shape index: {}]   ;;  %s14782_s1 = inlined_call_operand.vmem [shape: f32[2,3,256], index: 1, kind: input, shape index: {}]   ;;  %s14783_s2 = inlined_call_operand.hbm [shape: bf16[16,45], index: 2, kind: input, shape index: {}]   ;;  %s14784_s3 = inlined_call_operand.hbm [shape: bf16[16,144], index: 3, kind: input, shape index: {}]   ;;  %s14785_s4 = inlined_call_operand.vmem [shape: bf16[32,576], index: 4, kind: input, shape index: {}]   ;;  %s14786_s5 = inlined_call_operand.hbm [shape: bf16[32,288], index: 5, kind: input, shape index: {}]   ;;  %s14787_s6 = inlined_call_operand.hbm [shape: bf16[64,1152], index: 6, kind: input, shape index: {}]   ;;  %s14788_s7 = inlined_call_operand.vmem [shape: bf16[64,576], index: 7, kind: input, shape index: {}]   ;;  %s14789_s8 = inlined_call_operand.hbm [shape: bf16[64,576], index: 8, kind: input, shape index: {}]   ;;  %s14790_s9 = inlined_call_operand.hbm [shape: bf16[16,112], index: 9, kind: input, shape index: {}]   ;;  %s14791_s10 = inlined_call_operand.hbm [shape: bf16[8,16], index: 10, kind: input, shape index: {}]   ;;  %s14792_s11 = inlined_call_operand.hbm [shape: bf16[8,8], index: 11, kind: input, shape index: {}]   ;;  %s14793_s12 = inlined_call_operand.vmem [shape: f32[9,256], index: 12, kind: input, shape index: {}]   ;;  %s14794_s13 = inlined_call_operand.hbm [shape: f32[9,64], index: 13, kind: input, shape index: {}]   ;;  %s14795_s14 = inlined_call_operand.hbm [shape: f32[9,16], index: 14, kind: input, shape index: {}]   ;;  %s14796_s15 = inlined_call_operand.vmem [shape: bf16[256,64], index: 15, kind: input, shape index: {}]   ;;  %s14797_s16 = inlined_call_operand.vmem [shape: bf16[64,16], index: 16, kind: input, shape index: {}]   ;;  %s14798_s17 = inlined_call_operand.hbm [shape: bf16[64,256], index: 17, kind: input, shape index: {}]   ;;  %s14799_s18 = inlined_call_operand.vmem [shape: bf16[16,256], index: 18, kind: input, shape index: {}]   ;;  %s14800_s19 = inlined_call_operand.hbm [shape: f32[2,8,256], index: 19, kind: output, shape index: {}]  }
   0x1   :  { %14931 = sst [smem:[#allocation198_spill]] %s14781_s0 }
   0x2   :  { %14932 = sst [smem:[#allocation199_spill]] %s14782_s1 }
   0x3   :  { %14933 = sst [smem:[#allocation200_spill]] %s14783_s2 }
   0x4   :  { %14934 = sst [smem:[#allocation201_spill]] %s14784_s3 }
   0x5   :  { %14935 = sst [smem:[#allocation202_spill]] %s14785_s4 }
   0x6   :  { %14936 = sst [smem:[#allocation203_spill]] %s14786_s5 }
   0x7   :  { %14937 = sst [smem:[#allocation204_spill]] %s14787_s6 }
   0x8   :  { %14938 = sst [smem:[#allocation205_spill]] %s14788_s7 }
   0x9   :  { %14939 = sst [smem:[#allocation206_spill]] %s14789_s8 }
   0xa   :  { %14940 = sst [smem:[#allocation207_spill]] %s14790_s9 }
   0xb   :  { %14941 = sst [smem:[#allocation208_spill]] %s14791_s10 }
   0xc   :  { %14942 = sst [smem:[#allocation209_spill]] %s14792_s11 }
   0xd   :  { %14943 = sst [smem:[#allocation210_spill]] %s14793_s12 }
   0xe   :  { %14944 = sst [smem:[#allocation211_spill]] %s14794_s13 }
   0xf   :  { %14945 = sst [smem:[#allocation212_spill]] %s14795_s14 }
  0x10   :  { %14946 = sst [smem:[#allocation213_spill]] %s14796_s15 }
  0x11   :  { %14947 = sst [smem:[#allocation214_spill]] %s14797_s16 }
  0x12   :  { %14948 = sst [smem:[#allocation215_spill]] %s14798_s17 }
  0x13   :  { %14949 = sst [smem:[#allocation216_spill]] %s14799_s18 }
  0x14   :  { %14950 = sst [smem:[#allocation217_spill]] %s14800_s19 }
  0x15   :  { %24 = vsyncpa [#allocation3], 0 }
  0x16   :  { %26 = vsyncpa [#allocation3 + $0x1], 0 }
  0x17   :  { %27 = vsyncpa [#allocation6], 0 }
  0x18   :  { %28 = vsyncpa [#allocation9], 0 }
  0x19   :  { %29 = vsyncpa [#allocation12], 0 }
  0x1a   :  { %30 = vsyncpa [#allocation15], 0 }
  0x1b   :  { %31 = vsyncpa [#allocation18], 0 }
  0x1c   :  { %32 = vsyncpa [#allocation21], 0 }
  0x1d   :  { %33 = vsyncpa [#allocation4], 0 }
  0x1e   :  { %35 = vsyncpa [#allocation4 + $0x1], 0  ;;  %s9634_s0 = smov 0   ;;  %s9636_s30 = smov 0  }
  0x1f   :  { %s9638_s20 = smov 0   ;;  %s9640_s21 = smov 0  }
  0x20 LB: > { %s9475_s1 = smov [#allocation5]   ;;  %s9655_s2 = sadd.s32 4294967295, %s9473_s21   ;;  %s9473_s21 = sphi %s9640_s21, %s15609_s21   ;;  %s9469_s20 = sphi %s9638_s20, %s15608_s20   ;;  %s9465_s30 = sphi %s9636_s30, %s15607_s30   ;;  %s9461_s0 = sphi %s9634_s0, %s15606_s0  }
  0x21   : > { %s493_s22 = sshll.u32 %s9475_s1, 4  ;;  %p7782_p0 = scmp.ge.s32.totalorder %s9473_s21, 1  ;;  %s494_s22 = int_to_ptr.vmem [resolvable:$true] %s493_s22 }
  0x22   : > { %p14812_p1 = scmp.eq.s32.totalorder %s9655_s2, 0  ;;  %p481_p2 = scmp.lt.s32.totalorder %s9473_s21, 3 }
  0x23   : > { %s9476_s24 = smov [#allocation8]   ;;  %s9477_s26 = smov [#allocation11]  }
  0x24   : > { %p9660_p3 = pnand %p7782_p0, %p481_p2  ;;  %s522_s25 = sshll.u32 %s9476_s24, 4  ;;  %s9673_s25 = int_to_ptr.vmem [resolvable:$true] %s522_s25 }
  0x25   : > { %s9675_s27 = sshll.u32 %s9477_s26, 4  ;;  %s9082_s29 = scalar_lea.vmem %s494_s22, 128  ;;  %s552_s27 = int_to_ptr.vmem [resolvable:$true] %s9675_s27 }
  0x26   : > { %s14951_s23 = scalar_select %p9660_p3, 1, 0 }
  0x27   : > { %p8646_p5 = pneg %p9660_p3  ;;  %p9083_p8 = scmp.ne.s32.totalorder %s494_s22, %s9082_s29 }
  0x28   : > { %p9090_p11 = scmp.lt.s32.totalorder %s494_s22, %s494_s22  ;;  %p9091_p12 = scmp.lt.s32.totalorder %s9082_s29, %s9082_s29 }
  0x29   : > { %p9669_p6 = pnand %p8646_p5, %p14812_p1 }
  0x2a   : > { %p9092_p13 = por %p9091_p12, %p9090_p11 }
  0x2b   : > { %p9679_p7 = pneg %p9669_p6 }
  0x2d   : > { %p9085_p9 = pnand %p9083_p8, %p9679_p7 }
  0x2f   : > { %p9086_p10 = pneg %p9085_p9 }
  0x31   : > { %p9093_p0 = pnand %p9092_p13, %p9086_p10 }
  0x33   : > { %9096 = shalt.err (!%p9093_p0)
}
  0x34   : > { %s14806_s1 = smov 64   ;;  %s14807_s24 = smov 4  }
  0x35   : > { %s14954_s18 = sld [smem:[#allocation200_spill]]  ;;  %s9108_s7 = scalar_lea.vmem %s9673_s25, 768 }
  0x36   : > { %p9109_p2 = scmp.ne.s32.totalorder %s9673_s25, %s9108_s7  ;;  %p9116_p9 = scmp.lt.s32.totalorder %s9673_s25, %s9673_s25 }
  0x37   : > { %p9117_p10 = scmp.lt.s32.totalorder %s9108_s7, %s9108_s7 }
  0x38   : > { %p9111_p5 = pnand %p9109_p2, %p9679_p7 }
  0x39   : > { %p9118_p11 = por %p9117_p10, %p9116_p9 }
  0x3a   : > { %p9112_p8 = pneg %p9111_p5 }
  0x3b   : > { %8649 = dma.hbm_to_vmem [thread:$0]  (!%p9669_p6), %s14954_s18, 128, %s494_s22, [#allocation6], %s14806_s1, %s14806_s1, %s14807_s24  }
  0x3c   : > { %p9119_p12 = pnand %p9118_p11, %p9112_p8 }
  0x3e   : > { %9122 = shalt.err (!%p9119_p12)
}
  0x3f   : > { %s9480_s29 = smov 192   ;;  %s9481_s16 = smov 12  }
  0x40   : > { %s14955_s5 = sld [smem:[#allocation203_spill]]  ;;  %s9134_s22 = scalar_lea.vmem %s552_s27, 2560 }
  0x41   : > { %p9135_p13 = scmp.ne.s32.totalorder %s552_s27, %s9134_s22  ;;  %p9142_p5 = scmp.lt.s32.totalorder %s552_s27, %s552_s27 }
  0x42   : > { %p9143_p8 = scmp.lt.s32.totalorder %s9134_s22, %s9134_s22 }
  0x43   : > { %p9137_p0 = pnand %p9135_p13, %p9679_p7 }
  0x44   : > { %p9144_p9 = por %p9143_p8, %p9142_p5 }
  0x45   : > { %p9138_p2 = pneg %p9137_p0 }
  0x46   : > { %8655 = dma.hbm_to_vmem [thread:$0]  (!%p9669_p6), %s14955_s5, 768, %s9673_s25, [#allocation9], %s9480_s29, %s9480_s29, %s9481_s16  }
  0x47   : > { %p9145_p10 = pnand %p9144_p9, %p9138_p2 }
  0x49   : > { %9148 = shalt.err (!%p9145_p10)
}
  0x4a   : > { %s9482_s7 = smov 320   ;;  %s9483_s26 = smov 20  }
  0x4b   : > { %s14956_s8 = sld [smem:[#allocation206_spill]]  ;;  %s9484_s16 = smov [#allocation14]  }
  0x4c   : > { %s578_s25 = sshll.u32 %s9484_s16, 4  ;;  %s579_s25 = int_to_ptr.vmem [resolvable:$true] %s578_s25 }
  0x4d   : > { %s9160_s29 = scalar_lea.vmem %s579_s25, 64  ;;  %p9168_p0 = scmp.lt.s32.totalorder %s579_s25, %s579_s25 }
  0x4e   : > { %p9161_p11 = scmp.ne.s32.totalorder %s579_s25, %s9160_s29  ;;  %p9169_p2 = scmp.lt.s32.totalorder %s9160_s29, %s9160_s29 }
  0x50   : > { %p9163_p12 = pnand %p9161_p11, %p9679_p7  ;;  %p9170_p5 = por %p9169_p2, %p9168_p0 }
  0x51   : > { %8661 = dma.hbm_to_vmem [thread:$0]  (!%p9669_p6), %s14956_s8, 2560, %s552_s27, [#allocation12], %s9482_s7, %s9482_s7, %s9483_s26  }
  0x52   : > { %p9164_p13 = pneg %p9163_p12 }
  0x54   : > { %p9171_p8 = pnand %p9170_p5, %p9164_p13 }
  0x56   : > { %9174 = shalt.err (!%p9171_p8)
}
  0x57   : > { %s14957_s10 = sld [smem:[#allocation208_spill]]  ;;  %s9485_s27 = smov [#allocation17]  }
  0x58   : > { %s602_s1 = sshll.u32 %s9485_s27, 4  ;;  %s9486_s24 = smov [#allocation7]   ;;  %s603_s1 = int_to_ptr.vmem [resolvable:$true] %s602_s1 }
  0x59   : > { %s506_s22 = sshll.u32 %s9486_s24, 4  ;;  %s9186_s7 = scalar_lea.vmem %s603_s1, 256  ;;  %s507_s22 = int_to_ptr.vmem [resolvable:$true] %s506_s22 }
  0x5a   : > { %p9187_p9 = scmp.ne.s32.totalorder %s603_s1, %s9186_s7  ;;  %p9194_p12 = scmp.lt.s32.totalorder %s603_s1, %s603_s1 }
  0x5b   : > { %p9195_p13 = scmp.lt.s32.totalorder %s9186_s7, %s9186_s7 }
  0x5c   : > { %p9189_p10 = pnand %p9187_p9, %p9679_p7 }
  0x5d   : > { %8667 = dma.hbm_to_vmem [thread:$0]  (!%p9669_p6), %s14957_s10, 64, %s579_s25, [#allocation15]  }
  0x5e   : > { %p9190_p11 = pneg %p9189_p10  ;;  %p9196_p0 = por %p9195_p13, %p9194_p12 }
  0x60   : > { %p9197_p2 = pnand %p9196_p0, %p9190_p11 }
  0x62   : > { %9200 = shalt.err (!%p9197_p2)
}
  0x63   : > { %s14808_s26 = smov 128   ;;  %s14810_s16 = smov 8  }
  0x64   : > { %s14958_s13 = sld [smem:[#allocation211_spill]]  ;;  %s9212_s19 = scalar_lea.vmem %s507_s22, 256 }
  0x65   : > { %p9213_p5 = scmp.ne.s32.totalorder %s507_s22, %s9212_s19  ;;  %p9220_p10 = scmp.lt.s32.totalorder %s507_s22, %s507_s22 }
  0x66   : > { %p9221_p11 = scmp.lt.s32.totalorder %s9212_s19, %s9212_s19 }
  0x67   : > { %p9215_p8 = pnand %p9213_p5, %p9679_p7 }
  0x68   : > { %p9222_p12 = por %p9221_p11, %p9220_p10 }
  0x69   : > { %p9216_p9 = pneg %p9215_p8 }
  0x6a   : > { %8673 = dma.hbm_to_vmem [thread:$0]  (!%p9669_p6), %s14958_s13, 256, %s603_s1, [#allocation18], %s14808_s26, %s14808_s26, %s14810_s16  }
  0x6b   : > { %p9223_p13 = pnand %p9222_p12, %p9216_p9 }
  0x6d   : > { %9226 = shalt.err (!%p9223_p13)
}
  0x6e   : > { %s14959_s24 = sld [smem:[#allocation201_spill]]  ;;  %s9489_s1 = smov [#allocation10]  }
  0x6f   : > { %s535_s7 = sshll.u32 %s9489_s1, 4  ;;  %s536_s7 = int_to_ptr.vmem [resolvable:$true] %s535_s7 }
  0x70   : > { %s9238_s25 = scalar_lea.vmem %s536_s7, 4608  ;;  %p9246_p8 = scmp.lt.s32.totalorder %s536_s7, %s536_s7 }
  0x71   : > { %p9239_p0 = scmp.ne.s32.totalorder %s536_s7, %s9238_s25  ;;  %p9247_p9 = scmp.lt.s32.totalorder %s9238_s25, %s9238_s25 }
  0x73   : > { %p9241_p2 = pnand %p9239_p0, %p9679_p7  ;;  %p9248_p10 = por %p9247_p9, %p9246_p8 }
  0x74   : > { %8652 = dma.hbm_to_vmem [thread:$0]  (!%p9669_p6), %s14959_s24, 256, %s507_s22, [#allocation6], %s14808_s26, %s14808_s26, %s14810_s16  }
  0x75   : > { %p9242_p5 = pneg %p9241_p2 }
  0x77   : > { %p9249_p11 = pnand %p9248_p10, %p9242_p5 }
  0x79   : > { %9252 = shalt.err (!%p9249_p11)
}
  0x7a   : > { %s9490_s29 = smov 576   ;;  %s9491_s19 = smov 36  }
  0x7b   : > { %s14960_s6 = sld [smem:[#allocation204_spill]]  ;;  %s9492_s27 = smov [#allocation13]  }
  0x7c   : > { %s564_s24 = sshll.u32 %s9492_s27, 4  ;;  %s9493_s1 = smov [#allocation16]   ;;  %s565_s24 = int_to_ptr.vmem [resolvable:$true] %s564_s24 }
  0x7d   : > { %s589_s26 = sshll.u32 %s9493_s1, 4  ;;  %s9264_s16 = scalar_lea.vmem %s565_s24, 128  ;;  %s590_s26 = int_to_ptr.vmem [resolvable:$true] %s589_s26 }
  0x7e   : > { %p9265_p12 = scmp.ne.s32.totalorder %s565_s24, %s9264_s16  ;;  %p9272_p2 = scmp.lt.s32.totalorder %s565_s24, %s565_s24 }
  0x7f   : > { %p9273_p5 = scmp.lt.s32.totalorder %s9264_s16, %s9264_s16 }
  0x80   : > { %p9267_p13 = pnand %p9265_p12, %p9679_p7 }
  0x81   : > { %8658 = dma.hbm_to_vmem [thread:$0]  (!%p9669_p6), %s14960_s6, 4608, %s536_s7, [#allocation9], %s9490_s29, %s9490_s29, %s9491_s19  }
  0x82   : > { %p9268_p0 = pneg %p9267_p13  ;;  %p9274_p8 = por %p9273_p5, %p9272_p2 }
  0x84   : > { %p9275_p9 = pnand %p9274_p8, %p9268_p0 }
  0x86   : > { %9278 = shalt.err (!%p9275_p9)
}
  0x87   : > { %s14961_s25 = smov 4   ;;  %s14962_s18 = smov 64  }
  0x88   : > { %s14963_s9 = sld [smem:[#allocation207_spill]]  ;;  %s9290_s19 = scalar_lea.vmem %s590_s26, 64 }
  0x89   : > { %p9291_p10 = scmp.ne.s32.totalorder %s590_s26, %s9290_s19  ;;  %p9298_p13 = scmp.lt.s32.totalorder %s590_s26, %s590_s26 }
  0x8a   : > { %p9299_p2 = scmp.lt.s32.totalorder %s9290_s19, %s9290_s19 }
  0x8b   : > { %p9293_p11 = pnand %p9291_p10, %p9679_p7 }
  0x8c   : > { %p9300_p0 = por %p9299_p2, %p9298_p13 }
  0x8d   : > { %p9294_p12 = pneg %p9293_p11 }
  0x8e   : > { %8664 = dma.hbm_to_vmem [thread:$0]  (!%p9669_p6), %s14963_s9, 128, %s565_s24, [#allocation12], %s14962_s18, %s14962_s18, %s14961_s25  }
  0x8f   : > { %p9301_p5 = pnand %p9300_p0, %p9294_p12 }
  0x91   : > { %9304 = shalt.err (!%p9301_p5)
}
  0x92   : > { %s14964_s11 = sld [smem:[#allocation209_spill]]  ;;  %s9494_s27 = smov [#allocation19]  }
  0x93   : > { %s615_s24 = sshll.u32 %s9494_s27, 4  ;;  %s9495_s1 = smov [#allocation20]   ;;  %s616_s24 = int_to_ptr.vmem [resolvable:$true] %s615_s24 }
  0x94   : > { %s634_s25 = sshll.u32 %s9495_s1, 4  ;;  %s9316_s18 = scalar_lea.vmem %s616_s24, 256  ;;  %s635_s25 = int_to_ptr.vmem [resolvable:$true] %s634_s25 }
  0x95   : > { %p9317_p8 = scmp.ne.s32.totalorder %s616_s24, %s9316_s18  ;;  %p9324_p11 = scmp.lt.s32.totalorder %s616_s24, %s616_s24 }
  0x96   : > { %p9325_p12 = scmp.lt.s32.totalorder %s9316_s18, %s9316_s18 }
  0x97   : > { %p9319_p9 = pnand %p9317_p8, %p9679_p7 }
  0x98   : > { %8670 = dma.hbm_to_vmem [thread:$0]  (!%p9669_p6), %s14964_s11, 64, %s590_s26, [#allocation15]  }
  0x99   : > { %p9320_p10 = pneg %p9319_p9  ;;  %p9326_p13 = por %p9325_p12, %p9324_p11 }
  0x9b   : > { %p9327_p2 = pnand %p9326_p13, %p9320_p10 }
  0x9d   : > { %9330 = shalt.err (!%p9327_p2)
}
  0x9e   : > { %s14965_s7 = smov 8   ;;  %s14966_s29 = smov 128  }
  0x9f   : > { %s14967_s14 = sld [smem:[#allocation212_spill]]  ;;  %s9342_s16 = scalar_lea.vmem %s635_s25, 1024 }
  0xa0   : > { %p9343_p0 = scmp.ne.s32.totalorder %s635_s25, %s9342_s16  ;;  %p9350_p9 = scmp.lt.s32.totalorder %s635_s25, %s635_s25 }
  0xa1   : > { %p9351_p11 = scmp.lt.s32.totalorder %s9342_s16, %s9342_s16 }
  0xa2   : > { %p9345_p5 = pnand %p9343_p0, %p9679_p7 }
  0xa3   : > { %p9352_p10 = por %p9351_p11, %p9350_p9 }
  0xa4   : > { %p9346_p8 = pneg %p9345_p5 }
  0xa5   : > { %8676 = dma.hbm_to_vmem [thread:$0]  (!%p9669_p6), %s14967_s14, 256, %s616_s24, [#allocation18], %s14966_s29, %s14966_s29, %s14965_s7  }
  0xa6   : > { %p9353_p12 = pnand %p9352_p10, %p9346_p8 }
  0xa8   : > { %9356 = shalt.err (!%p9353_p12)
}
  0xa9   : > { %s14968_s17 = sld [smem:[#allocation215_spill]]  ;;  %s7781_s3 = sadd.s32 4294967294, %s9473_s21  }
  0xaa   : > { %s9786_s28 = sadd.s32 1, %s9473_s21   ;;  %s48_s24 = sadd.s32 1, %s9469_s20 }
  0xab   : > { %s45_s1 = ssub.s32 %s9473_s21, %s9786_s28  ;;  %p55_p7 = scmp.ne.s32.totalorder %s9469_s20, %s9465_s30 }
  0xac   : > { %p46_p13 = scmp.eq.s32.totalorder %s45_s1, 0  ;;  %p56_p2 = scmp.eq.s32.totalorder %s9473_s21, 0 }
  0xad   : > { %p61_p0 = scmp.ne.s32.totalorder %s9465_s30, %s9461_s0  ;;  %p468_p5 = scmp.eq.s32.totalorder %s9655_s2, 1 }
  0xae   : > { %s9798_s18 = scalar_select %p46_p13, %s9469_s20, %s48_s24  }
  0xaf   : > { %8679 = dma.hbm_to_vmem [thread:$0]  (!%p9669_p6), %s14968_s17, 1024, %s635_s25, [#allocation21], %s14966_s29, %s14966_s29, %s14965_s7  }
  0xb0   : > { %p57_p8 = por %p56_p2, %p55_p7  ;;  %p9802_p9 = por %p14812_p1, %p61_p0 }
  0xb1   : > { %p9806_p6 = por %p468_p5, %p55_p7  ;;  %p474_p11 = scmp.eq.s32.totalorder %s7781_s3, 1 }
  0xb2   : > { %s14969_s26 = scalar_select %p9802_p9, 1, 0 }
  0xb3   : > { %s14970_s25 = scalar_select %p9806_p6, 1, 0 }
  0xb4   : > { %p8699_p10 = scmp.lt.s32.totalorder %s9473_s21, 2  ;;  %s651_s7 = sand.u32 1, %s9469_s20  }
  0xb5   : > { %p9812_p12 = por %p474_p11, %p61_p0  ;;  %s7795_s19 = sshll.u32 %s651_s7, 1 }
  0xb6   : > { %s8001_s16 = sshll.u32 %s9473_s21, 5  ;;  %s14972_s24 = sld [smem:[#allocation198_spill]] }
  0xb7   : > { %s14971_s29 = scalar_select %p9812_p12, 1, 0 }
  0xb8   : > { %s655_s5 = scalar_lea.vmem [#allocation2], %s7795_s19  ;;  %p9822_p7 = pnand %p8699_p10, %p57_p8 }
  0xb9   : > { %s663_s6 = sshll.u32 %s655_s5, 4  ;;  %s652_s8 = scalar_lea.sflag [#allocation3], %s651_s7  ;;  %s664_s6 = int_to_ptr.vmem [resolvable:$true] %s663_s6 }
  0xba   : > { %p9359_p2 = pneg %p9822_p7 }
  0xbc   : > { %s9820_s1 = scalar_lea.hbm %s14972_s24, %s8001_s16  ;;  %s9362_s27 = scalar_lea.hbm %s14972_s24, 64 }
  0xbd   : > { %s9357_s9 = scalar_lea.hbm %s9820_s1, 32  ;;  %p9363_p8 = scmp.lt.s32.totalorder %s9820_s1, %s14972_s24 }
  0xbe   : > { %p9358_p13 = scmp.ne.s32.totalorder %s9820_s1, %s9357_s9  ;;  %p9364_p11 = scmp.lt.s32.totalorder %s9362_s27, %s9357_s9 }
  0xc0   : > { %p9360_p0 = pnand %p9359_p2, %p9358_p13  ;;  %p9365_p10 = por %p9364_p11, %p9363_p8 }
  0xc2   : > { %p9361_p5 = pneg %p9360_p0 }
  0xc4   : > { %p9366_p4 = pnand %p9365_p10, %p9361_p5 }
  0xc6   : > { %9369 = shalt.err (!%p9366_p4)
}
  0xc7   : > { %s9370_s5 = scalar_lea.vmem %s664_s6, 32  ;;  %s9496_s7 = smov [#allocation2]  }
  0xc8   : > { %p9371_p1 = scmp.ne.s32.totalorder %s664_s6, %s9370_s5  ;;  %s9375_s11 = sshll.u32 %s9496_s7, 4  ;;  %s9376_s11 = int_to_ptr.vmem [resolvable:$false] %s9375_s11 }
  0xc9   : > { %s9377_s13 = scalar_lea.vmem %s9376_s11, 64  ;;  %p9378_p13 = scmp.lt.s32.totalorder %s664_s6, %s9376_s11 }
  0xca   : > { %p9373_p12 = pnand %p9371_p1, %p9359_p2  ;;  %p9379_p0 = scmp.lt.s32.totalorder %s9377_s13, %s9370_s5 }
  0xcc   : > { %p9374_p6 = pneg %p9373_p12  ;;  %p9380_p9 = por %p9379_p0, %p9378_p13 }
  0xce   : > { %p9381_p3 = pnand %p9380_p9, %p9374_p6 }
  0xd0   : > { %9384 = shalt.err (!%p9381_p3)
}
  0xd1   : > { %8683 = dma.hbm_to_vmem [thread:$0]  (!%p9822_p7), %s9820_s1, 32, %s664_s6, %s652_s8  }
  0xd2   : > { %p14974_p5 = scmp.ne.s32.totalorder %s14951_s23, 0 }
  0xd4   : > { %680 = sbr.rel (%p14974_p5) target bundleno = 5781 (0x1695), region = 96 }
  0xd9   : > { %s9843_s9 = sand.u32 1, %s9465_s30   ;;  %p14975_p1 = scmp.ne.s32.totalorder %s14969_s26, 0 }
  0xda   : > { %s7799_s10 = sshll.u32 %s9843_s9, 1  ;;  %s683_s16 = scalar_lea.sflag [#allocation3], %s9843_s9 }
  0xdb   : > { %s686_s11 = scalar_lea.vmem [#allocation2], %s7799_s10 }
  0xdc   : > { %9428 = dma.done.wait (%p14975_p1), %s683_s16, 32  }
  0xdd   : > { %9430 = vsyncadd (%p14975_p1), %s683_s16, 4294967264  ;;  %p14976_p3 = scmp.eq.s32.totalorder %s9655_s2, 0 }
  0xdf   : > { %9432 = dma.done.wait (%p14976_p3), [#allocation6], 384   ;;  %p14977_p4 = pmov %p14976_p3 }
  0xe0   : > { %p14978_p9 = pmov %p14976_p3 }
  0xe1   : > { %9434 = vsyncadd (%p14977_p4), [#allocation6], 4294966912 }
  0xe2   : > { %9436 = dma.done.wait (%p14978_p9), [#allocation9], 5376   ;;  %p14979_p6 = pmov %p14976_p3 }
  0xe3   : > { %p14980_p12 = pmov %p14976_p3 }
  0xe4   : > { %9438 = vsyncadd (%p14979_p6), [#allocation9], 4294961920 }
  0xe5   : > { %9440 = dma.done.wait (%p14980_p12), [#allocation12], 2688   ;;  %p14981_p7 = pmov %p14976_p3 }
  0xe6   : > { %p14982_p2 = pmov %p14976_p3 }
  0xe7   : > { %9442 = vsyncadd (%p14981_p7), [#allocation12], 4294964608 }
  0xe8   : > { %9444 = dma.done.wait (%p14982_p2), [#allocation15], 128   ;;  %p14983_p8 = pmov %p14982_p2 }
  0xe9   : > { %p14984_p11 = pmov %p14982_p2 }
  0xea   : > { %9446 = vsyncadd (%p14983_p8), [#allocation15], 4294967168 }
  0xeb   : > { %9448 = dma.done.wait (%p14984_p11), [#allocation18], 512   ;;  %p14985_p10 = pmov %p14982_p2 }
  0xec   : > { %p14986_p13 = pmov %p14982_p2 }
  0xed   : > { %9450 = vsyncadd (%p14985_p10), [#allocation18], 4294966784 }
  0xee   : > { %9452 = dma.done.wait (%p14986_p13), [#allocation21], 1024   ;;  %p14987_p0 = pmov %p14982_p2 }
  0xef   : > { %p790_p5 = scmp.lt.s32.totalorder %s9655_s2, 1  ;;  %v810_v0 = vlaneseq  ;;  %v796_v2 = vld [vmem:[%s686_s11] sm:$0x3]  ;;  %s14989_s26 = sld [smem:[#allocation199_spill]]  ;;  %v804_v7 = vld [vmem:[#allocation19] sm:$0xff]  ;;  %vm837_vm0 = vcmask 1040384  }
  0xf0   : > { %9454 = vsyncadd (%p14987_p0), [#allocation21], 4294966272  ;;  %v806_v3 = vadd.f32 1e-06, %v796_v2  ;;  %vm14816_vm1 = vcmask 1043456   ;;  %s9497_s3 = smov 112  }
  0xf1   : > { %s791_s6 = scalar_select %p790_p5, %s9655_s2, 1  ;;  %v9877_v1 = vshrl.u32 %v810_v0, 7  ;;  %v14823_v29 = vmov 0   ;;  %vm14817_vm2 = vcmask 916480   ;;  %vm961_vm3 = vcmask 924672  }
  0xf2   : > { %9062 = vrcp.f32 %v806_v3  ;;  %s14821_s22 = smov 113   ;;  %s9499_s27 = smov 111   ;;  %1133 = vmatprep.mubr.bf16.mxu0 %v14823_v29  ;;  %vm1001_vm4 = vcmask 908288   ;;  %vm1075_vm5 = vcmask 1042432   ;;  %vm941_vm6 = vcmask 1039360  }
  0xf3   : > { %s8002_s8 = sshll.u32 %s791_s6, 3  ;;  %v9880_v4 = vsub.s32 0, %v9877_v1  ;;  %v9883_v5 = vsub.s32 1, %v9877_v1  ;;  %v9889_v8 = vsub.s32 7, %v9877_v1  ;;  %v9895_v12 = vsub.s32 6, %v9877_v1  ;;  %s14859_s19 = smov 127  }
  0xf4   : > { %v9906_v22 = vsub.s32 5, %v9877_v1  ;;  %v9935_v27 = vsub.s32 4, %v9877_v1  ;;  %s14902_s5 = smov 1   ;;  %s9502_s7 = smov 16   ;;  %vm1072_vm7 = vcmask 1045504   ;;  %vm1065_vm8 = vcmask 1046528  }
  0xf5   : > { %14988 = vst [vmem:[#allocation31_spill] sm:$0xff] %v9880_v4  ;;  %s794_s1 = scalar_lea.vmem %s14989_s26, %s8002_s8  ;;  %v9892_v9 = vrot.slane %v804_v7, %v9889_v8  ;;  %14991 = vst [vmem:[#allocation33_spill] sm:$0xff] %v9895_v12  ;;  %v813_v13 = vrot.slane %v796_v2, %v9880_v4  ;;  %v817_v15 = vrot.slane %v796_v2, %v9883_v5  ;;  %s14819_s10 = smov 15   ;;  %v9506_v51 = vmov 65535  }
  0xf6   : > { %v797_v6 = vld [vmem:[%s794_s1] sm:$0x77]  ;;  %v9900_v17 = vrot.slane %v804_v7, %v9895_v12  ;;  %v9913_v25 = vrot.slane %v804_v7, %v9906_v22  ;;  %14994 = vst [vmem:[#allocation36_spill] sm:$0xff] %v9935_v27  ;;  %v9938_v28 = vrot.slane %v804_v7, %v9935_v27  ;;  %s9505_s16 = smov 17   ;;  %s14996_s12 = sld [smem:[#allocation210_spill]]  ;;  %v1093_v52 = vsel %vm1072_vm7, 4294967295, %v9506_v51 }
  0xf7   : > { %14990 = vst [vmem:[#allocation32_spill] sm:$0xff] %v9892_v9  ;;  %v822_v10 = vrot.slane %v797_v6, 7  ;;  %v821_v11 = vcombine.high %v797_v6, %v797_v6  ;;  %v10027_v0 = vsub.s32 3, %v9877_v1  ;;  %vm912_vm9 = vcmask 7168   ;;  %s14997_s15 = sld [smem:[#allocation213_spill]]  ;;  %s14835_s6 = smov 8  }
  0xf8   : > { %14992 = vst [vmem:[#allocation34_spill] sm:$0xff] %v9900_v17  ;;  %14993 = vst [vmem:[#allocation35_spill] sm:$0xff] %v9913_v25  ;;  %vm14818_vm10 = vcmask 130048   ;;  %vm892_vm11 = vcmask 121856   ;;  %vm852_vm12 = vcmask 138240   ;;  %vm1062_vm13 = vcmask 1041408  }
  0xf9   : > { %v823_v16 = vrot.slane %v821_v11, 7  ;;  %v838_v19 = vsel %vm837_vm0, %v813_v13, %v822_v10  ;;  %14995 = vst [vmem:[#allocation37_spill] sm:$0xff] %v9938_v28  ;;  %v1094_v10 = vsel %vm1065_vm8, %v1093_v52, 0  ;;  %vm1059_vm14 = vcmask 1044480   ;;  %s14863_s8 = smov 120   ;;  %s14861_s13 = smov 56  }
  0xfa   : > { %vm1089_vm15 = vcmask 367616   ;;  %s14857_s23 = smov 63   ;;  %s9513_s26 = smov 71  }
  0xfb   : > { %v839_v23 = vsel %vm837_vm0, %v817_v15, %v823_v16  ;;  %s9514_s1 = smov 7   ;;  %s14833_s11 = smov 73  }
  0xfc   : > { %v9960_v30 = vld [vmem:[%s14996_s12] sm:$0xff]  ;;  %v9965_v31 = vld [vmem:[%s14996_s12 + $0x8] sm:$0xff]  ;;  %v10002_v49 = vld [vmem:[%s14996_s12 + $0x10] ss:$0 sm:$0xff]  ;;  %s15042_s4 = sld [smem:[#allocation202_spill]]  ;;  %s15528_s14 = smov 4  }
  0xfd   : > { %v9969_v34 = vrot.slane %v9960_v30, %v9889_v8  ;;  %v9973_v35 = vrot.slane %v9965_v31, %v9889_v8  ;;  %v9977_v36 = vrot.slane %v9960_v30, %v9895_v12  ;;  %v9981_v37 = vrot.slane %v9965_v31, %v9895_v12  ;;  %v10007_v50 = vld [vmem:[%s14996_s12 + $0x18] ss:$0 sm:$0xff]  ;;  %s15526_s12 = smov 1   ;;  %s7580_s24 = scalar_lea.sflag [#allocation4], %s9843_s9 }
  0xfe   : > { %v9985_v40 = vrot.slane %v9960_v30, %v9906_v22  ;;  %v10012_v53 = vrot.slane %v9965_v31, %v9935_v27  ;;  %v10016_v54 = vrot.slane %v9960_v30, %v9935_v27  ;;  %v10024_v63 = vrot.slane %v9965_v31, %v9906_v22  ;;  %p15603_p3 = scmp.ne.s32.totalorder %s14970_s25, 0 }
  0xff   : > { %v9063_v14 = vpop.eup %9062  ;;  %v10059_v52 = vrot.slane %v9960_v30, %v9883_v5 }
 0x100   : > { %v808_v18 = vmul.f32 %v9063_v14, %v796_v2 }
 0x102   : > { %v830_v20 = vrot.slane %v808_v18, %v9880_v4  ;;  %v834_v21 = vrot.slane %v808_v18, %v9883_v5 }
 0x104   : > { %v9910_v24 = vsel %vm14816_vm1, %v838_v19, %v830_v20  ;;  %v9920_v26 = vsel %vm14816_vm1, %v839_v23, %v834_v21  ;;  %v10042_v21 = vrot.slane %v9960_v30, %v10027_v0  ;;  %v10046_v23 = vrot.slane %v9965_v31, %v10027_v0 }
 0x105   : > { %977 = vrot.lane.b32.xlu1 %v9910_v24, %s9497_s3  ;;  %957 = vrot.lane.b32.xlu0 %v9910_v24, %s14821_s22  ;;  %v936_v11 = vmul.f32 %v10012_v53, %v9920_v26  ;;  %v935_v13 = vmul.f32 %v10016_v54, %v9910_v24 }
 0x109   : > { %979 = vrot.lane.b32.xlu1 %v9920_v26, %s9497_s3  ;;  %959 = vrot.lane.b32.xlu0 %v9920_v26, %s14821_s22 }
 0x10d   : > { %999 = vrot.lane.b32.xlu1 %v9920_v26, %s9499_s27  ;;  %997 = vrot.lane.b32.xlu0 %v9910_v24, %s9499_s27 }
 0x111   : > { %939 = vrot.lane.b32.xlu1 %v9920_v26, %s14859_s19  ;;  %937 = vrot.lane.b32.xlu0 %v9910_v24, %s14859_s19 }
 0x115   : > { %910 = vrot.lane.b32.xlu1 %v9910_v24, %s14902_s5  ;;  %907 = vrot.lane.b32.xlu0 %v9920_v26, %s14902_s5 }
 0x119   : > { %870 = vrot.lane.b32.xlu1 %v9910_v24, %s9502_s7  ;;  %867 = vrot.lane.b32.xlu0 %v9920_v26, %s9502_s7 }
 0x11d   : > { %890 = vrot.lane.b32.xlu1 %v9910_v24, %s14819_s10  ;;  %887 = vrot.lane.b32.xlu0 %v9920_v26, %s14819_s10 }
 0x121   : > { %850 = vrot.lane.b32.xlu1 %v9910_v24, %s9505_s16  ;;  %846 = vrot.lane.b32.xlu0 %v9920_v26, %s9505_s16 }
 0x177   : > { %v978_v32 = vpop.permute.xlu1 %977  ;;  %v958_v33 = vpop.permute.xlu0 %957 }
 0x17b   : > { %v980_v38 = vpop.permute.xlu1 %979  ;;  %v960_v39 = vpop.permute.xlu0 %959 }
 0x17c   : > { %v982_v41 = vsel %vm14817_vm2, %v978_v32, %v980_v38  ;;  %v986_v42 = vsel %vm14817_vm2, %v980_v38, %v978_v32  ;;  %v962_v43 = vsel %vm961_vm3, %v958_v33, %v960_v39  ;;  %v966_v44 = vsel %vm961_vm3, %v960_v39, %v958_v33 }
 0x17d   : > { %v995_v45 = vmul.f32 %v9969_v34, %v982_v41  ;;  %v996_v46 = vmul.f32 %v9973_v35, %v986_v42  ;;  %v9994_v47 = vmul.f32 %v9977_v36, %v962_v43  ;;  %v9997_v48 = vmul.f32 %v9981_v37, %v966_v44 }
 0x17e   : > { %v1038_v38 = vrot.slane %v936_v11, 4  ;;  %v1037_v39 = vrot.slane %v935_v13, 4 }
 0x17f   : > { %v1055_v55 = vrot.slane %v995_v45, 5  ;;  %v1056_v56 = vrot.slane %v996_v46, 5  ;;  %v1049_v57 = vrot.slane %v9994_v47, 2  ;;  %v1050_v58 = vrot.slane %v9997_v48, 2  ;;  %v1000_v59 = vpop.permute.xlu1 %999  ;;  %v998_v60 = vpop.permute.xlu0 %997 }
 0x180   : > { %v1002_v61 = vsel %vm1001_vm4, %v998_v60, %v1000_v59  ;;  %v1006_v62 = vsel %vm1001_vm4, %v1000_v59, %v998_v60  ;;  %v10053_v47 = vsub.s32 2, %v9877_v1  ;;  %v10065_v1 = vrot.slane %v9965_v31, %v9883_v5 }
 0x181   : > { %v1015_v2 = vmul.f32 %v10002_v49, %v1002_v61  ;;  %v1016_v3 = vmul.f32 %v10007_v50, %v1006_v62  ;;  %v1077_v6 = vsel %vm1075_vm5, %v1050_v58, %v1056_v56  ;;  %v1076_v7 = vsel %vm1075_vm5, %v1049_v57, %v1055_v55 }
 0x183   : > { %v940_v14 = vpop.permute.xlu1 %939  ;;  %v938_v15 = vpop.permute.xlu0 %937  ;;  %v1083_v16 = vpack.c.bf16 %v1016_v3, %v1077_v6  ;;  %v1082_v18 = vpack.c.bf16 %v1015_v2, %v1076_v7  ;;  %v10071_v6 = vrot.slane %v9960_v30, %v10053_v47  ;;  %v10075_v7 = vrot.slane %v9965_v31, %v10053_v47 }
 0x184   : > { %v942_v19 = vsel %vm941_vm6, %v938_v15, %v940_v14  ;;  %v946_v20 = vsel %vm941_vm6, %v940_v14, %v938_v15 }
 0x185   : > { %v955_v26 = vmul.f32 %v9985_v40, %v942_v19  ;;  %v956_v24 = vmul.f32 %v10024_v63, %v946_v20  ;;  %v1099_v32 = vand.u32 %v1094_v10, %v1083_v16  ;;  %v1096_v33 = vand.u32 %v1094_v10, %v1082_v18 }
 0x187   : > { %v1043_v41 = vrot.slane %v955_v26, 7  ;;  %v1044_v42 = vrot.slane %v956_v24, 7  ;;  %v911_v43 = vpop.permute.xlu1 %910  ;;  %1111 = vmatprep.subr.bf16.mxu0 %v1099_v32  ;;  %v908_v44 = vpop.permute.xlu0 %907 }
 0x188   : > { %v913_v45 = vsel %vm912_vm9, %v911_v43, %v908_v44  ;;  %v916_v46 = vsel %vm912_vm9, %v908_v44, %v911_v43  ;;  %1112 = vmatpush1.bf16.msra.mxu0 %v1096_v33 }
 0x189   : > { %v925_v48 = vmul.f32 %v10042_v21, %v916_v46  ;;  %v926_v51 = vmul.f32 %v10046_v23, %v913_v45  ;;  %v1071_v55 = vsel %vm837_vm0, %v1038_v38, %v1044_v42  ;;  %v1070_v56 = vsel %vm837_vm0, %v1037_v39, %v1043_v41 }
 0x18a   : > { %v1074_v11 = vsel %vm1072_vm7, %v1071_v55, %v1050_v58  ;;  %v1073_v14 = vsel %vm1072_vm7, %v1070_v56, %v1049_v57  ;;  %v10089_v57 = vrot.slane %v9960_v30, %v9880_v4 }
 0x18b   : > { %v1031_v59 = vrot.slane %v925_v48, 1  ;;  %v1032_v60 = vrot.slane %v926_v51, 1  ;;  %v871_v61 = vpop.permute.xlu1 %870  ;;  %v868_v62 = vpop.permute.xlu0 %867 }
 0x18c   : > { %v873_v2 = vsel %vm14818_vm10, %v871_v61, %v868_v62  ;;  %v876_v3 = vsel %vm14818_vm10, %v868_v62, %v871_v61 }
 0x18d   : > { %v1069_v10 = vsel %vm14816_vm1, %v1032_v60, %v1038_v38  ;;  %v1068_v13 = vsel %vm14816_vm1, %v1031_v59, %v1037_v39  ;;  %v885_v18 = vmul.f32 %v10059_v52, %v876_v3  ;;  %v886_v19 = vmul.f32 %v10065_v1, %v873_v2 }
 0x18e   : > { %v1081_v15 = vpack.c.bf16 %v1074_v11, %v1069_v10  ;;  %v1080_v16 = vpack.c.bf16 %v1073_v14, %v1068_v13  ;;  %v10093_v38 = vrot.slane %v9965_v31, %v9880_v4  ;;  %v8892_v11 = vld [vmem:[#allocation5] sm:$0xff]  }
 0x18f   : > { %v891_v20 = vpop.permute.xlu1 %890  ;;  %v888_v26 = vpop.permute.xlu0 %887  ;;  %v1019_v39 = vrot.slane %v885_v18, 3  ;;  %v1020_v41 = vrot.slane %v886_v19, 3 }
 0x190   : > { %v893_v24 = vsel %vm892_vm11, %v891_v20, %v888_v26  ;;  %v896_v32 = vsel %vm892_vm11, %v888_v26, %v891_v20  ;;  %1113 = vmatprep.subr.bf16.mxu0 %v1081_v15 }
 0x191   : > { %v905_v58 = vmul.f32 %v10071_v6, %v896_v32  ;;  %v906_v33 = vmul.f32 %v10075_v7, %v893_v24  ;;  %1114 = vmatpush1.bf16.msra.mxu0 %v1080_v16 }
 0x193   : > { %v1025_v42 = vrot.slane %v905_v58, 6  ;;  %v1026_v43 = vrot.slane %v906_v33, 6  ;;  %v851_v44 = vpop.permute.xlu1 %850  ;;  %v847_v45 = vpop.permute.xlu0 %846  ;;  %v8895_v58 = vld [vmem:[#allocation7 + $0x4] ss:$8 sps:$4 sm:$0xff]  }
 0x194   : > { %v853_v46 = vsel %vm852_vm12, %v851_v44, %v847_v45  ;;  %v856_v48 = vsel %vm852_vm12, %v847_v45, %v851_v44  ;;  %7820 = vmatprep.mubr.msk.bf16.mxu1 %vm14818_vm10, %v8895_v58 }
 0x195   : > { %v865_v51 = vmul.f32 %v10089_v57, %v856_v48  ;;  %v866_v30 = vmul.f32 %v10093_v38, %v853_v46  ;;  %v1064_v55 = vsel %vm1062_vm13, %v1020_v41, %v1026_v43  ;;  %v1063_v56 = vsel %vm1062_vm13, %v1019_v39, %v1025_v42 }
 0x196   : > { %v1067_v31 = vsel %vm1065_vm8, %v1064_v55, %v1032_v60  ;;  %v1066_v61 = vsel %vm1065_vm8, %v1063_v56, %v1031_v59 }
 0x197   : > { %v1061_v62 = vsel %vm1059_vm14, %v866_v30, %v1020_v41  ;;  %v1060_v2 = vsel %vm1059_vm14, %v865_v51, %v1019_v39 }
 0x198   : > { %v1079_v3 = vpack.c.bf16 %v1067_v31, %v1061_v62  ;;  %v1078_v10 = vpack.c.bf16 %v1066_v61, %v1060_v2 }
 0x19a   : > { %1115 = vmatprep.subr.bf16.mxu0 %v1079_v3 }
 0x19b   : > { %1116 = vmatpush1.bf16.msra.mxu0 %v1078_v10 }
 0x19e   : > { %7817 = vmatmul.mubr.msk.bf16.vlgmr.msra.gmra.mxu0 %vm1089_vm15, %v8892_v11 }
 0x25e   : > { %v1135_v13 = vpop.f32.mrf.mxu0 }
 0x25f   : > { %vm1144_vm0 = vcmp.gt.f32.partialorder %v1135_v13, 0.0  ;;  %v1148_v14 = vmul.f32 0.2, %v1135_v13 }
 0x260   : > { %v1137_v15 = vpop.f32.mrf.mxu0 }
 0x261   : > { %v10101_v16 = vsel %vm1144_vm0, %v1135_v13, %v1148_v14  ;;  %vm1145_vm5 = vcmp.gt.f32.partialorder %v1137_v15, 0.0  ;;  %v1149_v18 = vmul.f32 0.2, %v1137_v15 }
 0x262   : > { %1298 = vrot.lane.b32.xlu0 %v10101_v16, %s9497_s3  ;;  %v1139_v60 = vpop.f32.mrf.mxu0  ;;  %vm1541_vm14 = vcmp.eq.f32.partialorder %v10101_v16, 0.0 }
 0x263   : > { %v10105_v59 = vsel %vm1145_vm5, %v1137_v15, %v1149_v18  ;;  %v1150_v19 = vmul.f32 0.2, %v1139_v60  ;;  %vm1146_vm7 = vcmp.gt.f32.partialorder %v1139_v60, 0.0 }
 0x264   : > { %1300 = vrot.lane.b32.xlu1 %v10105_v59, %s9497_s3  ;;  %v1141_v26 = vpop.f32.mrf.mxu0  ;;  %vm1542_vm0 = vcmp.eq.f32.partialorder %v10105_v59, 0.0 }
 0x265   : > { %v10119_v20 = vsel %vm1146_vm7, %v1139_v60, %v1150_v19  ;;  %v1151_v24 = vmul.f32 0.2, %v1141_v26  ;;  %vm1147_vm8 = vcmp.gt.f32.partialorder %v1141_v26, 0.0 }
 0x266   : > { %1276 = vrot.lane.b32.xlu0 %v10101_v16, %s14821_s22  ;;  %vm1543_vm15 = vcmp.eq.f32.partialorder %v10119_v20, 0.0 }
 0x267   : > { %v10137_v32 = vsel %vm1147_vm8, %v1141_v26, %v1151_v24 }
 0x268   : > { %1278 = vrot.lane.b32.xlu1 %v10105_v59, %s14821_s22  ;;  %vm1544_vm7 = vcmp.eq.f32.partialorder %v10137_v32, 0.0 }
 0x26a   : > { %1254 = vrot.lane.b32.xlu0 %v10101_v16, %s14859_s19 }
 0x26c   : > { %1256 = vrot.lane.b32.xlu1 %v10105_v59, %s14859_s19 }
 0x26e   : > { %1234 = vrot.lane.b32.xlu0 %v10101_v16, %s14902_s5 }
 0x270   : > { %1236 = vrot.lane.b32.xlu1 %v10119_v20, %s14902_s5 }
 0x272   : > { %1212 = vrot.lane.b32.xlu0 %v10101_v16, %s14819_s10 }
 0x274   : > { %1214 = vrot.lane.b32.xlu1 %v10119_v20, %s14819_s10 }
 0x276   : > { %1228 = vrot.lane.b32.xlu0 %v10105_v59, %s14902_s5 }
 0x278   : > { %1192 = vrot.lane.b32.xlu1 %v10119_v20, %s9502_s7 }
 0x27a   : > { %1206 = vrot.lane.b32.xlu0 %v10105_v59, %s14819_s10 }
 0x27c   : > { %1170 = vrot.lane.b32.xlu1 %v10119_v20, %s9505_s16 }
 0x27e   : > { %1302 = vrot.lane.b32.xlu0 %v10119_v20, %s9497_s3 }
 0x280   : > { %1304 = vrot.lane.b32.xlu1 %v10137_v32, %s9497_s3 }
 0x282   : > { %1280 = vrot.lane.b32.xlu0 %v10119_v20, %s14821_s22 }
 0x284   : > { %1282 = vrot.lane.b32.xlu1 %v10137_v32, %s14821_s22  ;;  %s14853_s22 = smov 119  }
 0x286   : > { %1258 = vrot.lane.b32.xlu0 %v10119_v20, %s14859_s19 }
 0x288   : > { %1260 = vrot.lane.b32.xlu1 %v10137_v32, %s14859_s19 }
 0x28a   : > { %1184 = vrot.lane.b32.xlu0 %v10105_v59, %s9502_s7 }
 0x28c   : > { %1322 = vrot.lane.b32.xlu1 %v10105_v59, %s9499_s27 }
 0x28e   : > { %1190 = vrot.lane.b32.xlu0 %v10101_v16, %s9502_s7 }
 0x290   : > { %1230 = vrot.lane.b32.xlu1 %v10137_v32, %s14902_s5 }
 0x292   : > { %1160 = vrot.lane.b32.xlu0 %v10105_v59, %s9505_s16 }
 0x294   : > { %1208 = vrot.lane.b32.xlu1 %v10137_v32, %s14819_s10  ;;  %s9518_s10 = smov 57  }
 0x296   : > { %1168 = vrot.lane.b32.xlu0 %v10101_v16, %s9505_s16 }
 0x298   : > { %1186 = vrot.lane.b32.xlu1 %v10137_v32, %s9502_s7  ;;  %s9517_s7 = smov 121  }
 0x29a   : > { %1320 = vrot.lane.b32.xlu0 %v10101_v16, %s9499_s27 }
 0x29c   : > { %1162 = vrot.lane.b32.xlu1 %v10137_v32, %s9505_s16  ;;  %s14855_s16 = smov 72  }
 0x29e   : > { %1324 = vrot.lane.b32.xlu0 %v10119_v20, %s9499_s27 }
 0x2a0   : > { %1326 = vrot.lane.b32.xlu1 %v10137_v32, %s9499_s27  ;;  %s14837_s27 = smov 9  }
 0x2d4   : > { %v1299_v33 = vpop.permute.xlu0 %1298 }
 0x2d6   : > { %v1301_v39 = vpop.permute.xlu1 %1300 }
 0x2d7   : > { %v1306_v62 = vsel %vm14817_vm2, %v1299_v33, %v1301_v39  ;;  %v1314_v2 = vsel %vm14817_vm2, %v1301_v39, %v1299_v33 }
 0x2d8   : > { %v1277_v41 = vpop.permute.xlu0 %1276  ;;  %v1317_v14 = vmul.f32 %v1314_v2, %v9973_v35  ;;  %v1316_v18 = vmul.f32 %v1306_v62, %v9969_v34 }
 0x2da   : > { %v1279_v42 = vpop.permute.xlu1 %1278 }
 0x2db   : > { %v1284_v19 = vsel %vm961_vm3, %v1277_v41, %v1279_v42  ;;  %v1292_v26 = vsel %vm961_vm3, %v1279_v42, %v1277_v41 }
 0x2dc   : > { %v1255_v43 = vpop.permute.xlu0 %1254  ;;  %v1295_v2 = vmul.f32 %v1292_v26, %v9981_v37 }
 0x2de   : > { %v1257_v44 = vpop.permute.xlu1 %1256 }
 0x2df   : > { %v10206_v41 = vsel %vm941_vm6, %v1257_v44, %v1255_v43 }
 0x2e0   : > { %v1235_v45 = vpop.permute.xlu0 %1234 }
 0x2e2   : > { %v10174_v46 = vpop.permute.xlu1 %1236 }
 0x2e4   : > { %v10176_v48 = vpop.permute.xlu0 %1212 }
 0x2e6   : > { %v10178_v51 = vpop.permute.xlu1 %1214 }
 0x2e8   : > { %v1229_v30 = vpop.permute.xlu0 %1228 }
 0x2ea   : > { %v10180_v55 = vpop.permute.xlu1 %1192 }
 0x2ec   : > { %v10182_v56 = vpop.permute.xlu0 %1206 }
 0x2ee   : > { %v10184_v31 = vpop.permute.xlu1 %1170 }
 0x2f0   : > { %v1303_v61 = vpop.permute.xlu0 %1302 }
 0x2f2   : > { %v1305_v3 = vpop.permute.xlu1 %1304 }
 0x2f3   : > { %v1307_v10 = vsel %vm14817_vm2, %v1303_v61, %v1305_v3  ;;  %v1315_v11 = vsel %vm14817_vm2, %v1305_v3, %v1303_v61  ;;  %v1294_v3 = vmul.f32 %v1284_v19, %v9977_v36 }
 0x2f4   : > { %v1281_v13 = vpop.permute.xlu0 %1280  ;;  %v1319_v15 = vmul.f32 %v1315_v11, %v9973_v35  ;;  %v1318_v60 = vmul.f32 %v1307_v10, %v9969_v34  ;;  %v10203_v10 = vsel %vm941_vm6, %v1255_v43, %v1257_v44  ;;  %v1273_v43 = vmul.f32 %v10206_v41, %v10024_v63 }
 0x2f6   : > { %v1283_v24 = vpop.permute.xlu1 %1282  ;;  %v1357_v58 = vpack.c.bf16 %v1319_v15, %v1317_v14  ;;  %v1356_v33 = vpack.c.bf16 %v1318_v60, %v1316_v18 }
 0x2f7   : > { %v1285_v39 = vsel %vm961_vm3, %v1281_v13, %v1283_v24  ;;  %v1293_v61 = vsel %vm961_vm3, %v1283_v24, %v1281_v13 }
 0x2f8   : > { %v1296_v35 = vmul.f32 %v1285_v39, %v9977_v36  ;;  %v1297_v62 = vmul.f32 %v1293_v61, %v9981_v37  ;;  %v1259_v34 = vpop.permute.xlu0 %1258  ;;  %1372 = vmatprep.subr.bf16.mxu1 %v1357_v58  ;;  %v1253_v36 = vmul.f32 %v10137_v32, %v10012_v53  ;;  %v1272_v37 = vmul.f32 %v10203_v10, %v9985_v40 }
 0x2f9   : > { %1373 = vmatpush1.bf16.msra.mxu1 %v1356_v33  ;;  %v1251_v58 = vmul.f32 %v10105_v59, %v10012_v53  ;;  %v1252_v33 = vmul.f32 %v10119_v20, %v10016_v54 }
 0x2fa   : > { %v1261_v42 = vpop.permute.xlu1 %1260  ;;  %v1355_v11 = vpack.c.bf16 %v1297_v62, %v1295_v2  ;;  %v1354_v13 = vpack.c.bf16 %v1296_v35, %v1294_v3  ;;  %v1250_v3 = vmul.f32 %v10101_v16, %v10016_v54  ;;  %v1216_v54 = vsel %vm892_vm11, %v10176_v48, %v10182_v56 }
 0x2fb   : > { %v10209_v14 = vsel %vm941_vm6, %v1259_v34, %v1261_v42  ;;  %v10212_v15 = vsel %vm941_vm6, %v1261_v42, %v1259_v34  ;;  %v1351_v61 = vpack.c.bf16 %v1253_v36, %v1251_v58 }
 0x2fc   : > { %v1274_v44 = vmul.f32 %v10209_v14, %v9985_v40  ;;  %v1275_v18 = vmul.f32 %v10212_v15, %v10024_v63  ;;  %v1185_v60 = vpop.permute.xlu0 %1184  ;;  %1374 = vmatprep.subr.bf16.mxu1 %v1355_v11  ;;  %v1238_v40 = vsel %vm912_vm9, %v1235_v45, %v1229_v30  ;;  %v1244_v63 = vsel %vm912_vm9, %v1229_v30, %v1235_v45 }
 0x2fd   : > { %1375 = vmatpush1.bf16.msra.mxu1 %v1354_v13  ;;  %v1350_v62 = vpack.c.bf16 %v1252_v33, %v1250_v3  ;;  %v1246_v34 = vmul.f32 %v1244_v63, %v10042_v21  ;;  %v1247_v42 = vmul.f32 %v1238_v40, %v10046_v23  ;;  %v1222_v13 = vsel %vm892_vm11, %v10182_v56, %v10176_v48 }
 0x2fe   : > { %v10224_v19 = vpop.permute.xlu1 %1322  ;;  %v1353_v26 = vpack.c.bf16 %v1275_v18, %v1273_v43  ;;  %v1352_v24 = vpack.c.bf16 %v1274_v44, %v1272_v37  ;;  %v1225_v44 = vmul.f32 %v1216_v54, %v10075_v7 }
 0x300   : > { %v1191_v39 = vpop.permute.xlu0 %1190  ;;  %1376 = vmatprep.subr.bf16.mxu1 %v1353_v26 }
 0x301   : > { %1377 = vmatpush1.bf16.msra.mxu1 %v1352_v24  ;;  %v1194_v48 = vsel %vm14818_vm10, %v1191_v39, %v1185_v60  ;;  %v1200_v56 = vsel %vm14818_vm10, %v1185_v60, %v1191_v39 }
 0x302   : > { %v1231_v2 = vpop.permute.xlu1 %1230  ;;  %1378 = vmatprep.subr.bf16.mxu1 %v1351_v61 }
 0x303   : > { %v1239_v35 = vsel %vm912_vm9, %v10174_v46, %v1231_v2  ;;  %v1245_v53 = vsel %vm912_vm9, %v1231_v2, %v10174_v46 }
 0x304   : > { %v1248_v11 = vmul.f32 %v1245_v53, %v10042_v21  ;;  %v1249_v45 = vmul.f32 %v1239_v35, %v10046_v23  ;;  %v1161_v30 = vpop.permute.xlu0 %1160  ;;  %v1224_v23 = vmul.f32 %v1222_v13, %v10071_v6 }
 0x305   : > { %1379 = vmatpush1.bf16.msra.mxu1 %v1350_v62 }
 0x306   : > { %v1209_v46 = vpop.permute.xlu1 %1208  ;;  %v1349_v36 = vpack.c.bf16 %v1249_v45, %v1247_v42  ;;  %v1348_v37 = vpack.c.bf16 %v1248_v11, %v1246_v34 }
 0x307   : > { %v1217_v43 = vsel %vm892_vm11, %v10178_v51, %v1209_v46  ;;  %v1223_v21 = vsel %vm892_vm11, %v1209_v46, %v10178_v51 }
 0x308   : > { %v1226_v18 = vmul.f32 %v1223_v21, %v10071_v6  ;;  %v1227_v26 = vmul.f32 %v1217_v43, %v10075_v7  ;;  %v1169_v24 = vpop.permute.xlu0 %1168  ;;  %1380 = vmatprep.subr.bf16.mxu1 %v1349_v36  ;;  %v1202_v6 = vmul.f32 %v1200_v56, %v10059_v52  ;;  %v1203_v7 = vmul.f32 %v1194_v48, %v10065_v1 }
 0x309   : > { %1381 = vmatpush1.bf16.msra.mxu1 %v1348_v37  ;;  %v1172_v60 = vsel %vm852_vm12, %v1169_v24, %v1161_v30  ;;  %v1178_v39 = vsel %vm852_vm12, %v1161_v30, %v1169_v24 }
 0x30a   : > { %v1187_v58 = vpop.permute.xlu1 %1186  ;;  %v1347_v33 = vpack.c.bf16 %v1227_v26, %v1225_v44  ;;  %v1346_v61 = vpack.c.bf16 %v1226_v18, %v1224_v23  ;;  %v8893_v44 = vld [vmem:[#allocation7] ss:$8 sps:$4 sm:$0xff]   ;;  %v8896_v18 = vld [vmem:[%s14997_s15 + $0x78] sm:$0xff]  }
 0x30b   : > { %v1195_v51 = vsel %vm14818_vm10, %v10180_v55, %v1187_v58  ;;  %v1201_v40 = vsel %vm14818_vm10, %v1187_v58, %v10180_v55  ;;  %v8897_v26 = vld [vmem:[%s14997_s15 + $0x38] sm:$0xff]   ;;  %8004 = vmatprep.subr.bf16.mxu0 %v8896_v18  ;;  %v8900_v58 = vld [vmem:[%s14997_s15 + $0x68] sm:$0xff]   ;;  %v8911_v18 = vld [vmem:[%s14997_s15] sm:$0xff]  }
 0x30c   : > { %v1204_v63 = vmul.f32 %v1201_v40, %v10059_v52  ;;  %v1205_v3 = vmul.f32 %v1195_v51, %v10065_v1  ;;  %v1321_v2 = vpop.permute.xlu0 %1320  ;;  %1382 = vmatprep.subr.bf16.mxu1 %v1347_v33  ;;  %v1180_v52 = vmul.f32 %v1178_v39, %v10089_v57  ;;  %v1181_v1 = vmul.f32 %v1172_v60, %v10093_v38 }
 0x30d   : > { %1383 = vmatpush1.bf16.msra.mxu1 %v1346_v61  ;;  %v1328_v45 = vsel %vm1001_vm4, %v1321_v2, %v10224_v19  ;;  %v1336_v30 = vsel %vm1001_vm4, %v10224_v19, %v1321_v2  ;;  %8005 = vmatpush3.bf16.msra.mxu0 %v8897_v26  ;;  %v8901_v61 = vld [vmem:[%s14997_s15 + $0x28] sm:$0xff]   ;;  %v8902_v2 = vld [vmem:[%s14997_s15 + $0x60] sm:$0xff]   ;;  %v1549_v39 = vsub.f32 0.0, %v10101_v16 }
 0x30e   : > { %v1163_v35 = vpop.permute.xlu1 %1162  ;;  %v1345_v53 = vpack.c.bf16 %v1205_v3, %v1203_v7  ;;  %v1344_v62 = vpack.c.bf16 %v1204_v63, %v1202_v6 }
 0x30f   : > { %v1173_v55 = vsel %vm852_vm12, %v10184_v31, %v1163_v35  ;;  %v1179_v34 = vsel %vm852_vm12, %v1163_v35, %v10184_v31  ;;  %v8903_v35 = vld [vmem:[%s14997_s15 + $0x20] sm:$0xff]  }
 0x310   : > { %v1182_v42 = vmul.f32 %v1179_v34, %v10089_v57  ;;  %v1183_v11 = vmul.f32 %v1173_v55, %v10093_v38  ;;  %1384 = vmatprep.subr.bf16.mxu1 %v1345_v53  ;;  %v1325_v54 = vpop.permute.xlu0 %1324  ;;  %v1338_v57 = vmul.f32 %v10002_v49, %v1328_v45  ;;  %v1339_v38 = vmul.f32 %v10007_v50, %v1336_v30  ;;  %v8904_v34 = vld [vmem:[%s14997_s15 + $0x58] sm:$0xff]   ;;  %v8906_v45 = vld [vmem:[%s14997_s15 + $0x50] sm:$0xff]  }
 0x311   : > { %1385 = vmatpush1.bf16.msra.mxu1 %v1344_v62 }
 0x312   : > { %v1327_v13 = vpop.permute.xlu1 %1326  ;;  %v1343_v46 = vpack.c.bf16 %v1183_v11, %v1181_v1  ;;  %v1342_v31 = vpack.c.bf16 %v1182_v42, %v1180_v52  ;;  %v10328_v52 = vsel %vm1541_vm14, -999.0, %v1549_v39  ;;  %v1551_v1 = vsub.f32 0.0, %v10119_v20  ;;  %v8905_v11 = vld [vmem:[%s14997_s15 + $0x18] sm:$0xff]  }
 0x313   : > { %v1329_v36 = vsel %vm1001_vm4, %v1325_v54, %v1327_v13  ;;  %v1337_v37 = vsel %vm1001_vm4, %v1327_v13, %v1325_v54  ;;  %v1550_v42 = vsub.f32 0.0, %v10105_v59 }
 0x314   : > { %v1340_v43 = vmul.f32 %v10002_v49, %v1329_v36  ;;  %v1341_v21 = vmul.f32 %v10007_v50, %v1337_v37  ;;  %1386 = vmatprep.subr.bf16.mxu1 %v1343_v46  ;;  %v8898_v49 = vld [vmem:[%s14997_s15 + $0x70] sm:$0xff]   ;;  %v10343_v30 = vsel %vm1543_vm15, -999.0, %v1551_v1  ;;  %v1552_v46 = vsub.f32 0.0, %v10137_v32  ;;  %v8908_v36 = vld [vmem:[%s14997_s15 + $0x48] sm:$0xff]  }
 0x315   : > { %1387 = vmatpush1.bf16.msra.mxu1 %v1342_v31  ;;  %v8899_v50 = vld [vmem:[%s14997_s15 + $0x30] sm:$0xff]   ;;  %8006 = vmatprep.subr.bf16.mxu0 %v8898_v49  ;;  %v10345_v54 = vsel %vm1542_vm0, -999.0, %v1550_v42 }
 0x316   : > { %v1359_v19 = vpack.c.bf16 %v1341_v21, %v1339_v38  ;;  %v1358_v23 = vpack.c.bf16 %v1340_v43, %v1338_v57  ;;  %8007 = vmatpush3.bf16.msra.mxu0 %v8899_v50  ;;  %v8907_v31 = vld [vmem:[%s14997_s15 + $0x10] sm:$0xff]   ;;  %v10363_v57 = vsel %vm1544_vm7, -999.0, %v1552_v46  ;;  %v8909_v21 = vld [vmem:[%s14997_s15 + $0x8] sm:$0xff]  }
 0x317   : > { %8008 = vmatprep.subr.bf16.mxu0 %v8900_v58 }
 0x318   : > { %1402 = vmatprep.subr.bf16.mxu1 %v1359_v19  ;;  %v10378_v19 = vmax.f32 %v10101_v16, %v10203_v10  ;;  %v10399_v16 = vmax.f32 %v10119_v20, %v10209_v14 }
 0x319   : > { %1403 = vmatpush2.bf16.msra.mxu1 %v1358_v23  ;;  %v10382_v23 = vmax.f32 %v10105_v59, %v10206_v41  ;;  %v10403_v59 = vmax.f32 %v10137_v32, %v10212_v15 }
 0x31a   : > { %8009 = vmatpush3.bf16.msra.mxu0 %v8901_v61 }
 0x31b   : > { %8010 = vmatprep.subr.bf16.mxu0 %v8902_v2  ;;  %v8811_v10 = vpack.i.bf16 %v10382_v23, %v10378_v19 }
 0x31c   : > { %1405 = vmatmul.mubr.bf16.vlgmr.msra.gmra.mxu1 %v8893_v44  ;;  %v8910_v44 = vld [vmem:[%s14997_s15 + $0x40] sm:$0xff]   ;;  %s15529_s15 = smov 115  }
 0x31e   : > { %8011 = vmatpush3.bf16.msra.mxu0 %v8903_v35 }
 0x31f   : > { %8012 = vmatprep.subr.bf16.mxu0 %v8904_v34 }
 0x322   : > { %8013 = vmatpush3.bf16.msra.mxu0 %v8905_v11 }
 0x323   : > { %8014 = vmatprep.subr.bf16.mxu0 %v8906_v45 }
 0x326   : > { %8015 = vmatpush3.bf16.msra.mxu0 %v8907_v31 }
 0x327   : > { %8016 = vmatprep.subr.bf16.mxu0 %v8908_v36 }
 0x32a   : > { %8017 = vmatpush3.bf16.msra.mxu0 %v8909_v21 }
 0x32b   : > { %8018 = vmatprep.subr.bf16.mxu0 %v8910_v44 }
 0x32e   : > { %8019 = vmatpush3.bf16.msra.mxu0 %v8911_v18 }
 0x3dc   : > { %v1406_v24 = vpop.f32.mrf.mxu1 }
 0x3dd   : > { %v1419_v48 = vmul.f32 0.2, %v1406_v24  ;;  %vm1415_vm3 = vcmp.gt.f32.partialorder %v1406_v24, 0.0 }
 0x3de   : > { %v1408_v56 = vpop.f32.mrf.mxu1 }
 0x3df   : > { %vm1416_vm4 = vcmp.gt.f32.partialorder %v1408_v56, 0.0  ;;  %v1420_v33 = vmul.f32 0.2, %v1408_v56  ;;  %v10304_v40 = vsel %vm1415_vm3, %v1406_v24, %v1419_v48  ;;  %v8816_v24 = vpack.i.bf16 %v10403_v59, %v10399_v16 }
 0x3e0   : > { %v1410_v51 = vpop.f32.mrf.mxu1  ;;  %14998 = vst [vmem:[#allocation38_spill] sm:$0xff] %v10304_v40  ;;  %v1553_v13 = vsub.f32 0.0, %v10304_v40  ;;  %vm1545_vm5 = vcmp.eq.f32.partialorder %v10304_v40, 0.0 }
 0x3e1   : > { %v10306_v6 = vsel %vm1416_vm4, %v1408_v56, %v1420_v33  ;;  %v1421_v7 = vmul.f32 0.2, %v1410_v51  ;;  %vm1417_vm12 = vcmp.gt.f32.partialorder %v1410_v51, 0.0 }
 0x3e2   : > { %14999 = vst [vmem:[#allocation39_spill] sm:$0xff] %v10306_v6  ;;  %v1412_v63 = vpop.f32.mrf.mxu1  ;;  %v8801_v3 = vpack.i.bf16 %v10306_v6, %v10304_v40  ;;  %v10361_v37 = vsel %vm1545_vm5, -999.0, %v1553_v13  ;;  %v1554_v43 = vsub.f32 0.0, %v10306_v6  ;;  %vm1546_vm3 = vcmp.eq.f32.partialorder %v10306_v6, 0.0 }
 0x3e3   : > { %vm1418_vm13 = vcmp.gt.f32.partialorder %v1412_v63, 0.0  ;;  %v1422_v60 = vmul.f32 0.2, %v1412_v63  ;;  %v10319_v53 = vsel %vm1417_vm12, %v1410_v51, %v1421_v7 }
 0x3e4   : > { %8802 = vrot.lane.b32.xlu0 %v8801_v3, %s14859_s19  ;;  %15000 = vst [vmem:[#allocation40_spill] sm:$0xff] %v10319_v53  ;;  %v1555_v38 = vsub.f32 0.0, %v10319_v53  ;;  %vm1547_vm8 = vcmp.eq.f32.partialorder %v10319_v53, 0.0  ;;  %v1562_v49 = vsel %vm1546_vm3, -999.0, %v1554_v43 }
 0x3e5   : > { %v10321_v62 = vsel %vm1418_vm13, %v1412_v63, %v1422_v60 }
 0x3e6   : > { %15001 = vst [vmem:[#allocation41_spill] sm:$0xff] %v10321_v62  ;;  %v8806_v55 = vpack.i.bf16 %v10321_v62, %v10319_v53  ;;  %v10390_v26 = vsel %vm1547_vm8, -999.0, %v1555_v38  ;;  %v1556_v50 = vsub.f32 0.0, %v10321_v62  ;;  %vm1548_vm4 = vcmp.eq.f32.partialorder %v10321_v62, 0.0 }
 0x3e8   : > { %1573 = vrot.lane.b32.xlu0 %v10328_v52, %s14859_s19  ;;  %8807 = vrot.lane.b32.xlu1 %v8806_v55, %s14859_s19  ;;  %v1564_v41 = vsel %vm1548_vm4, -999.0, %v1556_v50 }
 0x3ec   : > { %1577 = vrot.lane.b32.xlu0 %v10343_v30, %s14859_s19  ;;  %1575 = vrot.lane.b32.xlu1 %v10345_v54, %s14859_s19 }
 0x3f0   : > { %1581 = vrot.lane.b32.xlu0 %v10361_v37, %s14859_s19  ;;  %1579 = vrot.lane.b32.xlu1 %v10363_v57, %s14859_s19 }
 0x3f4   : > { %1585 = vrot.lane.b32.xlu0 %v10390_v26, %s14859_s19  ;;  %1583 = vrot.lane.b32.xlu1 %v1562_v49, %s14859_s19 }
 0x3f8   : > { %8812 = vrot.lane.b32.xlu0 %v8811_v10, %s9497_s3  ;;  %1587 = vrot.lane.b32.xlu1 %v1564_v41, %s14859_s19 }
 0x3fc   : > { %8817 = vrot.lane.b32.xlu1 %v8816_v24, %s9497_s3 }
 0x456   : > { %v8803_v20 = vpop.permute.xlu0 %8802 }
 0x457   : > { %v8805_v14 = vunpack.i.h.bf16 %v8803_v20  ;;  %v8804_v48 = vunpack.i.l.bf16 %v8803_v20 }
 0x459   : > { %v1471_v32 = vsel %vm941_vm6, %v8804_v48, %v8805_v14  ;;  %v1479_v15 = vsel %vm941_vm6, %v8805_v14, %v8804_v48 }
 0x45a   : > { %v1574_v56 = vpop.permute.xlu0 %1573  ;;  %v8808_v58 = vpop.permute.xlu1 %8807  ;;  %v10415_v33 = vmax.f32 %v10304_v40, %v1471_v32  ;;  %v10418_v61 = vmax.f32 %v10306_v6, %v1479_v15 }
 0x45b   : > { %v8810_v51 = vunpack.i.h.bf16 %v8808_v58  ;;  %v8809_v7 = vunpack.i.l.bf16 %v8808_v58 }
 0x45c   : > { %v8821_v63 = vpack.i.bf16 %v10418_v61, %v10415_v33 }
 0x45d   : > { %v1472_v3 = vsel %vm941_vm6, %v8809_v7, %v8810_v51  ;;  %v1480_v2 = vsel %vm941_vm6, %v8810_v51, %v8809_v7 }
 0x45e   : > { %v1578_v60 = vpop.permute.xlu0 %1577  ;;  %8822 = vrot.lane.b32.xlu0 %v8821_v63, %s9497_s3  ;;  %v1576_v39 = vpop.permute.xlu1 %1575  ;;  %v10426_v35 = vmax.f32 %v10319_v53, %v1472_v3  ;;  %v10429_v55 = vmax.f32 %v10321_v62, %v1480_v2 }
 0x45f   : > { %v1589_v34 = vsel %vm941_vm6, %v1574_v56, %v1576_v39  ;;  %v1605_v11 = vsel %vm941_vm6, %v1576_v39, %v1574_v56 }
 0x460   : > { %v10433_v1 = vmax.f32 %v10328_v52, %v1589_v34  ;;  %v8826_v42 = vpack.i.bf16 %v10429_v55, %v10426_v35  ;;  %v10446_v52 = vmax.f32 %v10345_v54, %v1605_v11 }
 0x462   : > { %v1582_v45 = vpop.permute.xlu0 %1581  ;;  %1625 = vrot.lane.b32.xlu0 %v10433_v1, %s9497_s3  ;;  %v1580_v13 = vpop.permute.xlu1 %1579  ;;  %8827 = vrot.lane.b32.xlu1 %v8826_v42, %s9497_s3 }
 0x463   : > { %v1590_v46 = vsel %vm941_vm6, %v1578_v60, %v1580_v13  ;;  %v1606_v36 = vsel %vm941_vm6, %v1580_v13, %v1578_v60 }
 0x464   : > { %v10443_v31 = vmax.f32 %v10343_v30, %v1590_v46  ;;  %v10458_v30 = vmax.f32 %v10363_v57, %v1606_v36 }
 0x466   : > { %v1586_v38 = vpop.permute.xlu0 %1585  ;;  %1629 = vrot.lane.b32.xlu0 %v10443_v31, %s9497_s3  ;;  %v1584_v43 = vpop.permute.xlu1 %1583  ;;  %1627 = vrot.lane.b32.xlu1 %v10446_v52, %s9497_s3 }
 0x467   : > { %v1591_v21 = vsel %vm941_vm6, %v1582_v45, %v1584_v43  ;;  %v1607_v54 = vsel %vm941_vm6, %v1584_v43, %v1582_v45 }
 0x468   : > { %v10455_v44 = vmax.f32 %v10361_v37, %v1591_v21  ;;  %v10466_v14 = vmax.f32 %v1562_v49, %v1607_v54 }
 0x46a   : > { %v8813_v18 = vpop.permute.xlu0 %8812  ;;  %1633 = vrot.lane.b32.xlu0 %v10455_v44, %s9497_s3  ;;  %1631 = vrot.lane.b32.xlu1 %v10458_v30, %s9497_s3  ;;  %v1588_v50 = vpop.permute.xlu1 %1587 }
 0x46b   : > { %v8815_v10 = vunpack.i.h.bf16 %v8813_v18  ;;  %v8814_v24 = vunpack.i.l.bf16 %v8813_v18  ;;  %v1592_v20 = vsel %vm941_vm6, %v1586_v38, %v1588_v50  ;;  %v1608_v57 = vsel %vm941_vm6, %v1588_v50, %v1586_v38 }
 0x46c   : > { %v10469_v37 = vmax.f32 %v10390_v26, %v1592_v20  ;;  %v10478_v49 = vmax.f32 %v1564_v41, %v1608_v57 }
 0x46d   : > { %v1513_v32 = vsel %vm14817_vm2, %v8814_v24, %v8815_v10  ;;  %v1529_v58 = vsel %vm14817_vm2, %v8815_v10, %v8814_v24 }
 0x46e   : > { %1635 = vrot.lane.b32.xlu1 %v10466_v14, %s9497_s3  ;;  %1637 = vrot.lane.b32.xlu0 %v10469_v37, %s9497_s3  ;;  %v8818_v48 = vpop.permute.xlu1 %8817  ;;  %v1533_v7 = vmax.f32 %v10378_v19, %v1513_v32  ;;  %v1534_v3 = vmax.f32 %v10382_v23, %v1529_v58 }
 0x46f   : > { %v8820_v15 = vunpack.i.h.bf16 %v8818_v48  ;;  %v8819_v56 = vunpack.i.l.bf16 %v8818_v48 }
 0x471   : > { %v1514_v26 = vsel %vm14817_vm2, %v8819_v56, %v8820_v15  ;;  %v1530_v51 = vsel %vm14817_vm2, %v8820_v15, %v8819_v56 }
 0x472   : > { %v1535_v63 = vmax.f32 %v10399_v16, %v1514_v26  ;;  %1639 = vrot.lane.b32.xlu1 %v10478_v49, %s9497_s3  ;;  %v1536_v2 = vmax.f32 %v10403_v59, %v1530_v51  ;;  %s9507_s3 = smov 65  }
 0x474   : > { %v1694_v60 = vpack.c.bf16 %v1536_v2, %v1534_v3  ;;  %v1693_v39 = vpack.c.bf16 %v1535_v63, %v1533_v7 }
 0x476   : > { %1829 = vmatprep.mubr.bf16.mxu0 %v1694_v60 }
 0x477   : > { %1830 = vmatmul.mubr.bf16.vlgmr.msra.gmra.mxu0 %v1693_v39 }
 0x4d0   : > { %v8823_v41 = vpop.permute.xlu0 %8822 }
 0x4d1   : > { %v8825_v34 = vunpack.i.h.bf16 %v8823_v41  ;;  %v8824_v42 = vunpack.i.l.bf16 %v8823_v41 }
 0x4d3   : > { %v1531_v16 = vsel %vm14817_vm2, %v8825_v34, %v8824_v42  ;;  %v1515_v46 = vsel %vm14817_vm2, %v8824_v42, %v8825_v34 }
 0x4d4   : > { %v1626_v11 = vpop.permute.xlu0 %1625  ;;  %v8828_v45 = vpop.permute.xlu1 %8827  ;;  %v1538_v43 = vmax.f32 %v10418_v61, %v1531_v16  ;;  %v1537_v54 = vmax.f32 %v10415_v33, %v1515_v46 }
 0x4d5   : > { %v8830_v13 = vunpack.i.h.bf16 %v8828_v45  ;;  %v8829_v19 = vunpack.i.l.bf16 %v8828_v45 }
 0x4d7   : > { %v1532_v36 = vsel %vm14817_vm2, %v8830_v13, %v8829_v19  ;;  %v1516_v23 = vsel %vm14817_vm2, %v8829_v19, %v8830_v13 }
 0x4d8   : > { %v1630_v59 = vpop.permute.xlu0 %1629  ;;  %v1628_v38 = vpop.permute.xlu1 %1627  ;;  %v1540_v21 = vmax.f32 %v10429_v55, %v1532_v36  ;;  %v1539_v18 = vmax.f32 %v10426_v35, %v1516_v23 }
 0x4d9   : > { %v1641_v50 = vsel %vm14817_vm2, %v1626_v11, %v1628_v38  ;;  %v1657_v10 = vsel %vm14817_vm2, %v1628_v38, %v1626_v11 }
 0x4da   : > { %v1661_v24 = vmax.f32 %v10433_v1, %v1641_v50  ;;  %v1662_v20 = vmax.f32 %v10446_v52, %v1657_v10  ;;  %v1696_v57 = vpack.c.bf16 %v1540_v21, %v1538_v43  ;;  %v1695_v48 = vpack.c.bf16 %v1539_v18, %v1537_v54 }
 0x4dc   : > { %v1669_v32 = vsub.f32 0.0, %v1661_v24  ;;  %v1670_v15 = vsub.f32 0.0, %v1662_v20  ;;  %v1632_v56 = vpop.permute.xlu1 %1631  ;;  %1837 = vmatprep.mubr.bf16.mxu0 %v1696_v57  ;;  %v1634_v35 = vpop.permute.xlu0 %1633 }
 0x4dd   : > { %v1642_v61 = vsel %vm14817_vm2, %v1630_v59, %v1632_v56  ;;  %v1658_v33 = vsel %vm14817_vm2, %v1632_v56, %v1630_v59  ;;  %1838 = vmatmul.mubr.bf16.gmra.mxu0 %v1695_v48 }
 0x4de   : > { %v1663_v55 = vmax.f32 %v10443_v31, %v1642_v61  ;;  %v1664_v58 = vmax.f32 %v10458_v30, %v1658_v33  ;;  %vm1678_vm6 = vcmp.eq.f32.partialorder %v1670_v15, 999.0  ;;  %vm1677_vm12 = vcmp.eq.f32.partialorder %v1669_v32, 999.0 }
 0x4df   : > { %vm10508_vm13 = vmneg %vm1678_vm6 }
 0x4e0   : > { %v1671_v1 = vsub.f32 0.0, %v1663_v55  ;;  %v1672_v26 = vsub.f32 0.0, %v1664_v58  ;;  %v1636_v52 = vpop.permute.xlu1 %1635  ;;  %vm10512_vm0 = vmneg %vm1677_vm12  ;;  %v1638_v30 = vpop.permute.xlu0 %1637 }
 0x4e1   : > { %v1643_v51 = vsel %vm14817_vm2, %v1634_v35, %v1636_v52  ;;  %v1659_v7 = vsel %vm14817_vm2, %v1636_v52, %v1634_v35 }
 0x4e2   : > { %v7840_v63 = vpack.c.bf16 %v1672_v26, %v1670_v15  ;;  %v1665_v3 = vmax.f32 %v10455_v44, %v1643_v51  ;;  %v1666_v2 = vmax.f32 %v10466_v14, %v1659_v7  ;;  %vm1680_vm14 = vcmp.eq.f32.partialorder %v1672_v26, 999.0 }
 0x4e3   : > { %vm1679_vm15 = vcmp.eq.f32.partialorder %v1671_v1, 999.0  ;;  %vm7837_vm5 = vmneg %vm1680_vm14  ;;  %v7845_v14 = vpack.c.bf16 %v1671_v1, %v1669_v32 }
 0x4e4   : > { %v1673_v39 = vsub.f32 0.0, %v1665_v3  ;;  %v1674_v41 = vsub.f32 0.0, %v1666_v2  ;;  %v1640_v34 = vpop.permute.xlu1 %1639  ;;  %vm7839_vm7 = vmpackc.low %vm7837_vm5, %vm10508_vm13 }
 0x4e5   : > { %v1644_v42 = vsel %vm14817_vm2, %v1638_v30, %v1640_v34  ;;  %v1660_v44 = vsel %vm14817_vm2, %v1640_v34, %v1638_v30  ;;  %7841 = vmatprep.mubr.msk.bf16.mxu0 %vm7839_vm7, %v7840_v63  ;;  %vm7842_vm8 = vmneg %vm1679_vm15  ;;  %vm2068_vm15 = vcmask 56320  }
 0x4e6   : > { %v1667_v11 = vmax.f32 %v10469_v37, %v1644_v42  ;;  %v1668_v45 = vmax.f32 %v10478_v49, %v1660_v44  ;;  %vm1682_vm3 = vcmp.eq.f32.partialorder %v1674_v41, 999.0  ;;  %vm7844_vm4 = vmpackc.low %vm7842_vm8, %vm10512_vm0  ;;  %vm1681_vm6 = vcmp.eq.f32.partialorder %v1673_v39, 999.0 }
 0x4e7   : > { %7846 = vmatmul.mubr.msk.bf16.gmra.mxu0 %vm7844_vm4, %v7845_v14  ;;  %vm7848_vm12 = vmneg %vm1682_vm3  ;;  %vm1930_vm0 = vcmask 72704   ;;  %vm2286_vm8 = vcmask 465920   ;;  %vm2424_vm3 = vcmask 449536   ;;  %vm2531_vm4 = vcmask 523264  }
 0x4e8   : > { %v1675_v13 = vsub.f32 0.0, %v1667_v11  ;;  %v1676_v19 = vsub.f32 0.0, %v1668_v45  ;;  %vm7853_vm13 = vmneg %vm1681_vm6 }
 0x4ea   : > { %v7850_v16 = vpack.c.bf16 %v1676_v19, %v1674_v41  ;;  %vm1684_vm14 = vcmp.eq.f32.partialorder %v1676_v19, 999.0  ;;  %vm1683_vm1 = vcmp.eq.f32.partialorder %v1675_v13, 999.0  ;;  %v7855_v37 = vpack.c.bf16 %v1675_v13, %v1673_v39 }
 0x4eb   : > { %vm7847_vm5 = vmneg %vm1684_vm14 }
 0x4ec   : > { %vm7849_vm2 = vmpackc.low %vm7847_vm5, %vm7848_vm12  ;;  %vm3017_vm5 = vcmask 261120  }
 0x4ed   : > { %7851 = vmatprep.mubr.msk.bf16.mxu0 %vm7849_vm2, %v7850_v16  ;;  %vm7852_vm10 = vmneg %vm1683_vm1  ;;  %vm1999_vm1 = vcmask 64512   ;;  %vm2355_vm2 = vcmask 457728  }
 0x4ee   : > { %vm7854_vm7 = vmpackc.low %vm7852_vm10, %vm7853_vm13  ;;  %vm2217_vm10 = vcmask 515072  }
 0x4ef   : > { %7856 = vmatmul.mubr.msk.bf16.gmra.mxu0 %vm7854_vm7, %v7855_v37 }
 0x537   : > { %v8020_v49 = vpop.f32.mrf.mxu0 }
 0x539   : > { %v8021_v46 = vpop.f32.mrf.mxu0 }
 0x53a   : > { %v10524_v36 = vadd.f32 %v8021_v46, %v8020_v49 }
 0x53b   : > { %v8023_v23 = vpop.f32.mrf.mxu0 }
 0x53c   : > { %15006 = vst [vmem:[#allocation42_spill] sm:$0xff] %v10524_v36  ;;  %2089 = vrot.lane.b32.xlu0 %v10524_v36, %s9507_s3 }
 0x53d   : > { %v8024_v59 = vpop.f32.mrf.mxu0 }
 0x53e   : > { %v10528_v38 = vadd.f32 %v8024_v59, %v8023_v23 }
 0x540   : > { %15007 = vst [vmem:[#allocation43_spill] sm:$0xff] %v10528_v38  ;;  %2091 = vrot.lane.b32.xlu1 %v10528_v38, %s9507_s3  ;;  %2113 = vrot.lane.b32.xlu0 %v10524_v36, %s14902_s5 }
 0x544   : > { %2115 = vrot.lane.b32.xlu1 %v10528_v38, %s14902_s5  ;;  %1951 = vrot.lane.b32.xlu0 %v10524_v36, %s14855_s16 }
 0x548   : > { %1953 = vrot.lane.b32.xlu1 %v10528_v38, %s14855_s16  ;;  %1975 = vrot.lane.b32.xlu0 %v10524_v36, %s14835_s6 }
 0x54c   : > { %1977 = vrot.lane.b32.xlu1 %v10528_v38, %s14835_s6  ;;  %2307 = vrot.lane.b32.xlu0 %v10524_v36, %s14863_s8 }
 0x550   : > { %2309 = vrot.lane.b32.xlu1 %v10528_v38, %s14863_s8  ;;  %2331 = vrot.lane.b32.xlu0 %v10524_v36, %s14861_s13 }
 0x554   : > { %2333 = vrot.lane.b32.xlu1 %v10528_v38, %s14861_s13  ;;  %2169 = vrot.lane.b32.xlu0 %v10524_v36, %s14859_s19 }
 0x558   : > { %2171 = vrot.lane.b32.xlu1 %v10528_v38, %s14859_s19  ;;  %2193 = vrot.lane.b32.xlu0 %v10524_v36, %s14857_s23 }
 0x55c   : > { %2195 = vrot.lane.b32.xlu1 %v10528_v38, %s14857_s23  ;;  %2020 = vrot.lane.b32.xlu0 %v10524_v36, %s9513_s26 }
 0x560   : > { %2022 = vrot.lane.b32.xlu1 %v10528_v38, %s9513_s26  ;;  %2044 = vrot.lane.b32.xlu0 %v10524_v36, %s9514_s1 }
 0x564   : > { %2046 = vrot.lane.b32.xlu1 %v10528_v38, %s9514_s1  ;;  %1882 = vrot.lane.b32.xlu0 %v10524_v36, %s14833_s11 }
 0x568   : > { %1884 = vrot.lane.b32.xlu1 %v10528_v38, %s14833_s11  ;;  %1906 = vrot.lane.b32.xlu0 %v10524_v36, %s14837_s27 }
 0x56c   : > { %1908 = vrot.lane.b32.xlu1 %v10528_v38, %s14837_s27  ;;  %2238 = vrot.lane.b32.xlu0 %v10524_v36, %s9517_s7 }
 0x570   : > { %2240 = vrot.lane.b32.xlu1 %v10528_v38, %s9517_s7  ;;  %2262 = vrot.lane.b32.xlu0 %v10524_v36, %s9518_s10 }
 0x574   : > { %2264 = vrot.lane.b32.xlu1 %v10528_v38, %s9518_s10 }
 0x59d   : > { %v8026_v43 = vpop.f32.mrf.mxu0 }
 0x59f   : > { %v8027_v21 = vpop.f32.mrf.mxu0 }
 0x5a0   : > { %v10584_v54 = vadd.f32 %v8027_v21, %v8026_v43 }
 0x5a1   : > { %v8029_v18 = vpop.f32.mrf.mxu0 }
 0x5a2   : > { %15008 = vst [vmem:[#allocation44_spill] sm:$0xff] %v10584_v54  ;;  %2093 = vrot.lane.b32.xlu0 %v10584_v54, %s9507_s3 }
 0x5a3   : > { %v8030_v50 = vpop.f32.mrf.mxu0 }
 0x5a4   : > { %v10588_v10 = vadd.f32 %v8030_v50, %v8029_v18 }
 0x5a6   : > { %15009 = vst [vmem:[#allocation45_spill] sm:$0xff] %v10588_v10  ;;  %2095 = vrot.lane.b32.xlu1 %v10588_v10, %s9507_s3  ;;  %2117 = vrot.lane.b32.xlu0 %v10584_v54, %s14902_s5 }
 0x5a7   : > { %v8032_v32 = vpop.f32.mrf.mxu0 }
 0x5a9   : > { %v8033_v56 = vpop.f32.mrf.mxu0 }
 0x5aa   : > { %2119 = vrot.lane.b32.xlu1 %v10588_v10, %s14902_s5  ;;  %1955 = vrot.lane.b32.xlu0 %v10584_v54, %s14855_s16  ;;  %v10656_v55 = vadd.f32 %v8033_v56, %v8032_v32 }
 0x5ab   : > { %v8035_v35 = vpop.f32.mrf.mxu0 }
 0x5ac   : > { %15010 = vst [vmem:[#allocation46_spill] sm:$0xff] %v10656_v55 }
 0x5ad   : > { %v8036_v1 = vpop.f32.mrf.mxu0 }
 0x5ae   : > { %1957 = vrot.lane.b32.xlu1 %v10588_v10, %s14855_s16  ;;  %1979 = vrot.lane.b32.xlu0 %v10584_v54, %s14835_s6  ;;  %v10618_v24 = vpop.permute.xlu0 %2089  ;;  %v10666_v52 = vadd.f32 %v8036_v1, %v8035_v35 }
 0x5af   : > { %v8038_v45 = vpop.f32.mrf.mxu0 }
 0x5b0   : > { %15011 = vst [vmem:[#allocation47_spill] sm:$0xff] %v10666_v52 }
 0x5b1   : > { %v8039_v19 = vpop.f32.mrf.mxu0 }
 0x5b2   : > { %1981 = vrot.lane.b32.xlu1 %v10588_v10, %s14835_s6  ;;  %2311 = vrot.lane.b32.xlu0 %v10584_v54, %s14863_s8  ;;  %v10624_v20 = vpop.permute.xlu1 %2091  ;;  %v10630_v57 = vpop.permute.xlu0 %2113  ;;  %v10760_v46 = vadd.f32 %v8039_v19, %v8038_v45 }
 0x5b3   : > { %v8041_v49 = vpop.f32.mrf.mxu0 }
 0x5b4   : > { %15027 = vst [vmem:[#allocation63_spill] sm:$0xff] %v10760_v46 }
 0x5b5   : > { %v8042_v43 = vpop.f32.mrf.mxu0 }
 0x5b6   : > { %2313 = vrot.lane.b32.xlu1 %v10588_v10, %s14863_s8  ;;  %2335 = vrot.lane.b32.xlu0 %v10584_v54, %s14861_s13  ;;  %v10636_v48 = vpop.permute.xlu1 %2115  ;;  %v10638_v15 = vpop.permute.xlu0 %1951  ;;  %v10770_v21 = vadd.f32 %v8042_v43, %v8041_v49 }
 0x5b8   : > { %15029 = vst [vmem:[#allocation65_spill] sm:$0xff] %v10770_v21 }
 0x5ba   : > { %2337 = vrot.lane.b32.xlu1 %v10588_v10, %s14861_s13  ;;  %2173 = vrot.lane.b32.xlu0 %v10584_v54, %s14859_s19  ;;  %v10644_v61 = vpop.permute.xlu1 %1953  ;;  %v10650_v33 = vpop.permute.xlu0 %1975 }
 0x5be   : > { %2175 = vrot.lane.b32.xlu1 %v10588_v10, %s14859_s19  ;;  %2197 = vrot.lane.b32.xlu0 %v10584_v54, %s14857_s23  ;;  %v10658_v58 = vpop.permute.xlu1 %1977  ;;  %v10660_v26 = vpop.permute.xlu0 %2307 }
 0x5c2   : > { %2199 = vrot.lane.b32.xlu1 %v10588_v10, %s14857_s23  ;;  %2024 = vrot.lane.b32.xlu0 %v10584_v54, %s9513_s26  ;;  %v10668_v51 = vpop.permute.xlu1 %2309  ;;  %v10674_v7 = vpop.permute.xlu0 %2331 }
 0x5c6   : > { %2026 = vrot.lane.b32.xlu1 %v10588_v10, %s9513_s26  ;;  %2048 = vrot.lane.b32.xlu0 %v10584_v54, %s9514_s1  ;;  %v10680_v63 = vpop.permute.xlu1 %2333  ;;  %v10682_v3 = vpop.permute.xlu0 %2169 }
 0x5c7   : > { %15012 = vst [vmem:[#allocation48_spill] sm:$0xff] %v10682_v3 }
 0x5ca   : > { %2050 = vrot.lane.b32.xlu1 %v10588_v10, %s9514_s1  ;;  %1886 = vrot.lane.b32.xlu0 %v10584_v54, %s14833_s11  ;;  %v10688_v2 = vpop.permute.xlu1 %2171  ;;  %v10694_v60 = vpop.permute.xlu0 %2193 }
 0x5cb   : > { %15013 = vst [vmem:[#allocation49_spill] sm:$0xff] %v10688_v2  ;;  %15014 = vst [vmem:[#allocation50_spill] sm:$0xff] %v10694_v60 }
 0x5ce   : > { %1888 = vrot.lane.b32.xlu1 %v10588_v10, %s14833_s11  ;;  %1910 = vrot.lane.b32.xlu0 %v10584_v54, %s14837_s27  ;;  %v10700_v31 = vpop.permute.xlu1 %2195  ;;  %v10702_v30 = vpop.permute.xlu0 %2020 }
 0x5cf   : > { %15015 = vst [vmem:[#allocation51_spill] sm:$0xff] %v10700_v31  ;;  %15016 = vst [vmem:[#allocation52_spill] sm:$0xff] %v10702_v30 }
 0x5d2   : > { %1912 = vrot.lane.b32.xlu1 %v10588_v10, %s14837_s27  ;;  %2242 = vrot.lane.b32.xlu0 %v10584_v54, %s9517_s7  ;;  %v10708_v39 = vpop.permute.xlu1 %2022  ;;  %v10714_v41 = vpop.permute.xlu0 %2044 }
 0x5d3   : > { %15017 = vst [vmem:[#allocation53_spill] sm:$0xff] %v10708_v39  ;;  %15018 = vst [vmem:[#allocation54_spill] sm:$0xff] %v10714_v41 }
 0x5d6   : > { %2244 = vrot.lane.b32.xlu1 %v10588_v10, %s9517_s7  ;;  %2266 = vrot.lane.b32.xlu0 %v10584_v54, %s9518_s10  ;;  %v10720_v34 = vpop.permute.xlu1 %2046  ;;  %v10722_v42 = vpop.permute.xlu0 %1882 }
 0x5d7   : > { %15019 = vst [vmem:[#allocation55_spill] sm:$0xff] %v10720_v34  ;;  %15020 = vst [vmem:[#allocation56_spill] sm:$0xff] %v10722_v42 }
 0x5da   : > { %2268 = vrot.lane.b32.xlu1 %v10588_v10, %s9518_s10  ;;  %2097 = vrot.lane.b32.xlu0 %v10656_v55, %s9507_s3  ;;  %v10728_v44 = vpop.permute.xlu1 %1884  ;;  %v10734_v14 = vpop.permute.xlu0 %1906 }
 0x5db   : > { %15021 = vst [vmem:[#allocation57_spill] sm:$0xff] %v10728_v44  ;;  %15022 = vst [vmem:[#allocation58_spill] sm:$0xff] %v10734_v14 }
 0x5de   : > { %2099 = vrot.lane.b32.xlu1 %v10666_v52, %s9507_s3  ;;  %2121 = vrot.lane.b32.xlu0 %v10656_v55, %s14902_s5  ;;  %v10740_v11 = vpop.permute.xlu1 %1908  ;;  %v10742_v13 = vpop.permute.xlu0 %2238 }
 0x5df   : > { %15023 = vst [vmem:[#allocation59_spill] sm:$0xff] %v10740_v11  ;;  %15024 = vst [vmem:[#allocation60_spill] sm:$0xff] %v10742_v13 }
 0x5e2   : > { %2123 = vrot.lane.b32.xlu1 %v10666_v52, %s14902_s5  ;;  %1959 = vrot.lane.b32.xlu0 %v10656_v55, %s14855_s16  ;;  %v10748_v16 = vpop.permute.xlu1 %2240  ;;  %v10754_v37 = vpop.permute.xlu0 %2262 }
 0x5e3   : > { %15025 = vst [vmem:[#allocation61_spill] sm:$0xff] %v10748_v16  ;;  %15026 = vst [vmem:[#allocation62_spill] sm:$0xff] %v10754_v37 }
 0x5e6   : > { %1961 = vrot.lane.b32.xlu1 %v10666_v52, %s14855_s16  ;;  %1983 = vrot.lane.b32.xlu0 %v10656_v55, %s14835_s6  ;;  %v10762_v23 = vpop.permute.xlu1 %2264 }
 0x5e7   : > { %15028 = vst [vmem:[#allocation64_spill] sm:$0xff] %v10762_v23 }
 0x5ea   : > { %1985 = vrot.lane.b32.xlu1 %v10666_v52, %s14835_s6  ;;  %2315 = vrot.lane.b32.xlu0 %v10656_v55, %s14863_s8 }
 0x5ee   : > { %2317 = vrot.lane.b32.xlu1 %v10666_v52, %s14863_s8  ;;  %2339 = vrot.lane.b32.xlu0 %v10656_v55, %s14861_s13 }
 0x5f2   : > { %2341 = vrot.lane.b32.xlu1 %v10666_v52, %s14861_s13  ;;  %2177 = vrot.lane.b32.xlu0 %v10656_v55, %s14859_s19 }
 0x5f6   : > { %2179 = vrot.lane.b32.xlu1 %v10666_v52, %s14859_s19  ;;  %2201 = vrot.lane.b32.xlu0 %v10656_v55, %s14857_s23 }
 0x5fa   : > { %2203 = vrot.lane.b32.xlu1 %v10666_v52, %s14857_s23  ;;  %2028 = vrot.lane.b32.xlu0 %v10656_v55, %s9513_s26 }
 0x5fe   : > { %2030 = vrot.lane.b32.xlu1 %v10666_v52, %s9513_s26  ;;  %2052 = vrot.lane.b32.xlu0 %v10656_v55, %s9514_s1 }
 0x602   : > { %2054 = vrot.lane.b32.xlu1 %v10666_v52, %s9514_s1  ;;  %1890 = vrot.lane.b32.xlu0 %v10656_v55, %s14833_s11 }
 0x606   : > { %1892 = vrot.lane.b32.xlu1 %v10666_v52, %s14833_s11  ;;  %1914 = vrot.lane.b32.xlu0 %v10656_v55, %s14837_s27 }
 0x60a   : > { %1916 = vrot.lane.b32.xlu1 %v10666_v52, %s14837_s27  ;;  %2246 = vrot.lane.b32.xlu0 %v10656_v55, %s9517_s7 }
 0x60e   : > { %2248 = vrot.lane.b32.xlu1 %v10666_v52, %s9517_s7  ;;  %2270 = vrot.lane.b32.xlu0 %v10656_v55, %s9518_s10 }
 0x612   : > { %2272 = vrot.lane.b32.xlu1 %v10666_v52, %s9518_s10  ;;  %2384 = vrot.lane.b32.xlu0 %v10656_v55, %s14853_s22 }
 0x614   : > { %v10764_v59 = vpop.permute.xlu0 %2093 }
 0x616   : > { %2386 = vrot.lane.b32.xlu1 %v10666_v52, %s14853_s22  ;;  %2101 = vrot.lane.b32.xlu0 %v10760_v46, %s9507_s3 }
 0x618   : > { %v10772_v18 = vpop.permute.xlu1 %2095  ;;  %v10774_v50 = vpop.permute.xlu0 %2117 }
 0x61a   : > { %2103 = vrot.lane.b32.xlu1 %v10770_v21, %s9507_s3  ;;  %2125 = vrot.lane.b32.xlu0 %v10760_v46, %s14902_s5 }
 0x61c   : > { %v10780_v32 = vpop.permute.xlu1 %2119  ;;  %v10782_v56 = vpop.permute.xlu0 %1955 }
 0x61e   : > { %2127 = vrot.lane.b32.xlu1 %v10770_v21, %s14902_s5  ;;  %1963 = vrot.lane.b32.xlu0 %v10760_v46, %s14855_s16 }
 0x620   : > { %v10788_v35 = vpop.permute.xlu1 %1957  ;;  %v10790_v1 = vpop.permute.xlu0 %1979 }
 0x622   : > { %1965 = vrot.lane.b32.xlu1 %v10770_v21, %s14855_s16  ;;  %1987 = vrot.lane.b32.xlu0 %v10760_v46, %s14835_s6  ;;  %s15112_s16 = smov 8  }
 0x624   : > { %v10796_v45 = vpop.permute.xlu1 %1981  ;;  %v10798_v19 = vpop.permute.xlu0 %2311 }
 0x626   : > { %1989 = vrot.lane.b32.xlu1 %v10770_v21, %s14835_s6  ;;  %2319 = vrot.lane.b32.xlu0 %v10760_v46, %s14863_s8  ;;  %s15114_s6 = smov 9  }
 0x628   : > { %v10804_v49 = vpop.permute.xlu1 %2313  ;;  %v10806_v43 = vpop.permute.xlu0 %2335 }
 0x62a   : > { %2321 = vrot.lane.b32.xlu1 %v10770_v21, %s14863_s8  ;;  %2343 = vrot.lane.b32.xlu0 %v10760_v46, %s14861_s13 }
 0x62c   : > { %v10812_v29 = vpop.permute.xlu1 %2337  ;;  %v10814_v53 = vpop.permute.xlu0 %2173 }
 0x62e   : > { %2345 = vrot.lane.b32.xlu1 %v10770_v21, %s14861_s13  ;;  %2181 = vrot.lane.b32.xlu0 %v10760_v46, %s14859_s19 }
 0x630   : > { %v10820_v40 = vpop.permute.xlu1 %2175  ;;  %v10822_v62 = vpop.permute.xlu0 %2197 }
 0x632   : > { %2183 = vrot.lane.b32.xlu1 %v10770_v21, %s14859_s19  ;;  %2205 = vrot.lane.b32.xlu0 %v10760_v46, %s14857_s23 }
 0x634   : > { %v10828_v6 = vpop.permute.xlu1 %2199  ;;  %v10830_v17 = vpop.permute.xlu0 %2024 }
 0x635   : > { %15030 = vst [vmem:[#allocation66_spill] sm:$0xff] %v10830_v17 }
 0x636   : > { %2207 = vrot.lane.b32.xlu1 %v10770_v21, %s14857_s23  ;;  %2032 = vrot.lane.b32.xlu0 %v10760_v46, %s9513_s26  ;;  %s15113_s23 = smov 73  }
 0x638   : > { %v10836_v9 = vpop.permute.xlu1 %2026  ;;  %v10838_v25 = vpop.permute.xlu0 %2048 }
 0x639   : > { %15031 = vst [vmem:[#allocation67_spill] sm:$0xff] %v10836_v9  ;;  %15032 = vst [vmem:[#allocation68_spill] sm:$0xff] %v10838_v25 }
 0x63a   : > { %2034 = vrot.lane.b32.xlu1 %v10770_v21, %s9513_s26  ;;  %2056 = vrot.lane.b32.xlu0 %v10760_v46, %s9514_s1 }
 0x63c   : > { %v10844_v28 = vpop.permute.xlu1 %2050  ;;  %v10846_v13 = vpop.permute.xlu0 %1886 }
 0x63d   : > { %15033 = vst [vmem:[#allocation69_spill] sm:$0xff] %v10844_v28  ;;  %15034 = vst [vmem:[#allocation70_spill] sm:$0xff] %v10846_v13 }
 0x63e   : > { %2058 = vrot.lane.b32.xlu1 %v10770_v21, %s9514_s1  ;;  %1894 = vrot.lane.b32.xlu0 %v10760_v46, %s14833_s11 }
 0x640   : > { %v10852_v37 = vpop.permute.xlu1 %1888  ;;  %v10854_v16 = vpop.permute.xlu0 %1910 }
 0x641   : > { %15035 = vst [vmem:[#allocation71_spill] sm:$0xff] %v10852_v37  ;;  %15036 = vst [vmem:[#allocation72_spill] sm:$0xff] %v10854_v16 }
 0x642   : > { %1896 = vrot.lane.b32.xlu1 %v10770_v21, %s14833_s11  ;;  %1918 = vrot.lane.b32.xlu0 %v10760_v46, %s14837_s27  ;;  %s15115_s11 = smov 119  }
 0x644   : > { %v10860_v23 = vpop.permute.xlu1 %1912  ;;  %v10862_v42 = vpop.permute.xlu0 %2242 }
 0x645   : > { %15037 = vst [vmem:[#allocation73_spill] sm:$0xff] %v10860_v23  ;;  %15038 = vst [vmem:[#allocation74_spill] sm:$0xff] %v10862_v42  ;;  %v8914_v42 = vld [vmem:[%s15042_s4 + $0x4] ss:$20 sps:$4 sm:$0xff]  }
 0x646   : > { %1920 = vrot.lane.b32.xlu1 %v10770_v21, %s14837_s27  ;;  %2250 = vrot.lane.b32.xlu0 %v10760_v46, %s9517_s7  ;;  %s14851_s27 = smov 55  }
 0x647   : > { %2570 = vmatprep.mubr.bf16.mxu1 %v8914_v42  ;;  %v8917_v42 = vld [vmem:[%s15042_s4 + $0xc] ss:$20 sps:$4 sm:$0xff]  }
 0x648   : > { %v10868_v14 = vpop.permute.xlu1 %2244  ;;  %v10870_v44 = vpop.permute.xlu0 %2266  ;;  %2619 = vmatprep.mubr.bf16.mxu0 %v8917_v42 }
 0x649   : > { %15039 = vst [vmem:[#allocation75_spill] sm:$0xff] %v10868_v14  ;;  %15040 = vst [vmem:[#allocation76_spill] sm:$0xff] %v10870_v44 }
 0x64a   : > { %2252 = vrot.lane.b32.xlu1 %v10770_v21, %s9517_s7  ;;  %2274 = vrot.lane.b32.xlu0 %v10760_v46, %s9518_s10 }
 0x64c   : > { %v10876_v11 = vpop.permute.xlu1 %2268  ;;  %v10878_v30 = vpop.permute.xlu0 %2097 }
 0x64d   : > { %15041 = vst [vmem:[#allocation77_spill] sm:$0xff] %v10876_v11 }
 0x64e   : > { %2276 = vrot.lane.b32.xlu1 %v10770_v21, %s9518_s10  ;;  %2408 = vrot.lane.b32.xlu0 %v10656_v55, %s14851_s27 }
 0x650   : > { %v2100_v44 = vpop.permute.xlu1 %2099  ;;  %v10887_v14 = vpop.permute.xlu0 %2121 }
 0x652   : > { %2410 = vrot.lane.b32.xlu1 %v10666_v52, %s14851_s27  ;;  %2388 = vrot.lane.b32.xlu0 %v10760_v46, %s14853_s22 }
 0x654   : > { %v2124_v11 = vpop.permute.xlu1 %2123  ;;  %v10893_v41 = vpop.permute.xlu0 %1959 }
 0x655   : > { %v2142_v31 = vsel %vm912_vm9, %v2100_v44, %v2124_v11 }
 0x656   : > { %2382 = vrot.lane.b32.xlu1 %v10588_v10, %s14853_s22  ;;  %2412 = vrot.lane.b32.xlu0 %v10760_v46, %s14851_s27 }
 0x658   : > { %v1962_v55 = vpop.permute.xlu1 %1961  ;;  %v10902_v13 = vpop.permute.xlu0 %1983 }
 0x65a   : > { %2390 = vrot.lane.b32.xlu1 %v10770_v21, %s14853_s22  ;;  %2380 = vrot.lane.b32.xlu0 %v10584_v54, %s14853_s22 }
 0x65c   : > { %v1986_v52 = vpop.permute.xlu1 %1985  ;;  %v10908_v16 = vpop.permute.xlu0 %2315 }
 0x65e   : > { %2414 = vrot.lane.b32.xlu1 %v10770_v21, %s14851_s27  ;;  %2404 = vrot.lane.b32.xlu0 %v10584_v54, %s14851_s27 }
 0x660   : > { %v10914_v46 = vpop.permute.xlu1 %2317  ;;  %v10916_v12 = vpop.permute.xlu0 %2339 }
 0x662   : > { %2406 = vrot.lane.b32.xlu1 %v10588_v10, %s14851_s27  ;;  %2376 = vrot.lane.b32.xlu0 %v10524_v36, %s14853_s22 }
 0x664   : > { %v10922_v42 = vpop.permute.xlu1 %2341  ;;  %v10924_v37 = vpop.permute.xlu0 %2177 }
 0x666   : > { %2378 = vrot.lane.b32.xlu1 %v10528_v38, %s14853_s22  ;;  %2400 = vrot.lane.b32.xlu0 %v10524_v36, %s14851_s27  ;;  %s15110_s22 = smov 63  }
 0x668   : > { %v10930_v54 = vpop.permute.xlu1 %2179  ;;  %v10932_v21 = vpop.permute.xlu0 %2201 }
 0x66a   : > { %2402 = vrot.lane.b32.xlu1 %v10528_v38, %s14851_s27  ;;  %s15111_s27 = smov 72  }
 0x66c   : > { %v10936_v10 = vpop.permute.xlu1 %2203  ;;  %v10938_v23 = vpop.permute.xlu0 %2028 }
 0x66d   : > { %15043 = vst [vmem:[#allocation78_spill] sm:$0xff] %v10938_v23 }
 0x670   : > { %v10940_v39 = vpop.permute.xlu1 %2030  ;;  %v10942_v34 = vpop.permute.xlu0 %2052 }
 0x671   : > { %15044 = vst [vmem:[#allocation79_spill] sm:$0xff] %v10940_v39  ;;  %15045 = vst [vmem:[#allocation80_spill] sm:$0xff] %v10942_v34 }
 0x674   : > { %v10944_v17 = vpop.permute.xlu1 %2054  ;;  %v10946_v25 = vpop.permute.xlu0 %1890 }
 0x675   : > { %15046 = vst [vmem:[#allocation81_spill] sm:$0xff] %v10944_v17  ;;  %15047 = vst [vmem:[#allocation82_spill] sm:$0xff] %v10946_v25 }
 0x678   : > { %v10948_v36 = vpop.permute.xlu1 %1892  ;;  %v10950_v27 = vpop.permute.xlu0 %1914 }
 0x679   : > { %15048 = vst [vmem:[#allocation83_spill] sm:$0xff] %v10948_v36  ;;  %15049 = vst [vmem:[#allocation84_spill] sm:$0xff] %v10950_v27  ;;  %v10966_v36 = vld [vmem:[#allocation17] sm:$0xff] }
 0x67c   : > { %v10952_v9 = vpop.permute.xlu1 %1916  ;;  %v10954_v28 = vpop.permute.xlu0 %2246 }
 0x67d   : > { %15050 = vst [vmem:[#allocation85_spill] sm:$0xff] %v10952_v9  ;;  %15051 = vst [vmem:[#allocation86_spill] sm:$0xff] %v10954_v28  ;;  %v10971_v28 = vrot.slane %v10966_v36, %v10027_v0 }
 0x680   : > { %v10956_v38 = vpop.permute.xlu1 %2248  ;;  %v10958_v4 = vpop.permute.xlu0 %2270 }
 0x681   : > { %15052 = vst [vmem:[#allocation87_spill] sm:$0xff] %v10956_v38  ;;  %15053 = vst [vmem:[#allocation88_spill] sm:$0xff] %v10958_v4 }
 0x684   : > { %v10960_v23 = vpop.permute.xlu1 %2272  ;;  %v10962_v39 = vpop.permute.xlu0 %2384 }
 0x685   : > { %15054 = vst [vmem:[#allocation89_spill] sm:$0xff] %v10960_v23  ;;  %15055 = vst [vmem:[#allocation90_spill] sm:$0xff] %v10962_v39 }
 0x688   : > { %v10964_v34 = vpop.permute.xlu1 %2386  ;;  %v2102_v17 = vpop.permute.xlu0 %2101 }
 0x689   : > { %15056 = vst [vmem:[#allocation91_spill] sm:$0xff] %v10964_v34 }
 0x68c   : > { %v2104_v25 = vpop.permute.xlu1 %2103  ;;  %v2126_v3 = vpop.permute.xlu0 %2125 }
 0x68d   : > { %v2143_v27 = vsel %vm912_vm9, %v2102_v17, %v2126_v3  ;;  %v10980_v3 = vrot.slane %v10966_v36, %v9883_v5 }
 0x68e   : > { %v2155_v23 = vmul.f32 %v10971_v28, %v2143_v27 }
 0x690   : > { %v2128_v38 = vpop.permute.xlu1 %2127  ;;  %v1964_v9 = vpop.permute.xlu0 %1963 }
 0x691   : > { %v2144_v4 = vsel %vm912_vm9, %v2104_v25, %v2128_v38  ;;  %v2141_v25 = vsel %vm912_vm9, %v10878_v30, %v10887_v14  ;;  %v2004_v30 = vsel %vm1999_vm1, %v10893_v41, %v10902_v13  ;;  %v2138_v41 = vsel %vm912_vm9, %v10624_v20, %v10636_v48 }
 0x692   : > { %v2156_v39 = vmul.f32 %v10971_v28, %v2144_v4  ;;  %v2154_v4 = vmul.f32 %v10971_v28, %v2142_v31  ;;  %v2153_v44 = vmul.f32 %v10971_v28, %v2141_v25  ;;  %v2016_v13 = vmul.f32 %v10980_v3, %v2004_v30 }
 0x693   : > { %v2137_v20 = vsel %vm912_vm9, %v10618_v24, %v10630_v57 }
 0x694   : > { %v1966_v34 = vpop.permute.xlu1 %1965  ;;  %v1988_v60 = vpop.permute.xlu0 %1987  ;;  %v2460_v2 = vpack.c.bf16 %v2156_v39, %v2155_v23  ;;  %v2005_v39 = vsel %vm1999_vm1, %v1962_v55, %v1986_v52  ;;  %v2139_v55 = vsel %vm912_vm9, %v10764_v59, %v10774_v50  ;;  %v2002_v50 = vsel %vm1999_vm1, %v10782_v56, %v10790_v1 }
 0x695   : > { %v2006_v17 = vsel %vm1999_vm1, %v1964_v9, %v1988_v60  ;;  %v2140_v9 = vsel %vm912_vm9, %v10772_v18, %v10780_v32  ;;  %v2017_v52 = vmul.f32 %v10980_v3, %v2005_v39  ;;  %v2003_v18 = vsel %vm1999_vm1, %v10788_v35, %v10796_v45 }
 0x696   : > { %8044 = vmatprep.subr.bf16.mxu1 %v2460_v2  ;;  %v2018_v2 = vmul.f32 %v10980_v3, %v2006_v17  ;;  %v2152_v11 = vmul.f32 %v10971_v28, %v2140_v9  ;;  %v2459_v32 = vpack.c.bf16 %v2154_v4, %v2153_v44  ;;  %v2151_v59 = vmul.f32 %v10971_v28, %v2139_v55 }
 0x697   : > { %v11016_v35 = vrot.slane %v10966_v36, %v9889_v8  ;;  %v2015_v48 = vmul.f32 %v10980_v3, %v2003_v18  ;;  %v2451_v45 = vpack.c.bf16 %v2017_v52, %v2016_v13  ;;  %v2150_v4 = vmul.f32 %v10971_v28, %v2138_v41 }
 0x698   : > { %v1990_v27 = vpop.permute.xlu1 %1989  ;;  %v2320_v38 = vpop.permute.xlu0 %2319  ;;  %v2001_v56 = vsel %vm1999_vm1, %v10644_v61, %v10658_v58  ;;  %v2014_v8 = vmul.f32 %v10980_v3, %v2002_v50  ;;  %v2149_v57 = vmul.f32 %v10971_v28, %v2137_v20  ;;  %v2361_v55 = vsel %vm2355_vm2, %v10914_v46, %v10922_v42 }
 0x699   : > { %v2007_v23 = vsel %vm1999_vm1, %v1966_v34, %v1990_v27  ;;  %v2013_v9 = vmul.f32 %v10980_v3, %v2001_v56  ;;  %v2223_v46 = vsel %vm2217_vm10, %v10930_v54, %v10936_v10  ;;  %v2358_v54 = vsel %vm2355_vm2, %v10798_v19, %v10806_v43 }
 0x69a   : > { %v2019_v60 = vmul.f32 %v10980_v3, %v2007_v23  ;;  %v2000_v23 = vsel %vm1999_vm1, %v10638_v15, %v10650_v33  ;;  %v2450_v61 = vpack.c.bf16 %v2015_v48, %v2014_v8  ;;  %v2457_v44 = vpack.c.bf16 %v2150_v4, %v2149_v57  ;;  %v15060_v8 = vld [vmem:[#allocation48_spill] sm:$0xff] }
 0x69b   : > { %v2012_v30 = vmul.f32 %v10980_v3, %v2000_v23  ;;  %v11042_v15 = vrot.slane %v10966_v36, %v9906_v22  ;;  %v2359_v22 = vsel %vm2355_vm2, %v10804_v49, %v10812_v29  ;;  %v2370_v19 = vmul.f32 %v11016_v35, %v2358_v54  ;;  %v15068_v54 = vld [vmem:[#allocation69_spill] sm:$0xff] }
 0x69c   : > { %v2452_v31 = vpack.c.bf16 %v2019_v60, %v2018_v2  ;;  %v2322_v34 = vpop.permute.xlu1 %2321  ;;  %v2344_v14 = vpop.permute.xlu0 %2343  ;;  %v2371_v49 = vmul.f32 %v11016_v35, %v2359_v22  ;;  %v2220_v43 = vsel %vm2217_vm10, %v10814_v53, %v10822_v62  ;;  %v15058_v53 = vld [vmem:[#allocation49_spill] sm:$0xff] }
 0x69d   : > { %v2362_v17 = vsel %vm2355_vm2, %v2320_v38, %v2344_v14  ;;  %v2458_v38 = vpack.c.bf16 %v2152_v11, %v2151_v59  ;;  %v2449_v33 = vpack.c.bf16 %v2013_v9, %v2012_v30  ;;  %v2373_v11 = vmul.f32 %v11016_v35, %v2361_v55 }
 0x69e   : > { %8045 = vmatpush3.bf16.msra.mxu1 %v2452_v31  ;;  %v2374_v39 = vmul.f32 %v11016_v35, %v2362_v17  ;;  %v2360_v31 = vsel %vm2355_vm2, %v10908_v16, %v10916_v12  ;;  %v2222_v16 = vsel %vm2217_vm10, %v10924_v37, %v10932_v21  ;;  %v2235_v10 = vmul.f32 %v11042_v15, %v2223_v46 }
 0x69f   : > { %8046 = vmatprep.subr.bf16.mxu1 %v2459_v32  ;;  %v2372_v12 = vmul.f32 %v11016_v35, %v2360_v31  ;;  %v2221_v59 = vsel %vm2217_vm10, %v10820_v40, %v10828_v6  ;;  %v2357_v37 = vsel %vm2355_vm2, %v10668_v51, %v10680_v63  ;;  %v2234_v21 = vmul.f32 %v11042_v15, %v2222_v16 }
 0x6a0   : > { %v2346_v25 = vpop.permute.xlu1 %2345  ;;  %v2182_v27 = vpop.permute.xlu0 %2181  ;;  %v11080_v40 = vrot.slane %v10966_v36, %v10053_v47  ;;  %v2356_v6 = vsel %vm2355_vm2, %v10660_v26, %v10674_v7  ;;  %v2233_v51 = vmul.f32 %v11042_v15, %v2221_v59  ;;  %v2474_v4 = vpack.c.bf16 %v2371_v49, %v2370_v19  ;;  %v15070_v59 = vld [vmem:[#allocation84_spill] sm:$0xff] }
 0x6a1   : > { %v2363_v1 = vsel %vm2355_vm2, %v2322_v34, %v2346_v25  ;;  %v2475_v50 = vpack.c.bf16 %v2373_v11, %v2372_v12  ;;  %v2467_v63 = vpack.c.bf16 %v2235_v10, %v2234_v21  ;;  %v15057_v25 = vld [vmem:[#allocation51_spill] sm:$0xff]  ;;  %v2232_v56 = vmul.f32 %v11042_v15, %v2220_v43  ;;  %v15072_v21 = vld [vmem:[#allocation36_spill] sm:$0xff] }
 0x6a2   : > { %v2375_v24 = vmul.f32 %v11016_v35, %v2363_v1  ;;  %8047 = vmatpush3.bf16.msra.mxu1 %v2451_v45  ;;  %v2369_v45 = vmul.f32 %v11016_v35, %v2357_v37  ;;  %v2219_v62 = vsel %vm2217_vm10, %v15058_v53, %v15057_v25  ;;  %v2368_v7 = vmul.f32 %v11016_v35, %v2356_v6  ;;  %v15069_v10 = vld [vmem:[#allocation67_spill] sm:$0xff]  ;;  %v15073_v43 = vld [vmem:[#allocation68_spill] sm:$0xff]  ;;  %v15076_v25 = vld [vmem:[#allocation53_spill] sm:$0xff] }
 0x6a3   : > { %8048 = vmatprep.subr.bf16.mxu1 %v2458_v38  ;;  %v15059_v38 = vld [vmem:[#allocation50_spill] sm:$0xff]  ;;  %v2466_v57 = vpack.c.bf16 %v2233_v51, %v2232_v56  ;;  %v11127_v19 = vrot.slane %v10966_v36, %v15072_v21  ;;  %v15093_v21 = vld [vmem:[#allocation77_spill] sm:$0xff] }
 0x6a4   : > { %v2184_v58 = vpop.permute.xlu1 %2183  ;;  %v2206_v2 = vpop.permute.xlu0 %2205  ;;  %v2476_v60 = vpack.c.bf16 %v2375_v24, %v2374_v39  ;;  %v2218_v39 = vsel %vm2217_vm10, %v15060_v8, %v15059_v38  ;;  %v2231_v24 = vmul.f32 %v11042_v15, %v2219_v62  ;;  %v15080_v8 = vld [vmem:[#allocation65_spill] sm:$0xff] }
 0x6a5   : > { %v2224_v52 = vsel %vm2217_vm10, %v2182_v27, %v2206_v2  ;;  %v2230_v2 = vmul.f32 %v11042_v15, %v2218_v39  ;;  %v2168_v39 = vmul.f32 %v15080_v8, %v11127_v19 }
 0x6a6   : > { %8049 = vmatpush3.bf16.msra.mxu1 %v2450_v61  ;;  %8072 = vmatprep.subr.bf16.mxu0 %v2476_v60  ;;  %v2236_v18 = vmul.f32 %v11042_v15, %v2224_v52  ;;  %v15061_v60 = vld [vmem:[#allocation81_spill] sm:$0xff]  ;;  %v15063_v52 = vld [vmem:[#allocation31_spill] sm:$0xff] }
 0x6a7   : > { %8050 = vmatprep.subr.bf16.mxu1 %v2457_v44  ;;  %v15062_v44 = vld [vmem:[#allocation79_spill] sm:$0xff]  ;;  %v2465_v31 = vpack.c.bf16 %v2231_v24, %v2230_v2 }
 0x6a8   : > { %v2208_v34 = vpop.permute.xlu1 %2207  ;;  %v2033_v14 = vpop.permute.xlu0 %2032  ;;  %v2074_v30 = vsel %vm2068_vm15, %v15062_v44, %v15061_v60  ;;  %v15085_v60 = vld [vmem:[#allocation54_spill] sm:$0xff]  ;;  %v15086_v44 = vld [vmem:[#allocation52_spill] sm:$0xff] }
 0x6a9   : > { %v2225_v42 = vsel %vm2217_vm10, %v2184_v58, %v2208_v34  ;;  %v2473_v58 = vpack.c.bf16 %v2369_v45, %v2368_v7  ;;  %v15064_v34 = vld [vmem:[#allocation80_spill] sm:$0xff]  ;;  %v2086_v22 = vmul.f32 %v11080_v40, %v2074_v30  ;;  %v15075_v45 = vld [vmem:[#allocation55_spill] sm:$0xff]  ;;  %v2069_v30 = vsel %vm2068_vm15, %v15086_v44, %v15085_v60 }
 0x6aa   : > { %v2237_v32 = vmul.f32 %v11042_v15, %v2225_v42  ;;  %8051 = vmatpush3.bf16.msra.mxu1 %v2449_v33  ;;  %v11106_v33 = vrot.slane %v10966_v36, %v15063_v52  ;;  %v2070_v53 = vsel %vm2068_vm15, %v15076_v25, %v15075_v45 }
 0x6ac   : > { %v2468_v41 = vpack.c.bf16 %v2237_v32, %v2236_v18  ;;  %v2035_v13 = vpop.permute.xlu1 %2034  ;;  %v2057_v29 = vpop.permute.xlu0 %2056  ;;  %v15066_v18 = vld [vmem:[#allocation85_spill] sm:$0xff]  ;;  %v15067_v32 = vld [vmem:[#allocation83_spill] sm:$0xff] }
 0x6ad   : > { %v2075_v17 = vsel %vm2068_vm15, %v2033_v14, %v2057_v29  ;;  %v15065_v14 = vld [vmem:[#allocation78_spill] sm:$0xff]  ;;  %v1936_v12 = vsel %vm1930_vm0, %v15067_v32, %v15066_v18  ;;  %v15089_v32 = vld [vmem:[#allocation88_spill] sm:$0xff] }
 0x6ae   : > { %8073 = vmatpush3.bf16.msra.mxu0 %v2468_v41  ;;  %v2087_v1 = vmul.f32 %v11080_v40, %v2075_v17  ;;  %v2073_v11 = vsel %vm2068_vm15, %v15065_v14, %v15064_v34  ;;  %v2072_v41 = vsel %vm2068_vm15, %v15069_v10, %v15068_v54  ;;  %v15074_v17 = vld [vmem:[#allocation66_spill] sm:$0xff]  ;;  %v1948_v51 = vmul.f32 %v11106_v33, %v1936_v12 }
 0x6af   : > { %8074 = vmatprep.subr.bf16.mxu0 %v2475_v50  ;;  %v2085_v49 = vmul.f32 %v11080_v40, %v2073_v11  ;;  %v15071_v50 = vld [vmem:[#allocation82_spill] sm:$0xff]  ;;  %v2071_v6 = vsel %vm2068_vm15, %v15074_v17, %v15073_v43  ;;  %v2084_v62 = vmul.f32 %v11080_v40, %v2072_v41  ;;  %v15094_v43 = vld [vmem:[#allocation75_spill] sm:$0xff] }
 0x6b0   : > { %v2059_v20 = vpop.permute.xlu1 %2058  ;;  %v1895_v48 = vpop.permute.xlu0 %1894  ;;  %v1935_v37 = vsel %vm1930_vm0, %v15071_v50, %v15070_v59  ;;  %v2083_v24 = vmul.f32 %v11080_v40, %v2071_v6  ;;  %v15090_v12 = vld [vmem:[#allocation86_spill] sm:$0xff]  ;;  %v15092_v50 = vld [vmem:[#allocation56_spill] sm:$0xff]  ;;  %v2290_v17 = vsel %vm2286_vm8, %v15094_v43, %v15093_v21  ;;  %v15095_v6 = vld [vmem:[#allocation63_spill] sm:$0xff] }
 0x6b1   : > { %v2076_v27 = vsel %vm2068_vm15, %v2035_v13, %v2059_v20  ;;  %v1947_v38 = vmul.f32 %v11106_v33, %v1935_v37  ;;  %v15091_v59 = vld [vmem:[#allocation58_spill] sm:$0xff] }
 0x6b2   : > { %v2088_v26 = vmul.f32 %v11080_v40, %v2076_v27  ;;  %8075 = vmatpush3.bf16.msra.mxu0 %v2467_v63  ;;  %v15077_v27 = vld [vmem:[#allocation73_spill] sm:$0xff]  ;;  %v2454_v54 = vpack.c.bf16 %v2084_v62, %v2083_v24  ;;  %v1931_v37 = vsel %vm1930_vm0, %v15092_v50, %v15091_v59  ;;  %v15096_v62 = vld [vmem:[#allocation76_spill] sm:$0xff]  ;;  %v15107_v50 = vld [vmem:[#allocation91_spill] sm:$0xff] }
 0x6b3   : > { %8076 = vmatprep.subr.bf16.mxu0 %v2474_v4  ;;  %v15078_v4 = vld [vmem:[#allocation71_spill] sm:$0xff]  ;;  %v2447_v34 = vpack.c.bf16 %v1948_v51, %v1947_v38  ;;  %v2167_v51 = vmul.f32 %v15095_v6, %v11127_v19  ;;  %v1943_v8 = vmul.f32 %v11106_v33, %v1931_v37  ;;  %v15108_v43 = vld [vmem:[#allocation42_spill] sm:$0xff] }
 0x6b4   : > { %v1897_v23 = vpop.permute.xlu1 %1896  ;;  %v1919_v9 = vpop.permute.xlu0 %1918  ;;  %v2456_v61 = vpack.c.bf16 %v2088_v26, %v2087_v1  ;;  %v1934_v56 = vsel %vm1930_vm0, %v15078_v4, %v15077_v27  ;;  %v2455_v1 = vpack.c.bf16 %v2086_v22, %v2085_v49  ;;  %v15079_v26 = vld [vmem:[#allocation33_spill] sm:$0xff]  ;;  %v2081_v49 = vmul.f32 %v11080_v40, %v2069_v30  ;;  %v15097_v27 = vld [vmem:[#allocation74_spill] sm:$0xff] }
 0x6b5   : > { %v1937_v55 = vsel %vm1930_vm0, %v1895_v48, %v1919_v9  ;;  %v11142_v7 = vrot.slane %v10966_v36, %v15079_v26  ;;  %v15088_v22 = vld [vmem:[#allocation57_spill] sm:$0xff]  ;;  %v2289_v4 = vsel %vm2286_vm8, %v15097_v27, %v15096_v62  ;;  %v15098_v26 = vld [vmem:[#allocation47_spill] sm:$0xff]  ;;  %v15102_v30 = vld [vmem:[#allocation62_spill] sm:$0xff] }
 0x6b6   : > { %8052 = vmatprep.subr.bf16.mxu1 %v2456_v61  ;;  %8077 = vmatpush3.bf16.msra.mxu0 %v2466_v57  ;;  %v1949_v13 = vmul.f32 %v11106_v33, %v1937_v55  ;;  %v15081_v57 = vld [vmem:[#allocation72_spill] sm:$0xff]  ;;  %v15083_v61 = vld [vmem:[#allocation89_spill] sm:$0xff]  ;;  %v2082_v55 = vmul.f32 %v11080_v40, %v2070_v53  ;;  %v2166_v38 = vmul.f32 %v15098_v26, %v11127_v19 }
 0x6b7   : > { %8078 = vmatprep.subr.bf16.mxu0 %v2473_v58  ;;  %v15084_v58 = vld [vmem:[#allocation87_spill] sm:$0xff]  ;;  %v2302_v24 = vmul.f32 %v11142_v7, %v2290_v17  ;;  %v2161_v17 = vmul.f32 %v15108_v43, %v11127_v19 }
 0x6b8   : > { %v1921_v46 = vpop.permute.xlu1 %1920  ;;  %v2251_v42 = vpop.permute.xlu0 %2250  ;;  %v2292_v2 = vsel %vm2286_vm8, %v15084_v58, %v15083_v61  ;;  %v15101_v58 = vld [vmem:[#allocation46_spill] sm:$0xff] }
 0x6b9   : > { %v1938_v16 = vsel %vm1930_vm0, %v1897_v23, %v1921_v46  ;;  %v15082_v23 = vld [vmem:[#allocation70_spill] sm:$0xff]  ;;  %v15087_v46 = vld [vmem:[#allocation59_spill] sm:$0xff]  ;;  %v2304_v41 = vmul.f32 %v11142_v7, %v2292_v2  ;;  %v2165_v2 = vmul.f32 %v15101_v58, %v11127_v19 }
 0x6ba   : > { %v1950_v29 = vmul.f32 %v11106_v33, %v1938_v16  ;;  %8079 = vmatpush3.bf16.msra.mxu0 %v2465_v31  ;;  %v1933_v9 = vsel %vm1930_vm0, %v15082_v23, %v15081_v57  ;;  %v1946_v31 = vmul.f32 %v11106_v33, %v1934_v56  ;;  %v1932_v18 = vsel %vm1930_vm0, %v15088_v22, %v15087_v46  ;;  %v15099_v23 = vld [vmem:[#allocation64_spill] sm:$0xff]  ;;  %v15104_v46 = vld [vmem:[#allocation45_spill] sm:$0xff] }
 0x6bb   : > { %v1945_v10 = vmul.f32 %v11106_v33, %v1933_v9  ;;  %v2453_v56 = vpack.c.bf16 %v2082_v55, %v2081_v49  ;;  %v15100_v9 = vld [vmem:[#allocation61_spill] sm:$0xff]  ;;  %v15103_v55 = vld [vmem:[#allocation60_spill] sm:$0xff]  ;;  %v2164_v22 = vmul.f32 %v15104_v46, %v11127_v19 }
 0x6bc   : > { %v2448_v63 = vpack.c.bf16 %v1950_v29, %v1949_v13  ;;  %v2253_v20 = vpop.permute.xlu1 %2252  ;;  %v2275_v48 = vpop.permute.xlu0 %2274  ;;  %v2288_v61 = vsel %vm2286_vm8, %v15100_v9, %v15099_v23  ;;  %v8925_v46 = vld [vmem:[%s15042_s4 + $0x38] ss:$20 sps:$4 sm:$0xff]  }
 0x6bd   : > { %v2293_v36 = vsel %vm2286_vm8, %v2251_v42, %v2275_v48  ;;  %v2291_v42 = vsel %vm2286_vm8, %v15090_v12, %v15089_v32  ;;  %v8918_v12 = vld [vmem:[%s15042_s4 + $0x2c] ss:$20 sps:$4 sm:$0xff]  }
 0x6be   : > { %8053 = vmatpush3.bf16.msra.mxu1 %v2448_v63  ;;  %v2305_v13 = vmul.f32 %v11142_v7, %v2293_v36  ;;  %v1944_v63 = vmul.f32 %v11106_v33, %v1932_v18  ;;  %v2303_v48 = vmul.f32 %v11142_v7, %v2291_v42  ;;  %v2301_v36 = vmul.f32 %v11142_v7, %v2289_v4  ;;  %v15105_v42 = vld [vmem:[#allocation44_spill] sm:$0xff] }
 0x6bf   : > { %8054 = vmatprep.subr.bf16.mxu1 %v2455_v1  ;;  %v2464_v1 = vpack.c.bf16 %v2168_v39, %v2167_v51  ;;  %v2300_v18 = vmul.f32 %v11142_v7, %v2288_v61 }
 0x6c0   : > { %v2277_v14 = vpop.permute.xlu1 %2276  ;;  %v11160_v11 = vpop.permute.xlu0 %2408  ;;  %v2471_v57 = vpack.c.bf16 %v2304_v41, %v2303_v48  ;;  %v2445_v39 = vpack.c.bf16 %v1944_v63, %v1943_v8  ;;  %v2470_v32 = vpack.c.bf16 %v2302_v24, %v2301_v36  ;;  %v11219_v63 = vld [vmem:[#allocation17 + $0x8] ss:$0 sm:$0xff] }
 0x6c1   : > { %v2294_v16 = vsel %vm2286_vm8, %v2253_v20, %v2277_v14  ;;  %v2446_v20 = vpack.c.bf16 %v1946_v31, %v1945_v10  ;;  %v2287_v31 = vsel %vm2286_vm8, %v15103_v55, %v15102_v30  ;;  %v8912_v14 = vld [vmem:[%s15042_s4] ss:$20 sps:$4 sm:$0xff]   ;;  %v8924_v24 = vld [vmem:[%s15042_s4 + $0x10] ss:$20 sps:$4 sm:$0xff]  }
 0x6c2   : > { %v2306_v29 = vmul.f32 %v11142_v7, %v2294_v16  ;;  %8055 = vmatpush3.bf16.msra.mxu1 %v2447_v34  ;;  %v2463_v34 = vpack.c.bf16 %v2166_v38, %v2165_v2  ;;  %v2163_v16 = vmul.f32 %v15105_v42, %v11127_v19 }
 0x6c3   : > { %8056 = vmatprep.subr.bf16.mxu1 %v2454_v54  ;;  %v2299_v54 = vmul.f32 %v11142_v7, %v2287_v31 }
 0x6c4   : > { %v2411_v45 = vpop.permute.xlu1 %2410  ;;  %v2389_v25 = vpop.permute.xlu0 %2388  ;;  %v2472_v53 = vpack.c.bf16 %v2306_v29, %v2305_v13  ;;  %v2462_v13 = vpack.c.bf16 %v2164_v22, %v2163_v16  ;;  %v15106_v29 = vld [vmem:[#allocation43_spill] sm:$0xff] }
 0x6c5   : > { %v2162_v49 = vmul.f32 %v15106_v29, %v11127_v19  ;;  %v2469_v59 = vpack.c.bf16 %v2300_v18, %v2299_v54  ;;  %v2430_v37 = vsel %vm2424_vm3, %v15107_v50, %v2411_v45  ;;  %v8920_v45 = vld [vmem:[%s15042_s4 + $0x28] ss:$20 sps:$4 sm:$0xff]  }
 0x6c6   : > { %8057 = vmatpush3.bf16.msra.mxu1 %v2446_v20  ;;  %8080 = vmatprep.subr.bf16.mxu0 %v2472_v53  ;;  %v15109_v20 = vld [vmem:[#allocation90_spill] sm:$0xff] }
 0x6c7   : > { %8058 = vmatprep.subr.bf16.mxu1 %v2453_v56  ;;  %8081 = vmatpush3.bf16.msra.mxu0 %v2464_v1  ;;  %v2429_v48 = vsel %vm2424_vm3, %v15109_v20, %v11160_v11  ;;  %v2461_v62 = vpack.c.bf16 %v2162_v49, %v2161_v17  ;;  %v8915_v56 = vld [vmem:[%s15042_s4 + $0x8] ss:$20 sps:$4 sm:$0xff]  }
 0x6c8   : > { %v2383_v60 = vpop.permute.xlu1 %2382  ;;  %8082 = vmatprep.subr.bf16.mxu0 %v2471_v57  ;;  %v2413_v44 = vpop.permute.xlu0 %2412  ;;  %v8921_v11 = vld [vmem:[%s15042_s4 + $0x34] ss:$20 sps:$4 sm:$0xff]   ;;  %v2441_v1 = vmul.f32 %v11219_v63, %v2429_v48 }
 0x6c9   : > { %v2431_v21 = vsel %vm2424_vm3, %v2389_v25, %v2413_v44  ;;  %v2442_v25 = vmul.f32 %v11219_v63, %v2430_v37 }
 0x6ca   : > { %8059 = vmatpush3.bf16.msra.mxu1 %v2445_v39  ;;  %v2443_v27 = vmul.f32 %v11219_v63, %v2431_v21 }
 0x6cb   : > { %8083 = vmatpush3.bf16.msra.mxu0 %v2463_v34  ;;  %v2479_v61 = vpack.c.bf16 %v2442_v25, %v2441_v1 }
 0x6cc   : > { %v2391_v10 = vpop.permute.xlu1 %2390  ;;  %8084 = vmatprep.subr.bf16.mxu0 %v2470_v32  ;;  %v2381_v41 = vpop.permute.xlu0 %2380 }
 0x6cd   : > { %2571 = vmatmul.mubr.bf16.vlgmr.msra.gmra.mxu1 %v8912_v14 }
 0x6ce   : > { %2578 = vmatprep.mubr.bf16.mxu1 %v8918_v12 }
 0x6cf   : > { %8085 = vmatpush3.bf16.msra.mxu0 %v2462_v13 }
 0x6d0   : > { %v2415_v6 = vpop.permute.xlu1 %2414  ;;  %8086 = vmatprep.subr.bf16.mxu0 %v2469_v59  ;;  %v2405_v51 = vpop.permute.xlu0 %2404 }
 0x6d1   : > { %v2432_v53 = vsel %vm2424_vm3, %v2391_v10, %v2415_v6  ;;  %v2427_v57 = vsel %vm2424_vm3, %v2381_v41, %v2405_v51 }
 0x6d2   : > { %v2444_v4 = vmul.f32 %v11219_v63, %v2432_v53  ;;  %v2439_v58 = vmul.f32 %v11219_v63, %v2427_v57 }
 0x6d3   : > { %8087 = vmatpush3.bf16.msra.mxu0 %v2461_v62 }
 0x6d4   : > { %v2407_v26 = vpop.permute.xlu1 %2406  ;;  %v2377_v38 = vpop.permute.xlu0 %2376  ;;  %v2480_v8 = vpack.c.bf16 %v2444_v4, %v2443_v27 }
 0x6d5   : > { %v2428_v23 = vsel %vm2424_vm3, %v2383_v60, %v2407_v26  ;;  %2579 = vmatmul.mubr.bf16.gmra.mxu1 %v8920_v45  ;;  %v8923_v60 = vld [vmem:[%s15042_s4 + $0x30] ss:$20 sps:$4 sm:$0xff]   ;;  %s15489_s4 = smov 11  }
 0x6d6   : > { %v2440_v9 = vmul.f32 %v11219_v63, %v2428_v23  ;;  %2620 = vmatmul.mubr.bf16.vlgmr.msra.gmra.mxu0 %v8915_v56  ;;  %8498 = vmatprep.subr.bf16.mxu1 %v2480_v8 }
 0x6d7   : > { %8499 = vmatpush3.bf16.msra.mxu1 %v2480_v8  ;;  %2627 = vmatprep.mubr.bf16.mxu0 %v8921_v11 }
 0x6d8   : > { %v2379_v2 = vpop.permute.xlu1 %2378  ;;  %8500 = vmatprep.subr.bf16.mxu1 %v2479_v61  ;;  %v2401_v39 = vpop.permute.xlu0 %2400  ;;  %8506 = vmatprep.mubr.msk.bf16.mxu1 %vm2531_vm4, %v8924_v24  ;;  %v2478_v36 = vpack.c.bf16 %v2440_v9, %v2439_v58 }
 0x6d9   : > { %v2425_v44 = vsel %vm2424_vm3, %v2377_v38, %v2401_v39 }
 0x6da   : > { %v2437_v31 = vmul.f32 %v11219_v63, %v2425_v44 }
 0x6db   : > { %8501 = vmatpush3.bf16.msra.mxu1 %v2479_v61 }
 0x6dc   : > { %v2403_v30 = vpop.permute.xlu1 %2402  ;;  %8502 = vmatprep.subr.bf16.mxu1 %v2478_v36 }
 0x6dd   : > { %v2426_v55 = vsel %vm2424_vm3, %v2379_v2, %v2403_v30 }
 0x6de   : > { %v2438_v34 = vmul.f32 %v11219_v63, %v2426_v55  ;;  %2628 = vmatmul.mubr.bf16.gmra.mxu0 %v8923_v60 }
 0x6df   : > { %8503 = vmatpush3.bf16.msra.mxu1 %v2478_v36 }
 0x6e0   : > { %v2477_v14 = vpack.c.bf16 %v2438_v34, %v2437_v31  ;;  %v8928_v34 = vld [vmem:[#allocation8 + $0x4] ss:$12 sps:$4 sm:$0xff]  }
 0x6e1   : > { %3056 = vmatprep.mubr.bf16.mxu0 %v8928_v34 }
 0x6e2   : > { %8504 = vmatprep.subr.bf16.mxu1 %v2477_v14 }
 0x6e3   : > { %8505 = vmatpush3.bf16.msra.mxu1 %v2477_v14 }
 0x6e6   : > { %8507 = vmatmul.mubr.msk.bf16.vlgmr.msra.gmra.mxu1 %vm2531_vm4, %v8925_v46 }
 0x78d   : > { %v8060_v22 = vpop.f32.mrf.mxu1 }
 0x78f   : > { %v8061_v18 = vpop.f32.mrf.mxu1 }
 0x790   : > { %v8062_v32 = vadd.f32 %v8061_v18, %v8060_v22 }
 0x791   : > { %v8063_v12 = vpop.f32.mrf.mxu1 }
 0x793   : > { %v8064_v42 = vpop.f32.mrf.mxu1 }
 0x794   : > { %v8065_v50 = vadd.f32 %v8064_v42, %v8063_v12  ;;  %v8929_v42 = vld [vmem:[#allocation8 + $0x8] ss:$12 sps:$4 sm:$0xff]  }
 0x795   : > { %v8066_v54 = vpop.f32.mrf.mxu1  ;;  %8514 = vmatprep.mubr.msk.bf16.mxu1 %vm3017_vm5, %v8929_v42 }
 0x796   : > { %v8088_v16 = vpop.f32.mrf.mxu0 }
 0x797   : > { %v8067_v49 = vpop.f32.mrf.mxu1 }
 0x798   : > { %v8089_v10 = vpop.f32.mrf.mxu0  ;;  %v8068_v48 = vadd.f32 %v8067_v49, %v8066_v54 }
 0x799   : > { %v8090_v41 = vadd.f32 %v8089_v10, %v8088_v16  ;;  %v8069_v17 = vpop.f32.mrf.mxu1 }
 0x79a   : > { %v8091_v13 = vpop.f32.mrf.mxu0 }
 0x79b   : > { %v2622_v29 = vadd.f32 %v8090_v41, %v8062_v32  ;;  %v8070_v53 = vpop.f32.mrf.mxu1 }
 0x79c   : > { %v8092_v59 = vpop.f32.mrf.mxu0  ;;  %v8071_v4 = vadd.f32 %v8070_v53, %v8069_v17 }
 0x79d   : > { %v8093_v37 = vadd.f32 %v8092_v59, %v8091_v13 }
 0x79e   : > { %v8094_v21 = vpop.f32.mrf.mxu0 }
 0x79f   : > { %v2625_v43 = vadd.f32 %v8093_v37, %v8065_v50 }
 0x7a0   : > { %v8095_v6 = vpop.f32.mrf.mxu0 }
 0x7a1   : > { %v8096_v51 = vadd.f32 %v8095_v6, %v8094_v21 }
 0x7a2   : > { %v8097_v20 = vpop.f32.mrf.mxu0 }
 0x7a3   : > { %v2630_v25 = vadd.f32 %v8096_v51, %v8068_v48 }
 0x7a4   : > { %v8098_v62 = vpop.f32.mrf.mxu0 }
 0x7a5   : > { %v8099_v45 = vadd.f32 %v8098_v62, %v8097_v20 }
 0x7a6   : > { %v8508_v27 = vpop.f32.mrf.mxu1 }
 0x7a7   : > { %v2679_v56 = vadd.f32 %v8508_v27, %v2630_v25  ;;  %v2633_v26 = vadd.f32 %v8099_v45, %v8071_v4 }
 0x7a8   : > { %v2670_v11 = vpop.f32.mrf.mxu1 }
 0x7a9   : > { %vm2687_vm6 = vcmp.gt.f32.partialorder %v2679_v56, 0.0  ;;  %v2691_v1 = vmul.f32 0.2, %v2679_v56  ;;  %v2671_v9 = vadd.f32 %v2670_v11, %v2622_v29 }
 0x7aa   : > { %v8509_v38 = vpop.f32.mrf.mxu1 }
 0x7ab   : > { %v11257_v8 = vsel %vm2687_vm6, %v2679_v56, %v2691_v1  ;;  %v2682_v24 = vadd.f32 %v8509_v38, %v2633_v26  ;;  %v2689_v58 = vmul.f32 0.2, %v2671_v9  ;;  %vm2685_vm14 = vcmp.gt.f32.partialorder %v2671_v9, 0.0 }
 0x7ac   : > { %2909 = vrot.lane.b32.xlu0 %v11257_v8, %s14863_s8  ;;  %v2673_v61 = vpop.f32.mrf.mxu1  ;;  %v3373_v17 = vsub.f32 0.0, %v11257_v8 }
 0x7ad   : > { %vm2688_vm12 = vcmp.gt.f32.partialorder %v2682_v24, 0.0  ;;  %v2692_v57 = vmul.f32 0.2, %v2682_v24  ;;  %v2674_v2 = vadd.f32 %v2673_v61, %v2625_v43  ;;  %v11323_v39 = vsel %vm2685_vm14, %v2671_v9, %v2689_v58 }
 0x7ae   : > { %v3371_v12 = vsub.f32 0.0, %v11323_v39  ;;  %vm3363_vm7 = vcmp.eq.f32.partialorder %v11323_v39, 0.0 }
 0x7af   : > { %v11261_v23 = vsel %vm2688_vm12, %v2682_v24, %v2692_v57  ;;  %v2690_v36 = vmul.f32 0.2, %v2674_v2  ;;  %vm2686_vm13 = vcmp.gt.f32.partialorder %v2674_v2, 0.0  ;;  %vm3365_vm12 = vcmp.eq.f32.partialorder %v11257_v8, 0.0 }
 0x7b0   : > { %2911 = vrot.lane.b32.xlu1 %v11261_v23, %s14863_s8  ;;  %2921 = vrot.lane.b32.xlu0 %v11257_v8, %s14861_s13  ;;  %v3374_v41 = vsub.f32 0.0, %v11261_v23  ;;  %v11401_v13 = vsel %vm3363_vm7, -999.0, %v3371_v12  ;;  %vm3366_vm6 = vcmp.eq.f32.partialorder %v11261_v23, 0.0  ;;  %v11423_v53 = vsel %vm3365_vm12, -999.0, %v3373_v17 }
 0x7b1   : > { %v11329_v60 = vsel %vm2686_vm13, %v2674_v2, %v2690_v36 }
 0x7b2   : > { %v11410_v37 = vsel %vm3366_vm6, -999.0, %v3374_v41  ;;  %v3372_v48 = vsub.f32 0.0, %v11329_v60  ;;  %vm3364_vm14 = vcmp.eq.f32.partialorder %v11329_v60, 0.0 }
 0x7b4   : > { %2923 = vrot.lane.b32.xlu1 %v11261_v23, %s14861_s13  ;;  %2809 = vrot.lane.b32.xlu0 %v11257_v8, %s9507_s3  ;;  %v11428_v25 = vsel %vm3364_vm14, -999.0, %v3372_v48 }
 0x7b8   : > { %2811 = vrot.lane.b32.xlu1 %v11261_v23, %s9507_s3  ;;  %2821 = vrot.lane.b32.xlu0 %v11257_v8, %s14902_s5 }
 0x7bc   : > { %2823 = vrot.lane.b32.xlu1 %v11261_v23, %s14902_s5  ;;  %2877 = vrot.lane.b32.xlu0 %v11257_v8, %s9517_s7 }
 0x7c0   : > { %2879 = vrot.lane.b32.xlu1 %v11261_v23, %s9517_s7  ;;  %2889 = vrot.lane.b32.xlu0 %v11257_v8, %s9518_s10 }
 0x7c4   : > { %2891 = vrot.lane.b32.xlu1 %v11261_v23, %s9518_s10  ;;  %2777 = vrot.lane.b32.xlu0 %v11257_v8, %s9513_s26 }
 0x7c8   : > { %2779 = vrot.lane.b32.xlu1 %v11261_v23, %s9513_s26  ;;  %2789 = vrot.lane.b32.xlu0 %v11257_v8, %s9514_s1 }
 0x7cc   : > { %2791 = vrot.lane.b32.xlu1 %v11261_v23, %s9514_s1  ;;  %2845 = vrot.lane.b32.xlu0 %v11257_v8, %s14859_s19 }
 0x7d0   : > { %2847 = vrot.lane.b32.xlu1 %v11261_v23, %s14859_s19  ;;  %2857 = vrot.lane.b32.xlu0 %v11257_v8, %s15110_s22  ;;  %s15116_s19 = smov 55  }
 0x7d4   : > { %2859 = vrot.lane.b32.xlu1 %v11261_v23, %s15110_s22  ;;  %2745 = vrot.lane.b32.xlu0 %v11257_v8, %s15111_s27 }
 0x7d8   : > { %2747 = vrot.lane.b32.xlu1 %v11261_v23, %s15111_s27  ;;  %2757 = vrot.lane.b32.xlu0 %v11257_v8, %s15112_s16 }
 0x7dc   : > { %2759 = vrot.lane.b32.xlu1 %v11261_v23, %s15112_s16  ;;  %2713 = vrot.lane.b32.xlu0 %v11257_v8, %s15113_s23 }
 0x7e0   : > { %2715 = vrot.lane.b32.xlu1 %v11261_v23, %s15113_s23  ;;  %2725 = vrot.lane.b32.xlu0 %v11257_v8, %s15114_s6 }
 0x7e4   : > { %2727 = vrot.lane.b32.xlu1 %v11261_v23, %s15114_s6  ;;  %2941 = vrot.lane.b32.xlu0 %v11257_v8, %s15115_s11 }
 0x7e8   : > { %2943 = vrot.lane.b32.xlu1 %v11261_v23, %s15115_s11  ;;  %2953 = vrot.lane.b32.xlu0 %v11257_v8, %s15116_s19 }
 0x7ec   : > { %2955 = vrot.lane.b32.xlu1 %v11261_v23, %s15116_s19  ;;  %2905 = vrot.lane.b32.xlu0 %v11323_v39, %s14863_s8 }
 0x7f0   : > { %2907 = vrot.lane.b32.xlu1 %v11329_v60, %s14863_s8  ;;  %2917 = vrot.lane.b32.xlu0 %v11323_v39, %s14861_s13 }
 0x7f4   : > { %2919 = vrot.lane.b32.xlu1 %v11329_v60, %s14861_s13  ;;  %2805 = vrot.lane.b32.xlu0 %v11323_v39, %s9507_s3 }
 0x7f8   : > { %2807 = vrot.lane.b32.xlu1 %v11329_v60, %s9507_s3  ;;  %2817 = vrot.lane.b32.xlu0 %v11323_v39, %s14902_s5  ;;  %s15117_s3 = smov 127  }
 0x7fc   : > { %2819 = vrot.lane.b32.xlu1 %v11329_v60, %s14902_s5  ;;  %2873 = vrot.lane.b32.xlu0 %v11323_v39, %s9517_s7 }
 0x800   : > { %2875 = vrot.lane.b32.xlu1 %v11329_v60, %s9517_s7  ;;  %2885 = vrot.lane.b32.xlu0 %v11323_v39, %s9518_s10  ;;  %s14896_s7 = smov 115  }
 0x804   : > { %2887 = vrot.lane.b32.xlu1 %v11329_v60, %s9518_s10  ;;  %2773 = vrot.lane.b32.xlu0 %v11323_v39, %s9513_s26  ;;  %s14882_s10 = smov 5  }
 0x808   : > { %2775 = vrot.lane.b32.xlu1 %v11329_v60, %s9513_s26  ;;  %2785 = vrot.lane.b32.xlu0 %v11323_v39, %s9514_s1  ;;  %s15119_s26 = sld [smem:[#allocation214_spill]] }
 0x80c   : > { %2787 = vrot.lane.b32.xlu1 %v11329_v60, %s9514_s1  ;;  %2841 = vrot.lane.b32.xlu0 %v11323_v39, %s15117_s3  ;;  %s15120_s1 = smov 113  }
 0x810   : > { %2843 = vrot.lane.b32.xlu1 %v11329_v60, %s15117_s3  ;;  %2853 = vrot.lane.b32.xlu0 %v11323_v39, %s15110_s22 }
 0x814   : > { %2855 = vrot.lane.b32.xlu1 %v11329_v60, %s15110_s22  ;;  %2741 = vrot.lane.b32.xlu0 %v11323_v39, %s15111_s27 }
 0x818   : > { %2743 = vrot.lane.b32.xlu1 %v11329_v60, %s15111_s27  ;;  %2753 = vrot.lane.b32.xlu0 %v11323_v39, %s15112_s16  ;;  %s14878_s27 = smov 3  }
 0x81c   : > { %2755 = vrot.lane.b32.xlu1 %v11329_v60, %s15112_s16  ;;  %2709 = vrot.lane.b32.xlu0 %v11323_v39, %s15113_s23  ;;  %s15121_s16 = smov 15  }
 0x81e   : > { %v2910_v44 = vpop.permute.xlu0 %2909 }
 0x820   : > { %2711 = vrot.lane.b32.xlu1 %v11329_v60, %s15113_s23  ;;  %2721 = vrot.lane.b32.xlu0 %v11323_v39, %s15114_s6  ;;  %s14876_s23 = smov 124  }
 0x822   : > { %v2912_v30 = vpop.permute.xlu1 %2911  ;;  %v2922_v55 = vpop.permute.xlu0 %2921 }
 0x823   : > { %v2931_v31 = vsel %vm2355_vm2, %v2910_v44, %v2922_v55 }
 0x824   : > { %2723 = vrot.lane.b32.xlu1 %v11329_v60, %s15114_s6  ;;  %2937 = vrot.lane.b32.xlu0 %v11323_v39, %s15115_s11  ;;  %v2935_v18 = vmul.f32 %v2931_v31, %v11016_v35  ;;  %s14865_s6 = smov 12  }
 0x826   : > { %v2924_v14 = vpop.permute.xlu1 %2923  ;;  %v2810_v46 = vpop.permute.xlu0 %2809 }
 0x827   : > { %v2932_v22 = vsel %vm2355_vm2, %v2912_v30, %v2924_v14 }
 0x828   : > { %v2936_v32 = vmul.f32 %v2932_v22, %v11016_v35  ;;  %2939 = vrot.lane.b32.xlu1 %v11329_v60, %s15115_s11  ;;  %2949 = vrot.lane.b32.xlu0 %v11323_v39, %s15116_s19  ;;  %s14900_s11 = smov 116  }
 0x82a   : > { %v2812_v16 = vpop.permute.xlu1 %2811  ;;  %v2822_v54 = vpop.permute.xlu0 %2821  ;;  %v2984_v10 = vpack.c.bf16 %v2936_v32, %v2935_v18 }
 0x82b   : > { %v2831_v29 = vsel %vm912_vm9, %v2810_v46, %v2822_v54 }
 0x82c   : > { %8106 = vmatprep.subr.bf16.mxu0 %v2984_v10  ;;  %2951 = vrot.lane.b32.xlu1 %v11329_v60, %s15116_s19  ;;  %v2835_v21 = vmul.f32 %v2831_v29, %v10971_v28  ;;  %s14898_s19 = smov 4  }
 0x82d   : > { %3395 = vrot.lane.b32.xlu0 %v11401_v13, %s15117_s3 }
 0x82e   : > { %v2824_v49 = vpop.permute.xlu1 %2823  ;;  %v11407_v59 = vpop.permute.xlu0 %2877 }
 0x82f   : > { %v2832_v50 = vsel %vm912_vm9, %v2812_v16, %v2824_v49 }
 0x830   : > { %v2836_v43 = vmul.f32 %v2832_v50, %v10971_v28  ;;  %3401 = vrot.lane.b32.xlu1 %v11410_v37, %s15117_s3 }
 0x831   : > { %3419 = vrot.lane.b32.xlu0 %v11401_v13, %s15110_s22 }
 0x832   : > { %v2976_v6 = vpack.c.bf16 %v2836_v43, %v2835_v21  ;;  %v2880_v51 = vpop.permute.xlu1 %2879  ;;  %v2890_v20 = vpop.permute.xlu0 %2889 }
 0x834   : > { %8107 = vmatpush3.bf16.msra.mxu0 %v2976_v6  ;;  %3425 = vrot.lane.b32.xlu1 %v11410_v37, %s15110_s22 }
 0x835   : > { %3399 = vrot.lane.b32.xlu0 %v11423_v53, %s15117_s3 }
 0x836   : > { %v2892_v62 = vpop.permute.xlu1 %2891  ;;  %v2778_v45 = vpop.permute.xlu0 %2777 }
 0x838   : > { %3397 = vrot.lane.b32.xlu1 %v11428_v25, %s15117_s3 }
 0x839   : > { %3423 = vrot.lane.b32.xlu0 %v11423_v53, %s15110_s22 }
 0x83a   : > { %v2780_v27 = vpop.permute.xlu1 %2779  ;;  %v2790_v4 = vpop.permute.xlu0 %2789 }
 0x83c   : > { %3421 = vrot.lane.b32.xlu1 %v11428_v25, %s15110_s22 }
 0x83e   : > { %v2792_v56 = vpop.permute.xlu1 %2791  ;;  %v2846_v11 = vpop.permute.xlu0 %2845 }
 0x842   : > { %v2848_v1 = vpop.permute.xlu1 %2847  ;;  %v2858_v26 = vpop.permute.xlu0 %2857 }
 0x843   : > { %v11437_v38 = vsel %vm2217_vm10, %v2846_v11, %v2858_v26 }
 0x844   : > { %v11446_v61 = vmax.f32 %v11257_v8, %v11437_v38 }
 0x846   : > { %v2860_v24 = vpop.permute.xlu1 %2859  ;;  %v11439_v57 = vpop.permute.xlu0 %2745 }
 0x847   : > { %v11442_v9 = vsel %vm2217_vm10, %v2848_v1, %v2860_v24  ;;  %v2900_v24 = vsel %vm2286_vm8, %v2880_v51, %v2892_v62  ;;  %v2799_v62 = vsel %vm2068_vm15, %v2778_v45, %v2790_v4 }
 0x848   : > { %v11450_v58 = vmax.f32 %v11261_v23, %v11442_v9 }
 0x84a   : > { %v11454_v2 = vpack.i.bf16 %v11450_v58, %v11446_v61  ;;  %v11456_v36 = vpop.permute.xlu1 %2747  ;;  %v11458_v44 = vpop.permute.xlu0 %2757 }
 0x84c   : > { %8837 = vrot.lane.b32.xlu1 %v11454_v2, %s14861_s13 }
 0x84e   : > { %v11462_v30 = vpop.permute.xlu1 %2759  ;;  %v11464_v55 = vpop.permute.xlu0 %2713 }
 0x852   : > { %v11466_v31 = vpop.permute.xlu1 %2715  ;;  %v11468_v34 = vpop.permute.xlu0 %2725 }
 0x856   : > { %v11470_v14 = vpop.permute.xlu1 %2727  ;;  %v2942_v46 = vpop.permute.xlu0 %2941 }
 0x85a   : > { %v2944_v22 = vpop.permute.xlu1 %2943  ;;  %v2954_v18 = vpop.permute.xlu0 %2953 }
 0x85b   : > { %v2963_v32 = vsel %vm2424_vm3, %v2942_v46, %v2954_v18 }
 0x85c   : > { %v2967_v54 = vmul.f32 %v11219_v63, %v2963_v32 }
 0x85e   : > { %v2956_v12 = vpop.permute.xlu1 %2955  ;;  %v2906_v42 = vpop.permute.xlu0 %2905 }
 0x85f   : > { %v2964_v16 = vsel %vm2424_vm3, %v2944_v22, %v2956_v12  ;;  %v2899_v22 = vsel %vm2286_vm8, %v11407_v59, %v2890_v20  ;;  %v2904_v12 = vmul.f32 %v2900_v24, %v11142_v7  ;;  %v2768_v24 = vsel %vm1999_vm1, %v11456_v36, %v11462_v30 }
 0x860   : > { %v2968_v10 = vmul.f32 %v11219_v63, %v2964_v16  ;;  %v2903_v51 = vmul.f32 %v2899_v22, %v11142_v7 }
 0x862   : > { %v2908_v41 = vpop.permute.xlu1 %2907  ;;  %v2918_v29 = vpop.permute.xlu0 %2917  ;;  %v2986_v49 = vpack.c.bf16 %v2968_v10, %v2967_v54 }
 0x863   : > { %v2929_v50 = vsel %vm2355_vm2, %v2906_v42, %v2918_v29  ;;  %v2800_v42 = vsel %vm2068_vm15, %v2780_v27, %v2792_v56  ;;  %v2982_v29 = vpack.c.bf16 %v2904_v12, %v2903_v51  ;;  %v2772_v12 = vmul.f32 %v2768_v24, %v10980_v3 }
 0x864   : > { %8510 = vmatprep.subr.bf16.mxu1 %v2986_v49  ;;  %v2933_v6 = vmul.f32 %v2929_v50, %v11016_v35  ;;  %v2804_v10 = vmul.f32 %v2800_v42, %v11080_v40 }
 0x865   : > { %8511 = vmatpush3.bf16.msra.mxu1 %v2986_v49  ;;  %v2803_v49 = vmul.f32 %v2799_v62, %v11080_v40 }
 0x866   : > { %v2920_v21 = vpop.permute.xlu1 %2919  ;;  %v2806_v43 = vpop.permute.xlu0 %2805 }
 0x867   : > { %v2930_v17 = vsel %vm2355_vm2, %v2908_v41, %v2920_v21  ;;  %v2974_v56 = vpack.c.bf16 %v2804_v10, %v2803_v49 }
 0x868   : > { %v2934_v48 = vmul.f32 %v2930_v17, %v11016_v35 }
 0x86a   : > { %v2808_v11 = vpop.permute.xlu1 %2807  ;;  %v2818_v1 = vpop.permute.xlu0 %2817  ;;  %v2983_v26 = vpack.c.bf16 %v2934_v48, %v2933_v6 }
 0x86b   : > { %v2829_v46 = vsel %vm912_vm9, %v2806_v43, %v2818_v1 }
 0x86c   : > { %8108 = vmatprep.subr.bf16.mxu0 %v2983_v26  ;;  %v2833_v35 = vmul.f32 %v2829_v46, %v10971_v28  ;;  %v2872_v26 = vmul.f32 %v11442_v9, %v11042_v15 }
 0x86e   : > { %v2820_v18 = vpop.permute.xlu1 %2819  ;;  %v2874_v32 = vpop.permute.xlu0 %2873 }
 0x86f   : > { %v2830_v16 = vsel %vm912_vm9, %v2808_v11, %v2820_v18  ;;  %v2871_v18 = vmul.f32 %v11437_v38, %v11042_v15 }
 0x870   : > { %v2834_v54 = vmul.f32 %v2830_v16, %v10971_v28 }
 0x872   : > { %v2975_v41 = vpack.c.bf16 %v2834_v54, %v2833_v35  ;;  %v2876_v59 = vpop.permute.xlu1 %2875  ;;  %v2886_v20 = vpop.permute.xlu0 %2885  ;;  %v2980_v35 = vpack.c.bf16 %v2872_v26, %v2871_v18 }
 0x873   : > { %v2897_v27 = vsel %vm2286_vm8, %v2874_v32, %v2886_v20  ;;  %v2767_v32 = vsel %vm1999_vm1, %v11439_v57, %v11458_v44 }
 0x874   : > { %8109 = vmatpush3.bf16.msra.mxu0 %v2975_v41  ;;  %v2901_v43 = vmul.f32 %v2897_v27, %v11142_v7  ;;  %v2771_v36 = vmul.f32 %v2767_v32, %v10980_v3  ;;  %v8926_v32 = vld [vmem:[#allocation8] ss:$12 sps:$4 sm:$0xff]  }
 0x875   : > { %8110 = vmatprep.subr.bf16.mxu0 %v2982_v29 }
 0x876   : > { %v2888_v50 = vpop.permute.xlu1 %2887  ;;  %v2774_v21 = vpop.permute.xlu0 %2773 }
 0x877   : > { %v2898_v28 = vsel %vm2286_vm8, %v2876_v59, %v2888_v50 }
 0x878   : > { %v2902_v45 = vmul.f32 %v2898_v28, %v11142_v7  ;;  %8111 = vmatpush3.bf16.msra.mxu0 %v2974_v56 }
 0x87a   : > { %v2776_v4 = vpop.permute.xlu1 %2775  ;;  %v2786_v17 = vpop.permute.xlu0 %2785  ;;  %v2981_v6 = vpack.c.bf16 %v2902_v45, %v2901_v43  ;;  %v2735_v45 = vsel %vm1930_vm0, %v11464_v55, %v11468_v34  ;;  %v2837_v55 = vmul.f32 %v11323_v39, %v11127_v19 }
 0x87b   : > { %v2797_v48 = vsel %vm2068_vm15, %v2774_v21, %v2786_v17  ;;  %v2840_v21 = vmul.f32 %v11261_v23, %v11127_v19  ;;  %v2838_v23 = vmul.f32 %v11329_v60, %v11127_v19 }
 0x87c   : > { %8112 = vmatprep.subr.bf16.mxu0 %v2981_v6  ;;  %v2801_v7 = vmul.f32 %v2797_v48, %v11080_v40 }
 0x87d   : > { %v2977_v24 = vpack.c.bf16 %v2838_v23, %v2837_v55 }
 0x87e   : > { %v2788_v11 = vpop.permute.xlu1 %2787  ;;  %v2842_v1 = vpop.permute.xlu0 %2841 }
 0x87f   : > { %v2798_v46 = vsel %vm2068_vm15, %v2776_v4, %v2788_v11  ;;  %v2839_v4 = vmul.f32 %v11257_v8, %v11127_v19  ;;  %v2739_v11 = vmul.f32 %v2735_v45, %v11106_v33  ;;  %v8941_v45 = vld [vmem:[#allocation20 + $0x20] ss:$8 sps:$4 sm:$0xff]  }
 0x880   : > { %v2802_v22 = vmul.f32 %v2798_v46, %v11080_v40  ;;  %v2972_v40 = vpack.c.bf16 %v2772_v12, %v2771_v36  ;;  %v8931_v12 = vld [vmem:[#allocation8 + $0x1c] ss:$12 sps:$4 sm:$0xff]  }
 0x881   : > { %v2978_v48 = vpack.c.bf16 %v2840_v21, %v2839_v4  ;;  %v8946_v4 = vld [vmem:[#allocation20 + $0x14] ss:$8 sps:$4 sm:$0xff]  }
 0x882   : > { %v2973_v9 = vpack.c.bf16 %v2802_v22, %v2801_v7  ;;  %v2844_v42 = vpop.permute.xlu1 %2843  ;;  %v2854_v16 = vpop.permute.xlu0 %2853 }
 0x883   : > { %v2865_v30 = vsel %vm2217_vm10, %v2842_v1, %v2854_v16 }
 0x884   : > { %8113 = vmatpush3.bf16.msra.mxu0 %v2973_v9  ;;  %v2869_v62 = vmul.f32 %v2865_v30, %v11042_v15  ;;  %v11517_v57 = vmax.f32 %v11323_v39, %v2865_v30 }
 0x885   : > { %8114 = vmatprep.subr.bf16.mxu0 %v2980_v35 }
 0x886   : > { %v2856_v54 = vpop.permute.xlu1 %2855  ;;  %v2742_v51 = vpop.permute.xlu0 %2741 }
 0x887   : > { %v2866_v38 = vsel %vm2217_vm10, %v2844_v42, %v2856_v54  ;;  %v8930_v54 = vld [vmem:[#allocation8 + $0x20] ss:$12 sps:$4 sm:$0xff]  }
 0x888   : > { %v2870_v44 = vmul.f32 %v2866_v38, %v11042_v15  ;;  %v11521_v10 = vmax.f32 %v11329_v60, %v2866_v38  ;;  %8115 = vmatpush3.bf16.msra.mxu0 %v2972_v40  ;;  %v2736_v15 = vsel %vm1930_vm0, %v11466_v31, %v11470_v14  ;;  %v8933_v40 = vld [vmem:[#allocation8 + $0x18] ss:$12 sps:$4 sm:$0xff]  }
 0x889   : > { %v2740_v17 = vmul.f32 %v2736_v15, %v11106_v33 }
 0x88a   : > { %v11525_v41 = vpack.i.bf16 %v11521_v10, %v11517_v57  ;;  %v2744_v59 = vpop.permute.xlu1 %2743  ;;  %v2754_v20 = vpop.permute.xlu0 %2753  ;;  %v2979_v29 = vpack.c.bf16 %v2870_v44, %v2869_v62 }
 0x88b   : > { %v2765_v49 = vsel %vm1999_vm1, %v2742_v51, %v2754_v20  ;;  %v2970_v34 = vpack.c.bf16 %v2740_v17, %v2739_v11  ;;  %v8944_v17 = vld [vmem:[#allocation20 + $0x10] ss:$8 sps:$4 sm:$0xff]  }
 0x88c   : > { %8847 = vrot.lane.b32.xlu1 %v11525_v41, %s14861_s13  ;;  %8116 = vmatprep.subr.bf16.mxu0 %v2979_v29  ;;  %v2769_v28 = vmul.f32 %v2765_v49, %v10980_v3 }
 0x88e   : > { %v2756_v27 = vpop.permute.xlu1 %2755  ;;  %v2710_v56 = vpop.permute.xlu0 %2709 }
 0x88f   : > { %v2766_v50 = vsel %vm1999_vm1, %v2744_v59, %v2756_v27  ;;  %v15118_v59 = vmov 0  }
 0x890   : > { %v2770_v43 = vmul.f32 %v2766_v50, %v10980_v3 }
 0x892   : > { %v2971_v6 = vpack.c.bf16 %v2770_v43, %v2769_v28  ;;  %v2712_v31 = vpop.permute.xlu1 %2711  ;;  %v2722_v14 = vpop.permute.xlu0 %2721  ;;  %v8937_v28 = vld [vmem:[%s15119_s26] sm:$0xff]   ;;  %v8940_v43 = vld [vmem:[#allocation20 + $0x34] ss:$8 sps:$4 sm:$0xff]  }
 0x893   : > { %v2733_v3 = vsel %vm1930_vm0, %v2710_v56, %v2722_v14 }
 0x894   : > { %8117 = vmatpush3.bf16.msra.mxu0 %v2971_v6  ;;  %v2737_v46 = vmul.f32 %v2733_v3, %v11106_v33  ;;  %v8949_v6 = vld [vmem:[#allocation20 + $0x4] ss:$8 sps:$4 sm:$0xff]  }
 0x895   : > { %8118 = vmatprep.subr.bf16.mxu0 %v2978_v48 }
 0x896   : > { %v2724_v8 = vpop.permute.xlu1 %2723  ;;  %v2938_v1 = vpop.permute.xlu0 %2937 }
 0x897   : > { %v2734_v26 = vsel %vm1930_vm0, %v2712_v31, %v2724_v8  ;;  %v8947_v31 = vld [vmem:[#allocation20] ss:$8 sps:$4 sm:$0xff]  }
 0x898   : > { %v2738_v7 = vmul.f32 %v2734_v26, %v11106_v33  ;;  %8119 = vmatpush3.bf16.msra.mxu0 %v2970_v34 }
 0x899   : > { %8120 = vmatprep.subr.bf16.mxu0 %v2977_v24 }
 0x89a   : > { %v2969_v60 = vpack.c.bf16 %v2738_v7, %v2737_v46  ;;  %v2940_v22 = vpop.permute.xlu1 %2939  ;;  %v2950_v18 = vpop.permute.xlu0 %2949 }
 0x89b   : > { %v2961_v19 = vsel %vm2424_vm3, %v2938_v1, %v2950_v18 }
 0x89c   : > { %8121 = vmatpush3.bf16.msra.mxu0 %v2969_v60  ;;  %v2965_v16 = vmul.f32 %v11219_v63, %v2961_v19 }
 0x89e   : > { %v2952_v39 = vpop.permute.xlu1 %2951 }
 0x89f   : > { %v2962_v9 = vsel %vm2424_vm3, %v2940_v22, %v2952_v39  ;;  %v3396_v42 = vpop.permute.xlu0 %3395  ;;  %3057 = vmatmul.mubr.bf16.vlgmr.msra.gmra.mxu0 %v8926_v32 }
 0x8a0   : > { %v2966_v35 = vmul.f32 %v11219_v63, %v2962_v9  ;;  %3064 = vmatprep.mubr.bf16.mxu0 %v8931_v12 }
 0x8a2   : > { %v3402_v33 = vpop.permute.xlu1 %3401  ;;  %v2985_v36 = vpack.c.bf16 %v2966_v35, %v2965_v16 }
 0x8a3   : > { %v3420_v30 = vpop.permute.xlu0 %3419 }
 0x8a4   : > { %8512 = vmatprep.subr.bf16.mxu1 %v2985_v36  ;;  %v3443_v50 = vsel %vm2217_vm10, %v3396_v42, %v3420_v30 }
 0x8a5   : > { %8513 = vmatpush3.bf16.msra.mxu1 %v2985_v36  ;;  %v11596_v21 = vmax.f32 %v11401_v13, %v3443_v50  ;;  %v8943_v13 = vld [vmem:[#allocation20 + $0x24] ss:$8 sps:$4 sm:$0xff]  }
 0x8a6   : > { %v3426_v51 = vpop.permute.xlu1 %3425  ;;  %3198 = vmatprep.subr.bf16.mxu1 %v8940_v43 }
 0x8a7   : > { %v3446_v38 = vsel %vm2217_vm10, %v3402_v33, %v3426_v51  ;;  %v3400_v62 = vpop.permute.xlu0 %3399  ;;  %3065 = vmatmul.mubr.bf16.gmra.mxu0 %v8933_v40 }
 0x8a8   : > { %v11559_v44 = vmax.f32 %v11410_v37, %v3446_v38  ;;  %8515 = vmatmul.mubr.msk.bf16.vlgmr.msra.gmra.mxu1 %vm3017_vm5, %v8930_v54  ;;  %v8934_v37 = vld [vmem:[%s15119_s26 + $0x18] sm:$0xff]  }
 0x8a9   : > { %3222 = vmatprep.mubr.bf16.mxu1 %v15118_v59  ;;  %8518 = vmatprep.subr.bf16.mxu0 %v8934_v37 }
 0x8aa   : > { %v3398_v63 = vpop.permute.xlu1 %3397  ;;  %3473 = vrot.lane.b32.xlu1 %v11559_v44, %s14863_s8  ;;  %8519 = vmatpush3.bf16.msra.mxu0 %v8934_v37 }
 0x8ab   : > { %v3424_v20 = vpop.permute.xlu0 %3423 }
 0x8ac   : > { %v3445_v29 = vsel %vm2217_vm10, %v3400_v62, %v3424_v20 }
 0x8ad   : > { %v11567_v49 = vmax.f32 %v11423_v53, %v3445_v29  ;;  %v8935_v53 = vld [vmem:[%s15119_s26 + $0x10] sm:$0xff]  }
 0x8ae   : > { %v3422_v27 = vpop.permute.xlu1 %3421  ;;  %3497 = vrot.lane.b32.xlu1 %v11559_v44, %s14861_s13  ;;  %8520 = vmatprep.subr.bf16.mxu0 %v8935_v53 }
 0x8af   : > { %v3444_v56 = vsel %vm2217_vm10, %v3398_v63, %v3422_v27  ;;  %3471 = vrot.lane.b32.xlu0 %v11567_v49, %s14863_s8  ;;  %8521 = vmatpush3.bf16.msra.mxu0 %v8935_v53 }
 0x8b0   : > { %v11578_v15 = vmax.f32 %v11428_v25, %v3444_v56  ;;  %v8936_v25 = vld [vmem:[%s15119_s26 + $0x8] sm:$0xff]  }
 0x8b1   : > { %8522 = vmatprep.subr.bf16.mxu0 %v8936_v25 }
 0x8b2   : > { %3469 = vrot.lane.b32.xlu1 %v11578_v15, %s14863_s8 }
 0x8b3   : > { %3495 = vrot.lane.b32.xlu0 %v11567_v49, %s14861_s13  ;;  %8523 = vmatpush3.bf16.msra.mxu0 %v8936_v25 }
 0x8b4   : > { %8524 = vmatprep.subr.bf16.mxu0 %v8937_v28 }
 0x8b6   : > { %3493 = vrot.lane.b32.xlu1 %v11578_v15, %s14861_s13 }
 0x8b7   : > { %8832 = vrot.lane.b32.xlu0 %v11454_v2, %s14863_s8  ;;  %8525 = vmatpush3.bf16.msra.mxu0 %v8937_v28  ;;  %v8938_v2 = vld [vmem:[#allocation20 + $0x30] ss:$8 sps:$4 sm:$0xff]  }
 0x8b8   : > { %3199 = vmatpush1.bf16.msra.mxu1 %v8938_v2 }
 0x8b9   : > { %3200 = vmatprep.subr.bf16.mxu1 %v8943_v13 }
 0x8bb   : > { %3467 = vrot.lane.b32.xlu0 %v11596_v21, %s14863_s8 }
 0x8bc   : > { %3201 = vmatpush1.bf16.msra.mxu1 %v8941_v45 }
 0x8bd   : > { %3202 = vmatprep.subr.bf16.mxu1 %v8946_v4 }
 0x8be   : > { %v8838_v11 = vpop.permute.xlu1 %8837 }
 0x8bf   : > { %3491 = vrot.lane.b32.xlu0 %v11596_v21, %s14861_s13  ;;  %v8840_v8 = vunpack.i.h.bf16 %v8838_v11  ;;  %v8839_v1 = vunpack.i.l.bf16 %v8838_v11  ;;  %s14867_s13 = smov 125  }
 0x8c0   : > { %3203 = vmatpush1.bf16.msra.mxu1 %v8944_v17 }
 0x8c1   : > { %3204 = vmatprep.subr.bf16.mxu1 %v8949_v6 }
 0x8c3   : > { %8842 = vrot.lane.b32.xlu0 %v11525_v41, %s14863_s8  ;;  %s14914_s8 = smov 13  }
 0x8c4   : > { %3205 = vmatpush1.bf16.msra.mxu1 %v8947_v31 }
 0x8fe   : > { %v8848_v26 = vpop.permute.xlu1 %8847 }
 0x8ff   : > { %v8850_v60 = vunpack.i.h.bf16 %v8848_v26  ;;  %v8849_v22 = vunpack.i.l.bf16 %v8848_v26 }
 0x921   : > { %v11607_v14 = vpop.permute.xlu0 %3471 }
 0x925   : > { %v11609_v48 = vpop.permute.xlu0 %3495 }
 0x929   : > { %v8833_v41 = vpop.permute.xlu0 %8832 }
 0x92a   : > { %v8835_v3 = vunpack.i.h.bf16 %v8833_v41  ;;  %v8834_v55 = vunpack.i.l.bf16 %v8833_v41 }
 0x92c   : > { %v3350_v24 = vsel %vm2355_vm2, %v8835_v3, %v8840_v8  ;;  %v3349_v46 = vsel %vm2355_vm2, %v8834_v55, %v8839_v1 }
 0x92d   : > { %v11611_v23 = vpop.permute.xlu0 %3467  ;;  %v3358_v12 = vmax.f32 %v11450_v58, %v3350_v24  ;;  %v3357_v19 = vmax.f32 %v11446_v61, %v3349_v46 }
 0x92f   : > { %v3556_v33 = vpack.c.bf16 %v3358_v12, %v3357_v19 }
 0x931   : > { %v11613_v34 = vpop.permute.xlu0 %3491 }
 0x935   : > { %v8843_v7 = vpop.permute.xlu0 %8842 }
 0x936   : > { %v8845_v18 = vunpack.i.h.bf16 %v8843_v7  ;;  %v8844_v32 = vunpack.i.l.bf16 %v8843_v7 }
 0x938   : > { %v3348_v39 = vsel %vm2355_vm2, %v8845_v18, %v8850_v60  ;;  %v3347_v9 = vsel %vm2355_vm2, %v8844_v32, %v8849_v22 }
 0x939   : > { %v3356_v42 = vmax.f32 %v11521_v10, %v3348_v39  ;;  %v3355_v16 = vmax.f32 %v11517_v57, %v3347_v9 }
 0x93b   : > { %v3555_v35 = vpack.c.bf16 %v3356_v42, %v3355_v16  ;;  %v11756_v42 = vpop.permute.xlu1 %3473 }
 0x93d   : > { %8526 = vmatprep.mubr.msk.bf16.mxu0 %vm2531_vm4, %v3555_v35 }
 0x93e   : > { %8527 = vmatmul.mubr.msk.bf16.vlgmr.msra.gmra.mxu0 %vm2531_vm4, %v3556_v33 }
 0x95f   : > { %v8122_v36 = vpop.f32.mrf.mxu0 }
 0x961   : > { %v8123_v30 = vpop.f32.mrf.mxu0 }
 0x962   : > { %v8124_v54 = vadd.f32 %v8123_v30, %v8122_v36 }
 0x963   : > { %v8125_v40 = vpop.f32.mrf.mxu0 }
 0x965   : > { %v8126_v58 = vpop.f32.mrf.mxu0 }
 0x966   : > { %v8127_v10 = vadd.f32 %v8126_v58, %v8125_v40  ;;  %v11772_v40 = vpop.permute.xlu1 %3497 }
 0x967   : > { %v8128_v61 = vpop.f32.mrf.mxu0 }
 0x968   : > { %v8516_v51 = vpop.f32.mrf.mxu1 }
 0x969   : > { %v8129_v38 = vpop.f32.mrf.mxu0 }
 0x96a   : > { %v3107_v62 = vpop.f32.mrf.mxu1  ;;  %v8130_v63 = vadd.f32 %v8129_v38, %v8128_v61  ;;  %v11786_v61 = vpop.permute.xlu1 %3469 }
 0x96b   : > { %v3108_v20 = vadd.f32 %v8124_v54, %v3107_v62  ;;  %v8131_v29 = vpop.f32.mrf.mxu0 }
 0x96c   : > { %v8517_v57 = vpop.f32.mrf.mxu1  ;;  %v3116_v37 = vadd.f32 %v8516_v51, %v8130_v63 }
 0x96d   : > { %vm3122_vm15 = vcmp.gt.f32.partialorder %v3108_v20, 0.0  ;;  %v3126_v27 = vmul.f32 0.2, %v3108_v20  ;;  %v8132_v56 = vpop.f32.mrf.mxu0 }
 0x96e   : > { %v3110_v53 = vpop.f32.mrf.mxu1  ;;  %v8133_v28 = vadd.f32 %v8132_v56, %v8131_v29  ;;  %v3128_v13 = vmul.f32 0.2, %v3116_v37  ;;  %vm3124_vm3 = vcmp.gt.f32.partialorder %v3116_v37, 0.0  ;;  %v11792_v51 = vpop.permute.xlu1 %3493 }
 0x96f   : > { %v11625_v50 = vsel %vm3122_vm15, %v3108_v20, %v3126_v27  ;;  %v3111_v25 = vadd.f32 %v8127_v10, %v3110_v53 }
 0x970   : > { %vm3367_vm0 = vcmp.eq.f32.partialorder %v11625_v50, 0.0  ;;  %v3375_v2 = vsub.f32 0.0, %v11625_v50  ;;  %v3119_v17 = vadd.f32 %v8517_v57, %v8133_v28  ;;  %v11639_v41 = vsel %vm3124_vm3, %v3116_v37, %v3128_v13 }
 0x971   : > { %vm3123_vm8 = vcmp.gt.f32.partialorder %v3111_v25, 0.0  ;;  %v3127_v43 = vmul.f32 0.2, %v3111_v25  ;;  %v3377_v8 = vsub.f32 0.0, %v11639_v41  ;;  %vm3369_vm7 = vcmp.eq.f32.partialorder %v11639_v41, 0.0 }
 0x972   : > { %v11629_v45 = vsel %vm3367_vm0, -999.0, %v3375_v2  ;;  %v3129_v3 = vmul.f32 0.2, %v3119_v17  ;;  %vm3125_vm5 = vcmp.gt.f32.partialorder %v3119_v17, 0.0 }
 0x973   : > { %v11631_v4 = vsel %vm3123_vm8, %v3111_v25, %v3127_v43  ;;  %3403 = vrot.lane.b32.xlu0 %v11629_v45, %s15117_s3  ;;  %v11657_v26 = vsel %vm3369_vm7, -999.0, %v3377_v8  ;;  %vm4126_vm7 = vcmask 23552  }
 0x974   : > { %v8856_v6 = vpack.i.bf16 %v11631_v4, %v11625_v50  ;;  %vm3368_vm13 = vcmp.eq.f32.partialorder %v11631_v4, 0.0  ;;  %v3376_v31 = vsub.f32 0.0, %v11631_v4  ;;  %v3134_v11 = vpack.c.bf16 %v11631_v4, %v11625_v50 }
 0x975   : > { %v11654_v1 = vsel %vm3125_vm5, %v3119_v17, %v3129_v3  ;;  %vm3860_vm5 = vcmask 39936  }
 0x976   : > { %8857 = vrot.lane.b32.xlu1 %v8856_v6, %s15110_s22  ;;  %v11646_v55 = vsel %vm3368_vm13, -999.0, %v3376_v31  ;;  %7886 = vmatmul.mubr.msk.bf16.vlgmr.msra.gmra.mxu1 %vm2531_vm4, %v3134_v11  ;;  %v3135_v24 = vpack.c.bf16 %v11654_v1, %v11639_v41  ;;  %v8866_v46 = vpack.i.bf16 %v11654_v1, %v11639_v41  ;;  %v3378_v7 = vsub.f32 0.0, %v11654_v1 }
 0x977   : > { %3427 = vrot.lane.b32.xlu0 %v11629_v45, %s15110_s22  ;;  %3232 = vmatprep.mubr.bf16.mxu1 %v15118_v59  ;;  %vm3370_vm6 = vcmp.eq.f32.partialorder %v11654_v1, 0.0  ;;  %vm3993_vm13 = vcmask 31744  }
 0x978   : > { %v11673_v60 = vsel %vm3370_vm6, -999.0, %v3378_v7  ;;  %vm4676_vm6 = vcmask 97280  }
 0x97a   : > { %3405 = vrot.lane.b32.xlu1 %v11646_v55, %s15117_s3 }
 0x97b   : > { %8852 = vrot.lane.b32.xlu0 %v8856_v6, %s15117_s3 }
 0x97e   : > { %3429 = vrot.lane.b32.xlu1 %v11646_v55, %s15110_s22  ;;  %7887 = vmatmul.mubr.msk.bf16.gmra.mxu1 %vm2531_vm4, %v3135_v24 }
 0x97f   : > { %3407 = vrot.lane.b32.xlu0 %v11657_v26, %s15117_s3 }
 0x982   : > { %8867 = vrot.lane.b32.xlu1 %v8866_v46, %s15110_s22 }
 0x983   : > { %3431 = vrot.lane.b32.xlu0 %v11657_v26, %s15110_s22 }
 0x986   : > { %3409 = vrot.lane.b32.xlu1 %v11673_v60, %s15117_s3 }
 0x987   : > { %8862 = vrot.lane.b32.xlu0 %v8866_v46, %s15117_s3 }
 0x98a   : > { %3433 = vrot.lane.b32.xlu1 %v11673_v60, %s15110_s22  ;;  %s14884_s22 = smov 117  }
 0x9e5   : > { %v3404_v38 = vpop.permute.xlu0 %3403 }
 0x9e8   : > { %v8858_v62 = vpop.permute.xlu1 %8857 }
 0x9e9   : > { %v3428_v63 = vpop.permute.xlu0 %3427  ;;  %v8860_v37 = vunpack.i.h.bf16 %v8858_v62  ;;  %v8859_v56 = vunpack.i.l.bf16 %v8858_v62 }
 0x9ea   : > { %v3447_v2 = vsel %vm2217_vm10, %v3404_v38, %v3428_v63 }
 0x9eb   : > { %v11830_v6 = vmax.f32 %v11629_v45, %v3447_v2 }
 0x9ec   : > { %v3406_v20 = vpop.permute.xlu1 %3405 }
 0x9ed   : > { %v8853_v10 = vpop.permute.xlu0 %8852 }
 0x9ee   : > { %v8855_v53 = vunpack.i.h.bf16 %v8853_v10  ;;  %v8854_v25 = vunpack.i.l.bf16 %v8853_v10 }
 0x9f0   : > { %v3430_v29 = vpop.permute.xlu1 %3429  ;;  %v3280_v43 = vsel %vm2217_vm10, %v8855_v53, %v8860_v37  ;;  %v3279_v13 = vsel %vm2217_vm10, %v8854_v25, %v8859_v56 }
 0x9f1   : > { %v3408_v57 = vpop.permute.xlu0 %3407  ;;  %v11833_v31 = vmax.f32 %v11631_v4, %v3280_v43  ;;  %v11836_v11 = vmax.f32 %v11625_v50, %v3279_v13  ;;  %v3448_v8 = vsel %vm2217_vm10, %v3406_v20, %v3430_v29 }
 0x9f2   : > { %v11851_v62 = vmax.f32 %v11646_v55, %v3448_v8 }
 0x9f3   : > { %v8876_v45 = vpack.i.bf16 %v11833_v31, %v11836_v11 }
 0x9f4   : > { %v8868_v27 = vpop.permute.xlu1 %8867 }
 0x9f5   : > { %v3432_v28 = vpop.permute.xlu0 %3431  ;;  %v8870_v4 = vunpack.i.h.bf16 %v8868_v27  ;;  %v8869_v7 = vunpack.i.l.bf16 %v8868_v27 }
 0x9f6   : > { %v3449_v10 = vsel %vm2217_vm10, %v3408_v57, %v3432_v28 }
 0x9f7   : > { %v11864_v37 = vmax.f32 %v11657_v26, %v3449_v10 }
 0x9f8   : > { %v3410_v17 = vpop.permute.xlu1 %3409 }
 0x9f9   : > { %v8863_v3 = vpop.permute.xlu0 %8862 }
 0x9fa   : > { %v8865_v38 = vunpack.i.h.bf16 %v8863_v3  ;;  %v8864_v50 = vunpack.i.l.bf16 %v8863_v3 }
 0x9fc   : > { %v3434_v24 = vpop.permute.xlu1 %3433  ;;  %v3282_v29 = vsel %vm2217_vm10, %v8865_v38, %v8870_v4  ;;  %v3281_v27 = vsel %vm2217_vm10, %v8864_v50, %v8869_v7 }
 0x9fd   : > { %v11867_v55 = vmax.f32 %v11654_v1, %v3282_v29  ;;  %v11870_v56 = vmax.f32 %v11639_v41, %v3281_v27  ;;  %v3450_v41 = vsel %vm2217_vm10, %v3410_v17, %v3434_v24 }
 0x9fe   : > { %v11680_v22 = vpop.f32.mrf.mxu0  ;;  %v11891_v28 = vmax.f32 %v11673_v60, %v3450_v41 }
 0x9ff   : > { %3901 = vrot.lane.b32.xlu0 %v11680_v22, %s14900_s11  ;;  %v8886_v1 = vpack.i.bf16 %v11867_v55, %v11870_v56 }
 0xa00   : > { %v11684_v18 = vpop.f32.mrf.mxu0 }
 0xa02   : > { %v11686_v32 = vpop.f32.mrf.mxu0 }
 0xa03   : > { %3903 = vrot.lane.b32.xlu1 %v11686_v32, %s14900_s11  ;;  %3949 = vrot.lane.b32.xlu0 %v11680_v22, %s14898_s19 }
 0xa04   : > { %v11746_v19 = vpop.f32.mrf.mxu0 }
 0xa07   : > { %3951 = vrot.lane.b32.xlu1 %v11686_v32, %s14898_s19  ;;  %3768 = vrot.lane.b32.xlu0 %v11680_v22, %s14884_s22 }
 0xa0b   : > { %3770 = vrot.lane.b32.xlu1 %v11686_v32, %s14884_s22  ;;  %3816 = vrot.lane.b32.xlu0 %v11680_v22, %s14882_s10 }
 0xa0f   : > { %3818 = vrot.lane.b32.xlu1 %v11686_v32, %s14882_s10  ;;  %4167 = vrot.lane.b32.xlu0 %v11680_v22, %s15120_s1 }
 0xa13   : > { %4169 = vrot.lane.b32.xlu1 %v11686_v32, %s15120_s1  ;;  %4215 = vrot.lane.b32.xlu0 %v11680_v22, %s14902_s5 }
 0xa17   : > { %4217 = vrot.lane.b32.xlu1 %v11686_v32, %s14902_s5  ;;  %4034 = vrot.lane.b32.xlu0 %v11680_v22, %s14896_s7 }
 0xa1b   : > { %4036 = vrot.lane.b32.xlu1 %v11686_v32, %s14896_s7  ;;  %4082 = vrot.lane.b32.xlu0 %v11680_v22, %s14878_s27 }
 0xa1f   : > { %4084 = vrot.lane.b32.xlu1 %v11686_v32, %s14878_s27  ;;  %4319 = vrot.lane.b32.xlu0 %v11680_v22, %s15117_s3 }
 0xa23   : > { %4321 = vrot.lane.b32.xlu1 %v11686_v32, %s15117_s3  ;;  %4367 = vrot.lane.b32.xlu0 %v11680_v22, %s15121_s16 }
 0xa27   : > { %4369 = vrot.lane.b32.xlu1 %v11686_v32, %s15121_s16  ;;  %4584 = vrot.lane.b32.xlu0 %v11680_v22, %s14876_s23 }
 0xa2b   : > { %4586 = vrot.lane.b32.xlu1 %v11686_v32, %s14876_s23  ;;  %4632 = vrot.lane.b32.xlu0 %v11680_v22, %s14865_s6 }
 0xa2f   : > { %4634 = vrot.lane.b32.xlu1 %v11686_v32, %s14865_s6  ;;  %4451 = vrot.lane.b32.xlu0 %v11680_v22, %s14867_s13 }
 0xa33   : > { %4453 = vrot.lane.b32.xlu1 %v11686_v32, %s14867_s13  ;;  %4499 = vrot.lane.b32.xlu0 %v11680_v22, %s14914_s8 }
 0xa36   : > { %v11744_v12 = vpop.f32.mrf.mxu1 }
 0xa37   : > { %4501 = vrot.lane.b32.xlu1 %v11686_v32, %s14914_s8  ;;  %3897 = vrot.lane.b32.xlu0 %v11684_v18, %s14900_s11  ;;  %15122 = vst [vmem:[#allocation51_spill] sm:$0xff] %v11744_v12 }
 0xa38   : > { %v11748_v39 = vpop.f32.mrf.mxu1 }
 0xa39   : > { %15123 = vst [vmem:[#allocation49_spill] sm:$0xff] %v11748_v39 }
 0xa3a   : > { %v11754_v9 = vpop.f32.mrf.mxu1 }
 0xa3b   : > { %3899 = vrot.lane.b32.xlu1 %v11746_v19, %s14900_s11  ;;  %3945 = vrot.lane.b32.xlu0 %v11684_v18, %s14898_s19  ;;  %15124 = vst [vmem:[#allocation50_spill] sm:$0xff] %v11754_v9 }
 0xa3c   : > { %v11760_v35 = vpop.f32.mrf.mxu1 }
 0xa3d   : > { %15125 = vst [vmem:[#allocation48_spill] sm:$0xff] %v11760_v35 }
 0xa3e   : > { %v11768_v36 = vpop.f32.mrf.mxu1 }
 0xa3f   : > { %3947 = vrot.lane.b32.xlu1 %v11746_v19, %s14898_s19  ;;  %3764 = vrot.lane.b32.xlu0 %v11684_v18, %s14884_s22  ;;  %15126 = vst [vmem:[#allocation81_spill] sm:$0xff] %v11768_v36 }
 0xa40   : > { %v11770_v30 = vpop.f32.mrf.mxu1 }
 0xa41   : > { %15127 = vst [vmem:[#allocation79_spill] sm:$0xff] %v11770_v30 }
 0xa42   : > { %v11778_v58 = vpop.f32.mrf.mxu1 }
 0xa43   : > { %3766 = vrot.lane.b32.xlu1 %v11746_v19, %s14884_s22  ;;  %3812 = vrot.lane.b32.xlu0 %v11684_v18, %s14882_s10  ;;  %15128 = vst [vmem:[#allocation31_spill] sm:$0xff] %v11778_v58 }
 0xa47   : > { %3814 = vrot.lane.b32.xlu1 %v11746_v19, %s14882_s10  ;;  %4163 = vrot.lane.b32.xlu0 %v11684_v18, %s15120_s1 }
 0xa4b   : > { %4165 = vrot.lane.b32.xlu1 %v11746_v19, %s15120_s1  ;;  %4211 = vrot.lane.b32.xlu0 %v11684_v18, %s14902_s5 }
 0xa4f   : > { %4213 = vrot.lane.b32.xlu1 %v11746_v19, %s14902_s5  ;;  %4030 = vrot.lane.b32.xlu0 %v11684_v18, %s14896_s7 }
 0xa53   : > { %4032 = vrot.lane.b32.xlu1 %v11746_v19, %s14896_s7  ;;  %4078 = vrot.lane.b32.xlu0 %v11684_v18, %s14878_s27 }
 0xa57   : > { %4080 = vrot.lane.b32.xlu1 %v11746_v19, %s14878_s27  ;;  %4315 = vrot.lane.b32.xlu0 %v11684_v18, %s15117_s3 }
 0xa5b   : > { %4317 = vrot.lane.b32.xlu1 %v11746_v19, %s15117_s3  ;;  %4363 = vrot.lane.b32.xlu0 %v11684_v18, %s15121_s16 }
 0xa5f   : > { %4365 = vrot.lane.b32.xlu1 %v11746_v19, %s15121_s16  ;;  %4580 = vrot.lane.b32.xlu0 %v11684_v18, %s14876_s23 }
 0xa63   : > { %4582 = vrot.lane.b32.xlu1 %v11746_v19, %s14876_s23  ;;  %4628 = vrot.lane.b32.xlu0 %v11684_v18, %s14865_s6 }
 0xa67   : > { %4630 = vrot.lane.b32.xlu1 %v11746_v19, %s14865_s6  ;;  %4447 = vrot.lane.b32.xlu0 %v11684_v18, %s14867_s13  ;;  %s15129_s6 = smov 120  }
 0xa6b   : > { %4449 = vrot.lane.b32.xlu1 %v11746_v19, %s14867_s13  ;;  %4495 = vrot.lane.b32.xlu0 %v11684_v18, %s14914_s8  ;;  %s15130_s13 = smov 56  }
 0xa6f   : > { %4497 = vrot.lane.b32.xlu1 %v11746_v19, %s14914_s8  ;;  %3475 = vrot.lane.b32.xlu0 %v11830_v6, %s15129_s6 }
 0xa71   : > { %v11843_v46 = vpop.permute.xlu0 %3901 }
 0xa73   : > { %3499 = vrot.lane.b32.xlu0 %v11830_v6, %s15130_s13  ;;  %8877 = vrot.lane.b32.xlu1 %v8876_v45, %s15130_s13 }
 0xa75   : > { %v11853_v63 = vpop.permute.xlu1 %3903  ;;  %v11855_v20 = vpop.permute.xlu0 %3949 }
 0xa77   : > { %3477 = vrot.lane.b32.xlu1 %v11851_v62, %s15129_s6  ;;  %8872 = vrot.lane.b32.xlu0 %v8876_v45, %s15129_s6 }
 0xa79   : > { %v11872_v53 = vpop.permute.xlu1 %3951  ;;  %v11874_v57 = vpop.permute.xlu0 %3768 }
 0xa7b   : > { %3501 = vrot.lane.b32.xlu1 %v11851_v62, %s15130_s13  ;;  %3479 = vrot.lane.b32.xlu0 %v11864_v37, %s15129_s6 }
 0xa7d   : > { %v11880_v25 = vpop.permute.xlu1 %3770  ;;  %v11882_v26 = vpop.permute.xlu0 %3816 }
 0xa7f   : > { %8887 = vrot.lane.b32.xlu1 %v8886_v1, %s15130_s13  ;;  %3503 = vrot.lane.b32.xlu0 %v11864_v37, %s15130_s13 }
 0xa81   : > { %v11893_v2 = vpop.permute.xlu1 %3818  ;;  %v11895_v43 = vpop.permute.xlu0 %4167 }
 0xa83   : > { %3481 = vrot.lane.b32.xlu1 %v11891_v28, %s15129_s6  ;;  %8882 = vrot.lane.b32.xlu0 %v8886_v1, %s15129_s6  ;;  %s15172_s6 = smov 125  }
 0xa85   : > { %v11900_v13 = vpop.permute.xlu1 %4169  ;;  %v11902_v17 = vpop.permute.xlu0 %4215 }
 0xa87   : > { %3505 = vrot.lane.b32.xlu1 %v11891_v28, %s15130_s13  ;;  %s15171_s13 = smov 12  }
 0xa89   : > { %v11906_v3 = vpop.permute.xlu1 %4217  ;;  %v11908_v60 = vpop.permute.xlu0 %4034 }
 0xa8d   : > { %v11910_v8 = vpop.permute.xlu1 %4036  ;;  %v11912_v24 = vpop.permute.xlu0 %4082 }
 0xa91   : > { %v11914_v45 = vpop.permute.xlu1 %4084  ;;  %v11916_v4 = vpop.permute.xlu0 %4319 }
 0xa92   : > { %15131 = vst [vmem:[#allocation80_spill] sm:$0xff] %v11916_v4 }
 0xa95   : > { %v11918_v7 = vpop.permute.xlu1 %4321  ;;  %v11920_v38 = vpop.permute.xlu0 %4367 }
 0xa96   : > { %15132 = vst [vmem:[#allocation78_spill] sm:$0xff] %v11920_v38 }
 0xa99   : > { %v11922_v50 = vpop.permute.xlu1 %4369  ;;  %v11924_v10 = vpop.permute.xlu0 %4584 }
 0xa9a   : > { %15133 = vst [vmem:[#allocation85_spill] sm:$0xff] %v11924_v10 }
 0xa9d   : > { %v11926_v29 = vpop.permute.xlu1 %4586  ;;  %v11928_v27 = vpop.permute.xlu0 %4632 }
 0xa9e   : > { %15134 = vst [vmem:[#allocation83_spill] sm:$0xff] %v11926_v29  ;;  %15135 = vst [vmem:[#allocation69_spill] sm:$0xff] %v11928_v27 }
 0xaa1   : > { %v11930_v1 = vpop.permute.xlu1 %4634  ;;  %v11932_v41 = vpop.permute.xlu0 %4451 }
 0xaa2   : > { %15136 = vst [vmem:[#allocation67_spill] sm:$0xff] %v11930_v1  ;;  %15137 = vst [vmem:[#allocation84_spill] sm:$0xff] %v11932_v41 }
 0xaa5   : > { %v11934_v16 = vpop.permute.xlu1 %4453  ;;  %v11936_v33 = vpop.permute.xlu0 %4499 }
 0xaa6   : > { %15138 = vst [vmem:[#allocation82_spill] sm:$0xff] %v11934_v16  ;;  %15139 = vst [vmem:[#allocation36_spill] sm:$0xff] %v11936_v33 }
 0xaa9   : > { %v11938_v54 = vpop.permute.xlu1 %4501  ;;  %v11940_v12 = vpop.permute.xlu0 %3897 }
 0xaaa   : > { %15140 = vst [vmem:[#allocation68_spill] sm:$0xff] %v11938_v54  ;;  %15141 = vst [vmem:[#allocation66_spill] sm:$0xff] %v11940_v12 }
 0xaad   : > { %v11942_v9 = vpop.permute.xlu1 %3899  ;;  %v11944_v39 = vpop.permute.xlu0 %3945 }
 0xaae   : > { %15142 = vst [vmem:[#allocation55_spill] sm:$0xff] %v11942_v9  ;;  %15143 = vst [vmem:[#allocation53_spill] sm:$0xff] %v11944_v39 }
 0xab1   : > { %v11946_v35 = vpop.permute.xlu1 %3947  ;;  %v11948_v36 = vpop.permute.xlu0 %3764 }
 0xab2   : > { %15144 = vst [vmem:[#allocation73_spill] sm:$0xff] %v11946_v35  ;;  %15145 = vst [vmem:[#allocation71_spill] sm:$0xff] %v11948_v36 }
 0xab5   : > { %v11950_v58 = vpop.permute.xlu1 %3766  ;;  %v11952_v30 = vpop.permute.xlu0 %3812 }
 0xab6   : > { %15146 = vst [vmem:[#allocation33_spill] sm:$0xff] %v11950_v58  ;;  %15147 = vst [vmem:[#allocation65_spill] sm:$0xff] %v11952_v30 }
 0xab9   : > { %v11954_v59 = vpop.permute.xlu1 %3814  ;;  %v11956_v41 = vpop.permute.xlu0 %4163 }
 0xaba   : > { %15148 = vst [vmem:[#allocation72_spill] sm:$0xff] %v11954_v59  ;;  %15149 = vst [vmem:[#allocation70_spill] sm:$0xff] %v11956_v41 }
 0xabd   : > { %v11958_v33 = vpop.permute.xlu1 %4165  ;;  %v11960_v16 = vpop.permute.xlu0 %4211 }
 0xabe   : > { %15150 = vst [vmem:[#allocation89_spill] sm:$0xff] %v11958_v33  ;;  %15151 = vst [vmem:[#allocation87_spill] sm:$0xff] %v11960_v16 }
 0xac1   : > { %v11962_v54 = vpop.permute.xlu1 %4213  ;;  %v11964_v10 = vpop.permute.xlu0 %4030 }
 0xac2   : > { %15152 = vst [vmem:[#allocation54_spill] sm:$0xff] %v11962_v54  ;;  %15153 = vst [vmem:[#allocation52_spill] sm:$0xff] %v11964_v10 }
 0xac5   : > { %v11966_v27 = vpop.permute.xlu1 %4032  ;;  %v11968_v29 = vpop.permute.xlu0 %4078 }
 0xac6   : > { %15154 = vst [vmem:[#allocation59_spill] sm:$0xff] %v11966_v27  ;;  %15155 = vst [vmem:[#allocation57_spill] sm:$0xff] %v11968_v29 }
 0xac9   : > { %v11970_v1 = vpop.permute.xlu1 %4080  ;;  %v11972_v36 = vpop.permute.xlu0 %4315 }
 0xaca   : > { %15156 = vst [vmem:[#allocation88_spill] sm:$0xff] %v11970_v1  ;;  %15157 = vst [vmem:[#allocation86_spill] sm:$0xff] %v11972_v36 }
 0xacd   : > { %v11974_v30 = vpop.permute.xlu1 %4317  ;;  %v11976_v58 = vpop.permute.xlu0 %4363 }
 0xace   : > { %15158 = vst [vmem:[#allocation58_spill] sm:$0xff] %v11974_v30  ;;  %15159 = vst [vmem:[#allocation56_spill] sm:$0xff] %v11976_v58 }
 0xad1   : > { %v11978_v41 = vpop.permute.xlu1 %4365  ;;  %v11980_v33 = vpop.permute.xlu0 %4580 }
 0xad2   : > { %15160 = vst [vmem:[#allocation77_spill] sm:$0xff] %v11978_v41  ;;  %15161 = vst [vmem:[#allocation75_spill] sm:$0xff] %v11980_v33  ;;  %v3515_v33 = vsel %vm2355_vm2, %v11611_v23, %v11613_v34 }
 0xad5   : > { %v11982_v16 = vpop.permute.xlu1 %4582  ;;  %v11984_v54 = vpop.permute.xlu0 %4628 }
 0xad6   : > { %15162 = vst [vmem:[#allocation63_spill] sm:$0xff] %v11982_v16  ;;  %15163 = vst [vmem:[#allocation76_spill] sm:$0xff] %v11984_v54 }
 0xad9   : > { %v11986_v10 = vpop.permute.xlu1 %4630  ;;  %v11988_v27 = vpop.permute.xlu0 %4447 }
 0xada   : > { %15164 = vst [vmem:[#allocation74_spill] sm:$0xff] %v11986_v10  ;;  %15165 = vst [vmem:[#allocation47_spill] sm:$0xff] %v11988_v27 }
 0xadd   : > { %v11990_v29 = vpop.permute.xlu1 %4449  ;;  %v11992_v1 = vpop.permute.xlu0 %4495 }
 0xade   : > { %15166 = vst [vmem:[#allocation64_spill] sm:$0xff] %v11990_v29  ;;  %15167 = vst [vmem:[#allocation61_spill] sm:$0xff] %v11992_v1  ;;  %v3516_v1 = vsel %vm2355_vm2, %v11786_v61, %v11792_v51 }
 0xae1   : > { %v11994_v36 = vpop.permute.xlu1 %4497  ;;  %v3476_v30 = vpop.permute.xlu0 %3475 }
 0xae2   : > { %15168 = vst [vmem:[#allocation46_spill] sm:$0xff] %v11994_v36  ;;  %v3523_v36 = vmax.f32 %v11596_v21, %v3515_v33 }
 0xae5   : > { %v3500_v58 = vpop.permute.xlu0 %3499  ;;  %v8878_v59 = vpop.permute.xlu1 %8877 }
 0xae6   : > { %v8880_v54 = vunpack.i.h.bf16 %v8878_v59  ;;  %v8879_v12 = vunpack.i.l.bf16 %v8878_v59  ;;  %v3524_v59 = vmax.f32 %v11578_v15, %v3516_v1  ;;  %v3519_v15 = vsel %vm2355_vm2, %v3476_v30, %v3500_v58 }
 0xae8   : > { %v3532_v33 = vsub.f32 0.0, %v3524_v59 }
 0xae9   : > { %v3478_v16 = vpop.permute.xlu1 %3477  ;;  %v8873_v41 = vpop.permute.xlu0 %8872 }
 0xaea   : > { %v8875_v10 = vunpack.i.h.bf16 %v8873_v41  ;;  %v8874_v39 = vunpack.i.l.bf16 %v8873_v41  ;;  %v3531_v41 = vsub.f32 0.0, %v3523_v36  ;;  %vm3540_vm12 = vcmp.eq.f32.partialorder %v3532_v33, 999.0 }
 0xaeb   : > { %v3548_v1 = vsel %vm3540_vm12, 0.0, %v3532_v33  ;;  %vm4809_vm12 = vcmask 89088  }
 0xaec   : > { %v3352_v27 = vsel %vm2355_vm2, %v8875_v10, %v8880_v54  ;;  %v3351_v29 = vsel %vm2355_vm2, %v8874_v39, %v8879_v12  ;;  %v3517_v12 = vsel %vm2355_vm2, %v11607_v14, %v11609_v48  ;;  %v3518_v39 = vsel %vm2355_vm2, %v11756_v42, %v11772_v40 }
 0xaed   : > { %v3360_v4 = vmax.f32 %v11833_v31, %v3352_v27  ;;  %v3359_v23 = vmax.f32 %v11836_v11, %v3351_v29  ;;  %v3502_v34 = vpop.permute.xlu1 %3501  ;;  %v3480_v38 = vpop.permute.xlu0 %3479  ;;  %v3525_v61 = vmax.f32 %v11567_v49, %v3517_v12  ;;  %vm3539_vm10 = vcmp.eq.f32.partialorder %v3531_v41, 999.0 }
 0xaee   : > { %v3520_v21 = vsel %vm2355_vm2, %v3478_v16, %v3502_v34  ;;  %v3526_v48 = vmax.f32 %v11559_v44, %v3518_v39  ;;  %v3527_v16 = vmax.f32 %v11830_v6, %v3519_v15  ;;  %v3547_v10 = vsel %vm3539_vm10, 0.0, %v3531_v41 }
 0xaef   : > { %v3557_v9 = vpack.c.bf16 %v3360_v4, %v3359_v23  ;;  %v3528_v36 = vmax.f32 %v11851_v62, %v3520_v21  ;;  %v3533_v40 = vsub.f32 0.0, %v3525_v61  ;;  %v3559_v23 = vpack.c.bf16 %v3548_v1, %v3547_v10 }
 0xaf0   : > { %v3534_v27 = vsub.f32 0.0, %v3526_v48  ;;  %v3535_v34 = vsub.f32 0.0, %v3527_v16  ;;  %vm4543_vm10 = vcmask 105472  }
 0xaf1   : > { %v8888_v35 = vpop.permute.xlu1 %8887  ;;  %v3504_v54 = vpop.permute.xlu0 %3503  ;;  %8530 = vmatprep.mubr.msk.bf16.mxu0 %vm2531_vm4, %v3557_v9  ;;  %v3536_v29 = vsub.f32 0.0, %v3528_v36  ;;  %vm3541_vm14 = vcmp.eq.f32.partialorder %v3533_v40, 999.0 }
 0xaf2   : > { %v8890_v31 = vunpack.i.h.bf16 %v8888_v35  ;;  %v8889_v11 = vunpack.i.l.bf16 %v8888_v35  ;;  %v3521_v6 = vsel %vm2355_vm2, %v3480_v38, %v3504_v54  ;;  %vm3542_vm0 = vcmp.eq.f32.partialorder %v3534_v27, 999.0 }
 0xaf3   : > { %vm3544_vm15 = vcmp.eq.f32.partialorder %v3536_v29, 999.0  ;;  %vm3543_vm8 = vcmp.eq.f32.partialorder %v3535_v34, 999.0  ;;  %v3550_v21 = vsel %vm3542_vm0, 0.0, %v3534_v27 }
 0xaf4   : > { %v3552_v41 = vsel %vm3544_vm15, 0.0, %v3536_v29  ;;  %v3551_v33 = vsel %vm3543_vm8, 0.0, %v3535_v34 }
 0xaf5   : > { %v3482_v51 = vpop.permute.xlu1 %3481  ;;  %v8883_v9 = vpop.permute.xlu0 %8882  ;;  %v3561_v38 = vpack.c.bf16 %v3552_v41, %v3551_v33 }
 0xaf6   : > { %v8885_v4 = vunpack.i.h.bf16 %v8883_v9  ;;  %v8884_v14 = vunpack.i.l.bf16 %v8883_v9 }
 0xaf8   : > { %v3354_v42 = vsel %vm2355_vm2, %v8885_v4, %v8890_v31  ;;  %v3353_v49 = vsel %vm2355_vm2, %v8884_v14, %v8889_v11 }
 0xaf9   : > { %v3362_v30 = vmax.f32 %v11867_v55, %v3354_v42  ;;  %v3361_v58 = vmax.f32 %v11870_v56, %v3353_v49  ;;  %v3506_v62 = vpop.permute.xlu1 %3505  ;;  %v3529_v55 = vmax.f32 %v11864_v37, %v3521_v6  ;;  %v3549_v56 = vsel %vm3541_vm14, 0.0, %v3533_v40 }
 0xafa   : > { %v3522_v35 = vsel %vm2355_vm2, %v3482_v51, %v3506_v62  ;;  %v3560_v39 = vpack.c.bf16 %v3550_v21, %v3549_v56 }
 0xafb   : > { %v3558_v44 = vpack.c.bf16 %v3362_v30, %v3361_v58  ;;  %v3530_v59 = vmax.f32 %v11891_v28, %v3522_v35  ;;  %v3537_v61 = vsub.f32 0.0, %v3529_v55 }
 0xafd   : > { %8531 = vmatmul.mubr.msk.bf16.gmra.mxu0 %vm2531_vm4, %v3558_v44  ;;  %v3538_v12 = vsub.f32 0.0, %v3530_v59  ;;  %vm3545_vm3 = vcmp.eq.f32.partialorder %v3537_v61, 999.0 }
 0xafe   : > { %8534 = vmatprep.mubr.msk.bf16.mxu0 %vm2531_vm4, %v3559_v23  ;;  %v3553_v54 = vsel %vm3545_vm3, 0.0, %v3537_v61 }
 0xaff   : > { %vm3546_vm2 = vcmp.eq.f32.partialorder %v3538_v12, 999.0 }
 0xb00   : > { %v3554_v28 = vsel %vm3546_vm2, 0.0, %v3538_v12 }
 0xb01   : > { %v3562_v15 = vpack.c.bf16 %v3554_v28, %v3553_v54 }
 0xb05   : > { %8535 = vmatmul.mubr.msk.bf16.gmra.mxu0 %vm2531_vm4, %v3560_v39 }
 0xb06   : > { %8538 = vmatprep.mubr.msk.bf16.mxu0 %vm2531_vm4, %v3561_v38 }
 0xb0d   : > { %8539 = vmatmul.mubr.msk.bf16.gmra.mxu0 %vm2531_vm4, %v3562_v15 }
 0xbbd   : > { %v12034_v37 = vpop.f32.mrf.mxu0 }
 0xbbe   : > { %15169 = vst [vmem:[#allocation62_spill] sm:$0xff] %v12034_v37  ;;  %3909 = vrot.lane.b32.xlu0 %v12034_v37, %s14900_s11 }
 0xbbf   : > { %v12038_v36 = vpop.f32.mrf.mxu0 }
 0xbc0   : > { %15170 = vst [vmem:[#allocation60_spill] sm:$0xff] %v12038_v36 }
 0xbc1   : > { %v12040_v51 = vpop.f32.mrf.mxu0 }
 0xbc2   : > { %3957 = vrot.lane.b32.xlu0 %v12034_v37, %s14898_s19  ;;  %3911 = vrot.lane.b32.xlu1 %v12040_v51, %s14900_s11 }
 0xbc3   : > { %v12098_v9 = vpop.f32.mrf.mxu0 }
 0xbc4   : > { %15173 = vst [vmem:[#allocation45_spill] sm:$0xff] %v12098_v9 }
 0xbc5   : > { %v12148_v31 = vpop.f32.mrf.mxu0 }
 0xbc6   : > { %3776 = vrot.lane.b32.xlu0 %v12034_v37, %s14884_s22  ;;  %3959 = vrot.lane.b32.xlu1 %v12040_v51, %s14898_s19 }
 0xbc7   : > { %v12154_v11 = vpop.f32.mrf.mxu0 }
 0xbc8   : > { %15174 = vst [vmem:[#allocation44_spill] sm:$0xff] %v12154_v11 }
 0xbc9   : > { %v12162_v14 = vpop.f32.mrf.mxu0 }
 0xbca   : > { %3824 = vrot.lane.b32.xlu0 %v12034_v37, %s14882_s10  ;;  %3778 = vrot.lane.b32.xlu1 %v12040_v51, %s14884_s22  ;;  %15176 = vst [vmem:[#allocation91_spill] sm:$0xff] %v12162_v14 }
 0xbcb   : > { %v12276_v54 = vpop.f32.mrf.mxu0 }
 0xbcc   : > { %15203 = vst [vmem:[#allocation116_spill] sm:$0xff] %v12276_v54 }
 0xbce   : > { %4175 = vrot.lane.b32.xlu0 %v12034_v37, %s15120_s1  ;;  %3826 = vrot.lane.b32.xlu1 %v12040_v51, %s14882_s10 }
 0xbd2   : > { %4223 = vrot.lane.b32.xlu0 %v12034_v37, %s14902_s5  ;;  %4177 = vrot.lane.b32.xlu1 %v12040_v51, %s15120_s1 }
 0xbd6   : > { %4042 = vrot.lane.b32.xlu0 %v12034_v37, %s14896_s7  ;;  %4225 = vrot.lane.b32.xlu1 %v12040_v51, %s14902_s5 }
 0xbda   : > { %4090 = vrot.lane.b32.xlu0 %v12034_v37, %s14878_s27  ;;  %4044 = vrot.lane.b32.xlu1 %v12040_v51, %s14896_s7 }
 0xbde   : > { %4327 = vrot.lane.b32.xlu0 %v12034_v37, %s15117_s3  ;;  %4092 = vrot.lane.b32.xlu1 %v12040_v51, %s14878_s27 }
 0xbe2   : > { %4375 = vrot.lane.b32.xlu0 %v12034_v37, %s15121_s16  ;;  %4329 = vrot.lane.b32.xlu1 %v12040_v51, %s15117_s3 }
 0xbe6   : > { %4592 = vrot.lane.b32.xlu0 %v12034_v37, %s14876_s23  ;;  %4377 = vrot.lane.b32.xlu1 %v12040_v51, %s15121_s16 }
 0xbea   : > { %4640 = vrot.lane.b32.xlu0 %v12034_v37, %s15171_s13  ;;  %4594 = vrot.lane.b32.xlu1 %v12040_v51, %s14876_s23 }
 0xbee   : > { %4459 = vrot.lane.b32.xlu0 %v12034_v37, %s15172_s6  ;;  %4642 = vrot.lane.b32.xlu1 %v12040_v51, %s15171_s13 }
 0xbf2   : > { %4507 = vrot.lane.b32.xlu0 %v12034_v37, %s14914_s8  ;;  %4461 = vrot.lane.b32.xlu1 %v12040_v51, %s15172_s6 }
 0xbf6   : > { %3905 = vrot.lane.b32.xlu0 %v12038_v36, %s14900_s11  ;;  %4509 = vrot.lane.b32.xlu1 %v12040_v51, %s14914_s8 }
 0xbfa   : > { %3953 = vrot.lane.b32.xlu0 %v12038_v36, %s14898_s19  ;;  %3907 = vrot.lane.b32.xlu1 %v12098_v9, %s14900_s11 }
 0xbfe   : > { %3772 = vrot.lane.b32.xlu0 %v12038_v36, %s14884_s22  ;;  %3955 = vrot.lane.b32.xlu1 %v12098_v9, %s14898_s19 }
 0xc02   : > { %3820 = vrot.lane.b32.xlu0 %v12038_v36, %s14882_s10  ;;  %3774 = vrot.lane.b32.xlu1 %v12098_v9, %s14884_s22 }
 0xc06   : > { %4171 = vrot.lane.b32.xlu0 %v12038_v36, %s15120_s1  ;;  %3822 = vrot.lane.b32.xlu1 %v12098_v9, %s14882_s10 }
 0xc0a   : > { %4219 = vrot.lane.b32.xlu0 %v12038_v36, %s14902_s5  ;;  %4173 = vrot.lane.b32.xlu1 %v12098_v9, %s15120_s1 }
 0xc0e   : > { %4038 = vrot.lane.b32.xlu0 %v12038_v36, %s14896_s7  ;;  %4221 = vrot.lane.b32.xlu1 %v12098_v9, %s14902_s5 }
 0xc12   : > { %4086 = vrot.lane.b32.xlu0 %v12038_v36, %s14878_s27  ;;  %4040 = vrot.lane.b32.xlu1 %v12098_v9, %s14896_s7 }
 0xc16   : > { %4323 = vrot.lane.b32.xlu0 %v12038_v36, %s15117_s3  ;;  %4088 = vrot.lane.b32.xlu1 %v12098_v9, %s14878_s27 }
 0xc1a   : > { %4371 = vrot.lane.b32.xlu0 %v12038_v36, %s15121_s16  ;;  %4325 = vrot.lane.b32.xlu1 %v12098_v9, %s15117_s3 }
 0xc1e   : > { %4588 = vrot.lane.b32.xlu0 %v12038_v36, %s14876_s23  ;;  %4373 = vrot.lane.b32.xlu1 %v12098_v9, %s15121_s16 }
 0xc22   : > { %4636 = vrot.lane.b32.xlu0 %v12038_v36, %s15171_s13  ;;  %4590 = vrot.lane.b32.xlu1 %v12098_v9, %s14876_s23 }
 0xc26   : > { %4455 = vrot.lane.b32.xlu0 %v12038_v36, %s15172_s6  ;;  %4638 = vrot.lane.b32.xlu1 %v12098_v9, %s15171_s13 }
 0xc2a   : > { %4503 = vrot.lane.b32.xlu0 %v12038_v36, %s14914_s8  ;;  %4457 = vrot.lane.b32.xlu1 %v12098_v9, %s15172_s6 }
 0xc2e   : > { %4505 = vrot.lane.b32.xlu1 %v12098_v9, %s14914_s8  ;;  %3917 = vrot.lane.b32.xlu0 %v12148_v31, %s14900_s11 }
 0xc30   : > { %v12160_v4 = vpop.permute.xlu0 %3909 }
 0xc31   : > { %15175 = vst [vmem:[#allocation43_spill] sm:$0xff] %v12160_v4 }
 0xc32   : > { %3965 = vrot.lane.b32.xlu0 %v12148_v31, %s14898_s19  ;;  %3919 = vrot.lane.b32.xlu1 %v12162_v14, %s14900_s11 }
 0xc34   : > { %v12168_v48 = vpop.permute.xlu0 %3957  ;;  %v12170_v16 = vpop.permute.xlu1 %3911 }
 0xc35   : > { %15177 = vst [vmem:[#allocation42_spill] sm:$0xff] %v12168_v48 }
 0xc36   : > { %3784 = vrot.lane.b32.xlu0 %v12148_v31, %s14884_s22  ;;  %3967 = vrot.lane.b32.xlu1 %v12162_v14, %s14898_s19 }
 0xc38   : > { %v12176_v42 = vpop.permute.xlu0 %3776  ;;  %v12178_v49 = vpop.permute.xlu1 %3959 }
 0xc39   : > { %15178 = vst [vmem:[#allocation90_spill] sm:$0xff] %v12176_v42 }
 0xc3a   : > { %3832 = vrot.lane.b32.xlu0 %v12148_v31, %s14882_s10  ;;  %3786 = vrot.lane.b32.xlu1 %v12162_v14, %s14884_s22 }
 0xc3c   : > { %v12184_v40 = vpop.permute.xlu0 %3824  ;;  %v12186_v10 = vpop.permute.xlu1 %3778 }
 0xc3d   : > { %15179 = vst [vmem:[#allocation92_spill] sm:$0xff] %v12184_v40  ;;  %15180 = vst [vmem:[#allocation93_spill] sm:$0xff] %v12186_v10 }
 0xc3e   : > { %4183 = vrot.lane.b32.xlu0 %v12148_v31, %s15120_s1  ;;  %3834 = vrot.lane.b32.xlu1 %v12162_v14, %s14882_s10 }
 0xc40   : > { %v12192_v30 = vpop.permute.xlu0 %4175  ;;  %v12194_v58 = vpop.permute.xlu1 %3826 }
 0xc41   : > { %15181 = vst [vmem:[#allocation94_spill] sm:$0xff] %v12192_v30  ;;  %15182 = vst [vmem:[#allocation95_spill] sm:$0xff] %v12194_v58 }
 0xc42   : > { %4231 = vrot.lane.b32.xlu0 %v12148_v31, %s14902_s5  ;;  %4185 = vrot.lane.b32.xlu1 %v12162_v14, %s15120_s1 }
 0xc44   : > { %v12200_v62 = vpop.permute.xlu0 %4223  ;;  %v12202_v29 = vpop.permute.xlu1 %4177 }
 0xc45   : > { %15183 = vst [vmem:[#allocation96_spill] sm:$0xff] %v12200_v62  ;;  %15184 = vst [vmem:[#allocation97_spill] sm:$0xff] %v12202_v29 }
 0xc46   : > { %4050 = vrot.lane.b32.xlu0 %v12148_v31, %s14896_s7  ;;  %4233 = vrot.lane.b32.xlu1 %v12162_v14, %s14902_s5 }
 0xc48   : > { %v12208_v35 = vpop.permute.xlu0 %4042  ;;  %v12210_v27 = vpop.permute.xlu1 %4225 }
 0xc49   : > { %15185 = vst [vmem:[#allocation98_spill] sm:$0xff] %v12208_v35  ;;  %15186 = vst [vmem:[#allocation99_spill] sm:$0xff] %v12210_v27 }
 0xc4a   : > { %4098 = vrot.lane.b32.xlu0 %v12148_v31, %s14878_s27  ;;  %4052 = vrot.lane.b32.xlu1 %v12162_v14, %s14896_s7 }
 0xc4c   : > { %v12216_v1 = vpop.permute.xlu0 %4090  ;;  %v12218_v44 = vpop.permute.xlu1 %4044 }
 0xc4d   : > { %15187 = vst [vmem:[#allocation100_spill] sm:$0xff] %v12216_v1  ;;  %15188 = vst [vmem:[#allocation101_spill] sm:$0xff] %v12218_v44 }
 0xc4e   : > { %4335 = vrot.lane.b32.xlu0 %v12148_v31, %s15117_s3  ;;  %4100 = vrot.lane.b32.xlu1 %v12162_v14, %s14878_s27 }
 0xc50   : > { %v12224_v23 = vpop.permute.xlu0 %4327  ;;  %v12226_v34 = vpop.permute.xlu1 %4092 }
 0xc51   : > { %15189 = vst [vmem:[#allocation102_spill] sm:$0xff] %v12224_v23  ;;  %15190 = vst [vmem:[#allocation103_spill] sm:$0xff] %v12226_v34 }
 0xc52   : > { %4383 = vrot.lane.b32.xlu0 %v12148_v31, %s15121_s16  ;;  %4337 = vrot.lane.b32.xlu1 %v12162_v14, %s15117_s3 }
 0xc54   : > { %v12232_v6 = vpop.permute.xlu0 %4375  ;;  %v12234_v59 = vpop.permute.xlu1 %4329 }
 0xc55   : > { %15191 = vst [vmem:[#allocation104_spill] sm:$0xff] %v12232_v6  ;;  %15192 = vst [vmem:[#allocation105_spill] sm:$0xff] %v12234_v59 }
 0xc56   : > { %4600 = vrot.lane.b32.xlu0 %v12148_v31, %s14876_s23  ;;  %4385 = vrot.lane.b32.xlu1 %v12162_v14, %s15121_s16 }
 0xc58   : > { %v12240_v55 = vpop.permute.xlu0 %4592  ;;  %v12242_v56 = vpop.permute.xlu1 %4377 }
 0xc59   : > { %15193 = vst [vmem:[#allocation106_spill] sm:$0xff] %v12240_v55  ;;  %15194 = vst [vmem:[#allocation107_spill] sm:$0xff] %v12242_v56 }
 0xc5a   : > { %4648 = vrot.lane.b32.xlu0 %v12148_v31, %s15171_s13  ;;  %4602 = vrot.lane.b32.xlu1 %v12162_v14, %s14876_s23 }
 0xc5c   : > { %v12248_v41 = vpop.permute.xlu0 %4640  ;;  %v12250_v12 = vpop.permute.xlu1 %4594 }
 0xc5d   : > { %15195 = vst [vmem:[#allocation108_spill] sm:$0xff] %v12248_v41  ;;  %15196 = vst [vmem:[#allocation109_spill] sm:$0xff] %v12250_v12 }
 0xc5e   : > { %4467 = vrot.lane.b32.xlu0 %v12148_v31, %s15172_s6  ;;  %4650 = vrot.lane.b32.xlu1 %v12162_v14, %s15171_s13 }
 0xc60   : > { %v12256_v21 = vpop.permute.xlu0 %4459  ;;  %v12258_v39 = vpop.permute.xlu1 %4642 }
 0xc61   : > { %15197 = vst [vmem:[#allocation110_spill] sm:$0xff] %v12256_v21  ;;  %15198 = vst [vmem:[#allocation111_spill] sm:$0xff] %v12258_v39 }
 0xc62   : > { %4515 = vrot.lane.b32.xlu0 %v12148_v31, %s14914_s8  ;;  %4469 = vrot.lane.b32.xlu1 %v12162_v14, %s15172_s6 }
 0xc64   : > { %v12264_v33 = vpop.permute.xlu0 %4507  ;;  %v12266_v61 = vpop.permute.xlu1 %4461 }
 0xc65   : > { %15199 = vst [vmem:[#allocation112_spill] sm:$0xff] %v12264_v33  ;;  %15200 = vst [vmem:[#allocation113_spill] sm:$0xff] %v12266_v61 }
 0xc66   : > { %3913 = vrot.lane.b32.xlu0 %v12154_v11, %s14900_s11  ;;  %4517 = vrot.lane.b32.xlu1 %v12162_v14, %s14914_s8 }
 0xc68   : > { %v12272_v38 = vpop.permute.xlu0 %3905  ;;  %v12274_v28 = vpop.permute.xlu1 %4509 }
 0xc69   : > { %15201 = vst [vmem:[#allocation114_spill] sm:$0xff] %v12272_v38  ;;  %15202 = vst [vmem:[#allocation115_spill] sm:$0xff] %v12274_v28 }
 0xc6a   : > { %3961 = vrot.lane.b32.xlu0 %v12154_v11, %s14898_s19  ;;  %3915 = vrot.lane.b32.xlu1 %v12276_v54, %s14900_s11 }
 0xc6c   : > { %v12282_v15 = vpop.permute.xlu0 %3953  ;;  %v12284_v21 = vpop.permute.xlu1 %3907 }
 0xc6d   : > { %15204 = vst [vmem:[#allocation117_spill] sm:$0xff] %v12282_v15  ;;  %15205 = vst [vmem:[#allocation118_spill] sm:$0xff] %v12284_v21 }
 0xc6e   : > { %3780 = vrot.lane.b32.xlu0 %v12154_v11, %s14884_s22  ;;  %3963 = vrot.lane.b32.xlu1 %v12276_v54, %s14898_s19 }
 0xc70   : > { %v12290_v33 = vpop.permute.xlu0 %3772  ;;  %v12292_v61 = vpop.permute.xlu1 %3955 }
 0xc71   : > { %15206 = vst [vmem:[#allocation119_spill] sm:$0xff] %v12290_v33  ;;  %15207 = vst [vmem:[#allocation120_spill] sm:$0xff] %v12292_v61 }
 0xc72   : > { %3828 = vrot.lane.b32.xlu0 %v12154_v11, %s14882_s10  ;;  %3782 = vrot.lane.b32.xlu1 %v12276_v54, %s14884_s22 }
 0xc74   : > { %v12298_v28 = vpop.permute.xlu0 %3820  ;;  %v12300_v55 = vpop.permute.xlu1 %3774 }
 0xc75   : > { %15208 = vst [vmem:[#allocation121_spill] sm:$0xff] %v12298_v28  ;;  %15209 = vst [vmem:[#allocation122_spill] sm:$0xff] %v12300_v55 }
 0xc76   : > { %4179 = vrot.lane.b32.xlu0 %v12154_v11, %s15120_s1  ;;  %3830 = vrot.lane.b32.xlu1 %v12276_v54, %s14882_s10 }
 0xc78   : > { %v12306_v41 = vpop.permute.xlu0 %4171  ;;  %v12308_v12 = vpop.permute.xlu1 %3822 }
 0xc79   : > { %15210 = vst [vmem:[#allocation123_spill] sm:$0xff] %v12306_v41  ;;  %15211 = vst [vmem:[#allocation124_spill] sm:$0xff] %v12308_v12 }
 0xc7a   : > { %4227 = vrot.lane.b32.xlu0 %v12154_v11, %s14902_s5  ;;  %4181 = vrot.lane.b32.xlu1 %v12276_v54, %s15120_s1 }
 0xc7c   : > { %v12314_v39 = vpop.permute.xlu0 %4219  ;;  %v12316_v23 = vpop.permute.xlu1 %4173 }
 0xc7d   : > { %15212 = vst [vmem:[#allocation125_spill] sm:$0xff] %v12314_v39  ;;  %15213 = vst [vmem:[#allocation126_spill] sm:$0xff] %v12316_v23 }
 0xc7e   : > { %4046 = vrot.lane.b32.xlu0 %v12154_v11, %s14896_s7  ;;  %4229 = vrot.lane.b32.xlu1 %v12276_v54, %s14902_s5 }
 0xc80   : > { %v12322_v6 = vpop.permute.xlu0 %4038  ;;  %v12324_v59 = vpop.permute.xlu1 %4221 }
 0xc81   : > { %15214 = vst [vmem:[#allocation127_spill] sm:$0xff] %v12322_v6  ;;  %15215 = vst [vmem:[#allocation128_spill] sm:$0xff] %v12324_v59 }
 0xc82   : > { %4094 = vrot.lane.b32.xlu0 %v12154_v11, %s14878_s27  ;;  %4048 = vrot.lane.b32.xlu1 %v12276_v54, %s14896_s7 }
 0xc84   : > { %v12330_v56 = vpop.permute.xlu0 %4086  ;;  %v12332_v41 = vpop.permute.xlu1 %4040 }
 0xc85   : > { %15216 = vst [vmem:[#allocation129_spill] sm:$0xff] %v12330_v56  ;;  %15217 = vst [vmem:[#allocation130_spill] sm:$0xff] %v12332_v41 }
 0xc86   : > { %4331 = vrot.lane.b32.xlu0 %v12154_v11, %s15117_s3  ;;  %4096 = vrot.lane.b32.xlu1 %v12276_v54, %s14878_s27 }
 0xc88   : > { %v12338_v39 = vpop.permute.xlu0 %4323  ;;  %v12340_v6 = vpop.permute.xlu1 %4088 }
 0xc89   : > { %15218 = vst [vmem:[#allocation131_spill] sm:$0xff] %v12338_v39  ;;  %15219 = vst [vmem:[#allocation132_spill] sm:$0xff] %v12340_v6 }
 0xc8a   : > { %4379 = vrot.lane.b32.xlu0 %v12154_v11, %s15121_s16  ;;  %4333 = vrot.lane.b32.xlu1 %v12276_v54, %s15117_s3 }
 0xc8c   : > { %v12346_v35 = vpop.permute.xlu0 %4371  ;;  %v12348_v56 = vpop.permute.xlu1 %4325 }
 0xc8d   : > { %15220 = vst [vmem:[#allocation133_spill] sm:$0xff] %v12346_v35  ;;  %15221 = vst [vmem:[#allocation134_spill] sm:$0xff] %v12348_v56 }
 0xc8e   : > { %4596 = vrot.lane.b32.xlu0 %v12154_v11, %s14876_s23  ;;  %4381 = vrot.lane.b32.xlu1 %v12276_v54, %s15121_s16 }
 0xc90   : > { %v12354_v41 = vpop.permute.xlu0 %4588  ;;  %v12356_v39 = vpop.permute.xlu1 %4373 }
 0xc91   : > { %15222 = vst [vmem:[#allocation135_spill] sm:$0xff] %v12354_v41  ;;  %15223 = vst [vmem:[#allocation136_spill] sm:$0xff] %v12356_v39  ;;  %v12374_v39 = vpop.f32.mrf.mxu0 }
 0xc92   : > { %4644 = vrot.lane.b32.xlu0 %v12154_v11, %s15171_s13  ;;  %4598 = vrot.lane.b32.xlu1 %v12276_v54, %s14876_s23  ;;  %15228 = vst [vmem:[#allocation141_spill] sm:$0xff] %v12374_v39 }
 0xc93   : > { %v12384_v1 = vpop.f32.mrf.mxu0 }
 0xc94   : > { %v12362_v6 = vpop.permute.xlu0 %4636  ;;  %v12364_v35 = vpop.permute.xlu1 %4590 }
 0xc95   : > { %15224 = vst [vmem:[#allocation137_spill] sm:$0xff] %v12362_v6  ;;  %15225 = vst [vmem:[#allocation138_spill] sm:$0xff] %v12364_v35  ;;  %v12394_v23 = vpop.f32.mrf.mxu0 }
 0xc96   : > { %4463 = vrot.lane.b32.xlu0 %v12154_v11, %s15172_s6  ;;  %4646 = vrot.lane.b32.xlu1 %v12276_v54, %s15171_s13  ;;  %15232 = vst [vmem:[#allocation145_spill] sm:$0xff] %v12394_v23 }
 0xc97   : > { %v12524_v55 = vpop.f32.mrf.mxu0 }
 0xc98   : > { %v12370_v56 = vpop.permute.xlu0 %4455  ;;  %v12372_v41 = vpop.permute.xlu1 %4638 }
 0xc99   : > { %15226 = vst [vmem:[#allocation139_spill] sm:$0xff] %v12370_v56  ;;  %15227 = vst [vmem:[#allocation140_spill] sm:$0xff] %v12372_v41 }
 0xc9a   : > { %4511 = vrot.lane.b32.xlu0 %v12154_v11, %s14914_s8  ;;  %4465 = vrot.lane.b32.xlu1 %v12276_v54, %s15172_s6 }
 0xc9c   : > { %v12380_v6 = vpop.permute.xlu0 %4503  ;;  %v12382_v35 = vpop.permute.xlu1 %4457 }
 0xc9d   : > { %15229 = vst [vmem:[#allocation142_spill] sm:$0xff] %v12380_v6  ;;  %15230 = vst [vmem:[#allocation143_spill] sm:$0xff] %v12382_v35 }
 0xc9e   : > { %4513 = vrot.lane.b32.xlu1 %v12276_v54, %s14914_s8  ;;  %3925 = vrot.lane.b32.xlu0 %v12374_v39, %s14900_s11 }
 0xca0   : > { %v12390_v56 = vpop.permute.xlu1 %4505  ;;  %v12392_v41 = vpop.permute.xlu0 %3917 }
 0xca1   : > { %15231 = vst [vmem:[#allocation144_spill] sm:$0xff] %v12390_v56 }
 0xca2   : > { %3973 = vrot.lane.b32.xlu0 %v12374_v39, %s14898_s19  ;;  %3927 = vrot.lane.b32.xlu1 %v12394_v23, %s14900_s11 }
 0xca4   : > { %v12400_v6 = vpop.permute.xlu0 %3965  ;;  %v12402_v35 = vpop.permute.xlu1 %3919 }
 0xca6   : > { %3792 = vrot.lane.b32.xlu0 %v12374_v39, %s14884_s22  ;;  %3975 = vrot.lane.b32.xlu1 %v12394_v23, %s14898_s19 }
 0xca8   : > { %v12408_v56 = vpop.permute.xlu0 %3784  ;;  %v12410_v59 = vpop.permute.xlu1 %3967 }
 0xcaa   : > { %3840 = vrot.lane.b32.xlu0 %v12374_v39, %s14882_s10  ;;  %3794 = vrot.lane.b32.xlu1 %v12394_v23, %s14884_s22 }
 0xcac   : > { %v12416_v44 = vpop.permute.xlu0 %3832  ;;  %v12418_v34 = vpop.permute.xlu1 %3786 }
 0xcae   : > { %4191 = vrot.lane.b32.xlu0 %v12374_v39, %s15120_s1  ;;  %3842 = vrot.lane.b32.xlu1 %v12394_v23, %s14882_s10 }
 0xcb0   : > { %v12424_v30 = vpop.permute.xlu0 %4183  ;;  %v12426_v62 = vpop.permute.xlu1 %3834 }
 0xcb1   : > { %15233 = vst [vmem:[#allocation146_spill] sm:$0xff] %v12424_v30 }
 0xcb2   : > { %4239 = vrot.lane.b32.xlu0 %v12374_v39, %s14902_s5  ;;  %4193 = vrot.lane.b32.xlu1 %v12394_v23, %s15120_s1 }
 0xcb4   : > { %v12432_v29 = vpop.permute.xlu0 %4231  ;;  %v12434_v27 = vpop.permute.xlu1 %4185 }
 0xcb5   : > { %15234 = vst [vmem:[#allocation147_spill] sm:$0xff] %v12432_v29  ;;  %15235 = vst [vmem:[#allocation148_spill] sm:$0xff] %v12434_v27 }
 0xcb6   : > { %4058 = vrot.lane.b32.xlu0 %v12374_v39, %s14896_s7  ;;  %4241 = vrot.lane.b32.xlu1 %v12394_v23, %s14902_s5 }
 0xcb8   : > { %v12440_v33 = vpop.permute.xlu0 %4050  ;;  %v12442_v30 = vpop.permute.xlu1 %4233 }
 0xcb9   : > { %15236 = vst [vmem:[#allocation149_spill] sm:$0xff] %v12440_v33  ;;  %15237 = vst [vmem:[#allocation150_spill] sm:$0xff] %v12442_v30 }
 0xcba   : > { %4106 = vrot.lane.b32.xlu0 %v12374_v39, %s14878_s27  ;;  %4060 = vrot.lane.b32.xlu1 %v12394_v23, %s14896_s7 }
 0xcbc   : > { %v12448_v28 = vpop.permute.xlu0 %4098  ;;  %v12450_v29 = vpop.permute.xlu1 %4052 }
 0xcbd   : > { %15238 = vst [vmem:[#allocation151_spill] sm:$0xff] %v12448_v28  ;;  %15239 = vst [vmem:[#allocation152_spill] sm:$0xff] %v12450_v29 }
 0xcbe   : > { %4343 = vrot.lane.b32.xlu0 %v12374_v39, %s15117_s3  ;;  %4108 = vrot.lane.b32.xlu1 %v12394_v23, %s14878_s27  ;;  %s14892_s27 = smov 11  }
 0xcc0   : > { %v12456_v27 = vpop.permute.xlu0 %4335  ;;  %v12458_v33 = vpop.permute.xlu1 %4100 }
 0xcc1   : > { %15240 = vst [vmem:[#allocation153_spill] sm:$0xff] %v12456_v27  ;;  %15241 = vst [vmem:[#allocation154_spill] sm:$0xff] %v12458_v33 }
 0xcc2   : > { %4391 = vrot.lane.b32.xlu0 %v12374_v39, %s15121_s16  ;;  %4345 = vrot.lane.b32.xlu1 %v12394_v23, %s15117_s3 }
 0xcc4   : > { %v12464_v30 = vpop.permute.xlu0 %4383  ;;  %v12466_v28 = vpop.permute.xlu1 %4337 }
 0xcc5   : > { %15242 = vst [vmem:[#allocation155_spill] sm:$0xff] %v12464_v30  ;;  %15243 = vst [vmem:[#allocation156_spill] sm:$0xff] %v12466_v28 }
 0xcc6   : > { %4608 = vrot.lane.b32.xlu0 %v12374_v39, %s14876_s23  ;;  %4393 = vrot.lane.b32.xlu1 %v12394_v23, %s15121_s16 }
 0xcc8   : > { %v12472_v29 = vpop.permute.xlu0 %4600  ;;  %v12474_v27 = vpop.permute.xlu1 %4385 }
 0xcc9   : > { %15244 = vst [vmem:[#allocation157_spill] sm:$0xff] %v12472_v29  ;;  %15245 = vst [vmem:[#allocation158_spill] sm:$0xff] %v12474_v27 }
 0xcca   : > { %4656 = vrot.lane.b32.xlu0 %v12374_v39, %s15171_s13  ;;  %4610 = vrot.lane.b32.xlu1 %v12394_v23, %s14876_s23  ;;  %s14894_s23 = smov 123  }
 0xccc   : > { %v12480_v33 = vpop.permute.xlu0 %4648  ;;  %v12482_v30 = vpop.permute.xlu1 %4602 }
 0xccd   : > { %15246 = vst [vmem:[#allocation159_spill] sm:$0xff] %v12480_v33  ;;  %15247 = vst [vmem:[#allocation160_spill] sm:$0xff] %v12482_v30 }
 0xcce   : > { %4475 = vrot.lane.b32.xlu0 %v12374_v39, %s15172_s6  ;;  %4658 = vrot.lane.b32.xlu1 %v12394_v23, %s15171_s13 }
 0xcd0   : > { %v12488_v28 = vpop.permute.xlu0 %4467  ;;  %v12490_v29 = vpop.permute.xlu1 %4650 }
 0xcd1   : > { %15248 = vst [vmem:[#allocation161_spill] sm:$0xff] %v12488_v28  ;;  %15249 = vst [vmem:[#allocation162_spill] sm:$0xff] %v12490_v29 }
 0xcd2   : > { %4523 = vrot.lane.b32.xlu0 %v12374_v39, %s14914_s8  ;;  %4477 = vrot.lane.b32.xlu1 %v12394_v23, %s15172_s6 }
 0xcd4   : > { %v12496_v27 = vpop.permute.xlu0 %4515  ;;  %v12498_v33 = vpop.permute.xlu1 %4469 }
 0xcd5   : > { %15250 = vst [vmem:[#allocation163_spill] sm:$0xff] %v12496_v27  ;;  %15251 = vst [vmem:[#allocation164_spill] sm:$0xff] %v12498_v33 }
 0xcd6   : > { %4741 = vrot.lane.b32.xlu0 %v12374_v39, %s14894_s23  ;;  %4525 = vrot.lane.b32.xlu1 %v12394_v23, %s14914_s8 }
 0xcd8   : > { %v12504_v28 = vpop.permute.xlu0 %3913  ;;  %v12506_v30 = vpop.permute.xlu1 %4517 }
 0xcd9   : > { %15252 = vst [vmem:[#allocation165_spill] sm:$0xff] %v12506_v30 }
 0xcda   : > { %4789 = vrot.lane.b32.xlu0 %v12374_v39, %s14892_s27  ;;  %4743 = vrot.lane.b32.xlu1 %v12394_v23, %s14894_s23 }
 0xcdc   : > { %v12512_v27 = vpop.permute.xlu0 %3961  ;;  %v12514_v33 = vpop.permute.xlu1 %3915 }
 0xcde   : > { %3921 = vrot.lane.b32.xlu0 %v12384_v1, %s14900_s11  ;;  %4791 = vrot.lane.b32.xlu1 %v12394_v23, %s14892_s27 }
 0xce0   : > { %v12520_v29 = vpop.permute.xlu0 %3780  ;;  %v12522_v30 = vpop.permute.xlu1 %3963 }
 0xce1   : > { %15253 = vst [vmem:[#allocation166_spill] sm:$0xff] %v12520_v29 }
 0xce2   : > { %3969 = vrot.lane.b32.xlu0 %v12384_v1, %s14898_s19  ;;  %3923 = vrot.lane.b32.xlu1 %v12524_v55, %s14900_s11 }
 0xce4   : > { %v12530_v39 = vpop.permute.xlu0 %3828  ;;  %v12532_v12 = vpop.permute.xlu1 %3782 }
 0xce5   : > { %15254 = vst [vmem:[#allocation167_spill] sm:$0xff] %v12530_v39 }
 0xce6   : > { %3788 = vrot.lane.b32.xlu0 %v12384_v1, %s14884_s22  ;;  %3971 = vrot.lane.b32.xlu1 %v12524_v55, %s14898_s19 }
 0xce8   : > { %v12538_v23 = vpop.permute.xlu0 %4179  ;;  %v12540_v38 = vpop.permute.xlu1 %3830 }
 0xce9   : > { %15255 = vst [vmem:[#allocation168_spill] sm:$0xff] %v12538_v23 }
 0xcea   : > { %3836 = vrot.lane.b32.xlu0 %v12384_v1, %s14882_s10  ;;  %3790 = vrot.lane.b32.xlu1 %v12524_v55, %s14884_s22  ;;  %s15273_s22 = smov 124  }
 0xcec   : > { %v12546_v15 = vpop.permute.xlu0 %4227  ;;  %v12548_v42 = vpop.permute.xlu1 %4181 }
 0xced   : > { %15256 = vst [vmem:[#allocation169_spill] sm:$0xff] %v12546_v15  ;;  %15257 = vst [vmem:[#allocation170_spill] sm:$0xff] %v12548_v42 }
 0xcee   : > { %4187 = vrot.lane.b32.xlu0 %v12384_v1, %s15120_s1  ;;  %3838 = vrot.lane.b32.xlu1 %v12524_v55, %s14882_s10  ;;  %s15264_s10 = smov 3  }
 0xcf0   : > { %v12554_v40 = vpop.permute.xlu0 %4046  ;;  %v12556_v23 = vpop.permute.xlu1 %4229 }
 0xcf1   : > { %15258 = vst [vmem:[#allocation171_spill] sm:$0xff] %v12554_v40  ;;  %15259 = vst [vmem:[#allocation172_spill] sm:$0xff] %v12556_v23 }
 0xcf2   : > { %4235 = vrot.lane.b32.xlu0 %v12384_v1, %s14902_s5  ;;  %4189 = vrot.lane.b32.xlu1 %v12524_v55, %s15120_s1 }
 0xcf4   : > { %v12562_v21 = vpop.permute.xlu0 %4094  ;;  %v12564_v15 = vpop.permute.xlu1 %4048 }
 0xcf5   : > { %15260 = vst [vmem:[#allocation173_spill] sm:$0xff] %v12562_v21  ;;  %15261 = vst [vmem:[#allocation174_spill] sm:$0xff] %v12564_v15 }
 0xcf6   : > { %4054 = vrot.lane.b32.xlu0 %v12384_v1, %s14896_s7  ;;  %4237 = vrot.lane.b32.xlu1 %v12524_v55, %s14902_s5 }
 0xcf8   : > { %v12570_v42 = vpop.permute.xlu0 %4331  ;;  %v12572_v40 = vpop.permute.xlu1 %4096 }
 0xcf9   : > { %15262 = vst [vmem:[#allocation175_spill] sm:$0xff] %v12570_v42  ;;  %15263 = vst [vmem:[#allocation176_spill] sm:$0xff] %v12572_v40  ;;  %v8952_v40 = vld [vmem:[#allocation10 + $0x4] ss:$36 sps:$4 sm:$0xff]  }
 0xcfa   : > { %4102 = vrot.lane.b32.xlu0 %v12384_v1, %s15264_s10  ;;  %4056 = vrot.lane.b32.xlu1 %v12524_v55, %s14896_s7 }
 0xcfb   : > { %5134 = vmatprep.mubr.bf16.mxu1 %v8952_v40 }
 0xcfc   : > { %v12578_v23 = vpop.permute.xlu0 %4379  ;;  %v12580_v21 = vpop.permute.xlu1 %4333 }
 0xcfd   : > { %15265 = vst [vmem:[#allocation177_spill] sm:$0xff] %v12578_v23  ;;  %15266 = vst [vmem:[#allocation178_spill] sm:$0xff] %v12580_v21 }
 0xcfe   : > { %4733 = vrot.lane.b32.xlu0 %v12148_v31, %s14894_s23  ;;  %4104 = vrot.lane.b32.xlu1 %v12524_v55, %s15264_s10 }
 0xd00   : > { %v12586_v15 = vpop.permute.xlu0 %4596  ;;  %v12588_v42 = vpop.permute.xlu1 %4381 }
 0xd01   : > { %15267 = vst [vmem:[#allocation179_spill] sm:$0xff] %v12586_v15  ;;  %15268 = vst [vmem:[#allocation180_spill] sm:$0xff] %v12588_v42 }
 0xd02   : > { %4339 = vrot.lane.b32.xlu0 %v12384_v1, %s15117_s3  ;;  %4735 = vrot.lane.b32.xlu1 %v12162_v14, %s14894_s23 }
 0xd04   : > { %v12594_v23 = vpop.permute.xlu0 %4644  ;;  %v12596_v21 = vpop.permute.xlu1 %4598 }
 0xd05   : > { %15269 = vst [vmem:[#allocation181_spill] sm:$0xff] %v12594_v23  ;;  %15270 = vst [vmem:[#allocation182_spill] sm:$0xff] %v12596_v21  ;;  %v8958_v21 = vld [vmem:[#allocation10 + $0xc] ss:$36 sps:$4 sm:$0xff]  }
 0xd06   : > { %4387 = vrot.lane.b32.xlu0 %v12384_v1, %s15121_s16  ;;  %4783 = vrot.lane.b32.xlu1 %v12162_v14, %s14892_s27 }
 0xd07   : > { %5199 = vmatprep.mubr.bf16.mxu0 %v8958_v21 }
 0xd08   : > { %v12602_v15 = vpop.permute.xlu0 %4463  ;;  %v12604_v42 = vpop.permute.xlu1 %4646 }
 0xd09   : > { %15271 = vst [vmem:[#allocation183_spill] sm:$0xff] %v12602_v15  ;;  %15272 = vst [vmem:[#allocation184_spill] sm:$0xff] %v12604_v42 }
 0xd0a   : > { %4604 = vrot.lane.b32.xlu0 %v12384_v1, %s15273_s22  ;;  %4341 = vrot.lane.b32.xlu1 %v12524_v55, %s15117_s3 }
 0xd0c   : > { %v12610_v40 = vpop.permute.xlu0 %4511  ;;  %v12612_v23 = vpop.permute.xlu1 %4465 }
 0xd0d   : > { %15274 = vst [vmem:[#allocation185_spill] sm:$0xff] %v12610_v40  ;;  %15275 = vst [vmem:[#allocation186_spill] sm:$0xff] %v12612_v23 }
 0xd0e   : > { %4652 = vrot.lane.b32.xlu0 %v12384_v1, %s15171_s13  ;;  %4389 = vrot.lane.b32.xlu1 %v12524_v55, %s15121_s16 }
 0xd10   : > { %v12618_v15 = vpop.permute.xlu1 %4513  ;;  %v3926_v42 = vpop.permute.xlu0 %3925 }
 0xd11   : > { %15276 = vst [vmem:[#allocation187_spill] sm:$0xff] %v12618_v15  ;;  %v9068_v15 = vld [vmem:[#allocation19] sm:$0xff] }
 0xd12   : > { %4471 = vrot.lane.b32.xlu0 %v12384_v1, %s15172_s6  ;;  %4606 = vrot.lane.b32.xlu1 %v12524_v55, %s15273_s22  ;;  %v12630_v21 = vrot.slane %v9068_v15, %v9883_v5 }
 0xd14   : > { %v3974_v40 = vpop.permute.xlu0 %3973  ;;  %v3928_v14 = vpop.permute.xlu1 %3927 }
 0xd15   : > { %v4008_v23 = vsel %vm3993_vm13, %v3926_v42, %v3974_v40 }
 0xd16   : > { %4519 = vrot.lane.b32.xlu0 %v12384_v1, %s14914_s8  ;;  %4654 = vrot.lane.b32.xlu1 %v12524_v55, %s15171_s13  ;;  %v4028_v4 = vmul.f32 %v12630_v21, %v4008_v23 }
 0xd18   : > { %v3793_v61 = vpop.permute.xlu0 %3792  ;;  %v3976_v10 = vpop.permute.xlu1 %3975 }
 0xd19   : > { %v4009_v58 = vsel %vm3993_vm13, %v3928_v14, %v3976_v10  ;;  %v12645_v14 = vrot.slane %v9068_v15, %v15063_v52 }
 0xd1a   : > { %v4029_v48 = vmul.f32 %v12630_v21, %v4009_v58  ;;  %4737 = vrot.lane.b32.xlu0 %v12384_v1, %s14894_s23  ;;  %4473 = vrot.lane.b32.xlu1 %v12524_v55, %s15172_s6 }
 0xd1c   : > { %v3841_v29 = vpop.permute.xlu0 %3840  ;;  %v3795_v42 = vpop.permute.xlu1 %3794  ;;  %v4861_v40 = vpack.c.bf16 %v4029_v48, %v4028_v4 }
 0xd1d   : > { %v3875_v5 = vsel %vm3860_vm5, %v3793_v61, %v3841_v29 }
 0xd1e   : > { %4785 = vrot.lane.b32.xlu0 %v12384_v1, %s14892_s27  ;;  %8150 = vmatprep.subr.bf16.mxu1 %v4861_v40  ;;  %v3895_v39 = vmul.f32 %v12645_v14, %v3875_v5 }
 0xd1f   : > { %4521 = vrot.lane.b32.xlu1 %v12524_v55, %s14914_s8 }
 0xd20   : > { %v4192_v10 = vpop.permute.xlu0 %4191  ;;  %v3843_v58 = vpop.permute.xlu1 %3842 }
 0xd21   : > { %v3876_v23 = vsel %vm3860_vm5, %v3795_v42, %v3843_v58  ;;  %v12660_v42 = vrot.slane %v9068_v15, %v10027_v0 }
 0xd22   : > { %v3896_v4 = vmul.f32 %v12645_v14, %v3876_v23  ;;  %4781 = vrot.lane.b32.xlu0 %v12148_v31, %s14892_s27 }
 0xd23   : > { %4731 = vrot.lane.b32.xlu1 %v12276_v54, %s14894_s23 }
 0xd24   : > { %v4853_v48 = vpack.c.bf16 %v3896_v4, %v3895_v39  ;;  %v4240_v29 = vpop.permute.xlu0 %4239  ;;  %v4194_v61 = vpop.permute.xlu1 %4193 }
 0xd25   : > { %v4273_v52 = vsel %vm912_vm9, %v4192_v10, %v4240_v29  ;;  %v12675_v29 = vrot.slane %v9068_v15, %v10053_v47 }
 0xd26   : > { %4729 = vrot.lane.b32.xlu0 %v12154_v11, %s14894_s23  ;;  %8151 = vmatpush3.bf16.msra.mxu1 %v4853_v48  ;;  %v4293_v39 = vmul.f32 %v12660_v42, %v4273_v52 }
 0xd27   : > { %4779 = vrot.lane.b32.xlu1 %v12276_v54, %s14892_s27 }
 0xd28   : > { %v4059_v40 = vpop.permute.xlu0 %4058  ;;  %v4242_v5 = vpop.permute.xlu1 %4241 }
 0xd29   : > { %v4274_v58 = vsel %vm912_vm9, %v4194_v61, %v4242_v5 }
 0xd2a   : > { %v4294_v23 = vmul.f32 %v12660_v42, %v4274_v58  ;;  %4777 = vrot.lane.b32.xlu0 %v12154_v11, %s14892_s27 }
 0xd2b   : > { %4727 = vrot.lane.b32.xlu1 %v12040_v51, %s14894_s23 }
 0xd2c   : > { %v4107_v10 = vpop.permute.xlu0 %4106  ;;  %v4061_v4 = vpop.permute.xlu1 %4060  ;;  %v4877_v48 = vpack.c.bf16 %v4294_v23, %v4293_v39 }
 0xd2d   : > { %v4141_v0 = vsel %vm4126_vm7, %v4059_v40, %v4107_v10 }
 0xd2e   : > { %4725 = vrot.lane.b32.xlu0 %v12034_v37, %s14894_s23  ;;  %8190 = vmatprep.subr.bf16.mxu0 %v4877_v48  ;;  %v4161_v58 = vmul.f32 %v12675_v29, %v4141_v0 }
 0xd2f   : > { %4775 = vrot.lane.b32.xlu1 %v12040_v51, %s14892_s27 }
 0xd30   : > { %v12677_v61 = vpop.permute.xlu0 %4343  ;;  %v4109_v52 = vpop.permute.xlu1 %4108 }
 0xd31   : > { %v4142_v5 = vsel %vm4126_vm7, %v4061_v4, %v4109_v52 }
 0xd32   : > { %v4162_v39 = vmul.f32 %v12675_v29, %v4142_v5  ;;  %4773 = vrot.lane.b32.xlu0 %v12034_v37, %s14892_s27 }
 0xd33   : > { %4739 = vrot.lane.b32.xlu1 %v12524_v55, %s14894_s23 }
 0xd34   : > { %v4869_v40 = vpack.c.bf16 %v4162_v39, %v4161_v58  ;;  %v12686_v23 = vpop.permute.xlu0 %4391  ;;  %v12688_v47 = vpop.permute.xlu1 %4345 }
 0xd36   : > { %4721 = vrot.lane.b32.xlu0 %v12038_v36, %s14894_s23  ;;  %8191 = vmatpush3.bf16.msra.mxu0 %v4869_v40 }
 0xd37   : > { %4787 = vrot.lane.b32.xlu1 %v12524_v55, %s14892_s27 }
 0xd38   : > { %v12694_v15 = vpop.permute.xlu0 %4608  ;;  %v12696_v10 = vpop.permute.xlu1 %4393 }
 0xd39   : > { %15277 = vst [vmem:[#allocation188_spill] sm:$0xff] %v12694_v15 }
 0xd3a   : > { %4769 = vrot.lane.b32.xlu0 %v12038_v36, %s14892_s27 }
 0xd3b   : > { %4723 = vrot.lane.b32.xlu1 %v12098_v9, %s14894_s23 }
 0xd3c   : > { %v12702_v4 = vpop.permute.xlu0 %4656  ;;  %v12704_v48 = vpop.permute.xlu1 %4610 }
 0xd3d   : > { %15278 = vst [vmem:[#allocation189_spill] sm:$0xff] %v12702_v4 }
 0xd3e   : > { %4717 = vrot.lane.b32.xlu0 %v11680_v22, %s14894_s23 }
 0xd3f   : > { %4771 = vrot.lane.b32.xlu1 %v12098_v9, %s14892_s27 }
 0xd40   : > { %v12710_v0 = vpop.permute.xlu0 %4475  ;;  %v12712_v52 = vpop.permute.xlu1 %4658 }
 0xd41   : > { %15279 = vst [vmem:[#allocation190_spill] sm:$0xff] %v12710_v0 }
 0xd42   : > { %4765 = vrot.lane.b32.xlu0 %v11680_v22, %s14892_s27 }
 0xd43   : > { %4719 = vrot.lane.b32.xlu1 %v11686_v32, %s14894_s23 }
 0xd44   : > { %v12718_v5 = vpop.permute.xlu0 %4523  ;;  %v12720_v58 = vpop.permute.xlu1 %4477 }
 0xd45   : > { %15280 = vst [vmem:[#allocation191_spill] sm:$0xff] %v12718_v5  ;;  %15281 = vst [vmem:[#allocation192_spill] sm:$0xff] %v12720_v58  ;;  %v3997_v5 = vsel %vm3993_vm13, %v11853_v63, %v11872_v53  ;;  %v15287_v58 = vld [vmem:[#allocation37_spill] sm:$0xff] }
 0xd46   : > { %4713 = vrot.lane.b32.xlu0 %v11684_v18, %s14894_s23  ;;  %v12758_v4 = vmul.f32 %v11680_v22, %v15287_v58  ;;  %v12765_v63 = vmul.f32 %v12630_v21, %v3997_v5  ;;  %v3863_v22 = vsel %vm3860_vm5, %v11874_v57, %v11882_v26  ;;  %v4129_v57 = vsel %vm4126_vm7, %v11908_v60, %v11912_v24  ;;  %v15338_v24 = vld [vmem:[#allocation174_spill] sm:$0xff] }
 0xd47   : > { %4767 = vrot.lane.b32.xlu1 %v11686_v32, %s14892_s27 }
 0xd48   : > { %v12726_v39 = vpop.permute.xlu0 %4741  ;;  %v12728_v40 = vpop.permute.xlu1 %4525 }
 0xd49   : > { %15282 = vst [vmem:[#allocation193_spill] sm:$0xff] %v12726_v39  ;;  %15283 = vst [vmem:[#allocation194_spill] sm:$0xff] %v12728_v40  ;;  %v12747_v40 = vmul.f32 %v11686_v32, %v15287_v58  ;;  %v12762_v32 = vmul.f32 %v15287_v58, %v11684_v18 }
 0xd4a   : > { %4761 = vrot.lane.b32.xlu0 %v11684_v18, %s14892_s27 }
 0xd4b   : > { %4715 = vrot.lane.b32.xlu1 %v11746_v19, %s14894_s23  ;;  %s15456_s23 = smov 5  }
 0xd4c   : > { %v12734_v9 = vpop.permute.xlu0 %4789  ;;  %v12736_v36 = vpop.permute.xlu1 %4743 }
 0xd4d   : > { %15284 = vst [vmem:[#allocation195_spill] sm:$0xff] %v12734_v9  ;;  %15285 = vst [vmem:[#allocation196_spill] sm:$0xff] %v12736_v36  ;;  %v3996_v36 = vsel %vm3993_vm13, %v11843_v46, %v11855_v20  ;;  %v4262_v46 = vsel %vm912_vm9, %v11900_v13, %v11906_v3  ;;  %v4130_v20 = vsel %vm4126_vm7, %v11910_v8, %v11914_v45 }
 0xd4e   : > { %v4261_v3 = vsel %vm912_vm9, %v11895_v43, %v11902_v17  ;;  %v12794_v26 = vmul.f32 %v12660_v42, %v4262_v46  ;;  %v12797_v8 = vmul.f32 %v12675_v29, %v4130_v20  ;;  %v4414_v45 = vsel %vm892_vm11, %v11918_v7, %v11922_v50  ;;  %v15288_v43 = vld [vmem:[#allocation73_spill] sm:$0xff]  ;;  %v15289_v17 = vld [vmem:[#allocation55_spill] sm:$0xff]  ;;  %v15290_v50 = vld [vmem:[#allocation78_spill] sm:$0xff] }
 0xd4f   : > { %4763 = vrot.lane.b32.xlu1 %v11746_v19, %s14892_s27  ;;  %v3995_v60 = vsel %vm3993_vm13, %v15289_v17, %v15288_v43  ;;  %v12815_v5 = vmul.f32 %v12660_v42, %v4261_v3  ;;  %v12818_v7 = vmul.f32 %v12675_v29, %v4129_v57  ;;  %v4005_v20 = vsel %vm3993_vm13, %v12402_v35, %v12410_v59  ;;  %v15307_v43 = vld [vmem:[#allocation95_spill] sm:$0xff]  ;;  %s15455_s27 = smov 117  }
 0xd50   : > { %v3922_v37 = vpop.permute.xlu0 %3921  ;;  %v12740_v11 = vpop.permute.xlu1 %4791  ;;  %v12838_v17 = vmul.f32 %v12630_v21, %v3995_v60  ;;  %v4004_v35 = vsel %vm3993_vm13, %v12392_v41, %v12400_v6  ;;  %v4003_v6 = vsel %vm3993_vm13, %v12514_v33, %v12522_v30  ;;  %v4002_v30 = vsel %vm3993_vm13, %v12504_v28, %v12512_v27 }
 0xd51   : > { %15286 = vst [vmem:[#allocation197_spill] sm:$0xff] %v12740_v11  ;;  %v3864_v11 = vsel %vm3860_vm5, %v11880_v25, %v11893_v2  ;;  %v4024_v2 = vmul.f32 %v12630_v21, %v4004_v35  ;;  %v15297_v35 = vld [vmem:[#allocation54_spill] sm:$0xff] }
 0xd52   : > { %v12785_v13 = vmul.f32 %v12645_v14, %v3864_v11 }
 0xd54   : > { %v3970_v0 = vpop.permute.xlu0 %3969  ;;  %v3924_v39 = vpop.permute.xlu1 %3923 }
 0xd55   : > { %v4006_v9 = vsel %vm3993_vm13, %v3922_v37, %v3970_v0  ;;  %v12782_v37 = vmul.f32 %v12630_v21, %v3996_v36  ;;  %v12812_v0 = vmul.f32 %v15287_v58, %v11746_v19  ;;  %v15292_v19 = vld [vmem:[#allocation35_spill] sm:$0xff] }
 0xd56   : > { %v4026_v18 = vmul.f32 %v12630_v21, %v4006_v9 }
 0xd58   : > { %v3789_v54 = vpop.permute.xlu0 %3788  ;;  %v3972_v15 = vpop.permute.xlu1 %3971 }
 0xd59   : > { %v4007_v53 = vsel %vm3993_vm13, %v3924_v39, %v3972_v15  ;;  %v12803_v15 = vmul.f32 %v12645_v14, %v3863_v22  ;;  %v15291_v39 = vld [vmem:[#allocation80_spill] sm:$0xff]  ;;  %v12829_v22 = vmul.f32 %v15292_v19, %v4414_v45  ;;  %v15308_v45 = vld [vmem:[#allocation93_spill] sm:$0xff] }
 0xd5a   : > { %v4027_v25 = vmul.f32 %v12630_v21, %v4007_v53  ;;  %v4413_v46 = vsel %vm892_vm11, %v15291_v39, %v15290_v50  ;;  %v15332_v53 = vld [vmem:[#allocation86_spill] sm:$0xff] }
 0xd5b   : > { %v12846_v50 = vmul.f32 %v15292_v19, %v4413_v46 }
 0xd5c   : > { %v3837_v36 = vpop.permute.xlu0 %3836  ;;  %v3791_v9 = vpop.permute.xlu1 %3790  ;;  %v4860_v11 = vpack.c.bf16 %v4027_v25, %v4026_v18  ;;  %v15293_v18 = vld [vmem:[#allocation53_spill] sm:$0xff]  ;;  %v15294_v25 = vld [vmem:[#allocation66_spill] sm:$0xff] }
 0xd5d   : > { %v3994_v3 = vsel %vm3993_vm13, %v15294_v25, %v15293_v18  ;;  %v3873_v57 = vsel %vm3860_vm5, %v3789_v54, %v3837_v36  ;;  %v4025_v54 = vmul.f32 %v12630_v21, %v4005_v20  ;;  %v3872_v36 = vsel %vm3860_vm5, %v12418_v34, %v12426_v62  ;;  %v15295_v18 = vld [vmem:[#allocation72_spill] sm:$0xff]  ;;  %v15296_v25 = vld [vmem:[#allocation33_spill] sm:$0xff]  ;;  %v15300_v34 = vld [vmem:[#allocation71_spill] sm:$0xff] }
 0xd5e   : > { %8152 = vmatprep.subr.bf16.mxu1 %v4860_v11  ;;  %v12854_v39 = vmul.f32 %v12630_v21, %v3994_v3  ;;  %v3893_v41 = vmul.f32 %v12645_v14, %v3873_v57  ;;  %v3862_v20 = vsel %vm3860_vm5, %v15296_v25, %v15295_v18  ;;  %v3871_v62 = vsel %vm3860_vm5, %v12408_v56, %v12416_v44  ;;  %v15299_v25 = vld [vmem:[#allocation65_spill] sm:$0xff] }
 0xd5f   : > { %v4023_v44 = vmul.f32 %v12630_v21, %v4003_v6  ;;  %v3870_v56 = vsel %vm3860_vm5, %v12532_v12, %v12540_v38  ;;  %v3861_v27 = vsel %vm3860_vm5, %v15300_v34, %v15299_v25  ;;  %v12887_v28 = vmul.f32 %v12645_v14, %v3862_v20  ;;  %v15301_v6 = vld [vmem:[#allocation87_spill] sm:$0xff] }
 0xd60   : > { %v4188_v59 = vpop.permute.xlu0 %4187  ;;  %v3839_v11 = vpop.permute.xlu1 %3838  ;;  %v4022_v12 = vmul.f32 %v12630_v21, %v4002_v30  ;;  %v15303_v38 = vld [vmem:[#allocation167_spill] sm:$0xff]  ;;  %v3890_v25 = vmul.f32 %v12645_v14, %v3870_v56 }
 0xd61   : > { %v3874_v60 = vsel %vm3860_vm5, %v3791_v9, %v3839_v11  ;;  %v3892_v9 = vmul.f32 %v12645_v14, %v3872_v36  ;;  %v4859_v36 = vpack.c.bf16 %v4025_v54, %v4024_v2  ;;  %v15304_v2 = vld [vmem:[#allocation166_spill] sm:$0xff]  ;;  %v15318_v11 = vld [vmem:[#allocation148_spill] sm:$0xff] }
 0xd62   : > { %v3894_v46 = vmul.f32 %v12645_v14, %v3874_v60  ;;  %v15298_v60 = vld [vmem:[#allocation89_spill] sm:$0xff]  ;;  %v3869_v54 = vsel %vm3860_vm5, %v15304_v2, %v15303_v38  ;;  %v3868_v38 = vsel %vm3860_vm5, %v15308_v45, %v15307_v43  ;;  %v15311_v45 = vld [vmem:[#allocation92_spill] sm:$0xff] }
 0xd63   : > { %v4260_v18 = vsel %vm912_vm9, %v15298_v60, %v15297_v35  ;;  %v15302_v35 = vld [vmem:[#allocation70_spill] sm:$0xff] }
 0xd64   : > { %v4852_v33 = vpack.c.bf16 %v3894_v46, %v3893_v41  ;;  %v4236_v3 = vpop.permute.xlu0 %4235  ;;  %v4190_v57 = vpop.permute.xlu1 %4189  ;;  %v4001_v41 = vsel %vm3993_vm13, %v12170_v16, %v12178_v49  ;;  %v3891_v46 = vmul.f32 %v12645_v14, %v3871_v62  ;;  %v4259_v60 = vsel %vm912_vm9, %v15302_v35, %v15301_v6  ;;  %v15305_v16 = vld [vmem:[#allocation42_spill] sm:$0xff]  ;;  %v15306_v49 = vld [vmem:[#allocation43_spill] sm:$0xff] }
 0xd65   : > { %v4271_v20 = vsel %vm912_vm9, %v4188_v59, %v4236_v3  ;;  %v12902_v34 = vmul.f32 %v12660_v42, %v4260_v18  ;;  %v4000_v62 = vsel %vm3993_vm13, %v15306_v49, %v15305_v16  ;;  %v4021_v30 = vmul.f32 %v12630_v21, %v4001_v41  ;;  %v15309_v18 = vld [vmem:[#allocation120_spill] sm:$0xff] }
 0xd66   : > { %8153 = vmatpush3.bf16.msra.mxu1 %v4852_v33  ;;  %v4851_v33 = vpack.c.bf16 %v3892_v9, %v3891_v46  ;;  %v4858_v3 = vpack.c.bf16 %v4023_v44, %v4022_v12  ;;  %v3889_v16 = vmul.f32 %v12645_v14, %v3869_v54  ;;  %v4291_v9 = vmul.f32 %v12660_v42, %v4271_v20  ;;  %v15313_v54 = vld [vmem:[#allocation117_spill] sm:$0xff]  ;;  %v15314_v20 = vld [vmem:[#allocation114_spill] sm:$0xff] }
 0xd67   : > { %8154 = vmatprep.subr.bf16.mxu1 %v4859_v36  ;;  %v15310_v36 = vld [vmem:[#allocation118_spill] sm:$0xff]  ;;  %v12920_v41 = vmul.f32 %v12645_v14, %v3861_v27  ;;  %v12923_v46 = vmul.f32 %v12660_v42, %v4259_v60  ;;  %v4020_v43 = vmul.f32 %v12630_v21, %v4000_v62  ;;  %v3888_v12 = vmul.f32 %v12645_v14, %v3868_v38 }
 0xd68   : > { %v4055_v6 = vpop.permute.xlu0 %4054  ;;  %v4238_v35 = vpop.permute.xlu1 %4237  ;;  %v3999_v2 = vsel %vm3993_vm13, %v15310_v36, %v15309_v18  ;;  %v3998_v49 = vsel %vm3993_vm13, %v15314_v20, %v15313_v54  ;;  %v15315_v18 = vld [vmem:[#allocation124_spill] sm:$0xff]  ;;  %v15316_v36 = vld [vmem:[#allocation122_spill] sm:$0xff]  ;;  %v15321_v20 = vld [vmem:[#allocation121_spill] sm:$0xff] }
 0xd69   : > { %v4272_v59 = vsel %vm912_vm9, %v4190_v57, %v4238_v35  ;;  %v15312_v57 = vld [vmem:[#allocation90_spill] sm:$0xff]  ;;  %v4019_v62 = vmul.f32 %v12630_v21, %v3999_v2 }
 0xd6a   : > { %v4292_v56 = vmul.f32 %v12660_v42, %v4272_v59  ;;  %8155 = vmatpush3.bf16.msra.mxu1 %v4851_v33  ;;  %v3867_v44 = vsel %vm3860_vm5, %v15312_v57, %v15311_v45  ;;  %v4850_v33 = vpack.c.bf16 %v3890_v25, %v3889_v16  ;;  %v3866_v45 = vsel %vm3860_vm5, %v15316_v36, %v15315_v18  ;;  %v15317_v57 = vld [vmem:[#allocation150_spill] sm:$0xff]  ;;  %v15319_v16 = vld [vmem:[#allocation57_spill] sm:$0xff]  ;;  %v15322_v18 = vld [vmem:[#allocation119_spill] sm:$0xff] }
 0xd6b   : > { %8156 = vmatprep.subr.bf16.mxu1 %v4858_v3  ;;  %v4857_v3 = vpack.c.bf16 %v4021_v30, %v4020_v43  ;;  %v3887_v38 = vmul.f32 %v12645_v14, %v3867_v44  ;;  %v4270_v54 = vsel %vm912_vm9, %v15318_v11, %v15317_v57  ;;  %v3865_v30 = vsel %vm3860_vm5, %v15322_v18, %v15321_v20  ;;  %v15323_v44 = vld [vmem:[#allocation88_spill] sm:$0xff]  ;;  %v15324_v11 = vld [vmem:[#allocation59_spill] sm:$0xff]  ;;  %v15326_v25 = vld [vmem:[#allocation146_spill] sm:$0xff] }
 0xd6c   : > { %v4103_v35 = vpop.permute.xlu0 %4102  ;;  %v4057_v27 = vpop.permute.xlu1 %4056  ;;  %v4876_v59 = vpack.c.bf16 %v4292_v56, %v4291_v9  ;;  %v15320_v9 = vld [vmem:[#allocation52_spill] sm:$0xff]  ;;  %v4018_v56 = vmul.f32 %v12630_v21, %v3998_v49  ;;  %v3886_v36 = vmul.f32 %v12645_v14, %v3866_v45  ;;  %v15325_v57 = vld [vmem:[#allocation147_spill] sm:$0xff]  ;;  %v4290_v60 = vmul.f32 %v12660_v42, %v4270_v54  ;;  %v15327_v20 = vld [vmem:[#allocation154_spill] sm:$0xff] }
 0xd6d   : > { %v4127_v2 = vsel %vm4126_vm7, %v15320_v9, %v15319_v16  ;;  %v4139_v43 = vsel %vm4126_vm7, %v4055_v6, %v4103_v35  ;;  %v4269_v16 = vsel %vm912_vm9, %v15326_v25, %v15325_v57  ;;  %v15328_v18 = vld [vmem:[#allocation152_spill] sm:$0xff]  ;;  %v15330_v45 = vld [vmem:[#allocation170_spill] sm:$0xff] }
 0xd6e   : > { %8157 = vmatpush3.bf16.msra.mxu1 %v4850_v33  ;;  %8192 = vmatprep.subr.bf16.mxu0 %v4876_v59  ;;  %v4128_v33 = vsel %vm4126_vm7, %v15324_v11, %v15323_v44  ;;  %v4849_v59 = vpack.c.bf16 %v3888_v12, %v3887_v38  ;;  %v4138_v6 = vsel %vm4126_vm7, %v15328_v18, %v15327_v20  ;;  %v15329_v38 = vld [vmem:[#allocation172_spill] sm:$0xff]  ;;  %v15335_v18 = vld [vmem:[#allocation169_spill] sm:$0xff] }
 0xd6f   : > { %8158 = vmatprep.subr.bf16.mxu1 %v4857_v3  ;;  %v4856_v3 = vpack.c.bf16 %v4019_v62, %v4018_v56  ;;  %v3885_v12 = vmul.f32 %v12645_v14, %v3865_v30  ;;  %v4268_v44 = vsel %vm912_vm9, %v15330_v45, %v15329_v38  ;;  %v4159_v25 = vmul.f32 %v12675_v29, %v4139_v43  ;;  %v15331_v57 = vld [vmem:[#allocation56_spill] sm:$0xff]  ;;  %v15333_v62 = vld [vmem:[#allocation151_spill] sm:$0xff]  ;;  %v15334_v56 = vld [vmem:[#allocation149_spill] sm:$0xff] }
 0xd70   : > { %v12960_v9 = vpop.permute.xlu0 %4733  ;;  %v4105_v49 = vpop.permute.xlu1 %4104  ;;  %v12974_v54 = vmul.f32 %v12675_v29, %v4127_v2  ;;  %v4411_v20 = vsel %vm892_vm11, %v15332_v53, %v15331_v57  ;;  %v4137_v30 = vsel %vm4126_vm7, %v15334_v56, %v15333_v62  ;;  %v4158_v43 = vmul.f32 %v12675_v29, %v4138_v6  ;;  %v15337_v57 = vld [vmem:[#allocation176_spill] sm:$0xff]  ;;  %v15340_v6 = vld [vmem:[#allocation97_spill] sm:$0xff] }
 0xd71   : > { %v4140_v35 = vsel %vm4126_vm7, %v4057_v27, %v4105_v49  ;;  %v4289_v27 = vmul.f32 %v12660_v42, %v4269_v16  ;;  %v4848_v49 = vpack.c.bf16 %v3886_v36, %v3885_v12  ;;  %v12990_v53 = vmul.f32 %v12675_v29, %v4128_v33  ;;  %v15339_v12 = vld [vmem:[#allocation99_spill] sm:$0xff] }
 0xd72   : > { %v4160_v11 = vmul.f32 %v12675_v29, %v4140_v35  ;;  %8159 = vmatpush3.bf16.msra.mxu1 %v4849_v59  ;;  %v15336_v35 = vld [vmem:[#allocation168_spill] sm:$0xff]  ;;  %v4288_v16 = vmul.f32 %v12660_v42, %v4268_v44  ;;  %v4266_v62 = vsel %vm912_vm9, %v15340_v6, %v15339_v12  ;;  %v4157_v56 = vmul.f32 %v12675_v29, %v4137_v30  ;;  %v15348_v6 = vld [vmem:[#allocation77_spill] sm:$0xff] }
 0xd73   : > { %8160 = vmatprep.subr.bf16.mxu1 %v4856_v3  ;;  %v4267_v59 = vsel %vm912_vm9, %v15336_v35, %v15335_v18  ;;  %v4136_v3 = vsel %vm4126_vm7, %v15338_v24, %v15337_v57  ;;  %v4875_v36 = vpack.c.bf16 %v4290_v60, %v4289_v27  ;;  %v13004_v33 = vmul.f32 %v15292_v19, %v4411_v20  ;;  %v15342_v24 = vld [vmem:[#allocation171_spill] sm:$0xff]  ;;  %v15344_v30 = vld [vmem:[#allocation96_spill] sm:$0xff]  ;;  %v15345_v18 = vld [vmem:[#allocation94_spill] sm:$0xff] }
 0xd74   : > { %v4868_v2 = vpack.c.bf16 %v4160_v11, %v4159_v25  ;;  %v4340_v38 = vpop.permute.xlu0 %4339  ;;  %v12987_v45 = vpop.permute.xlu1 %4735  ;;  %v4426_v25 = vsel %vm892_vm11, %v12688_v47, %v12696_v10  ;;  %v4287_v44 = vmul.f32 %v12660_v42, %v4267_v59  ;;  %v15341_v11 = vld [vmem:[#allocation173_spill] sm:$0xff]  ;;  %v15343_v27 = vpack.c.bf16 %v12765_v63, %v12782_v37  ;;  %v15346_v57 = vld [vmem:[#allocation103_spill] sm:$0xff] }
 0xd75   : > { %v4135_v60 = vsel %vm4126_vm7, %v15342_v24, %v15341_v11  ;;  %v4265_v47 = vsel %vm912_vm9, %v15345_v18, %v15344_v30  ;;  %v4867_v10 = vpack.c.bf16 %v4158_v43, %v4157_v56  ;;  %v4425_v20 = vsel %vm892_vm11, %v12677_v61, %v12686_v23  ;;  %v15347_v63 = vld [vmem:[#allocation101_spill] sm:$0xff]  ;;  %v15349_v43 = vld [vmem:[#allocation58_spill] sm:$0xff]  ;;  %v15350_v56 = vld [vmem:[#allocation128_spill] sm:$0xff] }
 0xd76   : > { %8161 = vmatpush3.bf16.msra.mxu1 %v4848_v49  ;;  %8193 = vmatpush3.bf16.msra.mxu0 %v4868_v2  ;;  %v4156_v49 = vmul.f32 %v12675_v29, %v4136_v3  ;;  %v4286_v2 = vmul.f32 %v12660_v42, %v4266_v62  ;;  %v4134_v37 = vsel %vm4126_vm7, %v15347_v63, %v15346_v57  ;;  %v15351_v11 = vld [vmem:[#allocation126_spill] sm:$0xff]  ;;  %v15356_v18 = vld [vmem:[#allocation125_spill] sm:$0xff]  ;;  %v15357_v57 = vld [vmem:[#allocation123_spill] sm:$0xff] }
 0xd77   : > { %8162 = vmatprep.subr.bf16.mxu1 %v15343_v27  ;;  %8194 = vmatprep.subr.bf16.mxu0 %v4875_v36  ;;  %v4446_v36 = vmul.f32 %v15292_v19, %v4426_v25  ;;  %v4874_v12 = vpack.c.bf16 %v4288_v16, %v4287_v44  ;;  %v4412_v3 = vsel %vm892_vm11, %v15349_v43, %v15348_v6  ;;  %v15353_v27 = vld [vmem:[#allocation100_spill] sm:$0xff]  ;;  %v15354_v25 = vld [vmem:[#allocation98_spill] sm:$0xff]  ;;  %v15358_v63 = vld [vmem:[#allocation145_spill] sm:$0xff] }
 0xd78   : > { %v4388_v35 = vpop.permute.xlu0 %4387  ;;  %v13020_v59 = vpop.permute.xlu1 %4783  ;;  %v4264_v61 = vsel %vm912_vm9, %v15351_v11, %v15350_v56  ;;  %v4155_v23 = vmul.f32 %v12675_v29, %v4135_v60  ;;  %v15352_v62 = vpack.c.bf16 %v12785_v13, %v12803_v15  ;;  %v4285_v24 = vmul.f32 %v12660_v42, %v4265_v47  ;;  %v15359_v43 = vld [vmem:[#allocation132_spill] sm:$0xff]  ;;  %v15360_v56 = vld [vmem:[#allocation130_spill] sm:$0xff] }
 0xd79   : > { %v4133_v16 = vsel %vm4126_vm7, %v15354_v25, %v15353_v27  ;;  %v4445_v44 = vmul.f32 %v15292_v19, %v4425_v20  ;;  %v15355_v30 = vpack.c.bf16 %v12838_v17, %v12854_v39  ;;  %v4154_v60 = vmul.f32 %v12675_v29, %v4134_v37  ;;  %v8950_v37 = vld [vmem:[#allocation10] ss:$36 sps:$4 sm:$0xff]   ;;  %v15362_v27 = vld [vmem:[#allocation127_spill] sm:$0xff] }
 0xd7a   : > { %8163 = vmatpush3.bf16.msra.mxu1 %v15352_v62  ;;  %8195 = vmatpush3.bf16.msra.mxu0 %v4867_v10  ;;  %v4263_v13 = vsel %vm912_vm9, %v15357_v57, %v15356_v18  ;;  %v4866_v15 = vpack.c.bf16 %v4156_v49, %v4155_v23  ;;  %v4314_v6 = vmul.f32 %v15358_v63, %v15287_v58  ;;  %v15361_v62 = vld [vmem:[#allocation129_spill] sm:$0xff]  ;;  %v15365_v18 = vld [vmem:[#allocation158_spill] sm:$0xff] }
 0xd7b   : > { %8164 = vmatprep.subr.bf16.mxu1 %v15355_v30  ;;  %8196 = vmatprep.subr.bf16.mxu0 %v4874_v12  ;;  %v4284_v20 = vmul.f32 %v12660_v42, %v4264_v61  ;;  %v4132_v17 = vsel %vm4126_vm7, %v15360_v56, %v15359_v43  ;;  %v4873_v39 = vpack.c.bf16 %v4286_v2, %v4285_v24  ;;  %v15364_v61 = vld [vmem:[#allocation141_spill] sm:$0xff]  ;;  %v15366_v2 = vld [vmem:[#allocation156_spill] sm:$0xff]  ;;  %v15367_v43 = vld [vmem:[#allocation155_spill] sm:$0xff] }
 0xd7c   : > { %v13049_v10 = vpop.permute.xlu0 %4604  ;;  %v4342_v47 = vpop.permute.xlu1 %4341  ;;  %v4893_v12 = vpack.c.bf16 %v4446_v36, %v4445_v44  ;;  %v4153_v11 = vmul.f32 %v12675_v29, %v4133_v16  ;;  %v4131_v49 = vsel %vm4126_vm7, %v15362_v27, %v15361_v62  ;;  %v15363_v23 = vpack.c.bf16 %v12887_v28, %v12920_v41  ;;  %v8953_v16 = vld [vmem:[#allocation10 + $0x4c] ss:$36 sps:$4 sm:$0xff]   ;;  %v15368_v56 = vld [vmem:[#allocation153_spill] sm:$0xff] }
 0xd7d   : > { %v4313_v25 = vmul.f32 %v15364_v61, %v15287_v58  ;;  %v4283_v30 = vmul.f32 %v12660_v42, %v4263_v13  ;;  %v4422_v36 = vsel %vm892_vm11, %v15366_v2, %v15365_v18  ;;  %v4423_v24 = vsel %vm892_vm11, %v4340_v38, %v4388_v35  ;;  %v15371_v61 = vld [vmem:[#allocation91_spill] sm:$0xff]  ;;  %v15374_v2 = vld [vmem:[#allocation177_spill] sm:$0xff] }
 0xd7e   : > { %8165 = vmatpush3.bf16.msra.mxu1 %v15363_v23  ;;  %8197 = vmatpush3.bf16.msra.mxu0 %v4866_v15  ;;  %v4865_v44 = vpack.c.bf16 %v4154_v60, %v4153_v11  ;;  %v4152_v57 = vmul.f32 %v12675_v29, %v4132_v17  ;;  %v4312_v63 = vmul.f32 %v15287_v58, %v12524_v55 }
 0xd7f   : > { %8198 = vmatprep.subr.bf16.mxu0 %v4873_v39  ;;  %8230 = vmatprep.subr.bf16.mxu1 %v4893_v12  ;;  %v4885_v15 = vpack.c.bf16 %v4314_v6, %v4313_v25  ;;  %v4151_v13 = vmul.f32 %v12675_v29, %v4131_v49  ;;  %v4421_v62 = vsel %vm892_vm11, %v15368_v56, %v15367_v43  ;;  %v15369_v6 = vld [vmem:[#allocation180_spill] sm:$0xff]  ;;  %v15370_v12 = vld [vmem:[#allocation178_spill] sm:$0xff]  ;;  %v15372_v25 = vld [vmem:[#allocation107_spill] sm:$0xff] }
 0xd80   : > { %v13072_v28 = vpop.permute.xlu0 %4652  ;;  %v4390_v41 = vpop.permute.xlu1 %4389  ;;  %v4872_v35 = vpack.c.bf16 %v4284_v20, %v4283_v30  ;;  %v4442_v60 = vmul.f32 %v15292_v19, %v4422_v36  ;;  %v4443_v17 = vmul.f32 %v15292_v19, %v4423_v24  ;;  %v13085_v55 = vmul.f32 %v15292_v19, %v4412_v3  ;;  %v15373_v30 = vld [vmem:[#allocation105_spill] sm:$0xff]  ;;  %v15375_v36 = vld [vmem:[#allocation175_spill] sm:$0xff] }
 0xd81   : > { %v4424_v38 = vsel %vm892_vm11, %v4342_v47, %v4390_v41  ;;  %5135 = vmatmul.mubr.bf16.vlgmr.msra.gmra.mxu1 %v8950_v37  ;;  %v4420_v11 = vsel %vm892_vm11, %v15370_v12, %v15369_v6  ;;  %v4311_v47 = vmul.f32 %v15287_v58, %v12384_v1  ;;  %v4864_v20 = vpack.c.bf16 %v4152_v57, %v4151_v13  ;;  %v8959_v13 = vld [vmem:[#allocation10 + $0x94] ss:$36 sps:$4 sm:$0xff]   ;;  %v15377_v56 = vld [vmem:[#allocation189_spill] sm:$0xff] }
 0xd82   : > { %v4444_v39 = vmul.f32 %v15292_v19, %v4424_v38  ;;  %8199 = vmatpush3.bf16.msra.mxu0 %v4865_v44  ;;  %8231 = vmatpush3.bf16.msra.mxu1 %v4885_v15  ;;  %v4441_v37 = vmul.f32 %v15292_v19, %v4421_v62  ;;  %v4310_v3 = vmul.f32 %v15371_v61, %v15287_v58  ;;  %v15378_v62 = vld [vmem:[#allocation188_spill] sm:$0xff] }
 0xd83   : > { %8200 = vmatprep.subr.bf16.mxu0 %v4872_v35  ;;  %5142 = vmatprep.mubr.bf16.mxu1 %v8953_v16  ;;  %v4418_v18 = vsel %vm892_vm11, %v15373_v30, %v15372_v25  ;;  %v4419_v24 = vsel %vm892_vm11, %v15375_v36, %v15374_v2  ;;  %v4884_v1 = vpack.c.bf16 %v4312_v63, %v4311_v47  ;;  %v8955_v16 = vld [vmem:[#allocation10 + $0x48] ss:$36 sps:$4 sm:$0xff]   ;;  %v15382_v6 = vld [vmem:[#allocation32_spill] sm:$0xff]  ;;  %v15388_v2 = vld [vmem:[#allocation191_spill] sm:$0xff] }
 0xd84   : > { %v13093_v27 = vpop.permute.xlu0 %4471  ;;  %v4607_v49 = vpop.permute.xlu1 %4606  ;;  %v4892_v23 = vpack.c.bf16 %v4444_v39, %v4443_v17  ;;  %v4309_v44 = vmul.f32 %v12148_v31, %v15287_v58  ;;  %v4440_v57 = vmul.f32 %v15292_v19, %v4420_v11  ;;  %v4692_v41 = vsel %vm4676_vm6, %v12704_v48, %v12712_v52  ;;  %v15381_v17 = vld [vmem:[#allocation102_spill] sm:$0xff]  ;;  %v15384_v47 = vld [vmem:[#allocation192_spill] sm:$0xff] }
 0xd85   : > { %v4891_v15 = vpack.c.bf16 %v4442_v60, %v4441_v37  ;;  %v4862_v43 = vpack.c.bf16 %v12990_v53, %v12974_v54  ;;  %v15376_v63 = vpack.c.bf16 %v12794_v26, %v12815_v5  ;;  %v13116_v31 = vmul.f32 %v12040_v51, %v15287_v58  ;;  %v15379_v26 = vld [vmem:[#allocation116_spill] sm:$0xff]  ;;  %v15383_v11 = vld [vmem:[#allocation194_spill] sm:$0xff] }
 0xd86   : > { %8201 = vmatpush3.bf16.msra.mxu0 %v4864_v20  ;;  %8232 = vmatprep.subr.bf16.mxu1 %v4892_v23  ;;  %v4886_v48 = vpack.c.bf16 %v13085_v55, %v13004_v33  ;;  %v4439_v52 = vmul.f32 %v15292_v19, %v4419_v24  ;;  %v4691_v38 = vsel %vm4676_vm6, %v15378_v62, %v15377_v56  ;;  %v15380_v60 = vld [vmem:[#allocation104_spill] sm:$0xff]  ;;  %v15386_v23 = vld [vmem:[#allocation134_spill] sm:$0xff] }
 0xd87   : > { %8202 = vmatprep.subr.bf16.mxu0 %v15376_v63  ;;  %8233 = vmatpush3.bf16.msra.mxu1 %v4884_v1  ;;  %v4883_v53 = vpack.c.bf16 %v4310_v3, %v4309_v44  ;;  %v4308_v5 = vmul.f32 %v15287_v58, %v15379_v26  ;;  %v4417_v51 = vsel %vm892_vm11, %v15381_v17, %v15380_v60  ;;  %v15385_v37 = vld [vmem:[#allocation136_spill] sm:$0xff]  ;;  %v15389_v36 = vld [vmem:[#allocation190_spill] sm:$0xff] }
 0xd88   : > { %v4520_v35 = vpop.permute.xlu0 %4519  ;;  %v4655_v54 = vpop.permute.xlu1 %4654  ;;  %8234 = vmatprep.subr.bf16.mxu1 %v4891_v15  ;;  %v4438_v39 = vmul.f32 %v15292_v19, %v4418_v18  ;;  %v4712_v12 = vmul.f32 %v15382_v6, %v4692_v41  ;;  %v4559_v20 = vsel %vm4543_vm10, %v15384_v47, %v15383_v11  ;;  %v4416_v61 = vsel %vm892_vm11, %v15386_v23, %v15385_v37  ;;  %v15394_v41 = vld [vmem:[#allocation34_spill] sm:$0xff] }
 0xd89   : > { %5143 = vmatmul.mubr.bf16.gmra.mxu1 %v8955_v16  ;;  %v4690_v3 = vsel %vm4676_vm6, %v4607_v49, %v4655_v54  ;;  %v15387_v25 = vpack.c.bf16 %v12797_v8, %v12818_v7  ;;  %v4890_v30 = vpack.c.bf16 %v4440_v57, %v4439_v52  ;;  %v4711_v18 = vmul.f32 %v15382_v6, %v4691_v38  ;;  %v15391_v16 = vld [vmem:[#allocation44_spill] sm:$0xff]  ;;  %v15392_v8 = vld [vmem:[#allocation133_spill] sm:$0xff]  ;;  %v15393_v7 = vld [vmem:[#allocation131_spill] sm:$0xff] }
 0xd8a   : > { %5150 = vmatprep.mubr.bf16.mxu1 %v8959_v13  ;;  %v4558_v24 = vsel %vm4543_vm10, %v15389_v36, %v15388_v2  ;;  %v15390_v1 = vpack.c.bf16 %v12902_v34, %v12923_v46  ;;  %v4307_v49 = vmul.f32 %v15287_v58, %v15391_v16  ;;  %v4437_v44 = vmul.f32 %v15292_v19, %v4417_v51  ;;  %v8956_v38 = vld [vmem:[#allocation10 + $0x8] ss:$36 sps:$4 sm:$0xff]   ;;  %v8961_v54 = vld [vmem:[#allocation10 + $0x90] ss:$36 sps:$4 sm:$0xff]   ;;  %v15403_v16 = vld [vmem:[#allocation164_spill] sm:$0xff] }
 0xd8b   : > { %8203 = vmatpush3.bf16.msra.mxu0 %v15387_v25  ;;  %8235 = vmatpush3.bf16.msra.mxu1 %v4883_v53  ;;  %v4415_v57 = vsel %vm892_vm11, %v15393_v7, %v15392_v8  ;;  %v4579_v15 = vmul.f32 %v15394_v41, %v4559_v20  ;;  %v4689_v13 = vsel %vm4676_vm6, %v13049_v10, %v13072_v28  ;;  %v15395_v60 = vld [vmem:[#allocation62_spill] sm:$0xff]  ;;  %v15396_v10 = vld [vmem:[#allocation60_spill] sm:$0xff] }
 0xd8c   : > { %8204 = vmatprep.subr.bf16.mxu0 %v15390_v1  ;;  %v13158_v63 = vpop.permute.xlu0 %4737  ;;  %v4474_v34 = vpop.permute.xlu1 %4473  ;;  %8236 = vmatprep.subr.bf16.mxu1 %v4890_v30  ;;  %v4436_v46 = vmul.f32 %v15292_v19, %v4416_v61  ;;  %v4710_v52 = vmul.f32 %v15382_v6, %v4690_v3  ;;  %v4882_v56 = vpack.c.bf16 %v4308_v5, %v4307_v49  ;;  %v8962_v51 = vld [vmem:[#allocation10 + $0x54] ss:$36 sps:$4 sm:$0xff]   ;;  %v15397_v47 = vld [vmem:[#allocation162_spill] sm:$0xff]  ;;  %v15399_v61 = vld [vmem:[#allocation45_spill] sm:$0xff] }
 0xd8d   : > { %v4909_v62 = vpack.c.bf16 %v4712_v12, %v4711_v18  ;;  %v4578_v53 = vmul.f32 %v15394_v41, %v4558_v24  ;;  %v4889_v26 = vpack.c.bf16 %v4438_v39, %v4437_v44  ;;  %v4305_v17 = vmul.f32 %v15395_v60, %v15287_v58  ;;  %v15398_v20 = vld [vmem:[#allocation160_spill] sm:$0xff]  ;;  %v15400_v30 = vld [vmem:[#allocation159_spill] sm:$0xff]  ;;  %v15401_v18 = vld [vmem:[#allocation157_spill] sm:$0xff] }
 0xd8e   : > { %v4303_v28 = vmul.f32 %v15287_v58, %v15396_v10  ;;  %v4435_v11 = vmul.f32 %v15292_v19, %v4415_v57  ;;  %v4688_v5 = vsel %vm4676_vm6, %v15398_v20, %v15397_v47  ;;  %v4709_v12 = vmul.f32 %v15382_v6, %v4689_v13  ;;  %v8964_v25 = vld [vmem:[#allocation10 + $0xdc] ss:$36 sps:$4 sm:$0xff]   ;;  %v15405_v8 = vld [vmem:[#allocation182_spill] sm:$0xff]  ;;  %v8966_v47 = vld [vmem:[#allocation10 + $0x50] ss:$36 sps:$4 sm:$0xff]  }
 0xd8f   : > { %8205 = vmatpush3.bf16.msra.mxu0 %v4862_v43  ;;  %8237 = vmatpush3.bf16.msra.mxu1 %v4882_v56  ;;  %v4901_v37 = vpack.c.bf16 %v4579_v15, %v4578_v53  ;;  %v4556_v43 = vsel %vm4543_vm10, %v13093_v27, %v4520_v35  ;;  %v4881_v23 = vpack.c.bf16 %v13116_v31, %v4305_v17  ;;  %v15402_v35 = vld [vmem:[#allocation165_spill] sm:$0xff]  ;;  %v15404_v44 = vld [vmem:[#allocation184_spill] sm:$0xff]  ;;  %v15411_v17 = vld [vmem:[#allocation179_spill] sm:$0xff] }
 0xd90   : > { %8270 = vmatprep.subr.bf16.mxu0 %v4909_v62  ;;  %v13174_v39 = vpop.permute.xlu0 %4785  ;;  %8238 = vmatprep.subr.bf16.mxu1 %v4889_v26  ;;  %v4304_v3 = vmul.f32 %v15287_v58, %v15399_v61  ;;  %v4687_v2 = vsel %vm4676_vm6, %v15401_v18, %v15400_v30  ;;  %v4908_v24 = vpack.c.bf16 %v4710_v52, %v4709_v12  ;;  %v15407_v52 = vld [vmem:[#allocation161_spill] sm:$0xff]  ;;  %v8967_v20 = vld [vmem:[#allocation10 + $0xd8] ss:$36 sps:$4 sm:$0xff]   ;;  %v15412_v12 = vld [vmem:[#allocation187_spill] sm:$0xff] }
 0xd91   : > { %v4522_v36 = vpop.permute.xlu1 %4521  ;;  %5151 = vmatmul.mubr.bf16.gmra.mxu1 %v8961_v54  ;;  %v4888_v1 = vpack.c.bf16 %v4436_v46, %v4435_v11  ;;  %v4708_v27 = vmul.f32 %v15382_v6, %v4688_v5  ;;  %v4555_v49 = vsel %vm4543_vm10, %v15403_v16, %v15402_v35  ;;  %v4686_v7 = vsel %vm4676_vm6, %v15405_v8, %v15404_v44  ;;  %v15406_v46 = vld [vmem:[#allocation163_spill] sm:$0xff]  ;;  %v15409_v54 = vld [vmem:[#allocation109_spill] sm:$0xff] }
 0xd92   : > { %5200 = vmatmul.mubr.bf16.vlgmr.msra.gmra.mxu0 %v8956_v38  ;;  %v4557_v31 = vsel %vm4543_vm10, %v4474_v34, %v4522_v36  ;;  %v4576_v57 = vmul.f32 %v15394_v41, %v4556_v43  ;;  %v4707_v13 = vmul.f32 %v15382_v6, %v4687_v2  ;;  %v4554_v56 = vsel %vm4543_vm10, %v15407_v52, %v15406_v46  ;;  %v15408_v38 = vld [vmem:[#allocation111_spill] sm:$0xff]  ;;  %v15410_v60 = vld [vmem:[#allocation181_spill] sm:$0xff]  ;;  %v15417_v36 = vld [vmem:[#allocation196_spill] sm:$0xff] }
 0xd93   : > { %8271 = vmatpush3.bf16.msra.mxu0 %v4901_v37  ;;  %5207 = vmatprep.mubr.bf16.mxu0 %v8962_v51  ;;  %v4577_v15 = vmul.f32 %v15394_v41, %v4557_v31  ;;  %v4880_v34 = vpack.c.bf16 %v4304_v3, %v4303_v28  ;;  %v4684_v53 = vsel %vm4676_vm6, %v15409_v54, %v15408_v38  ;;  %v15413_v28 = vld [vmem:[#allocation186_spill] sm:$0xff]  ;;  %v8973_v61 = vld [vmem:[#allocation10 + $0x14] ss:$36 sps:$4 sm:$0xff]   ;;  %v15416_v2 = vld [vmem:[#allocation197_spill] sm:$0xff] }
 0xd94   : > { %8239 = vmatpush3.bf16.msra.mxu1 %v4881_v23  ;;  %8272 = vmatprep.subr.bf16.mxu0 %v4908_v24  ;;  %v13196_v62 = vpop.permute.xlu0 %4781  ;;  %v4575_v26 = vmul.f32 %v15394_v41, %v4555_v49  ;;  %v4685_v10 = vsel %vm4676_vm6, %v15411_v17, %v15410_v60  ;;  %v4706_v5 = vmul.f32 %v15382_v6, %v4686_v7  ;;  %v8968_v23 = vld [vmem:[#allocation10 + $0x9c] ss:$36 sps:$4 sm:$0xff]  }
 0xd95   : > { %8240 = vmatprep.subr.bf16.mxu1 %v4888_v1  ;;  %5158 = vmatprep.mubr.bf16.mxu1 %v8964_v25  ;;  %v4900_v51 = vpack.c.bf16 %v4577_v15, %v4576_v57  ;;  %v13205_v11 = vpop.permute.xlu1 %4731  ;;  %v4553_v37 = vsel %vm4543_vm10, %v15413_v28, %v15412_v12  ;;  %v4907_v43 = vpack.c.bf16 %v4708_v27, %v4707_v13  ;;  %v15414_v3 = vld [vmem:[#allocation108_spill] sm:$0xff]  ;;  %v15415_v25 = vld [vmem:[#allocation106_spill] sm:$0xff]  ;;  %v15418_v16 = vld [vmem:[#allocation185_spill] sm:$0xff] }
 0xd96   : > { %v4683_v30 = vsel %vm4676_vm6, %v15415_v25, %v15414_v3  ;;  %v4574_v18 = vmul.f32 %v15394_v41, %v4554_v56  ;;  %v4825_v24 = vsel %vm4809_vm12, %v15417_v36, %v15416_v2  ;;  %v4704_v1 = vmul.f32 %v15382_v6, %v4684_v53  ;;  %v15419_v27 = vld [vmem:[#allocation183_spill] sm:$0xff]  ;;  %v13229_v57 = vld [vmem:[#allocation19 + $0x8] ss:$0 sm:$0xff]  ;;  %v15422_v13 = vld [vmem:[#allocation193_spill] sm:$0xff] }
 0xd97   : > { %8273 = vmatpush3.bf16.msra.mxu0 %v4900_v51  ;;  %v4705_v35 = vmul.f32 %v15382_v6, %v4685_v10  ;;  %v4552_v49 = vsel %vm4543_vm10, %v15419_v27, %v15418_v16  ;;  %v15420_v44 = vpack.c.bf16 %v12829_v22, %v12846_v50  ;;  %v4573_v7 = vmul.f32 %v15394_v41, %v4553_v37  ;;  %v15421_v15 = vld [vmem:[#allocation195_spill] sm:$0xff]  ;;  %v15425_v54 = vld [vmem:[#allocation140_spill] sm:$0xff]  ;;  %v15426_v53 = vld [vmem:[#allocation138_spill] sm:$0xff] }
 0xd98   : > { %8241 = vmatpush3.bf16.msra.mxu1 %v4880_v34  ;;  %8274 = vmatprep.subr.bf16.mxu0 %v4907_v43  ;;  %v13223_v31 = vpop.permute.xlu0 %4729  ;;  %v4899_v8 = vpack.c.bf16 %v4575_v26, %v4574_v18  ;;  %v4824_v46 = vsel %vm4809_vm12, %v15422_v13, %v15421_v15  ;;  %v15423_v56 = vld [vmem:[#allocation115_spill] sm:$0xff]  ;;  %v15424_v34 = vld [vmem:[#allocation113_spill] sm:$0xff]  ;;  %v4845_v22 = vmul.f32 %v13229_v57, %v4825_v24  ;;  %v8970_v25 = vld [vmem:[#allocation10 + $0x98] ss:$36 sps:$4 sm:$0xff]  }
 0xd99   : > { %8242 = vmatprep.subr.bf16.mxu1 %v15420_v44  ;;  %v13234_v52 = vpop.permute.xlu1 %4779  ;;  %5159 = vmatmul.mubr.bf16.gmra.mxu1 %v8967_v20  ;;  %v4551_v38 = vsel %vm4543_vm10, %v15424_v34, %v15423_v56  ;;  %v4906_v50 = vpack.c.bf16 %v4706_v5, %v4705_v35  ;;  %v4682_v26 = vsel %vm4676_vm6, %v15426_v53, %v15425_v54  ;;  %v15429_v20 = vld [vmem:[#allocation110_spill] sm:$0xff]  ;;  %v15433_v43 = vld [vmem:[#allocation135_spill] sm:$0xff]  ;;  %v15434_v18 = vld [vmem:[#allocation144_spill] sm:$0xff] }
 0xd9a   : > { %5208 = vmatmul.mubr.bf16.gmra.mxu0 %v8966_v47  ;;  %5264 = vmatprep.mubr.bf16.mxu1 %v8973_v61  ;;  %v4572_v60 = vmul.f32 %v15394_v41, %v4552_v49  ;;  %v15427_v17 = vpack.c.bf16 %v12747_v40, %v12758_v4  ;;  %v4878_v10 = vpack.c.bf16 %v12812_v0, %v12762_v32  ;;  %v15428_v47 = vld [vmem:[#allocation112_spill] sm:$0xff]  ;;  %v15430_v4 = vld [vmem:[#allocation67_spill] sm:$0xff]  ;;  %v15432_v0 = vld [vmem:[#allocation137_spill] sm:$0xff] }
 0xd9b   : > { %5215 = vmatprep.mubr.bf16.mxu0 %v8968_v23  ;;  %8275 = vmatpush3.bf16.msra.mxu0 %v4899_v8  ;;  %v4703_v51 = vmul.f32 %v15382_v6, %v4683_v30  ;;  %v4550_v5 = vsel %vm4543_vm10, %v15429_v20, %v15428_v47  ;;  %v4844_v12 = vmul.f32 %v13229_v57, %v4824_v46  ;;  %v15431_v40 = vld [vmem:[#allocation83_spill] sm:$0xff]  ;;  %v8974_v24 = vld [vmem:[#allocation10 + $0xe4] ss:$36 sps:$4 sm:$0xff]   ;;  %v15444_v47 = vld [vmem:[#allocation36_spill] sm:$0xff] }
 0xd9c   : > { %8243 = vmatpush3.bf16.msra.mxu1 %v15427_v17  ;;  %8276 = vmatprep.subr.bf16.mxu0 %v4906_v50  ;;  %v13254_v28 = vpop.permute.xlu0 %4777  ;;  %v4680_v37 = vsel %vm4676_vm6, %v15431_v40, %v15430_v4  ;;  %v4571_v32 = vmul.f32 %v15394_v41, %v4551_v38  ;;  %v4681_v23 = vsel %vm4676_vm6, %v15433_v43, %v15432_v0  ;;  %v15435_v2 = vld [vmem:[#allocation143_spill] sm:$0xff]  ;;  %v15436_v27 = vld [vmem:[#allocation142_spill] sm:$0xff]  ;;  %v15438_v15 = vld [vmem:[#allocation69_spill] sm:$0xff] }
 0xd9d   : > { %8244 = vmatprep.subr.bf16.mxu1 %v4886_v48  ;;  %v4898_v61 = vpack.c.bf16 %v4573_v7, %v4572_v60  ;;  %v13266_v3 = vpop.permute.xlu1 %4727  ;;  %v4702_v30 = vmul.f32 %v15382_v6, %v4682_v26  ;;  %v4549_v33 = vsel %vm4543_vm10, %v15435_v2, %v15434_v18  ;;  %v4905_v55 = vpack.c.bf16 %v4704_v1, %v4703_v51  ;;  %v8971_v36 = vld [vmem:[#allocation10 + $0x10] ss:$36 sps:$4 sm:$0xff]   ;;  %v8977_v7 = vld [vmem:[#allocation10 + $0x5c] ss:$36 sps:$4 sm:$0xff]   ;;  %v15441_v50 = vld [vmem:[#allocation82_spill] sm:$0xff] }
 0xd9e   : > { %v4917_v48 = vpack.c.bf16 %v4845_v22, %v4844_v12  ;;  %v4570_v35 = vmul.f32 %v15394_v41, %v4550_v5  ;;  %v4701_v16 = vmul.f32 %v15382_v6, %v4681_v23  ;;  %v15437_v49 = vld [vmem:[#allocation139_spill] sm:$0xff]  ;;  %v15439_v1 = vld [vmem:[#allocation85_spill] sm:$0xff]  ;;  %v4700_v46 = vmul.f32 %v15382_v6, %v4680_v37  ;;  %v15440_v22 = vld [vmem:[#allocation68_spill] sm:$0xff] }
 0xd9f   : > { %8277 = vmatpush3.bf16.msra.mxu0 %v4898_v61  ;;  %v4548_v44 = vsel %vm4543_vm10, %v15437_v49, %v15436_v27  ;;  %v4679_v13 = vsel %vm4676_vm6, %v15439_v1, %v15438_v15  ;;  %v4569_v34 = vmul.f32 %v15394_v41, %v4549_v33  ;;  %v4547_v54 = vsel %vm4543_vm10, %v15441_v50, %v15440_v22  ;;  %v15442_v53 = vld [vmem:[#allocation74_spill] sm:$0xff]  ;;  %v15443_v26 = vld [vmem:[#allocation63_spill] sm:$0xff]  ;;  %v15445_v20 = vld [vmem:[#allocation84_spill] sm:$0xff] }
 0xda0   : > { %8245 = vmatpush3.bf16.msra.mxu1 %v4878_v10  ;;  %8278 = vmatprep.subr.bf16.mxu0 %v4905_v55  ;;  %v13277_v8 = vpop.permute.xlu0 %4725  ;;  %v4897_v56 = vpack.c.bf16 %v4571_v32, %v4570_v35  ;;  %v4678_v60 = vsel %vm4676_vm6, %v15443_v26, %v15442_v53  ;;  %v4904_v17 = vpack.c.bf16 %v4702_v30, %v4701_v16  ;;  %v15446_v12 = vld [vmem:[#allocation76_spill] sm:$0xff]  ;;  %v15447_v4 = vld [vmem:[#allocation75_spill] sm:$0xff]  ;;  %v8976_v61 = vld [vmem:[#allocation10 + $0xe0] ss:$36 sps:$4 sm:$0xff]  }
 0xda1   : > { %8542 = vmatprep.subr.bf16.mxu1 %v4917_v48  ;;  %v13284_v38 = vpop.permute.xlu1 %4775  ;;  %v4568_v10 = vmul.f32 %v15394_v41, %v4548_v44  ;;  %v4699_v51 = vmul.f32 %v15382_v6, %v4679_v13  ;;  %v4546_v5 = vsel %vm4543_vm10, %v15445_v20, %v15444_v47  ;;  %v4677_v40 = vsel %vm4676_vm6, %v15447_v4, %v15446_v12  ;;  %v15449_v30 = vld [vmem:[#allocation64_spill] sm:$0xff]  ;;  %v15451_v35 = vld [vmem:[#allocation47_spill] sm:$0xff]  ;;  %v8983_v27 = vld [vmem:[#allocation10 + $0xa4] ss:$36 sps:$4 sm:$0xff]  }
 0xda2   : > { %5216 = vmatmul.mubr.bf16.gmra.mxu0 %v8970_v25  ;;  %v4567_v32 = vmul.f32 %v15394_v41, %v4547_v54  ;;  %v4698_v0 = vmul.f32 %v15382_v6, %v4678_v60  ;;  %v15448_v25 = vld [vmem:[#allocation46_spill] sm:$0xff]  ;;  %v8979_v33 = vld [vmem:[#allocation10 + $0x58] ss:$36 sps:$4 sm:$0xff]   ;;  %v4822_v49 = vsel %vm4809_vm12, %v13158_v63, %v13174_v39  ;;  %v4820_v44 = vsel %vm4809_vm12, %v12960_v9, %v13196_v62 }
 0xda3   : > { %5265 = vmatmul.mubr.bf16.vlgmr.msra.gmra.mxu1 %v8971_v36  ;;  %5223 = vmatprep.mubr.bf16.mxu0 %v8974_v24  ;;  %v4896_v43 = vpack.c.bf16 %v4569_v34, %v4568_v10  ;;  %v4545_v18 = vsel %vm4543_vm10, %v15449_v30, %v15448_v25  ;;  %v4903_v2 = vpack.c.bf16 %v4700_v46, %v4699_v51  ;;  %v8982_v55 = vld [vmem:[#allocation10 + $0x1c] ss:$36 sps:$4 sm:$0xff]   ;;  %v8986_v47 = vld [vmem:[#allocation10 + $0x64] ss:$36 sps:$4 sm:$0xff]  }
 0xda4   : > { %8279 = vmatpush3.bf16.msra.mxu0 %v4897_v56  ;;  %8543 = vmatpush3.bf16.msra.mxu1 %v4917_v48  ;;  %v4774_v37 = vpop.permute.xlu0 %4773  ;;  %v4566_v48 = vmul.f32 %v15394_v41, %v4546_v5  ;;  %v4697_v36 = vmul.f32 %v15382_v6, %v4677_v40  ;;  %v15450_v24 = vld [vmem:[#allocation61_spill] sm:$0xff]  ;;  %v4565_v1 = vmul.f32 %v15394_v41, %v4545_v18  ;;  %v8980_v60 = vld [vmem:[#allocation10 + $0x18] ss:$36 sps:$4 sm:$0xff]  }
 0xda5   : > { %8280 = vmatprep.subr.bf16.mxu0 %v4904_v17  ;;  %5272 = vmatprep.mubr.bf16.mxu1 %v8977_v7  ;;  %v4740_v23 = vpop.permute.xlu1 %4739  ;;  %v4544_v16 = vsel %vm4543_vm10, %v15451_v35, %v15450_v24  ;;  %v4821_v34 = vsel %vm4809_vm12, %v12987_v45, %v13020_v59  ;;  %v4842_v9 = vmul.f32 %v13229_v57, %v4822_v49  ;;  %v8985_v17 = vld [vmem:[#allocation10 + $0xa0] ss:$36 sps:$4 sm:$0xff]  }
 0xda6   : > { %v4895_v15 = vpack.c.bf16 %v4567_v32, %v4566_v48  ;;  %v4902_v46 = vpack.c.bf16 %v4698_v0, %v4697_v36  ;;  %v4564_v56 = vmul.f32 %v15394_v41, %v4544_v16  ;;  %v4840_v39 = vmul.f32 %v13229_v57, %v4820_v44  ;;  %v8998_v25 = vld [vmem:[#allocation10 + $0x20] ss:$36 sps:$4 sm:$0xff]   ;;  %v8995_v44 = vld [vmem:[#allocation10 + $0xf4] ss:$36 sps:$4 sm:$0xff]  }
 0xda7   : > { %v4818_v22 = vsel %vm4809_vm12, %v13223_v31, %v13254_v28  ;;  %v4841_v45 = vmul.f32 %v13229_v57, %v4821_v34  ;;  %v4819_v26 = vsel %vm4809_vm12, %v13205_v11, %v13234_v52  ;;  %v8988_v31 = vld [vmem:[#allocation10 + $0xec] ss:$36 sps:$4 sm:$0xff]   ;;  %v4816_v28 = vsel %vm4809_vm12, %v13277_v8, %v4774_v37 }
 0xda8   : > { %8281 = vmatpush3.bf16.msra.mxu0 %v4896_v43  ;;  %v4722_v7 = vpop.permute.xlu0 %4721  ;;  %v4894_v54 = vpack.c.bf16 %v4565_v1, %v4564_v56  ;;  %v4838_v10 = vmul.f32 %v13229_v57, %v4818_v22  ;;  %v4839_v5 = vmul.f32 %v13229_v57, %v4819_v26  ;;  %v4817_v11 = vsel %vm4809_vm12, %v13266_v3, %v13284_v38  ;;  %v8990_v43 = vld [vmem:[#allocation10 + $0x60] ss:$36 sps:$4 sm:$0xff]   ;;  %v8997_v34 = vld [vmem:[#allocation10 + $0xf0] ss:$36 sps:$4 sm:$0xff]  }
 0xda9   : > { %8282 = vmatprep.subr.bf16.mxu0 %v4903_v2  ;;  %v4788_v13 = vpop.permute.xlu1 %4787  ;;  %v4915_v51 = vpack.c.bf16 %v4841_v45, %v4840_v39  ;;  %v4836_v52 = vmul.f32 %v13229_v57, %v4816_v28  ;;  %v4837_v37 = vmul.f32 %v13229_v57, %v4817_v11  ;;  %v9001_v39 = vld [vmem:[#allocation10 + $0xf8] ss:$36 sps:$4 sm:$0xff]  }
 0xdaa   : > { %5224 = vmatmul.mubr.bf16.gmra.mxu0 %v8976_v61  ;;  %v4823_v63 = vsel %vm4809_vm12, %v4740_v23, %v4788_v13  ;;  %v4914_v4 = vpack.c.bf16 %v4839_v5, %v4838_v10  ;;  %v8991_v23 = vld [vmem:[#allocation10 + $0xe8] ss:$36 sps:$4 sm:$0xff]  }
 0xdab   : > { %5273 = vmatmul.mubr.bf16.gmra.mxu1 %v8979_v33  ;;  %5329 = vmatprep.mubr.bf16.mxu0 %v8982_v55  ;;  %v4843_v62 = vmul.f32 %v13229_v57, %v4823_v63  ;;  %v4913_v38 = vpack.c.bf16 %v4837_v37, %v4836_v52  ;;  %v8992_v61 = vld [vmem:[#allocation10 + $0xac] ss:$36 sps:$4 sm:$0xff]  }
 0xdac   : > { %8283 = vmatpush3.bf16.msra.mxu0 %v4895_v15  ;;  %5280 = vmatprep.mubr.bf16.mxu1 %v8983_v27  ;;  %v4770_v50 = vpop.permute.xlu0 %4769  ;;  %v8994_v27 = vld [vmem:[#allocation10 + $0xa8] ss:$36 sps:$4 sm:$0xff]  }
 0xdad   : > { %8284 = vmatprep.subr.bf16.mxu0 %v4902_v46  ;;  %v4724_v59 = vpop.permute.xlu1 %4723  ;;  %v4916_v53 = vpack.c.bf16 %v4843_v62, %v4842_v9  ;;  %v4814_v0 = vsel %vm4809_vm12, %v4722_v7, %v4770_v50  ;;  %v8999_v63 = vld [vmem:[#allocation10 + $0x68] ss:$36 sps:$4 sm:$0xff]   ;;  %v9000_v9 = vld [vmem:[#allocation10 + $0xb0] ss:$36 sps:$4 sm:$0xff]   ;;  %v13353_v62 = vpop.f32.mrf.mxu1 }
 0xdae   : > { %v4834_v18 = vmul.f32 %v13229_v57, %v4814_v0  ;;  %15452 = vst [vmem:[#allocation73_spill] sm:$0xff] %v13353_v62 }
 0xdaf   : > { %8544 = vmatprep.subr.bf16.mxu1 %v4916_v53 }
 0xdb0   : > { %8285 = vmatpush3.bf16.msra.mxu0 %v4894_v54  ;;  %8545 = vmatpush3.bf16.msra.mxu1 %v4916_v53  ;;  %v4718_v20 = vpop.permute.xlu0 %4717 }
 0xdb1   : > { %v4772_v12 = vpop.permute.xlu1 %4771  ;;  %8546 = vmatprep.subr.bf16.mxu1 %v4915_v51 }
 0xdb2   : > { %v4815_v40 = vsel %vm4809_vm12, %v4724_v59, %v4772_v12 }
 0xdb3   : > { %5330 = vmatmul.mubr.bf16.vlgmr.msra.gmra.mxu0 %v8980_v60  ;;  %5281 = vmatmul.mubr.bf16.gmra.mxu1 %v8985_v17  ;;  %v4835_v3 = vmul.f32 %v13229_v57, %v4815_v40 }
 0xdb4   : > { %5337 = vmatprep.mubr.bf16.mxu0 %v8986_v47  ;;  %5288 = vmatprep.mubr.bf16.mxu1 %v8988_v31  ;;  %v4766_v8 = vpop.permute.xlu0 %4765 }
 0xdb5   : > { %8547 = vmatpush3.bf16.msra.mxu1 %v4915_v51  ;;  %v4720_v32 = vpop.permute.xlu1 %4719  ;;  %v4812_v33 = vsel %vm4809_vm12, %v4718_v20, %v4766_v8  ;;  %v4912_v36 = vpack.c.bf16 %v4835_v3, %v4834_v18 }
 0xdb6   : > { %8548 = vmatprep.subr.bf16.mxu1 %v4914_v4  ;;  %v4832_v24 = vmul.f32 %v13229_v57, %v4812_v33 }
 0xdb8   : > { %v4714_v30 = vpop.permute.xlu0 %4713 }
 0xdb9   : > { %8549 = vmatpush3.bf16.msra.mxu1 %v4914_v4  ;;  %v4768_v2 = vpop.permute.xlu1 %4767 }
 0xdba   : > { %8550 = vmatprep.subr.bf16.mxu1 %v4913_v38  ;;  %v4813_v55 = vsel %vm4809_vm12, %v4720_v32, %v4768_v2 }
 0xdbb   : > { %5338 = vmatmul.mubr.bf16.gmra.mxu0 %v8990_v43  ;;  %5289 = vmatmul.mubr.bf16.gmra.mxu1 %v8991_v23  ;;  %v4833_v48 = vmul.f32 %v13229_v57, %v4813_v55 }
 0xdbc   : > { %5345 = vmatprep.mubr.bf16.mxu0 %v8992_v61  ;;  %8558 = vmatprep.mubr.bf16.mxu1 %v8998_v25  ;;  %v4762_v35 = vpop.permute.xlu0 %4761 }
 0xdbd   : > { %8551 = vmatpush3.bf16.msra.mxu1 %v4913_v38  ;;  %v4716_v16 = vpop.permute.xlu1 %4715  ;;  %v4911_v49 = vpack.c.bf16 %v4833_v48, %v4832_v24  ;;  %v4810_v7 = vsel %vm4809_vm12, %v4714_v30, %v4762_v35 }
 0xdbe   : > { %8552 = vmatprep.subr.bf16.mxu1 %v4912_v36  ;;  %v4830_v13 = vmul.f32 %v13229_v57, %v4810_v7 }
 0xdc1   : > { %8553 = vmatpush3.bf16.msra.mxu1 %v4912_v36  ;;  %v4764_v15 = vpop.permute.xlu1 %4763 }
 0xdc2   : > { %8554 = vmatprep.subr.bf16.mxu1 %v4911_v49  ;;  %v4811_v1 = vsel %vm4809_vm12, %v4716_v16, %v4764_v15 }
 0xdc3   : > { %5346 = vmatmul.mubr.bf16.gmra.mxu0 %v8994_v27  ;;  %v4831_v46 = vmul.f32 %v13229_v57, %v4811_v1 }
 0xdc4   : > { %5353 = vmatprep.mubr.bf16.mxu0 %v8995_v44 }
 0xdc5   : > { %8555 = vmatpush3.bf16.msra.mxu1 %v4911_v49  ;;  %v4910_v56 = vpack.c.bf16 %v4831_v46, %v4830_v13 }
 0xdc7   : > { %8556 = vmatprep.subr.bf16.mxu1 %v4910_v56 }
 0xdc9   : > { %8557 = vmatpush3.bf16.msra.mxu1 %v4910_v56 }
 0xdcb   : > { %5354 = vmatmul.mubr.bf16.gmra.mxu0 %v8997_v34 }
 0xdcc   : > { %8559 = vmatmul.mubr.bf16.vlgmr.msra.gmra.mxu1 %v8999_v63 }
 0xdcd   : > { %8562 = vmatprep.mubr.bf16.mxu1 %v9000_v9 }
 0xdd4   : > { %8563 = vmatmul.mubr.bf16.gmra.mxu1 %v9001_v39 }
 0xe41   : > { %v8166_v22 = vpop.f32.mrf.mxu1 }
 0xe43   : > { %v8167_v50 = vpop.f32.mrf.mxu1 }
 0xe44   : > { %v8168_v54 = vadd.f32 %v8167_v50, %v8166_v22 }
 0xe45   : > { %v8169_v45 = vpop.f32.mrf.mxu1 }
 0xe47   : > { %v8170_v57 = vpop.f32.mrf.mxu1 }
 0xe48   : > { %v8171_v59 = vadd.f32 %v8170_v57, %v8169_v45 }
 0xe49   : > { %v13355_v53 = vpop.f32.mrf.mxu1 }
 0xe4b   : > { %v13357_v26 = vpop.f32.mrf.mxu1 }
 0xe4d   : > { %v13359_v60 = vpop.f32.mrf.mxu1 }
 0xe4f   : > { %v13361_v17 = vpop.f32.mrf.mxu1 }
 0xe51   : > { %v8178_v51 = vpop.f32.mrf.mxu1 }
 0xe52   : > { %v8206_v10 = vpop.f32.mrf.mxu0 }
 0xe53   : > { %v8179_v31 = vpop.f32.mrf.mxu1 }
 0xe54   : > { %v8207_v47 = vpop.f32.mrf.mxu0  ;;  %v8180_v20 = vadd.f32 %v8179_v31, %v8178_v51 }
 0xe55   : > { %v8208_v28 = vadd.f32 %v8207_v47, %v8206_v10  ;;  %v8181_v12 = vpop.f32.mrf.mxu1 }
 0xe56   : > { %v8209_v5 = vpop.f32.mrf.mxu0 }
 0xe57   : > { %v5202_v11 = vadd.f32 %v8208_v28, %v8168_v54  ;;  %v8182_v4 = vpop.f32.mrf.mxu1 }
 0xe58   : > { %v8210_v52 = vpop.f32.mrf.mxu0  ;;  %v8183_v8 = vadd.f32 %v8182_v4, %v8181_v12 }
 0xe59   : > { %v8211_v40 = vadd.f32 %v8210_v52, %v8209_v5  ;;  %v8184_v32 = vpop.f32.mrf.mxu1 }
 0xe5a   : > { %v13363_v37 = vpop.f32.mrf.mxu0 }
 0xe5b   : > { %v5205_v0 = vadd.f32 %v8211_v40, %v8171_v59  ;;  %v8185_v23 = vpop.f32.mrf.mxu1 }
 0xe5c   : > { %v13365_v43 = vpop.f32.mrf.mxu0  ;;  %v8186_v3 = vadd.f32 %v8185_v23, %v8184_v32 }
 0xe5d   : > { %v8187_v61 = vpop.f32.mrf.mxu1 }
 0xe5e   : > { %v13367_v38 = vpop.f32.mrf.mxu0 }
 0xe5f   : > { %v8188_v30 = vpop.f32.mrf.mxu1 }
 0xe60   : > { %v13369_v25 = vpop.f32.mrf.mxu0  ;;  %v8189_v18 = vadd.f32 %v8188_v30, %v8187_v61 }
 0xe62   : > { %v8218_v2 = vpop.f32.mrf.mxu0 }
 0xe63   : > { %v8246_v33 = vpop.f32.mrf.mxu1 }
 0xe64   : > { %v8219_v55 = vpop.f32.mrf.mxu0 }
 0xe65   : > { %v8220_v48 = vadd.f32 %v8219_v55, %v8218_v2  ;;  %v8247_v36 = vpop.f32.mrf.mxu1 }
 0xe66   : > { %v8248_v24 = vadd.f32 %v8247_v36, %v8246_v33  ;;  %v8221_v35 = vpop.f32.mrf.mxu0 }
 0xe67   : > { %v5218_v16 = vadd.f32 %v8220_v48, %v8180_v20  ;;  %v8249_v27 = vpop.f32.mrf.mxu1 }
 0xe68   : > { %v5267_v49 = vadd.f32 %v8248_v24, %v5202_v11  ;;  %v8222_v44 = vpop.f32.mrf.mxu0 }
 0xe69   : > { %v8223_v7 = vadd.f32 %v8222_v44, %v8221_v35  ;;  %v8250_v15 = vpop.f32.mrf.mxu1 }
 0xe6a   : > { %v8251_v1 = vadd.f32 %v8250_v15, %v8249_v27  ;;  %v8224_v13 = vpop.f32.mrf.mxu0  ;;  %v8214_v27 = vadd.f32 %v13365_v43, %v13363_v37  ;;  %v8177_v37 = vadd.f32 %v13361_v17, %v13359_v60 }
 0xe6b   : > { %v5221_v46 = vadd.f32 %v8223_v7, %v8183_v8  ;;  %v8252_v56 = vpop.f32.mrf.mxu1  ;;  %v8174_v7 = vadd.f32 %v13357_v26, %v13355_v53 }
 0xe6c   : > { %v5270_v34 = vadd.f32 %v8251_v1, %v5205_v0  ;;  %v8225_v63 = vpop.f32.mrf.mxu0 }
 0xe6d   : > { %v8226_v9 = vadd.f32 %v8225_v63, %v8224_v13  ;;  %v8253_v39 = vpop.f32.mrf.mxu1 }
 0xe6e   : > { %v8227_v22 = vpop.f32.mrf.mxu0  ;;  %v8254_v15 = vadd.f32 %v8253_v39, %v8252_v56 }
 0xe6f   : > { %v5226_v50 = vadd.f32 %v8226_v9, %v8186_v3  ;;  %v8255_v54 = vpop.f32.mrf.mxu1 }
 0xe70   : > { %v8228_v45 = vpop.f32.mrf.mxu0 }
 0xe71   : > { %v8229_v57 = vadd.f32 %v8228_v45, %v8227_v22  ;;  %v8256_v59 = vpop.f32.mrf.mxu1 }
 0xe73   : > { %v5229_v10 = vadd.f32 %v8229_v57, %v8189_v18  ;;  %v8286_v51 = vpop.f32.mrf.mxu0  ;;  %v8258_v47 = vpop.f32.mrf.mxu1 }
 0xe75   : > { %v8287_v31 = vpop.f32.mrf.mxu0  ;;  %v8259_v28 = vpop.f32.mrf.mxu1 }
 0xe76   : > { %v8288_v20 = vadd.f32 %v8287_v31, %v8286_v51  ;;  %v8260_v5 = vadd.f32 %v8259_v28, %v8258_v47 }
 0xe77   : > { %v8289_v12 = vpop.f32.mrf.mxu0  ;;  %v8261_v11 = vpop.f32.mrf.mxu1 }
 0xe78   : > { %v5283_v52 = vadd.f32 %v8260_v5, %v5218_v16  ;;  %v13371_v4 = vadd.f32 %v8288_v20, %v5267_v49 }
 0xe79   : > { %v8290_v40 = vpop.f32.mrf.mxu0  ;;  %v8262_v8 = vpop.f32.mrf.mxu1 }
 0xe7a   : > { %v8291_v32 = vadd.f32 %v8290_v40, %v8289_v12  ;;  %v8263_v0 = vadd.f32 %v8262_v8, %v8261_v11 }
 0xe7b   : > { %v8292_v23 = vpop.f32.mrf.mxu0  ;;  %v8264_v3 = vpop.f32.mrf.mxu1 }
 0xe7c   : > { %v5286_v61 = vadd.f32 %v8263_v0, %v5221_v46  ;;  %v13373_v30 = vadd.f32 %v8291_v32, %v5270_v34  ;;  %v5210_v46 = vadd.f32 %v8214_v27, %v8174_v7  ;;  %v8217_v34 = vadd.f32 %v13369_v25, %v13367_v38 }
 0xe7d   : > { %v8293_v18 = vpop.f32.mrf.mxu0  ;;  %v8265_v2 = vpop.f32.mrf.mxu1 }
 0xe7e   : > { %v8266_v33 = vadd.f32 %v8265_v2, %v8264_v3  ;;  %v8294_v63 = vadd.f32 %v8293_v18, %v8292_v23  ;;  %v5275_v43 = vadd.f32 %v8254_v15, %v5210_v46 }
 0xe7f   : > { %v8295_v55 = vpop.f32.mrf.mxu0  ;;  %v8267_v48 = vpop.f32.mrf.mxu1 }
 0xe80   : > { %v13375_v36 = vadd.f32 %v8266_v33, %v5226_v50  ;;  %v8257_v50 = vadd.f32 %v8256_v59, %v8255_v54  ;;  %v5340_v26 = vadd.f32 %v8294_v63, %v5275_v43 }
 0xe81   : > { %v8296_v24 = vpop.f32.mrf.mxu0  ;;  %v8268_v35 = vpop.f32.mrf.mxu1 }
 0xe82   : > { %v8269_v16 = vadd.f32 %v8268_v35, %v8267_v48  ;;  %v8297_v53 = vadd.f32 %v8296_v24, %v8295_v55 }
 0xe83   : > { %v8298_v49 = vpop.f32.mrf.mxu0 }
 0xe84   : > { %v13379_v44 = vadd.f32 %v8269_v16, %v5229_v10  ;;  %v5213_v10 = vadd.f32 %v8217_v34, %v8177_v37 }
 0xe85   : > { %v8299_v1 = vpop.f32.mrf.mxu0 }
 0xe86   : > { %v8300_v13 = vadd.f32 %v8299_v1, %v8298_v49  ;;  %v5278_v51 = vadd.f32 %v8257_v50, %v5213_v10 }
 0xe87   : > { %v8301_v9 = vpop.f32.mrf.mxu0 }
 0xe88   : > { %v13385_v22 = vadd.f32 %v8300_v13, %v5283_v52  ;;  %v5343_v31 = vadd.f32 %v8297_v53, %v5278_v51 }
 0xe89   : > { %v8302_v45 = vpop.f32.mrf.mxu0 }
 0xe8a   : > { %v8303_v57 = vadd.f32 %v8302_v45, %v8301_v9 }
 0xe8b   : > { %v8304_v8 = vpop.f32.mrf.mxu0 }
 0xe8c   : > { %v8560_v56 = vpop.f32.mrf.mxu1  ;;  %v13389_v39 = vadd.f32 %v8303_v57, %v5286_v61 }
 0xe8d   : > { %v5405_v47 = vadd.f32 %v8560_v56, %v5340_v26  ;;  %v8305_v32 = vpop.f32.mrf.mxu0 }
 0xe8e   : > { %v5396_v38 = vpop.f32.mrf.mxu1  ;;  %v8306_v3 = vadd.f32 %v8305_v32, %v8304_v8 }
 0xe8f   : > { %vm5429_vm14 = vcmp.gt.f32.partialorder %v5405_v47, 0.0  ;;  %v5437_v25 = vmul.f32 0.2, %v5405_v47  ;;  %v5397_v59 = vadd.f32 %v5396_v38, %v13371_v4  ;;  %v8307_v0 = vpop.f32.mrf.mxu0 }
 0xe90   : > { %v8561_v28 = vpop.f32.mrf.mxu1  ;;  %v5356_v2 = vadd.f32 %v8306_v3, %v13375_v36 }
 0xe91   : > { %v13391_v20 = vsel %vm5429_vm14, %v5405_v47, %v5437_v25  ;;  %v5408_v60 = vadd.f32 %v8561_v28, %v5343_v31  ;;  %v5435_v12 = vmul.f32 0.2, %v5397_v59  ;;  %vm5427_vm0 = vcmp.gt.f32.partialorder %v5397_v59, 0.0  ;;  %v8308_v61 = vpop.f32.mrf.mxu0 }
 0xe92   : > { %15453 = vst [vmem:[#allocation55_spill] sm:$0xff] %v13391_v20  ;;  %5679 = vrot.lane.b32.xlu0 %v13391_v20, %s15120_s1  ;;  %v5399_v5 = vpop.f32.mrf.mxu1  ;;  %v8309_v18 = vadd.f32 %v8308_v61, %v8307_v0 }
 0xe93   : > { %vm5430_vm15 = vcmp.gt.f32.partialorder %v5408_v60, 0.0  ;;  %v5438_v17 = vmul.f32 0.2, %v5408_v60  ;;  %v5400_v11 = vadd.f32 %v5399_v5, %v13373_v30  ;;  %v13451_v52 = vsel %vm5427_vm0, %v5397_v59, %v5435_v12 }
 0xe94   : > { %15457 = vst [vmem:[#allocation80_spill] sm:$0xff] %v13451_v52  ;;  %v8564_v23 = vpop.f32.mrf.mxu1  ;;  %v5359_v48 = vadd.f32 %v8309_v18, %v13379_v44 }
 0xe95   : > { %v13395_v54 = vsel %vm5430_vm15, %v5408_v60, %v5438_v17  ;;  %v5436_v4 = vmul.f32 0.2, %v5400_v11  ;;  %vm5428_vm8 = vcmp.gt.f32.partialorder %v5400_v11, 0.0  ;;  %v5421_v33 = vadd.f32 %v8564_v23, %v5356_v2 }
 0xe96   : > { %15454 = vst [vmem:[#allocation78_spill] sm:$0xff] %v13395_v54  ;;  %5681 = vrot.lane.b32.xlu1 %v13395_v54, %s15120_s1  ;;  %5703 = vrot.lane.b32.xlu0 %v13391_v20, %s14902_s5  ;;  %v13499_v30 = vpop.f32.mrf.mxu1 }
 0xe97   : > { %v13457_v40 = vsel %vm5428_vm8, %v5400_v11, %v5436_v4  ;;  %v5441_v24 = vmul.f32 0.2, %v5421_v33  ;;  %vm5433_vm2 = vcmp.gt.f32.partialorder %v5421_v33, 0.0  ;;  %v5413_v31 = vadd.f32 %v13499_v30, %v13385_v22 }
 0xe98   : > { %15458 = vst [vmem:[#allocation35_spill] sm:$0xff] %v13457_v40  ;;  %v8565_v55 = vpop.f32.mrf.mxu1 }
 0xe99   : > { %v5424_v35 = vadd.f32 %v8565_v55, %v5359_v48  ;;  %v13515_v36 = vsel %vm5433_vm2, %v5421_v33, %v5441_v24  ;;  %v5439_v59 = vmul.f32 0.2, %v5413_v31  ;;  %vm5431_vm14 = vcmp.gt.f32.partialorder %v5413_v31, 0.0 }
 0xe9a   : > { %5705 = vrot.lane.b32.xlu1 %v13395_v54, %s14902_s5  ;;  %5551 = vrot.lane.b32.xlu0 %v13391_v20, %s14900_s11  ;;  %15459 = vst [vmem:[#allocation53_spill] sm:$0xff] %v13515_v36  ;;  %v5415_v28 = vpop.f32.mrf.mxu1 }
 0xe9b   : > { %v5442_v16 = vmul.f32 0.2, %v5424_v35  ;;  %vm5434_vm3 = vcmp.gt.f32.partialorder %v5424_v35, 0.0  ;;  %v5416_v5 = vadd.f32 %v5415_v28, %v13389_v39  ;;  %v13632_v11 = vsel %vm5431_vm14, %v5413_v31, %v5439_v59 }
 0xe9c   : > { %15472 = vst [vmem:[#allocation43_spill] sm:$0xff] %v13632_v11 }
 0xe9d   : > { %v13523_v49 = vsel %vm5434_vm3, %v5424_v35, %v5442_v16  ;;  %v5440_v4 = vmul.f32 0.2, %v5416_v5  ;;  %vm5432_vm15 = vcmp.gt.f32.partialorder %v5416_v5, 0.0 }
 0xe9e   : > { %5553 = vrot.lane.b32.xlu1 %v13395_v54, %s14900_s11  ;;  %5575 = vrot.lane.b32.xlu0 %v13391_v20, %s14898_s19  ;;  %15460 = vst [vmem:[#allocation66_spill] sm:$0xff] %v13523_v49 }
 0xe9f   : > { %v13642_v32 = vsel %vm5432_vm15, %v5416_v5, %v5440_v4 }
 0xea0   : > { %15474 = vst [vmem:[#allocation93_spill] sm:$0xff] %v13642_v32 }
 0xea2   : > { %5577 = vrot.lane.b32.xlu1 %v13395_v54, %s14898_s19  ;;  %5879 = vrot.lane.b32.xlu0 %v13391_v20, %s15273_s22 }
 0xea6   : > { %5881 = vrot.lane.b32.xlu1 %v13395_v54, %s15273_s22  ;;  %5903 = vrot.lane.b32.xlu0 %v13391_v20, %s15171_s13 }
 0xeaa   : > { %5905 = vrot.lane.b32.xlu1 %v13395_v54, %s15171_s13  ;;  %5751 = vrot.lane.b32.xlu0 %v13391_v20, %s15117_s3 }
 0xeae   : > { %5753 = vrot.lane.b32.xlu1 %v13395_v54, %s15117_s3  ;;  %5775 = vrot.lane.b32.xlu0 %v13391_v20, %s15121_s16 }
 0xeb2   : > { %5777 = vrot.lane.b32.xlu1 %v13395_v54, %s15121_s16  ;;  %5615 = vrot.lane.b32.xlu0 %v13391_v20, %s14896_s7 }
 0xeb6   : > { %5617 = vrot.lane.b32.xlu1 %v13395_v54, %s14896_s7  ;;  %5639 = vrot.lane.b32.xlu0 %v13391_v20, %s15264_s10 }
 0xeba   : > { %5641 = vrot.lane.b32.xlu1 %v13395_v54, %s15264_s10  ;;  %5487 = vrot.lane.b32.xlu0 %v13391_v20, %s15455_s27 }
 0xebe   : > { %5489 = vrot.lane.b32.xlu1 %v13395_v54, %s15455_s27  ;;  %5511 = vrot.lane.b32.xlu0 %v13391_v20, %s15456_s23 }
 0xec2   : > { %5513 = vrot.lane.b32.xlu1 %v13395_v54, %s15456_s23  ;;  %5815 = vrot.lane.b32.xlu0 %v13391_v20, %s15172_s6 }
 0xec6   : > { %5817 = vrot.lane.b32.xlu1 %v13395_v54, %s15172_s6  ;;  %5839 = vrot.lane.b32.xlu0 %v13391_v20, %s14914_s8 }
 0xeca   : > { %5841 = vrot.lane.b32.xlu1 %v13395_v54, %s14914_s8  ;;  %5675 = vrot.lane.b32.xlu0 %v13451_v52, %s15120_s1 }
 0xece   : > { %5677 = vrot.lane.b32.xlu1 %v13457_v40, %s15120_s1  ;;  %5699 = vrot.lane.b32.xlu0 %v13451_v52, %s14902_s5 }
 0xed2   : > { %5701 = vrot.lane.b32.xlu1 %v13457_v40, %s14902_s5  ;;  %5547 = vrot.lane.b32.xlu0 %v13451_v52, %s14900_s11 }
 0xed6   : > { %5549 = vrot.lane.b32.xlu1 %v13457_v40, %s14900_s11  ;;  %5571 = vrot.lane.b32.xlu0 %v13451_v52, %s14898_s19 }
 0xeda   : > { %5573 = vrot.lane.b32.xlu1 %v13457_v40, %s14898_s19  ;;  %5875 = vrot.lane.b32.xlu0 %v13451_v52, %s15273_s22 }
 0xede   : > { %5877 = vrot.lane.b32.xlu1 %v13457_v40, %s15273_s22  ;;  %5899 = vrot.lane.b32.xlu0 %v13451_v52, %s15171_s13 }
 0xee2   : > { %5901 = vrot.lane.b32.xlu1 %v13457_v40, %s15171_s13  ;;  %5747 = vrot.lane.b32.xlu0 %v13451_v52, %s15117_s3 }
 0xee6   : > { %5749 = vrot.lane.b32.xlu1 %v13457_v40, %s15117_s3  ;;  %5771 = vrot.lane.b32.xlu0 %v13451_v52, %s15121_s16 }
 0xeea   : > { %5773 = vrot.lane.b32.xlu1 %v13457_v40, %s15121_s16  ;;  %5611 = vrot.lane.b32.xlu0 %v13451_v52, %s14896_s7 }
 0xeee   : > { %5613 = vrot.lane.b32.xlu1 %v13457_v40, %s14896_s7  ;;  %5635 = vrot.lane.b32.xlu0 %v13451_v52, %s15264_s10 }
 0xef2   : > { %5637 = vrot.lane.b32.xlu1 %v13457_v40, %s15264_s10  ;;  %5483 = vrot.lane.b32.xlu0 %v13451_v52, %s15455_s27 }
 0xef6   : > { %5485 = vrot.lane.b32.xlu1 %v13457_v40, %s15455_s27  ;;  %5507 = vrot.lane.b32.xlu0 %v13451_v52, %s15456_s23 }
 0xefa   : > { %5509 = vrot.lane.b32.xlu1 %v13457_v40, %s15456_s23  ;;  %5811 = vrot.lane.b32.xlu0 %v13451_v52, %s15172_s6 }
 0xefe   : > { %5813 = vrot.lane.b32.xlu1 %v13457_v40, %s15172_s6  ;;  %5835 = vrot.lane.b32.xlu0 %v13451_v52, %s14914_s8 }
 0xf02   : > { %5837 = vrot.lane.b32.xlu1 %v13457_v40, %s14914_s8  ;;  %5687 = vrot.lane.b32.xlu0 %v13515_v36, %s15120_s1 }
 0xf04   : > { %v13521_v27 = vpop.permute.xlu0 %5679 }
 0xf06   : > { %5689 = vrot.lane.b32.xlu1 %v13523_v49, %s15120_s1  ;;  %5711 = vrot.lane.b32.xlu0 %v13515_v36, %s14902_s5 }
 0xf08   : > { %v13529_v44 = vpop.permute.xlu1 %5681  ;;  %v13531_v7 = vpop.permute.xlu0 %5703 }
 0xf0a   : > { %5713 = vrot.lane.b32.xlu1 %v13523_v49, %s14902_s5  ;;  %5559 = vrot.lane.b32.xlu0 %v13515_v36, %s14900_s11 }
 0xf0c   : > { %v13537_v15 = vpop.permute.xlu1 %5705  ;;  %v13539_v1 = vpop.permute.xlu0 %5551 }
 0xf0d   : > { %v5726_v58 = vsel %vm912_vm9, %v13529_v44, %v13537_v15 }
 0xf0e   : > { %5561 = vrot.lane.b32.xlu1 %v13523_v49, %s14900_s11  ;;  %5583 = vrot.lane.b32.xlu0 %v13515_v36, %s14898_s19 }
 0xf10   : > { %v13545_v13 = vpop.permute.xlu1 %5553  ;;  %v13547_v46 = vpop.permute.xlu0 %5575 }
 0xf12   : > { %5585 = vrot.lane.b32.xlu1 %v13523_v49, %s14898_s19  ;;  %5887 = vrot.lane.b32.xlu0 %v13515_v36, %s15273_s22 }
 0xf14   : > { %v13553_v34 = vpop.permute.xlu1 %5577  ;;  %v13555_v63 = vpop.permute.xlu0 %5879 }
 0xf16   : > { %5889 = vrot.lane.b32.xlu1 %v13523_v49, %s15273_s22  ;;  %5911 = vrot.lane.b32.xlu0 %v13515_v36, %s15171_s13 }
 0xf18   : > { %v13561_v9 = vpop.permute.xlu1 %5881  ;;  %v13563_v37 = vpop.permute.xlu0 %5903 }
 0xf1a   : > { %5913 = vrot.lane.b32.xlu1 %v13523_v49, %s15171_s13  ;;  %5759 = vrot.lane.b32.xlu0 %v13515_v36, %s15117_s3 }
 0xf1c   : > { %v13569_v43 = vpop.permute.xlu1 %5905  ;;  %v13571_v50 = vpop.permute.xlu0 %5751 }
 0xf1e   : > { %5761 = vrot.lane.b32.xlu1 %v13523_v49, %s15117_s3  ;;  %5783 = vrot.lane.b32.xlu0 %v13515_v36, %s15121_s16 }
 0xf20   : > { %v13577_v45 = vpop.permute.xlu1 %5753  ;;  %v13579_v57 = vpop.permute.xlu0 %5775 }
 0xf22   : > { %5785 = vrot.lane.b32.xlu1 %v13523_v49, %s15121_s16  ;;  %5623 = vrot.lane.b32.xlu0 %v13515_v36, %s14896_s7 }
 0xf24   : > { %v13585_v10 = vpop.permute.xlu1 %5777  ;;  %v13587_v53 = vpop.permute.xlu0 %5615 }
 0xf25   : > { %15461 = vst [vmem:[#allocation72_spill] sm:$0xff] %v13587_v53 }
 0xf26   : > { %5625 = vrot.lane.b32.xlu1 %v13523_v49, %s14896_s7  ;;  %5647 = vrot.lane.b32.xlu0 %v13515_v36, %s15264_s10 }
 0xf28   : > { %v13593_v26 = vpop.permute.xlu1 %5617  ;;  %v13595_v56 = vpop.permute.xlu0 %5639 }
 0xf29   : > { %15462 = vst [vmem:[#allocation33_spill] sm:$0xff] %v13593_v26  ;;  %15463 = vst [vmem:[#allocation54_spill] sm:$0xff] %v13595_v56 }
 0xf2a   : > { %5649 = vrot.lane.b32.xlu1 %v13523_v49, %s15264_s10  ;;  %5495 = vrot.lane.b32.xlu0 %v13515_v36, %s15455_s27 }
 0xf2c   : > { %v13601_v51 = vpop.permute.xlu1 %5641  ;;  %v13603_v47 = vpop.permute.xlu0 %5487 }
 0xf2d   : > { %15464 = vst [vmem:[#allocation89_spill] sm:$0xff] %v13601_v51  ;;  %15465 = vst [vmem:[#allocation65_spill] sm:$0xff] %v13603_v47 }
 0xf2e   : > { %5497 = vrot.lane.b32.xlu1 %v13523_v49, %s15455_s27  ;;  %5519 = vrot.lane.b32.xlu0 %v13515_v36, %s15456_s23 }
 0xf30   : > { %v13609_v38 = vpop.permute.xlu1 %5489  ;;  %v13611_v25 = vpop.permute.xlu0 %5511 }
 0xf31   : > { %15466 = vst [vmem:[#allocation71_spill] sm:$0xff] %v13609_v38  ;;  %15467 = vst [vmem:[#allocation87_spill] sm:$0xff] %v13611_v25 }
 0xf32   : > { %5521 = vrot.lane.b32.xlu1 %v13523_v49, %s15456_s23  ;;  %5823 = vrot.lane.b32.xlu0 %v13515_v36, %s15172_s6 }
 0xf34   : > { %v13619_v60 = vpop.permute.xlu1 %5513  ;;  %v13621_v17 = vpop.permute.xlu0 %5815 }
 0xf35   : > { %15468 = vst [vmem:[#allocation70_spill] sm:$0xff] %v13619_v60  ;;  %15469 = vst [vmem:[#allocation167_spill] sm:$0xff] %v13621_v17 }
 0xf36   : > { %5825 = vrot.lane.b32.xlu1 %v13523_v49, %s15172_s6  ;;  %5847 = vrot.lane.b32.xlu0 %v13515_v36, %s14914_s8 }
 0xf38   : > { %v13628_v22 = vpop.permute.xlu1 %5817  ;;  %v13630_v12 = vpop.permute.xlu0 %5839 }
 0xf39   : > { %15470 = vst [vmem:[#allocation166_spill] sm:$0xff] %v13628_v22  ;;  %15471 = vst [vmem:[#allocation42_spill] sm:$0xff] %v13630_v12 }
 0xf3a   : > { %5849 = vrot.lane.b32.xlu1 %v13523_v49, %s14914_s8  ;;  %5683 = vrot.lane.b32.xlu0 %v13632_v11, %s15120_s1 }
 0xf3c   : > { %v13638_v39 = vpop.permute.xlu1 %5841  ;;  %v13640_v8 = vpop.permute.xlu0 %5675 }
 0xf3d   : > { %15473 = vst [vmem:[#allocation95_spill] sm:$0xff] %v13638_v39 }
 0xf3e   : > { %5685 = vrot.lane.b32.xlu1 %v13642_v32, %s15120_s1  ;;  %5707 = vrot.lane.b32.xlu0 %v13632_v11, %s14902_s5 }
 0xf40   : > { %v13648_v0 = vpop.permute.xlu1 %5677  ;;  %v13650_v23 = vpop.permute.xlu0 %5699 }
 0xf42   : > { %5709 = vrot.lane.b32.xlu1 %v13642_v32, %s14902_s5  ;;  %5555 = vrot.lane.b32.xlu0 %v13632_v11, %s14900_s11  ;;  %s15530_s5 = smov 13  }
 0xf44   : > { %v13656_v3 = vpop.permute.xlu1 %5701  ;;  %v13658_v61 = vpop.permute.xlu0 %5547 }
 0xf46   : > { %5557 = vrot.lane.b32.xlu1 %v13642_v32, %s14900_s11  ;;  %5579 = vrot.lane.b32.xlu0 %v13632_v11, %s14898_s19  ;;  %s15482_s11 = sld [smem:[#allocation205_spill]] }
 0xf48   : > { %v13664_v30 = vpop.permute.xlu1 %5549  ;;  %v13666_v18 = vpop.permute.xlu0 %5571 }
 0xf4a   : > { %5581 = vrot.lane.b32.xlu1 %v13642_v32, %s14898_s19  ;;  %5883 = vrot.lane.b32.xlu0 %v13632_v11, %s15273_s22  ;;  %s15487_s19 = smov 123  }
 0xf4c   : > { %v13672_v2 = vpop.permute.xlu1 %5573  ;;  %v13674_v33 = vpop.permute.xlu0 %5875 }
 0xf4e   : > { %5885 = vrot.lane.b32.xlu1 %v13642_v32, %s15273_s22  ;;  %5907 = vrot.lane.b32.xlu0 %v13632_v11, %s15171_s13 }
 0xf50   : > { %v13680_v55 = vpop.permute.xlu1 %5877  ;;  %v13682_v48 = vpop.permute.xlu0 %5899 }
 0xf52   : > { %5909 = vrot.lane.b32.xlu1 %v13642_v32, %s15171_s13  ;;  %5755 = vrot.lane.b32.xlu0 %v13632_v11, %s15117_s3 }
 0xf54   : > { %v13688_v24 = vpop.permute.xlu1 %5901  ;;  %v13690_v35 = vpop.permute.xlu0 %5747 }
 0xf56   : > { %5757 = vrot.lane.b32.xlu1 %v13642_v32, %s15117_s3  ;;  %5779 = vrot.lane.b32.xlu0 %v13632_v11, %s15121_s16 }
 0xf58   : > { %v13696_v16 = vpop.permute.xlu1 %5749  ;;  %v13698_v31 = vpop.permute.xlu0 %5771 }
 0xf5a   : > { %5781 = vrot.lane.b32.xlu1 %v13642_v32, %s15121_s16  ;;  %5619 = vrot.lane.b32.xlu0 %v13632_v11, %s14896_s7 }
 0xf5c   : > { %v13704_v28 = vpop.permute.xlu1 %5773  ;;  %v13706_v59 = vpop.permute.xlu0 %5611 }
 0xf5d   : > { %15475 = vst [vmem:[#allocation120_spill] sm:$0xff] %v13706_v59 }
 0xf5e   : > { %5621 = vrot.lane.b32.xlu1 %v13642_v32, %s14896_s7  ;;  %5643 = vrot.lane.b32.xlu0 %v13632_v11, %s15264_s10  ;;  %s15602_s7 = sld [smem:[#allocation217_spill]] }
 0xf60   : > { %v13712_v5 = vpop.permute.xlu1 %5613  ;;  %v13714_v4 = vpop.permute.xlu0 %5635 }
 0xf61   : > { %15476 = vst [vmem:[#allocation118_spill] sm:$0xff] %v13712_v5  ;;  %15477 = vst [vmem:[#allocation92_spill] sm:$0xff] %v13714_v4 }
 0xf62   : > { %5645 = vrot.lane.b32.xlu1 %v13642_v32, %s15264_s10  ;;  %5491 = vrot.lane.b32.xlu0 %v13632_v11, %s15455_s27 }
 0xf64   : > { %v13720_v62 = vpop.permute.xlu1 %5637  ;;  %v13722_v17 = vpop.permute.xlu0 %5483 }
 0xf65   : > { %15478 = vst [vmem:[#allocation90_spill] sm:$0xff] %v13720_v62  ;;  %15479 = vst [vmem:[#allocation117_spill] sm:$0xff] %v13722_v17  ;;  %v9004_v17 = vld [vmem:[%s15482_s11 + $0x4] ss:$20 sps:$4 sm:$0xff]  }
 0xf66   : > { %5493 = vrot.lane.b32.xlu1 %v13642_v32, %s15455_s27  ;;  %5515 = vrot.lane.b32.xlu0 %v13632_v11, %s15456_s23 }
 0xf67   : > { %6183 = vmatprep.mubr.bf16.mxu0 %v9004_v17  ;;  %v9010_v17 = vld [vmem:[%s15482_s11 + $0xc] ss:$20 sps:$4 sm:$0xff]  }
 0xf68   : > { %v13728_v12 = vpop.permute.xlu1 %5485  ;;  %v13730_v22 = vpop.permute.xlu0 %5507  ;;  %6248 = vmatprep.mubr.bf16.mxu1 %v9010_v17 }
 0xf69   : > { %15480 = vst [vmem:[#allocation114_spill] sm:$0xff] %v13728_v12  ;;  %15481 = vst [vmem:[#allocation124_spill] sm:$0xff] %v13730_v22 }
 0xf6a   : > { %5517 = vrot.lane.b32.xlu1 %v13642_v32, %s15456_s23  ;;  %5819 = vrot.lane.b32.xlu0 %v13632_v11, %s15172_s6 }
 0xf6c   : > { %v13739_v39 = vpop.permute.xlu1 %5509  ;;  %v13741_v59 = vpop.permute.xlu0 %5811 }
 0xf6d   : > { %15483 = vst [vmem:[#allocation122_spill] sm:$0xff] %v13739_v39  ;;  %15484 = vst [vmem:[#allocation150_spill] sm:$0xff] %v13741_v59 }
 0xf6e   : > { %5821 = vrot.lane.b32.xlu1 %v13642_v32, %s15172_s6  ;;  %5843 = vrot.lane.b32.xlu0 %v13632_v11, %s14914_s8 }
 0xf70   : > { %v13747_v22 = vpop.permute.xlu1 %5813  ;;  %v13749_v12 = vpop.permute.xlu0 %5835 }
 0xf71   : > { %15485 = vst [vmem:[#allocation148_spill] sm:$0xff] %v13747_v22  ;;  %15486 = vst [vmem:[#allocation57_spill] sm:$0xff] %v13749_v12 }
 0xf72   : > { %5845 = vrot.lane.b32.xlu1 %v13642_v32, %s14914_s8  ;;  %5951 = vrot.lane.b32.xlu0 %v13515_v36, %s15487_s19  ;;  %s15527_s8 = smov 116  }
 0xf74   : > { %v13755_v39 = vpop.permute.xlu1 %5837  ;;  %v5688_v59 = vpop.permute.xlu0 %5687 }
 0xf75   : > { %15488 = vst [vmem:[#allocation52_spill] sm:$0xff] %v13755_v39 }
 0xf76   : > { %5953 = vrot.lane.b32.xlu1 %v13523_v49, %s15487_s19  ;;  %5975 = vrot.lane.b32.xlu0 %v13515_v36, %s15489_s4 }
 0xf78   : > { %v5690_v12 = vpop.permute.xlu1 %5689  ;;  %v5712_v22 = vpop.permute.xlu0 %5711 }
 0xf79   : > { %v5729_v39 = vsel %vm912_vm9, %v5688_v59, %v5712_v22 }
 0xf7a   : > { %5977 = vrot.lane.b32.xlu1 %v13523_v49, %s15489_s4  ;;  %5947 = vrot.lane.b32.xlu0 %v13632_v11, %s15487_s19  ;;  %v5737_v5 = vmul.f32 %v5729_v39, %v12660_v42 }
 0xf7c   : > { %v5714_v4 = vpop.permute.xlu1 %5713  ;;  %v5560_v47 = vpop.permute.xlu0 %5559 }
 0xf7d   : > { %v5730_v25 = vsel %vm912_vm9, %v5690_v12, %v5714_v4 }
 0xf7e   : > { %v5738_v62 = vmul.f32 %v5730_v25, %v12660_v42  ;;  %5945 = vrot.lane.b32.xlu1 %v13395_v54, %s15487_s19  ;;  %5971 = vrot.lane.b32.xlu0 %v13632_v11, %s15489_s4 }
 0xf80   : > { %v5562_v17 = vpop.permute.xlu1 %5561  ;;  %v5584_v38 = vpop.permute.xlu0 %5583  ;;  %v6018_v60 = vpack.c.bf16 %v5738_v62, %v5737_v5 }
 0xf81   : > { %v5601_v22 = vsel %vm3993_vm13, %v5560_v47, %v5584_v38 }
 0xf82   : > { %5969 = vrot.lane.b32.xlu1 %v13395_v54, %s15489_s4  ;;  %5943 = vrot.lane.b32.xlu0 %v13391_v20, %s15487_s19  ;;  %v5609_v59 = vmul.f32 %v5601_v22, %v12630_v21 }
 0xf83   : > { %8322 = vmatprep.subr.bf16.mxu0 %v6018_v60 }
 0xf84   : > { %v5586_v12 = vpop.permute.xlu1 %5585  ;;  %v5888_v25 = vpop.permute.xlu0 %5887 }
 0xf85   : > { %v5602_v39 = vsel %vm3993_vm13, %v5562_v17, %v5586_v12 }
 0xf86   : > { %v5610_v4 = vmul.f32 %v5602_v39, %v12630_v21  ;;  %5949 = vrot.lane.b32.xlu1 %v13642_v32, %s15487_s19  ;;  %5967 = vrot.lane.b32.xlu0 %v13391_v20, %s15489_s4 }
 0xf88   : > { %v6010_v62 = vpack.c.bf16 %v5610_v4, %v5609_v59  ;;  %v5890_v5 = vpop.permute.xlu1 %5889  ;;  %v5912_v54 = vpop.permute.xlu0 %5911 }
 0xf89   : > { %v5929_v47 = vsel %vm4676_vm6, %v5888_v25, %v5912_v54 }
 0xf8a   : > { %5973 = vrot.lane.b32.xlu1 %v13642_v32, %s15489_s4  ;;  %5939 = vrot.lane.b32.xlu0 %v13451_v52, %s15487_s19  ;;  %v5937_v22 = vmul.f32 %v5929_v47, %v15382_v6 }
 0xf8b   : > { %8323 = vmatpush3.bf16.msra.mxu0 %v6010_v62 }
 0xf8c   : > { %v5914_v38 = vpop.permute.xlu1 %5913  ;;  %v5760_v60 = vpop.permute.xlu0 %5759 }
 0xf8d   : > { %v5930_v17 = vsel %vm4676_vm6, %v5890_v5, %v5914_v38 }
 0xf8e   : > { %v5938_v12 = vmul.f32 %v5930_v17, %v15382_v6  ;;  %5941 = vrot.lane.b32.xlu1 %v13457_v40, %s15487_s19  ;;  %5963 = vrot.lane.b32.xlu0 %v13451_v52, %s15489_s4 }
 0xf90   : > { %v5762_v39 = vpop.permute.xlu1 %5761  ;;  %v5784_v59 = vpop.permute.xlu0 %5783  ;;  %v6034_v4 = vpack.c.bf16 %v5938_v12, %v5937_v22 }
 0xf91   : > { %v5801_v54 = vsel %vm892_vm11, %v5760_v60, %v5784_v59 }
 0xf92   : > { %5965 = vrot.lane.b32.xlu1 %v13457_v40, %s15489_s4  ;;  %8362 = vmatprep.subr.bf16.mxu1 %v6034_v4  ;;  %v5809_v47 = vmul.f32 %v5801_v54, %v15292_v19 }
 0xf94   : > { %v5786_v25 = vpop.permute.xlu1 %5785  ;;  %v5624_v62 = vpop.permute.xlu0 %5623 }
 0xf95   : > { %v5802_v5 = vsel %vm892_vm11, %v5762_v39, %v5786_v25 }
 0xf96   : > { %v5810_v38 = vmul.f32 %v5802_v5, %v15292_v19 }
 0xf98   : > { %v6026_v17 = vpack.c.bf16 %v5810_v38, %v5809_v47  ;;  %v5626_v20 = vpop.permute.xlu1 %5625  ;;  %v5648_v52 = vpop.permute.xlu0 %5647 }
 0xf9a   : > { %8363 = vmatpush3.bf16.msra.mxu1 %v6026_v17 }
 0xf9c   : > { %v5650_v11 = vpop.permute.xlu1 %5649  ;;  %v13806_v22 = vpop.permute.xlu0 %5495 }
 0xfa0   : > { %v5498_v12 = vpop.permute.xlu1 %5497  ;;  %v5520_v40 = vpop.permute.xlu0 %5519 }
 0xfa4   : > { %v5522_v4 = vpop.permute.xlu1 %5521  ;;  %v13808_v32 = vpop.permute.xlu0 %5823 }
 0xfa8   : > { %v13810_v60 = vpop.permute.xlu1 %5825  ;;  %v13812_v59 = vpop.permute.xlu0 %5847 }
 0xfac   : > { %v13814_v39 = vpop.permute.xlu1 %5849  ;;  %v5684_v54 = vpop.permute.xlu0 %5683 }
 0xfb0   : > { %v5686_v25 = vpop.permute.xlu1 %5685  ;;  %v5708_v5 = vpop.permute.xlu0 %5707 }
 0xfb1   : > { %v5727_v47 = vsel %vm912_vm9, %v5684_v54, %v5708_v5  ;;  %v5725_v54 = vsel %vm912_vm9, %v13521_v27, %v13531_v7 }
 0xfb2   : > { %v5735_v56 = vmul.f32 %v5727_v47, %v12660_v42  ;;  %v5734_v47 = vmul.f32 %v5726_v58, %v12660_v42  ;;  %v5733_v27 = vmul.f32 %v5725_v54, %v12660_v42  ;;  %v5597_v58 = vsel %vm3993_vm13, %v13539_v1, %v13547_v46 }
 0xfb3   : > { %v5666_v1 = vsel %vm4126_vm7, %v5626_v20, %v5650_v11  ;;  %v5538_v20 = vsel %vm3860_vm5, %v5498_v12, %v5522_v4 }
 0xfb4   : > { %v5710_v38 = vpop.permute.xlu1 %5709  ;;  %v5556_v17 = vpop.permute.xlu0 %5555 }
 0xfb5   : > { %v5728_v53 = vsel %vm912_vm9, %v5686_v25, %v5710_v38 }
 0xfb6   : > { %v5736_v36 = vmul.f32 %v5728_v53, %v12660_v42  ;;  %v5598_v53 = vsel %vm3993_vm13, %v13545_v13, %v13553_v34  ;;  %v5723_v13 = vsel %vm912_vm9, %v13640_v8, %v13650_v23  ;;  %v5595_v8 = vsel %vm3993_vm13, %v13658_v61, %v13666_v18 }
 0xfb7   : > { %v5606_v7 = vmul.f32 %v5598_v53, %v12630_v21  ;;  %v5731_v46 = vmul.f32 %v5723_v13, %v12660_v42  ;;  %v5603_v53 = vmul.f32 %v5595_v8, %v12630_v21 }
 0xfb8   : > { %v5558_v26 = vpop.permute.xlu1 %5557  ;;  %v5580_v51 = vpop.permute.xlu0 %5579  ;;  %v6017_v49 = vpack.c.bf16 %v5736_v36, %v5735_v56 }
 0xfb9   : > { %v5599_v41 = vsel %vm3993_vm13, %v5556_v17, %v5580_v51 }
 0xfba   : > { %8324 = vmatprep.subr.bf16.mxu0 %v6017_v49  ;;  %v5724_v49 = vsel %vm912_vm9, %v13648_v0, %v13656_v3  ;;  %v5607_v44 = vmul.f32 %v5599_v41, %v12630_v21  ;;  %v5596_v41 = vsel %vm3993_vm13, %v13664_v30, %v13672_v2  ;;  %v6016_v0 = vpack.c.bf16 %v5734_v47, %v5733_v27 }
 0xfbb   : > { %v5732_v51 = vmul.f32 %v5724_v49, %v12660_v42  ;;  %v5605_v3 = vmul.f32 %v5597_v58, %v12630_v21  ;;  %v5604_v17 = vmul.f32 %v5596_v41, %v12630_v21  ;;  %v5665_v30 = vsel %vm4126_vm7, %v5624_v62, %v5648_v52 }
 0xfbc   : > { %v5582_v5 = vpop.permute.xlu1 %5581  ;;  %v5884_v25 = vpop.permute.xlu0 %5883  ;;  %v5537_v52 = vsel %vm3860_vm5, %v13806_v22, %v5520_v40  ;;  %v5925_v40 = vsel %vm4676_vm6, %v13555_v63, %v13563_v37  ;;  %v5797_v37 = vsel %vm892_vm11, %v13571_v50, %v13579_v57  ;;  %v5866_v50 = vsel %vm4543_vm10, %v13810_v60, %v13814_v39  ;;  %v15490_v60 = vld [vmem:[#allocation34_spill] sm:$0xff] }
 0xfbd   : > { %v5600_v36 = vsel %vm3993_vm13, %v5558_v26, %v5582_v5  ;;  %v6008_v38 = vpack.c.bf16 %v5606_v7, %v5605_v3  ;;  %v5674_v5 = vmul.f32 %v5666_v1, %v12675_v29  ;;  %v6015_v47 = vpack.c.bf16 %v5732_v51, %v5731_v46 }
 0xfbe   : > { %v5608_v15 = vmul.f32 %v5600_v36, %v12630_v21  ;;  %v6007_v62 = vpack.c.bf16 %v5604_v17, %v5603_v53  ;;  %v5546_v36 = vmul.f32 %v5538_v20, %v12645_v14  ;;  %v5545_v27 = vmul.f32 %v5537_v52, %v12645_v14 }
 0xfbf   : > { %v5933_v63 = vmul.f32 %v5925_v40, %v15382_v6  ;;  %v5796_v3 = vsel %vm892_vm11, %v13696_v16, %v13704_v28  ;;  %v5805_v46 = vmul.f32 %v5797_v37, %v15292_v19  ;;  %v5865_v28 = vsel %vm4543_vm10, %v13808_v32, %v13812_v59  ;;  %v15502_v37 = vld [vmem:[#allocation87_spill] sm:$0xff] }
 0xfc0   : > { %v6009_v34 = vpack.c.bf16 %v5608_v15, %v5607_v44  ;;  %v5886_v26 = vpop.permute.xlu1 %5885  ;;  %v5908_v56 = vpop.permute.xlu0 %5907  ;;  %v5926_v15 = vsel %vm4676_vm6, %v13561_v9, %v13569_v43  ;;  %v6006_v22 = vpack.c.bf16 %v5546_v36, %v5545_v27  ;;  %v5798_v9 = vsel %vm892_vm11, %v13577_v45, %v13585_v10 }
 0xfc1   : > { %v5927_v23 = vsel %vm4676_vm6, %v5884_v25, %v5908_v56  ;;  %v5673_v25 = vmul.f32 %v5665_v30, %v12675_v29  ;;  %v5806_v41 = vmul.f32 %v5798_v9, %v15292_v19  ;;  %v5923_v45 = vsel %vm4676_vm6, %v13674_v33, %v13682_v48  ;;  %v15500_v9 = vld [vmem:[#allocation90_spill] sm:$0xff] }
 0xfc2   : > { %8325 = vmatpush3.bf16.msra.mxu0 %v6009_v34  ;;  %v5935_v61 = vmul.f32 %v5927_v23, %v15382_v6  ;;  %v5934_v34 = vmul.f32 %v5926_v15, %v15382_v6  ;;  %v5931_v57 = vmul.f32 %v5923_v45, %v15382_v6  ;;  %v5795_v33 = vsel %vm892_vm11, %v13690_v35, %v13698_v31 }
 0xfc3   : > { %8326 = vmatprep.subr.bf16.mxu0 %v6016_v0  ;;  %v6014_v44 = vpack.c.bf16 %v5674_v5, %v5673_v25  ;;  %v6024_v8 = vpack.c.bf16 %v5806_v41, %v5805_v46  ;;  %v5804_v16 = vmul.f32 %v5796_v3, %v15292_v19  ;;  %v5874_v39 = vmul.f32 %v5866_v50, %v15490_v60  ;;  %v15494_v25 = vld [vmem:[#allocation33_spill] sm:$0xff] }
 0xfc4   : > { %v5910_v2 = vpop.permute.xlu1 %5909  ;;  %v5756_v54 = vpop.permute.xlu0 %5755  ;;  %v6032_v1 = vpack.c.bf16 %v5934_v34, %v5933_v63  ;;  %v15503_v41 = vld [vmem:[#allocation65_spill] sm:$0xff] }
 0xfc5   : > { %v5928_v11 = vsel %vm4676_vm6, %v5886_v26, %v5910_v2  ;;  %v5924_v26 = vsel %vm4676_vm6, %v13680_v55, %v13688_v24  ;;  %v5803_v2 = vmul.f32 %v5795_v33, %v15292_v19  ;;  %v5533_v45 = vsel %vm3860_vm5, %v15503_v41, %v15502_v37  ;;  %v15507_v33 = vld [vmem:[#allocation114_spill] sm:$0xff] }
 0xfc6   : > { %v5936_v18 = vmul.f32 %v5928_v11, %v15382_v6  ;;  %8327 = vmatpush3.bf16.msra.mxu0 %v6008_v38  ;;  %v5932_v24 = vmul.f32 %v5924_v26, %v15382_v6  ;;  %v15491_v11 = vld [vmem:[#allocation37_spill] sm:$0xff] }
 0xfc7   : > { %8328 = vmatprep.subr.bf16.mxu0 %v6015_v47  ;;  %v6023_v5 = vpack.c.bf16 %v5804_v16, %v5803_v2  ;;  %v15492_v47 = vld [vmem:[#allocation66_spill] sm:$0xff]  ;;  %v5541_v16 = vmul.f32 %v5533_v45, %v12645_v14  ;;  %v9005_v45 = vld [vmem:[%s15482_s11 + $0x2c] ss:$20 sps:$4 sm:$0xff]  }
 0xfc8   : > { %v5758_v12 = vpop.permute.xlu1 %5757  ;;  %v5780_v4 = vpop.permute.xlu0 %5779  ;;  %v6033_v49 = vpack.c.bf16 %v5936_v18, %v5935_v61  ;;  %v6031_v30 = vpack.c.bf16 %v5932_v24, %v5931_v57  ;;  %v5746_v53 = vmul.f32 %v15492_v47, %v15491_v11  ;;  %v15493_v18 = vld [vmem:[#allocation89_spill] sm:$0xff]  ;;  %v15506_v57 = vld [vmem:[#allocation122_spill] sm:$0xff] }
 0xfc9   : > { %v5799_v58 = vsel %vm892_vm11, %v5756_v54, %v5780_v4  ;;  %v5873_v54 = vmul.f32 %v5865_v28, %v15490_v60  ;;  %v5662_v52 = vsel %vm4126_vm7, %v15494_v25, %v15493_v18  ;;  %v15496_v4 = vld [vmem:[#allocation54_spill] sm:$0xff]  ;;  %v15508_v28 = vld [vmem:[#allocation95_spill] sm:$0xff]  ;;  %v15514_v18 = vld [vmem:[#allocation93_spill] sm:$0xff] }
 0xfca   : > { %8329 = vmatpush3.bf16.msra.mxu0 %v6007_v62  ;;  %8364 = vmatprep.subr.bf16.mxu1 %v6033_v49  ;;  %v5807_v56 = vmul.f32 %v5799_v58, %v15292_v19  ;;  %v15495_v62 = vld [vmem:[#allocation53_spill] sm:$0xff]  ;;  %v15497_v49 = vld [vmem:[#allocation72_spill] sm:$0xff]  ;;  %v5670_v40 = vmul.f32 %v5662_v52, %v12675_v29  ;;  %v5744_v25 = vmul.f32 %v15514_v18, %v15491_v11 }
 0xfcb   : > { %8330 = vmatprep.subr.bf16.mxu0 %v6014_v44  ;;  %v6030_v61 = vpack.c.bf16 %v5874_v39, %v5873_v54  ;;  %v5745_v36 = vmul.f32 %v15495_v62, %v15491_v11  ;;  %v5661_v44 = vsel %vm4126_vm7, %v15497_v49, %v15496_v4  ;;  %v15515_v4 = vld [vmem:[#allocation52_spill] sm:$0xff]  ;;  %v9017_v18 = vld [vmem:[%s15482_s11 + $0x7c] ss:$20 sps:$4 sm:$0xff]  }
 0xfcc   : > { %v5782_v7 = vpop.permute.xlu1 %5781  ;;  %v5620_v13 = vpop.permute.xlu0 %5619  ;;  %v5669_v63 = vmul.f32 %v5661_v44, %v12675_v29  ;;  %v15516_v49 = vld [vmem:[#allocation148_spill] sm:$0xff] }
 0xfcd   : > { %v5800_v43 = vsel %vm892_vm11, %v5758_v12, %v5782_v7  ;;  %v6022_v58 = vpack.c.bf16 %v5746_v53, %v5745_v36  ;;  %v15499_v7 = vld [vmem:[#allocation71_spill] sm:$0xff]  ;;  %v5860_v44 = vsel %vm4543_vm10, %v15516_v49, %v15515_v4 }
 0xfce   : > { %v5808_v51 = vmul.f32 %v5800_v43, %v15292_v19  ;;  %8331 = vmatpush3.bf16.msra.mxu0 %v6006_v22  ;;  %v15498_v22 = vld [vmem:[#allocation70_spill] sm:$0xff]  ;;  %v5868_v37 = vmul.f32 %v5860_v44, %v15490_v60 }
 0xfcf   : > { %v15501_v43 = vld [vmem:[#allocation118_spill] sm:$0xff] }
 0xfd0   : > { %v6025_v10 = vpack.c.bf16 %v5808_v51, %v5807_v56  ;;  %v5622_v0 = vpop.permute.xlu1 %5621  ;;  %v5644_v55 = vpop.permute.xlu0 %5643  ;;  %v5660_v26 = vsel %vm4126_vm7, %v15501_v43, %v15500_v9  ;;  %v15519_v9 = vld [vmem:[#allocation150_spill] sm:$0xff] }
 0xfd1   : > { %v5663_v48 = vsel %vm4126_vm7, %v5620_v13, %v5644_v55  ;;  %v5534_v13 = vsel %vm3860_vm5, %v15499_v7, %v15498_v22  ;;  %v15505_v55 = vld [vmem:[#allocation120_spill] sm:$0xff]  ;;  %v5668_v50 = vmul.f32 %v5660_v26, %v12675_v29 }
 0xfd2   : > { %8365 = vmatpush3.bf16.msra.mxu1 %v6025_v10  ;;  %v5671_v35 = vmul.f32 %v5663_v48, %v12675_v29  ;;  %v5542_v10 = vmul.f32 %v5534_v13, %v12645_v14  ;;  %v5532_v48 = vsel %vm3860_vm5, %v15507_v33, %v15506_v57  ;;  %v15522_v57 = vld [vmem:[#allocation35_spill] sm:$0xff] }
 0xfd3   : > { %8366 = vmatprep.subr.bf16.mxu1 %v6032_v1  ;;  %v5540_v54 = vmul.f32 %v5532_v48, %v12645_v14  ;;  %v5740_v33 = vmul.f32 %v15522_v57, %v15491_v11  ;;  %v9069_v48 = vld [vmem:[#allocation19 + $0x8] ss:$0 sm:$0xff] }
 0xfd4   : > { %v5646_v23 = vpop.permute.xlu1 %5645  ;;  %v5492_v38 = vpop.permute.xlu0 %5491 }
 0xfd5   : > { %v5664_v17 = vsel %vm4126_vm7, %v5622_v0, %v5646_v23  ;;  %v15504_v0 = vld [vmem:[#allocation92_spill] sm:$0xff]  ;;  %v15509_v23 = vld [vmem:[#allocation166_spill] sm:$0xff] }
 0xfd6   : > { %v5672_v31 = vmul.f32 %v5664_v17, %v12675_v29  ;;  %8367 = vmatpush3.bf16.msra.mxu1 %v6024_v8  ;;  %v5659_v24 = vsel %vm4126_vm7, %v15505_v55, %v15504_v0  ;;  %v6012_v8 = vpack.c.bf16 %v5670_v40, %v5669_v63  ;;  %v15510_v17 = vld [vmem:[#allocation124_spill] sm:$0xff]  ;;  %v15521_v0 = vld [vmem:[#allocation55_spill] sm:$0xff] }
 0xfd7   : > { %8368 = vmatprep.subr.bf16.mxu1 %v6031_v30  ;;  %v5667_v39 = vmul.f32 %v5659_v24, %v12675_v29  ;;  %v15511_v30 = vld [vmem:[#allocation117_spill] sm:$0xff]  ;;  %v5741_v55 = vmul.f32 %v15521_v0, %v15491_v11 }
 0xfd8   : > { %v5494_v20 = vpop.permute.xlu1 %5493  ;;  %v5516_v32 = vpop.permute.xlu0 %5515  ;;  %v6013_v59 = vpack.c.bf16 %v5672_v31, %v5671_v35  ;;  %v5531_v2 = vsel %vm3860_vm5, %v15511_v30, %v15510_v17  ;;  %v6004_v31 = vpack.c.bf16 %v5542_v10, %v5541_v16  ;;  %v9027_v0 = vld [vmem:[%s15482_s11 + $0x38] ss:$20 sps:$4 sm:$0xff]  }
 0xfd9   : > { %v5535_v12 = vsel %vm3860_vm5, %v5492_v38, %v5516_v32  ;;  %v5862_v38 = vsel %vm4543_vm10, %v15509_v23, %v15508_v28  ;;  %v15512_v32 = vld [vmem:[#allocation42_spill] sm:$0xff]  ;;  %v5539_v62 = vmul.f32 %v5531_v2, %v12645_v14  ;;  %v15523_v23 = vld [vmem:[#allocation80_spill] sm:$0xff] }
 0xfda   : > { %8332 = vmatprep.subr.bf16.mxu0 %v6013_v59  ;;  %8369 = vmatpush3.bf16.msra.mxu1 %v6023_v5  ;;  %v5543_v56 = vmul.f32 %v5535_v12, %v12645_v14  ;;  %v15513_v59 = vld [vmem:[#allocation167_spill] sm:$0xff]  ;;  %v5870_v52 = vmul.f32 %v5862_v38, %v15490_v60  ;;  %v5739_v38 = vmul.f32 %v15523_v23, %v15491_v11 }
 0xfdb   : > { %8370 = vmatprep.subr.bf16.mxu1 %v6030_v61  ;;  %v5861_v47 = vsel %vm4543_vm10, %v15513_v59, %v15512_v32  ;;  %v6011_v61 = vpack.c.bf16 %v5668_v50, %v5667_v39  ;;  %v6003_v40 = vpack.c.bf16 %v5540_v54, %v5539_v62  ;;  %v9011_v54 = vld [vmem:[%s15482_s11 + $0x54] ss:$20 sps:$4 sm:$0xff]   ;;  %v9020_v62 = vld [vmem:[%s15482_s11 + $0x5c] ss:$20 sps:$4 sm:$0xff]  }
 0xfdc   : > { %v5518_v15 = vpop.permute.xlu1 %5517  ;;  %v5820_v27 = vpop.permute.xlu0 %5819  ;;  %v6019_v2 = vpack.c.bf16 %v5740_v33, %v5739_v38 }
 0xfdd   : > { %v5536_v34 = vsel %vm3860_vm5, %v5494_v20, %v5518_v15  ;;  %v15517_v15 = vld [vmem:[#allocation43_spill] sm:$0xff] }
 0xfde   : > { %v5544_v51 = vmul.f32 %v5536_v34, %v12645_v14  ;;  %8371 = vmatpush3.bf16.msra.mxu1 %v6022_v58  ;;  %v5869_v58 = vmul.f32 %v5861_v47, %v15490_v60  ;;  %v15518_v34 = vld [vmem:[#allocation57_spill] sm:$0xff] }
 0xfdf   : > { %v5859_v43 = vsel %vm4543_vm10, %v15519_v9, %v15518_v34  ;;  %v9022_v9 = vld [vmem:[%s15482_s11 + $0x58] ss:$20 sps:$4 sm:$0xff]  }
 0xfe0   : > { %v6005_v3 = vpack.c.bf16 %v5544_v51, %v5543_v56  ;;  %v5822_v1 = vpop.permute.xlu1 %5821  ;;  %v5844_v46 = vpop.permute.xlu0 %5843  ;;  %v9002_v56 = vld [vmem:[%s15482_s11] ss:$20 sps:$4 sm:$0xff]   ;;  %v6028_v41 = vpack.c.bf16 %v5870_v52, %v5869_v58  ;;  %v5867_v24 = vmul.f32 %v5859_v43, %v15490_v60  ;;  %v9025_v43 = vld [vmem:[%s15482_s11 + $0x10] ss:$20 sps:$4 sm:$0xff]  }
 0xfe1   : > { %v5863_v35 = vsel %vm4543_vm10, %v5820_v27, %v5844_v46  ;;  %v5743_v27 = vmul.f32 %v15517_v15, %v15491_v11  ;;  %v15520_v51 = vld [vmem:[#allocation78_spill] sm:$0xff] }
 0xfe2   : > { %8333 = vmatpush3.bf16.msra.mxu0 %v6005_v3  ;;  %v5871_v36 = vmul.f32 %v5863_v35, %v15490_v60  ;;  %v5742_v63 = vmul.f32 %v15520_v51, %v15491_v11  ;;  %v6027_v28 = vpack.c.bf16 %v5868_v37, %v5867_v24  ;;  %v9007_v35 = vld [vmem:[%s15482_s11 + $0x28] ss:$20 sps:$4 sm:$0xff]  }
 0xfe3   : > { %8334 = vmatprep.subr.bf16.mxu0 %v6012_v8  ;;  %v6021_v26 = vpack.c.bf16 %v5744_v25, %v5743_v27  ;;  %v9029_v24 = vld [vmem:[%s15482_s11 + $0x88] ss:$20 sps:$4 sm:$0xff]  }
 0xfe4   : > { %v5846_v5 = vpop.permute.xlu1 %5845  ;;  %v5952_v20 = vpop.permute.xlu0 %5951  ;;  %v6020_v50 = vpack.c.bf16 %v5742_v63, %v5741_v55  ;;  %v9028_v55 = vld [vmem:[%s15482_s11 + $0x60] ss:$20 sps:$4 sm:$0xff]  }
 0xfe5   : > { %v5864_v53 = vsel %vm4543_vm10, %v5822_v1, %v5846_v5  ;;  %v9014_v5 = vld [vmem:[%s15482_s11 + $0x34] ss:$20 sps:$4 sm:$0xff]  }
 0xfe6   : > { %v5872_v12 = vmul.f32 %v5864_v53, %v15490_v60  ;;  %8335 = vmatpush3.bf16.msra.mxu0 %v6004_v31  ;;  %v9008_v31 = vld [vmem:[%s15482_s11 + $0x8] ss:$20 sps:$4 sm:$0xff]   ;;  %v9013_v53 = vld [vmem:[%s15482_s11 + $0x50] ss:$20 sps:$4 sm:$0xff]  }
 0xfe7   : > { %8336 = vmatprep.subr.bf16.mxu0 %v6011_v61  ;;  %v9016_v61 = vld [vmem:[%s15482_s11 + $0x30] ss:$20 sps:$4 sm:$0xff]  }
 0xfe8   : > { %v5954_v22 = vpop.permute.xlu1 %5953  ;;  %v5976_v7 = vpop.permute.xlu0 %5975  ;;  %v6029_v13 = vpack.c.bf16 %v5872_v12, %v5871_v36 }
 0xfe9   : > { %v5993_v10 = vsel %vm4809_vm12, %v5952_v20, %v5976_v7 }
 0xfea   : > { %8337 = vmatpush3.bf16.msra.mxu0 %v6003_v40  ;;  %8372 = vmatprep.subr.bf16.mxu1 %v6029_v13  ;;  %v6001_v8 = vmul.f32 %v9069_v48, %v5993_v10  ;;  %v9019_v13 = vld [vmem:[%s15482_s11 + $0x78] ss:$20 sps:$4 sm:$0xff]   ;;  %v9026_v10 = vld [vmem:[%s15482_s11 + $0x80] ss:$20 sps:$4 sm:$0xff]  }
 0xfeb   : > { %8373 = vmatpush3.bf16.msra.mxu1 %v6021_v26 }
 0xfec   : > { %v5978_v3 = vpop.permute.xlu1 %5977  ;;  %8374 = vmatprep.subr.bf16.mxu1 %v6028_v41  ;;  %v5948_v1 = vpop.permute.xlu0 %5947 }
 0xfed   : > { %v5994_v46 = vsel %vm4809_vm12, %v5954_v22, %v5978_v3  ;;  %6184 = vmatmul.mubr.bf16.vlgmr.msra.gmra.mxu0 %v9002_v56  ;;  %v9023_v56 = vld [vmem:[%s15482_s11 + $0x84] ss:$20 sps:$4 sm:$0xff]  }
 0xfee   : > { %v6002_v16 = vmul.f32 %v9069_v48, %v5994_v46  ;;  %6191 = vmatprep.mubr.bf16.mxu0 %v9005_v45 }
 0xfef   : > { %8375 = vmatpush3.bf16.msra.mxu1 %v6020_v50 }
 0xff0   : > { %v5946_v39 = vpop.permute.xlu1 %5945  ;;  %8376 = vmatprep.subr.bf16.mxu1 %v6027_v28  ;;  %v5972_v17 = vpop.permute.xlu0 %5971  ;;  %v6038_v30 = vpack.c.bf16 %v6002_v16, %v6001_v8 }
 0xff1   : > { %v5991_v25 = vsel %vm4809_vm12, %v5948_v1, %v5972_v17 }
 0xff2   : > { %8566 = vmatprep.subr.bf16.mxu0 %v6038_v30  ;;  %v5999_v44 = vmul.f32 %v9069_v48, %v5991_v25 }
 0xff3   : > { %8377 = vmatpush3.bf16.msra.mxu1 %v6019_v2  ;;  %8567 = vmatpush3.bf16.msra.mxu0 %v6038_v30 }
 0xff4   : > { %v5970_v20 = vpop.permute.xlu1 %5969  ;;  %v5944_v32 = vpop.permute.xlu0 %5943 }
 0xff5   : > { %6192 = vmatmul.mubr.bf16.gmra.mxu0 %v9007_v35  ;;  %v5990_v4 = vsel %vm4809_vm12, %v5946_v39, %v5970_v20 }
 0xff6   : > { %6249 = vmatmul.mubr.bf16.vlgmr.msra.gmra.mxu1 %v9008_v31  ;;  %6199 = vmatprep.mubr.bf16.mxu0 %v9011_v54  ;;  %v5998_v58 = vmul.f32 %v9069_v48, %v5990_v4 }
 0xff7   : > { %6256 = vmatprep.mubr.bf16.mxu1 %v9014_v5 }
 0xff8   : > { %v5950_v59 = vpop.permute.xlu1 %5949  ;;  %v5968_v47 = vpop.permute.xlu0 %5967 }
 0xff9   : > { %v5989_v52 = vsel %vm4809_vm12, %v5944_v32, %v5968_v47 }
 0xffa   : > { %v5997_v15 = vmul.f32 %v9069_v48, %v5989_v52 }
 0xffc   : > { %v5974_v36 = vpop.permute.xlu1 %5973  ;;  %v5940_v12 = vpop.permute.xlu0 %5939  ;;  %v6036_v34 = vpack.c.bf16 %v5998_v58, %v5997_v15 }
 0xffd   : > { %v5992_v49 = vsel %vm4809_vm12, %v5950_v59, %v5974_v36  ;;  %6200 = vmatmul.mubr.bf16.gmra.mxu0 %v9013_v53 }
 0xffe   : > { %v6000_v27 = vmul.f32 %v9069_v48, %v5992_v49  ;;  %6257 = vmatmul.mubr.bf16.gmra.mxu1 %v9016_v61  ;;  %6207 = vmatprep.mubr.bf16.mxu0 %v9017_v18 }
 0xfff   : > { %6264 = vmatprep.mubr.bf16.mxu1 %v9020_v62 }
0x1000   : > { %v5942_v40 = vpop.permute.xlu1 %5941  ;;  %v5964_v22 = vpop.permute.xlu0 %5963  ;;  %v6037_v7 = vpack.c.bf16 %v6000_v27, %v5999_v44 }
0x1001   : > { %v5987_v26 = vsel %vm4809_vm12, %v5940_v12, %v5964_v22 }
0x1002   : > { %8568 = vmatprep.subr.bf16.mxu0 %v6037_v7  ;;  %v5995_v37 = vmul.f32 %v9069_v48, %v5987_v26 }
0x1003   : > { %8569 = vmatpush3.bf16.msra.mxu0 %v6037_v7 }
0x1004   : > { %v5966_v51 = vpop.permute.xlu1 %5965  ;;  %8570 = vmatprep.subr.bf16.mxu0 %v6036_v34 }
0x1005   : > { %v5988_v63 = vsel %vm4809_vm12, %v5942_v40, %v5966_v51  ;;  %6208 = vmatmul.mubr.bf16.gmra.mxu0 %v9019_v13 }
0x1006   : > { %v5996_v41 = vmul.f32 %v9069_v48, %v5988_v63  ;;  %6265 = vmatmul.mubr.bf16.gmra.mxu1 %v9022_v9  ;;  %8574 = vmatprep.mubr.msk.bf16.mxu0 %vm2531_vm4, %v9025_v43 }
0x1007   : > { %8571 = vmatpush3.bf16.msra.mxu0 %v6036_v34  ;;  %6272 = vmatprep.mubr.bf16.mxu1 %v9023_v56 }
0x1008   : > { %v6035_v45 = vpack.c.bf16 %v5996_v41, %v5995_v37 }
0x100a   : > { %8572 = vmatprep.subr.bf16.mxu0 %v6035_v45 }
0x100b   : > { %8573 = vmatpush3.bf16.msra.mxu0 %v6035_v45 }
0x100e   : > { %6273 = vmatmul.mubr.bf16.gmra.mxu1 %v9026_v10  ;;  %8575 = vmatmul.mubr.msk.bf16.vlgmr.msra.gmra.mxu0 %vm2531_vm4, %v9027_v0 }
0x100f   : > { %8578 = vmatprep.mubr.msk.bf16.mxu0 %vm2531_vm4, %v9028_v55 }
0x1016   : > { %8579 = vmatmul.mubr.msk.bf16.gmra.mxu0 %vm2531_vm4, %v9029_v24 }
0x10ad   : > { %v8338_v3 = vpop.f32.mrf.mxu0 }
0x10af   : > { %v8339_v1 = vpop.f32.mrf.mxu0 }
0x10b0   : > { %v8340_v46 = vadd.f32 %v8339_v1, %v8338_v3 }
0x10b1   : > { %v8341_v50 = vpop.f32.mrf.mxu0 }
0x10b3   : > { %v8342_v57 = vpop.f32.mrf.mxu0 }
0x10b4   : > { %v8343_v33 = vadd.f32 %v8342_v57, %v8341_v50 }
0x10b5   : > { %v8344_v48 = vpop.f32.mrf.mxu0 }
0x10b6   : > { %v8378_v8 = vpop.f32.mrf.mxu1 }
0x10b7   : > { %v8345_v16 = vpop.f32.mrf.mxu0 }
0x10b8   : > { %v8379_v28 = vpop.f32.mrf.mxu1  ;;  %v8346_v58 = vadd.f32 %v8345_v16, %v8344_v48 }
0x10b9   : > { %v8380_v23 = vadd.f32 %v8379_v28, %v8378_v8  ;;  %v8347_v38 = vpop.f32.mrf.mxu0 }
0x10ba   : > { %v8381_v39 = vpop.f32.mrf.mxu1 }
0x10bb   : > { %v8348_v17 = vpop.f32.mrf.mxu0  ;;  %v14055_v30 = vadd.f32 %v8380_v23, %v8340_v46 }
0x10bc   : > { %v8382_v2 = vpop.f32.mrf.mxu1  ;;  %v8349_v56 = vadd.f32 %v8348_v17, %v8347_v38 }
0x10bd   : > { %v8383_v35 = vadd.f32 %v8382_v2, %v8381_v39  ;;  %v8350_v31 = vpop.f32.mrf.mxu0 }
0x10be   : > { %v8384_v54 = vpop.f32.mrf.mxu1 }
0x10bf   : > { %v8351_v5 = vpop.f32.mrf.mxu0  ;;  %v14057_v20 = vadd.f32 %v8383_v35, %v8343_v33 }
0x10c0   : > { %v8352_v32 = vadd.f32 %v8351_v5, %v8350_v31  ;;  %v8385_v59 = vpop.f32.mrf.mxu1 }
0x10c1   : > { %v8353_v47 = vpop.f32.mrf.mxu0  ;;  %v8386_v49 = vadd.f32 %v8385_v59, %v8384_v54 }
0x10c2   : > { %v8387_v53 = vpop.f32.mrf.mxu1 }
0x10c3   : > { %v8354_v61 = vpop.f32.mrf.mxu0  ;;  %v6259_v43 = vadd.f32 %v8386_v49, %v8346_v58 }
0x10c4   : > { %v8355_v18 = vadd.f32 %v8354_v61, %v8353_v47  ;;  %v8388_v25 = vpop.f32.mrf.mxu1 }
0x10c5   : > { %v8356_v52 = vpop.f32.mrf.mxu0  ;;  %v8389_v34 = vadd.f32 %v8388_v25, %v8387_v53 }
0x10c6   : > { %v8390_v62 = vpop.f32.mrf.mxu1 }
0x10c7   : > { %v8357_v36 = vpop.f32.mrf.mxu0  ;;  %v6262_v45 = vadd.f32 %v8389_v34, %v8349_v56 }
0x10c8   : > { %v14059_v12 = vadd.f32 %v8357_v36, %v8356_v52  ;;  %v8391_v4 = vpop.f32.mrf.mxu1 }
0x10c9   : > { %v8392_v44 = vadd.f32 %v8391_v4, %v8390_v62  ;;  %v8359_v15 = vpop.f32.mrf.mxu0 }
0x10ca   : > { %v8393_v27 = vpop.f32.mrf.mxu1 }
0x10cb   : > { %v8360_v40 = vpop.f32.mrf.mxu0  ;;  %v14061_v22 = vadd.f32 %v8392_v44, %v8352_v32 }
0x10cc   : > { %v14063_v7 = vadd.f32 %v8360_v40, %v8359_v15  ;;  %v8394_v13 = vpop.f32.mrf.mxu1 }
0x10cd   : > { %v8395_v9 = vadd.f32 %v8394_v13, %v8393_v27 }
0x10ce   : > { %v8576_v26 = vpop.f32.mrf.mxu0  ;;  %v8396_v16 = vpop.f32.mrf.mxu1 }
0x10cf   : > { %v6324_v51 = vadd.f32 %v8576_v26, %v6259_v43  ;;  %v14065_v63 = vadd.f32 %v8395_v9, %v8355_v18 }
0x10d0   : > { %v6315_v37 = vpop.f32.mrf.mxu0  ;;  %v8397_v28 = vpop.f32.mrf.mxu1 }
0x10d1   : > { %vm6348_vm0 = vcmp.gt.f32.partialorder %v6324_v51, 0.0  ;;  %v6356_v41 = vmul.f32 0.2, %v6324_v51  ;;  %v6316_v1 = vadd.f32 %v6315_v37, %v14055_v30  ;;  %v8398_v39 = vadd.f32 %v8397_v28, %v8396_v16 }
0x10d2   : > { %v8577_v10 = vpop.f32.mrf.mxu0  ;;  %v8399_v23 = vpop.f32.mrf.mxu1 }
0x10d3   : > { %v14067_v0 = vsel %vm6348_vm0, %v6324_v51, %v6356_v41  ;;  %v6327_v55 = vadd.f32 %v8577_v10, %v6262_v45  ;;  %v6354_v50 = vmul.f32 0.2, %v6316_v1  ;;  %vm6346_vm2 = vcmp.gt.f32.partialorder %v6316_v1, 0.0 }
0x10d4   : > { %15524 = vst [vmem:[#allocation121_spill] sm:$0xff] %v14067_v0  ;;  %6598 = vrot.lane.b32.xlu0 %v14067_v0, %s15120_s1  ;;  %v6318_v46 = vpop.f32.mrf.mxu0  ;;  %v8400_v17 = vpop.f32.mrf.mxu1  ;;  %v6275_v35 = vadd.f32 %v8398_v39, %v14059_v12 }
0x10d5   : > { %vm6349_vm8 = vcmp.gt.f32.partialorder %v6327_v55, 0.0  ;;  %v6357_v24 = vmul.f32 0.2, %v6327_v55  ;;  %v6319_v57 = vadd.f32 %v6318_v46, %v14057_v20  ;;  %v14131_v33 = vsel %vm6346_vm2, %v6316_v1, %v6354_v50 }
0x10d6   : > { %15531 = vst [vmem:[#allocation88_spill] sm:$0xff] %v14131_v33  ;;  %v8580_v38 = vpop.f32.mrf.mxu0  ;;  %v8401_v2 = vadd.f32 %v8400_v17, %v8399_v23 }
0x10d7   : > { %v14071_v3 = vsel %vm6349_vm8, %v6327_v55, %v6357_v24  ;;  %v6355_v48 = vmul.f32 0.2, %v6319_v57  ;;  %vm6347_vm3 = vcmp.gt.f32.partialorder %v6319_v57, 0.0  ;;  %v6340_v31 = vadd.f32 %v8580_v38, %v6275_v35 }
0x10d8   : > { %15525 = vst [vmem:[#allocation119_spill] sm:$0xff] %v14071_v3  ;;  %6600 = vrot.lane.b32.xlu1 %v14071_v3, %s15120_s1  ;;  %6622 = vrot.lane.b32.xlu0 %v14067_v0, %s15526_s12  ;;  %v14179_v30 = vpop.f32.mrf.mxu0  ;;  %v6278_v5 = vadd.f32 %v8401_v2, %v14063_v7 }
0x10d9   : > { %v14137_v8 = vsel %vm6347_vm3, %v6319_v57, %v6355_v48  ;;  %v6360_v20 = vmul.f32 0.2, %v6340_v31  ;;  %vm6352_vm14 = vcmp.gt.f32.partialorder %v6340_v31, 0.0  ;;  %v6332_v46 = vadd.f32 %v14179_v30, %v14061_v22 }
0x10da   : > { %15532 = vst [vmem:[#allocation59_spill] sm:$0xff] %v14137_v8  ;;  %v8581_v54 = vpop.f32.mrf.mxu0 }
0x10db   : > { %v6343_v32 = vadd.f32 %v8581_v54, %v6278_v5  ;;  %v14197_v47 = vsel %vm6352_vm14, %v6340_v31, %v6360_v20  ;;  %v6358_v16 = vmul.f32 0.2, %v6332_v46  ;;  %vm6350_vm0 = vcmp.gt.f32.partialorder %v6332_v46, 0.0 }
0x10dc   : > { %6624 = vrot.lane.b32.xlu1 %v14071_v3, %s15526_s12  ;;  %6470 = vrot.lane.b32.xlu0 %v14067_v0, %s15527_s8  ;;  %15533 = vst [vmem:[#allocation147_spill] sm:$0xff] %v14197_v47  ;;  %v6334_v50 = vpop.f32.mrf.mxu0 }
0x10dd   : > { %v6361_v53 = vmul.f32 0.2, %v6343_v32  ;;  %vm6353_vm15 = vcmp.gt.f32.partialorder %v6343_v32, 0.0  ;;  %v6335_v28 = vadd.f32 %v6334_v50, %v14065_v63  ;;  %v14326_v38 = vsel %vm6350_vm0, %v6332_v46, %v6358_v16 }
0x10de   : > { %15541 = vst [vmem:[#allocation151_spill] sm:$0xff] %v14326_v38 }
0x10df   : > { %v14207_v25 = vsel %vm6353_vm15, %v6343_v32, %v6361_v53  ;;  %v6359_v39 = vmul.f32 0.2, %v6335_v28  ;;  %vm6351_vm8 = vcmp.gt.f32.partialorder %v6335_v28, 0.0  ;;  %vm15599_vm15 = vcmask 916480  }
0x10e0   : > { %6472 = vrot.lane.b32.xlu1 %v14071_v3, %s15527_s8  ;;  %6494 = vrot.lane.b32.xlu0 %v14067_v0, %s15528_s14  ;;  %15534 = vst [vmem:[#allocation146_spill] sm:$0xff] %v14207_v25 }
0x10e1   : > { %v14333_v2 = vsel %vm6351_vm8, %v6335_v28, %v6359_v39 }
0x10e2   : > { %15542 = vst [vmem:[#allocation149_spill] sm:$0xff] %v14333_v2 }
0x10e4   : > { %6496 = vrot.lane.b32.xlu1 %v14071_v3, %s15528_s14  ;;  %6534 = vrot.lane.b32.xlu0 %v14067_v0, %s15529_s15 }
0x10e8   : > { %6536 = vrot.lane.b32.xlu1 %v14071_v3, %s15529_s15  ;;  %6558 = vrot.lane.b32.xlu0 %v14067_v0, %s15264_s10 }
0x10ec   : > { %6560 = vrot.lane.b32.xlu1 %v14071_v3, %s15264_s10  ;;  %6406 = vrot.lane.b32.xlu0 %v14067_v0, %s15455_s27 }
0x10f0   : > { %6408 = vrot.lane.b32.xlu1 %v14071_v3, %s15455_s27  ;;  %6430 = vrot.lane.b32.xlu0 %v14067_v0, %s15456_s23 }
0x10f4   : > { %6432 = vrot.lane.b32.xlu1 %v14071_v3, %s15456_s23  ;;  %6798 = vrot.lane.b32.xlu0 %v14067_v0, %s15273_s22 }
0x10f8   : > { %6800 = vrot.lane.b32.xlu1 %v14071_v3, %s15273_s22  ;;  %6822 = vrot.lane.b32.xlu0 %v14067_v0, %s15171_s13 }
0x10fc   : > { %6824 = vrot.lane.b32.xlu1 %v14071_v3, %s15171_s13  ;;  %6670 = vrot.lane.b32.xlu0 %v14067_v0, %s15117_s3 }
0x1100   : > { %6672 = vrot.lane.b32.xlu1 %v14071_v3, %s15117_s3  ;;  %6694 = vrot.lane.b32.xlu0 %v14067_v0, %s15121_s16 }
0x1104   : > { %6696 = vrot.lane.b32.xlu1 %v14071_v3, %s15121_s16  ;;  %6734 = vrot.lane.b32.xlu0 %v14067_v0, %s15172_s6 }
0x1108   : > { %6736 = vrot.lane.b32.xlu1 %v14071_v3, %s15172_s6  ;;  %6758 = vrot.lane.b32.xlu0 %v14067_v0, %s15530_s5 }
0x110c   : > { %6760 = vrot.lane.b32.xlu1 %v14071_v3, %s15530_s5  ;;  %6862 = vrot.lane.b32.xlu0 %v14067_v0, %s15487_s19 }
0x1110   : > { %6864 = vrot.lane.b32.xlu1 %v14071_v3, %s15487_s19  ;;  %6594 = vrot.lane.b32.xlu0 %v14131_v33, %s15120_s1 }
0x1114   : > { %6596 = vrot.lane.b32.xlu1 %v14137_v8, %s15120_s1  ;;  %6618 = vrot.lane.b32.xlu0 %v14131_v33, %s15526_s12 }
0x1118   : > { %6620 = vrot.lane.b32.xlu1 %v14137_v8, %s15526_s12  ;;  %6466 = vrot.lane.b32.xlu0 %v14131_v33, %s15527_s8 }
0x111c   : > { %6468 = vrot.lane.b32.xlu1 %v14137_v8, %s15527_s8  ;;  %6490 = vrot.lane.b32.xlu0 %v14131_v33, %s15528_s14 }
0x1120   : > { %6492 = vrot.lane.b32.xlu1 %v14137_v8, %s15528_s14  ;;  %6530 = vrot.lane.b32.xlu0 %v14131_v33, %s15529_s15 }
0x1124   : > { %6532 = vrot.lane.b32.xlu1 %v14137_v8, %s15529_s15  ;;  %6554 = vrot.lane.b32.xlu0 %v14131_v33, %s15264_s10 }
0x1128   : > { %6556 = vrot.lane.b32.xlu1 %v14137_v8, %s15264_s10  ;;  %6402 = vrot.lane.b32.xlu0 %v14131_v33, %s15455_s27 }
0x112c   : > { %6404 = vrot.lane.b32.xlu1 %v14137_v8, %s15455_s27  ;;  %6426 = vrot.lane.b32.xlu0 %v14131_v33, %s15456_s23 }
0x1130   : > { %6428 = vrot.lane.b32.xlu1 %v14137_v8, %s15456_s23  ;;  %6794 = vrot.lane.b32.xlu0 %v14131_v33, %s15273_s22 }
0x1134   : > { %6796 = vrot.lane.b32.xlu1 %v14137_v8, %s15273_s22  ;;  %6818 = vrot.lane.b32.xlu0 %v14131_v33, %s15171_s13 }
0x1138   : > { %6820 = vrot.lane.b32.xlu1 %v14137_v8, %s15171_s13  ;;  %6666 = vrot.lane.b32.xlu0 %v14131_v33, %s15117_s3 }
0x113c   : > { %6668 = vrot.lane.b32.xlu1 %v14137_v8, %s15117_s3  ;;  %6690 = vrot.lane.b32.xlu0 %v14131_v33, %s15121_s16 }
0x1140   : > { %6692 = vrot.lane.b32.xlu1 %v14137_v8, %s15121_s16  ;;  %6730 = vrot.lane.b32.xlu0 %v14131_v33, %s15172_s6 }
0x1144   : > { %6732 = vrot.lane.b32.xlu1 %v14137_v8, %s15172_s6  ;;  %6754 = vrot.lane.b32.xlu0 %v14131_v33, %s15530_s5 }
0x1146   : > { %v14195_v59 = vpop.permute.xlu0 %6598 }
0x1148   : > { %6756 = vrot.lane.b32.xlu1 %v14137_v8, %s15530_s5  ;;  %6606 = vrot.lane.b32.xlu0 %v14197_v47, %s15120_s1 }
0x114a   : > { %v14203_v61 = vpop.permute.xlu1 %6600  ;;  %v14205_v18 = vpop.permute.xlu0 %6622 }
0x114c   : > { %6608 = vrot.lane.b32.xlu1 %v14207_v25, %s15120_s1  ;;  %6630 = vrot.lane.b32.xlu0 %v14197_v47, %s15526_s12 }
0x114e   : > { %v14213_v52 = vpop.permute.xlu1 %6624  ;;  %v14215_v62 = vpop.permute.xlu0 %6470 }
0x1150   : > { %6632 = vrot.lane.b32.xlu1 %v14207_v25, %s15526_s12  ;;  %6478 = vrot.lane.b32.xlu0 %v14197_v47, %s15527_s8 }
0x1152   : > { %v14221_v36 = vpop.permute.xlu1 %6472  ;;  %v14223_v12 = vpop.permute.xlu0 %6494 }
0x1154   : > { %6480 = vrot.lane.b32.xlu1 %v14207_v25, %s15527_s8  ;;  %6502 = vrot.lane.b32.xlu0 %v14197_v47, %s15528_s14 }
0x1156   : > { %v14229_v4 = vpop.permute.xlu1 %6496  ;;  %v14231_v49 = vpop.permute.xlu0 %6534 }
0x1158   : > { %6504 = vrot.lane.b32.xlu1 %v14207_v25, %s15528_s14  ;;  %6542 = vrot.lane.b32.xlu0 %v14197_v47, %s15529_s15 }
0x115a   : > { %v14237_v44 = vpop.permute.xlu1 %6536  ;;  %v14239_v15 = vpop.permute.xlu0 %6558 }
0x115c   : > { %6544 = vrot.lane.b32.xlu1 %v14207_v25, %s15529_s15  ;;  %6566 = vrot.lane.b32.xlu0 %v14197_v47, %s15264_s10 }
0x115e   : > { %v14245_v27 = vpop.permute.xlu1 %6560  ;;  %v14247_v58 = vpop.permute.xlu0 %6406 }
0x1160   : > { %6568 = vrot.lane.b32.xlu1 %v14207_v25, %s15264_s10  ;;  %6414 = vrot.lane.b32.xlu0 %v14197_v47, %s15455_s27 }
0x1162   : > { %v14253_v40 = vpop.permute.xlu1 %6408  ;;  %v14255_v7 = vpop.permute.xlu0 %6430 }
0x1164   : > { %6416 = vrot.lane.b32.xlu1 %v14207_v25, %s15455_s27  ;;  %6438 = vrot.lane.b32.xlu0 %v14197_v47, %s15456_s23 }
0x1166   : > { %v14261_v13 = vpop.permute.xlu1 %6432  ;;  %v14263_v34 = vpop.permute.xlu0 %6798 }
0x1168   : > { %6440 = vrot.lane.b32.xlu1 %v14207_v25, %s15456_s23  ;;  %6806 = vrot.lane.b32.xlu0 %v14197_v47, %s15273_s22 }
0x116a   : > { %v14269_v9 = vpop.permute.xlu1 %6800  ;;  %v14271_v43 = vpop.permute.xlu0 %6822 }
0x116c   : > { %6808 = vrot.lane.b32.xlu1 %v14207_v25, %s15273_s22  ;;  %6830 = vrot.lane.b32.xlu0 %v14197_v47, %s15171_s13 }
0x116e   : > { %v14277_v26 = vpop.permute.xlu1 %6824  ;;  %v14279_v56 = vpop.permute.xlu0 %6670 }
0x1170   : > { %6832 = vrot.lane.b32.xlu1 %v14207_v25, %s15171_s13  ;;  %6678 = vrot.lane.b32.xlu0 %v14197_v47, %s15117_s3 }
0x1172   : > { %v14285_v51 = vpop.permute.xlu1 %6672  ;;  %v14287_v37 = vpop.permute.xlu0 %6694 }
0x1174   : > { %6680 = vrot.lane.b32.xlu1 %v14207_v25, %s15117_s3  ;;  %6702 = vrot.lane.b32.xlu0 %v14197_v47, %s15121_s16 }
0x1176   : > { %v14293_v41 = vpop.permute.xlu1 %6696  ;;  %v14295_v45 = vpop.permute.xlu0 %6734 }
0x1177   : > { %15535 = vst [vmem:[#allocation154_spill] sm:$0xff] %v14295_v45 }
0x1178   : > { %6704 = vrot.lane.b32.xlu1 %v14207_v25, %s15121_s16  ;;  %6742 = vrot.lane.b32.xlu0 %v14197_v47, %s15172_s6 }
0x117a   : > { %v14301_v10 = vpop.permute.xlu1 %6736  ;;  %v14303_v55 = vpop.permute.xlu0 %6758 }
0x117b   : > { %15536 = vst [vmem:[#allocation152_spill] sm:$0xff] %v14301_v10  ;;  %15537 = vst [vmem:[#allocation172_spill] sm:$0xff] %v14303_v55 }
0x117c   : > { %6744 = vrot.lane.b32.xlu1 %v14207_v25, %s15172_s6  ;;  %6766 = vrot.lane.b32.xlu0 %v14197_v47, %s15530_s5 }
0x117e   : > { %v14309_v24 = vpop.permute.xlu1 %6760  ;;  %v14311_v1 = vpop.permute.xlu0 %6862 }
0x117f   : > { %15538 = vst [vmem:[#allocation170_spill] sm:$0xff] %v14309_v24  ;;  %15539 = vst [vmem:[#allocation56_spill] sm:$0xff] %v14311_v1 }
0x1180   : > { %6768 = vrot.lane.b32.xlu1 %v14207_v25, %s15530_s5  ;;  %6870 = vrot.lane.b32.xlu0 %v14197_v47, %s15487_s19 }
0x1182   : > { %v14319_v57 = vpop.permute.xlu1 %6864  ;;  %v6595_v48 = vpop.permute.xlu0 %6594 }
0x1183   : > { %15540 = vst [vmem:[#allocation86_spill] sm:$0xff] %v14319_v57 }
0x1184   : > { %6872 = vrot.lane.b32.xlu1 %v14207_v25, %s15487_s19  ;;  %6894 = vrot.lane.b32.xlu0 %v14197_v47, %s15489_s4 }
0x1186   : > { %v6597_v22 = vpop.permute.xlu1 %6596  ;;  %v6619_v23 = vpop.permute.xlu0 %6618 }
0x1187   : > { %v6642_v17 = vsel %vm912_vm9, %v6595_v48, %v6619_v23 }
0x1188   : > { %6896 = vrot.lane.b32.xlu1 %v14207_v25, %s15489_s4  ;;  %6602 = vrot.lane.b32.xlu0 %v14326_v38, %s15120_s1  ;;  %v14337_v31 = vmul.f32 %v6642_v17, %v12660_v42 }
0x118a   : > { %v6621_v63 = vpop.permute.xlu1 %6620  ;;  %v6467_v30 = vpop.permute.xlu0 %6466 }
0x118b   : > { %v6643_v35 = vsel %vm912_vm9, %v6597_v22, %v6621_v63 }
0x118c   : > { %v14340_v54 = vmul.f32 %v6643_v35, %v12660_v42  ;;  %6604 = vrot.lane.b32.xlu1 %v14333_v2, %s15120_s1  ;;  %6626 = vrot.lane.b32.xlu0 %v14326_v38, %s15526_s12 }
0x118e   : > { %v6469_v5 = vpop.permute.xlu1 %6468  ;;  %v6491_v20 = vpop.permute.xlu0 %6490 }
0x118f   : > { %v6514_v53 = vsel %vm3993_vm13, %v6467_v30, %v6491_v20 }
0x1190   : > { %6628 = vrot.lane.b32.xlu1 %v14333_v2, %s15526_s12  ;;  %6474 = vrot.lane.b32.xlu0 %v14326_v38, %s15527_s8  ;;  %v14355_v16 = vmul.f32 %v6514_v53, %v12630_v21 }
0x1192   : > { %v6493_v46 = vpop.permute.xlu1 %6492  ;;  %v6531_v50 = vpop.permute.xlu0 %6530 }
0x1193   : > { %v6515_v48 = vsel %vm3993_vm13, %v6469_v5, %v6493_v46 }
0x1194   : > { %v14358_v28 = vmul.f32 %v6515_v48, %v12630_v21  ;;  %6476 = vrot.lane.b32.xlu1 %v14333_v2, %s15527_s8  ;;  %6498 = vrot.lane.b32.xlu0 %v14326_v38, %s15528_s14  ;;  %s9533_s8 = smov [#allocation22]  }
0x1196   : > { %v6533_v23 = vpop.permute.xlu1 %6532  ;;  %v6555_v39 = vpop.permute.xlu0 %6554 }
0x1197   : > { %v6578_v17 = vsel %vm4126_vm7, %v6531_v50, %v6555_v39 }
0x1198   : > { %6500 = vrot.lane.b32.xlu1 %v14333_v2, %s15528_s14  ;;  %6538 = vrot.lane.b32.xlu0 %v14326_v38, %s15529_s15  ;;  %v14373_v5 = vmul.f32 %v6578_v17, %v12675_v29 }
0x119a   : > { %v6557_v63 = vpop.permute.xlu1 %6556  ;;  %v6403_v30 = vpop.permute.xlu0 %6402 }
0x119b   : > { %v6579_v35 = vsel %vm4126_vm7, %v6533_v23, %v6557_v63 }
0x119c   : > { %v14376_v20 = vmul.f32 %v6579_v35, %v12675_v29  ;;  %6540 = vrot.lane.b32.xlu1 %v14333_v2, %s15529_s15  ;;  %6562 = vrot.lane.b32.xlu0 %v14326_v38, %s15264_s10 }
0x119e   : > { %v6405_v53 = vpop.permute.xlu1 %6404  ;;  %v6427_v46 = vpop.permute.xlu0 %6426 }
0x119f   : > { %v6450_v48 = vsel %vm3860_vm5, %v6403_v30, %v6427_v46 }
0x11a0   : > { %6564 = vrot.lane.b32.xlu1 %v14333_v2, %s15264_s10  ;;  %6410 = vrot.lane.b32.xlu0 %v14326_v38, %s15455_s27  ;;  %v14391_v63 = vmul.f32 %v6450_v48, %v12645_v14 }
0x11a2   : > { %v6429_v23 = vpop.permute.xlu1 %6428  ;;  %v6795_v39 = vpop.permute.xlu0 %6794 }
0x11a3   : > { %v6451_v17 = vsel %vm3860_vm5, %v6405_v53, %v6429_v23  ;;  %v9032_v53 = vld [vmem:[#allocation11 + $0x4] ss:$20 sps:$4 sm:$0xff]  }
0x11a4   : > { %v14394_v35 = vmul.f32 %v6451_v17, %v12645_v14  ;;  %6412 = vrot.lane.b32.xlu1 %v14333_v2, %s15455_s27  ;;  %6434 = vrot.lane.b32.xlu0 %v14326_v38, %s15456_s23  ;;  %s7811_s27 = sshll.u32 %s9843_s9, 4 }
0x11a5   : > { %7102 = vmatprep.mubr.bf16.mxu1 %v9032_v53 }
0x11a6   : > { %v6797_v46 = vpop.permute.xlu1 %6796  ;;  %v6819_v50 = vpop.permute.xlu0 %6818 }
0x11a7   : > { %v6842_v22 = vsel %vm4676_vm6, %v6795_v39, %v6819_v50 }
0x11a8   : > { %6436 = vrot.lane.b32.xlu1 %v14333_v2, %s15456_s23  ;;  %6802 = vrot.lane.b32.xlu0 %v14326_v38, %s15273_s22  ;;  %v14409_v32 = vmul.f32 %v6842_v22, %v15382_v6  ;;  %s789_s23 = scalar_lea.vmem [#allocation22], %s7811_s27 }
0x11aa   : > { %v6821_v48 = vpop.permute.xlu1 %6820  ;;  %v6667_v23 = vpop.permute.xlu0 %6666 }
0x11ab   : > { %v6843_v17 = vsel %vm4676_vm6, %v6797_v46, %v6821_v48 }
0x11ac   : > { %v14412_v30 = vmul.f32 %v6843_v17, %v15382_v6  ;;  %6804 = vrot.lane.b32.xlu1 %v14333_v2, %s15273_s22  ;;  %6826 = vrot.lane.b32.xlu0 %v14326_v38, %s15171_s13  ;;  %s15579_s22 = sld [smem:[#allocation216_spill]] }
0x11ae   : > { %v6669_v50 = vpop.permute.xlu1 %6668  ;;  %v6691_v39 = vpop.permute.xlu0 %6690 }
0x11af   : > { %v6714_v46 = vsel %vm892_vm11, %v6667_v23, %v6691_v39 }
0x11b0   : > { %6828 = vrot.lane.b32.xlu1 %v14333_v2, %s15171_s13  ;;  %6674 = vrot.lane.b32.xlu0 %v14326_v38, %s15117_s3  ;;  %v14427_v17 = vmul.f32 %v6714_v46, %v15292_v19  ;;  %s7594_s13 = sshll.u32 %s789_s23, 4  ;;  %s7595_s13 = int_to_ptr.vmem [resolvable:$true] %s7594_s13 }
0x11b1   : > { %s9385_s12 = scalar_lea.vmem %s7595_s13, 256 }
0x11b2   : > { %v6693_v22 = vpop.permute.xlu1 %6692  ;;  %v6731_v53 = vpop.permute.xlu0 %6730  ;;  %15543 = vst [vmem:[#allocation169_spill] sm:$0xff] %v14427_v17  ;;  %p9386_p1 = scmp.ne.s32.totalorder %s7595_s13, %s9385_s12 }
0x11b3   : > { %v6715_v48 = vsel %vm892_vm11, %v6669_v50, %v6693_v22 }
0x11b4   : > { %v14430_v57 = vmul.f32 %v6715_v48, %v15292_v19  ;;  %6676 = vrot.lane.b32.xlu1 %v14333_v2, %s15117_s3  ;;  %6698 = vrot.lane.b32.xlu0 %v14326_v38, %s15121_s16  ;;  %p9387_p4 = pnand %p9386_p1, %p15603_p3 }
0x11b6   : > { %15544 = vst [vmem:[#allocation168_spill] sm:$0xff] %v14430_v57  ;;  %v6733_v39 = vpop.permute.xlu1 %6732  ;;  %v6755_v1 = vpop.permute.xlu0 %6754  ;;  %p9388_p9 = pneg %p9387_p4 }
0x11b7   : > { %v6778_v45 = vsel %vm4543_vm10, %v6731_v53, %v6755_v1 }
0x11b8   : > { %6700 = vrot.lane.b32.xlu1 %v14333_v2, %s15121_s16  ;;  %6886 = vrot.lane.b32.xlu0 %v14067_v0, %s15489_s4  ;;  %v14445_v48 = vmul.f32 %v6778_v45, %v15490_v60  ;;  %s8003_s16 = sshll.u32 %s9655_s2, 8  ;;  %s9389_s2 = sshll.u32 %s9533_s8, 4  ;;  %s9390_s2 = int_to_ptr.vmem [resolvable:$false] %s9389_s2 }
0x11b9   : > { %s14744_s17 = scalar_lea.hbm %s15602_s7, %s8003_s16  ;;  %s9391_s14 = scalar_lea.vmem %s9390_s2, 512 }
0x11ba   : > { %v6757_v50 = vpop.permute.xlu1 %6756  ;;  %v6607_v46 = vpop.permute.xlu0 %6606  ;;  %15545 = vst [vmem:[#allocation176_spill] sm:$0xff] %v14445_v48  ;;  %p9392_p6 = scmp.lt.s32.totalorder %s7595_s13, %s9390_s2  ;;  %p9393_p12 = scmp.lt.s32.totalorder %s9391_s14, %s9385_s12 }
0x11bb   : > { %v6779_v22 = vsel %vm4543_vm10, %v6733_v39, %v6757_v50 }
0x11bc   : > { %v14448_v55 = vmul.f32 %v6779_v22, %v15490_v60  ;;  %6888 = vrot.lane.b32.xlu1 %v14071_v3, %s15489_s4  ;;  %6738 = vrot.lane.b32.xlu0 %v14326_v38, %s15172_s6  ;;  %p9394_p7 = por %p9393_p12, %p9392_p6 }
0x11be   : > { %15546 = vst [vmem:[#allocation174_spill] sm:$0xff] %v14448_v55  ;;  %v6609_v1 = vpop.permute.xlu1 %6608  ;;  %v6631_v53 = vpop.permute.xlu0 %6630  ;;  %p9395_p2 = pnand %p9394_p7, %p9388_p9 }
0x11bf   : > { %v6648_v45 = vsel %vm912_vm9, %v6607_v46, %v6631_v53 }
0x11c0   : > { %6740 = vrot.lane.b32.xlu1 %v14333_v2, %s15172_s6  ;;  %6762 = vrot.lane.b32.xlu0 %v14326_v38, %s15530_s5  ;;  %v6656_v0 = vmul.f32 %v6648_v45, %v12660_v42 }
0x11c2   : > { %v6633_v39 = vpop.permute.xlu1 %6632  ;;  %v6479_v50 = vpop.permute.xlu0 %6478 }
0x11c3   : > { %v6649_v22 = vsel %vm912_vm9, %v6609_v1, %v6633_v39  ;;  %v9044_v1 = vld [vmem:[#allocation11 + $0xc] ss:$20 sps:$4 sm:$0xff]  }
0x11c4   : > { %v6657_v3 = vmul.f32 %v6649_v22, %v12660_v42  ;;  %6764 = vrot.lane.b32.xlu1 %v14333_v2, %s15530_s5  ;;  %6866 = vrot.lane.b32.xlu0 %v14326_v38, %s15487_s19 }
0x11c5   : > { %7167 = vmatprep.mubr.bf16.mxu0 %v9044_v1 }
0x11c6   : > { %v6481_v23 = vpop.permute.xlu1 %6480  ;;  %v6503_v48 = vpop.permute.xlu0 %6502  ;;  %v6937_v55 = vpack.c.bf16 %v6657_v3, %v6656_v0 }
0x11c7   : > { %v6520_v46 = vsel %vm3993_vm13, %v6479_v50, %v6503_v48 }
0x11c8   : > { %6868 = vrot.lane.b32.xlu1 %v14333_v2, %s15487_s19  ;;  %6890 = vrot.lane.b32.xlu0 %v14326_v38, %s15489_s4  ;;  %v6528_v22 = vmul.f32 %v6520_v46, %v12630_v21 }
0x11c9   : > { %8410 = vmatprep.subr.bf16.mxu1 %v6937_v55 }
0x11ca   : > { %v6505_v53 = vpop.permute.xlu1 %6504  ;;  %v6543_v45 = vpop.permute.xlu0 %6542 }
0x11cb   : > { %v6521_v39 = vsel %vm3993_vm13, %v6481_v23, %v6505_v53 }
0x11cc   : > { %v6529_v47 = vmul.f32 %v6521_v39, %v12630_v21  ;;  %6892 = vrot.lane.b32.xlu1 %v14333_v2, %s15489_s4  ;;  %6858 = vrot.lane.b32.xlu0 %v14131_v33, %s15487_s19 }
0x11ce   : > { %v6929_v0 = vpack.c.bf16 %v6529_v47, %v6528_v22  ;;  %v6545_v3 = vpop.permute.xlu1 %6544  ;;  %v6567_v48 = vpop.permute.xlu0 %6566 }
0x11cf   : > { %v6584_v55 = vsel %vm4126_vm7, %v6543_v45, %v6567_v48 }
0x11d0   : > { %6860 = vrot.lane.b32.xlu1 %v14137_v8, %s15487_s19  ;;  %6882 = vrot.lane.b32.xlu0 %v14131_v33, %s15489_s4  ;;  %v14487_v1 = vmul.f32 %v6584_v55, %v12675_v29 }
0x11d1   : > { %8411 = vmatpush3.bf16.msra.mxu1 %v6929_v0 }
0x11d2   : > { %v6569_v23 = vpop.permute.xlu1 %6568  ;;  %v6415_v50 = vpop.permute.xlu0 %6414 }
0x11d3   : > { %v6585_v46 = vsel %vm4126_vm7, %v6545_v3, %v6569_v23 }
0x11d4   : > { %v14490_v47 = vmul.f32 %v6585_v46, %v12675_v29  ;;  %6884 = vrot.lane.b32.xlu1 %v14137_v8, %s15489_s4 }
0x11d6   : > { %v6417_v53 = vpop.permute.xlu1 %6416  ;;  %v6439_v45 = vpop.permute.xlu0 %6438 }
0x11d7   : > { %v6456_v22 = vsel %vm3860_vm5, %v6415_v50, %v6439_v45 }
0x11d8   : > { %v14499_v55 = vmul.f32 %v6456_v22, %v12645_v14 }
0x11da   : > { %v6441_v0 = vpop.permute.xlu1 %6440  ;;  %v6807_v48 = vpop.permute.xlu0 %6806 }
0x11db   : > { %v6457_v3 = vsel %vm3860_vm5, %v6417_v53, %v6441_v0 }
0x11dc   : > { %v14502_v23 = vmul.f32 %v6457_v3, %v12645_v14 }
0x11de   : > { %v6809_v33 = vpop.permute.xlu1 %6808  ;;  %v6831_v8 = vpop.permute.xlu0 %6830 }
0x11df   : > { %v6848_v38 = vsel %vm4676_vm6, %v6807_v48, %v6831_v8 }
0x11e0   : > { %v6856_v45 = vmul.f32 %v6848_v38, %v15382_v6 }
0x11e2   : > { %v6833_v39 = vpop.permute.xlu1 %6832  ;;  %v6679_v2 = vpop.permute.xlu0 %6678 }
0x11e3   : > { %v6849_v50 = vsel %vm4676_vm6, %v6809_v33, %v6833_v39 }
0x11e4   : > { %v6857_v53 = vmul.f32 %v6849_v50, %v15382_v6 }
0x11e6   : > { %v6681_v22 = vpop.permute.xlu1 %6680  ;;  %v6703_v0 = vpop.permute.xlu0 %6702  ;;  %v6953_v17 = vpack.c.bf16 %v6857_v53, %v6856_v45  ;;  %v6645_v53 = vsel %vm912_vm9, %v14203_v61, %v14213_v52 }
0x11e7   : > { %v6720_v3 = vsel %vm892_vm11, %v6679_v2, %v6703_v0 }
0x11e8   : > { %8450 = vmatprep.subr.bf16.mxu0 %v6953_v17  ;;  %v6728_v8 = vmul.f32 %v6720_v3, %v15292_v19 }
0x11ea   : > { %v6705_v57 = vpop.permute.xlu1 %6704  ;;  %v6743_v46 = vpop.permute.xlu0 %6742 }
0x11eb   : > { %v6721_v10 = vsel %vm892_vm11, %v6681_v22, %v6705_v57 }
0x11ec   : > { %v6729_v48 = vmul.f32 %v6721_v10, %v15292_v19 }
0x11ee   : > { %v6945_v24 = vpack.c.bf16 %v6729_v48, %v6728_v8  ;;  %v6745_v33 = vpop.permute.xlu1 %6744  ;;  %v6767_v39 = vpop.permute.xlu0 %6766 }
0x11ef   : > { %v6784_v38 = vsel %vm4543_vm10, %v6743_v46, %v6767_v39 }
0x11f0   : > { %8451 = vmatpush3.bf16.msra.mxu0 %v6945_v24  ;;  %v14519_v2 = vmul.f32 %v6784_v38, %v15490_v60 }
0x11f2   : > { %v6769_v50 = vpop.permute.xlu1 %6768  ;;  %v14515_v25 = vpop.permute.xlu0 %6870  ;;  %15547 = vst [vmem:[#allocation99_spill] sm:$0xff] %v14519_v2 }
0x11f3   : > { %v6785_v17 = vsel %vm4543_vm10, %v6745_v33, %v6769_v50 }
0x11f4   : > { %v14522_v57 = vmul.f32 %v6785_v17, %v15490_v60 }
0x11f6   : > { %v14524_v45 = vpop.permute.xlu1 %6872  ;;  %v14526_v10 = vpop.permute.xlu0 %6894 }
0x11fa   : > { %v14530_v46 = vpop.permute.xlu1 %6896  ;;  %v6603_v24 = vpop.permute.xlu0 %6602 }
0x11fe   : > { %v6605_v22 = vpop.permute.xlu1 %6604  ;;  %v6627_v0 = vpop.permute.xlu0 %6626 }
0x11ff   : > { %v6646_v3 = vsel %vm912_vm9, %v6603_v24, %v6627_v0  ;;  %v6644_v24 = vsel %vm912_vm9, %v14195_v59, %v14205_v18  ;;  %v6516_v59 = vsel %vm3993_vm13, %v14215_v62, %v14223_v12 }
0x1200   : > { %v6654_v39 = vmul.f32 %v6646_v3, %v12660_v42  ;;  %v6653_v3 = vmul.f32 %v6645_v53, %v12660_v42  ;;  %v6652_v61 = vmul.f32 %v6644_v24, %v12660_v42 }
0x1202   : > { %v6629_v8 = vpop.permute.xlu1 %6628  ;;  %v6475_v48 = vpop.permute.xlu0 %6474 }
0x1203   : > { %v6647_v33 = vsel %vm912_vm9, %v6605_v22, %v6629_v8  ;;  %v6517_v8 = vsel %vm3993_vm13, %v14221_v36, %v14229_v4  ;;  %v6524_v36 = vmul.f32 %v6516_v59, %v12630_v21 }
0x1204   : > { %v6655_v38 = vmul.f32 %v6647_v33, %v12660_v42  ;;  %v6525_v18 = vmul.f32 %v6517_v8, %v12630_v21  ;;  %v15548_v42 = vpack.c.bf16 %v14340_v54, %v14337_v31  ;;  %v15550_v31 = vpack.c.bf16 %v14490_v47, %v14487_v1 }
0x1205   : > { %v6580_v54 = vsel %vm4126_vm7, %v14231_v49, %v14239_v15  ;;  %v15551_v47 = vpack.c.bf16 %v14502_v23, %v14499_v55  ;;  %v6452_v15 = vsel %vm3860_vm5, %v14247_v58, %v14255_v7  ;;  %v6913_v55 = vsel %vm4809_vm12, %v14524_v45, %v14530_v46 }
0x1206   : > { %v6477_v50 = vpop.permute.xlu1 %6476  ;;  %v6499_v17 = vpop.permute.xlu0 %6498  ;;  %v6936_v60 = vpack.c.bf16 %v6655_v38, %v6654_v39  ;;  %v6935_v38 = vpack.c.bf16 %v6653_v3, %v6652_v61  ;;  %v6927_v4 = vpack.c.bf16 %v6525_v18, %v6524_v36  ;;  %v15549_v3 = vpack.c.bf16 %v14358_v28, %v14355_v16 }
0x1207   : > { %v6518_v2 = vsel %vm3993_vm13, %v6475_v48, %v6499_v17  ;;  %v6588_v49 = vmul.f32 %v6580_v54, %v12675_v29  ;;  %v6912_v58 = vsel %vm4809_vm12, %v14515_v25, %v14526_v10 }
0x1208   : > { %8412 = vmatprep.subr.bf16.mxu1 %v6936_v60  ;;  %v6526_v39 = vmul.f32 %v6518_v2, %v12630_v21 }
0x120a   : > { %v6501_v0 = vpop.permute.xlu1 %6500  ;;  %v6539_v22 = vpop.permute.xlu0 %6538 }
0x120b   : > { %v6519_v33 = vsel %vm3993_vm13, %v6477_v50, %v6501_v0 }
0x120c   : > { %v6527_v60 = vmul.f32 %v6519_v33, %v12630_v21  ;;  %v6581_v21 = vsel %vm4126_vm7, %v14237_v44, %v14245_v27  ;;  %v6453_v27 = vsel %vm3860_vm5, %v14253_v40, %v14261_v13 }
0x120d   : > { %v6589_v44 = vmul.f32 %v6581_v21, %v12675_v29  ;;  %v6461_v40 = vmul.f32 %v6453_v27, %v12645_v14 }
0x120e   : > { %v6928_v52 = vpack.c.bf16 %v6527_v60, %v6526_v39  ;;  %v6541_v53 = vpop.permute.xlu1 %6540  ;;  %v6563_v48 = vpop.permute.xlu0 %6562 }
0x120f   : > { %v6582_v62 = vsel %vm4126_vm7, %v6539_v22, %v6563_v48  ;;  %v6931_v18 = vpack.c.bf16 %v6589_v44, %v6588_v49  ;;  %v14599_v48 = vld [vmem:[#allocation19 + $0x8] ss:$0 sm:$0xff]  ;;  %v15557_v49 = vld [vmem:[#allocation152_spill] sm:$0xff] }
0x1210   : > { %8413 = vmatpush3.bf16.msra.mxu1 %v6928_v52  ;;  %v6590_v8 = vmul.f32 %v6582_v62, %v12675_v29  ;;  %v6460_v52 = vmul.f32 %v6452_v15, %v12645_v14  ;;  %v6920_v46 = vmul.f32 %v14599_v48, %v6912_v58  ;;  %v15553_v62 = vpack.c.bf16 %v14394_v35, %v14391_v63  ;;  %v15565_v58 = vld [vmem:[#allocation172_spill] sm:$0xff] }
0x1211   : > { %8414 = vmatprep.subr.bf16.mxu1 %v6935_v38  ;;  %v6921_v38 = vmul.f32 %v14599_v48, %v6913_v55  ;;  %v9039_v55 = vld [vmem:[#allocation11 + $0x7c] ss:$20 sps:$4 sm:$0xff]  }
0x1212   : > { %v6565_v2 = vpop.permute.xlu1 %6564  ;;  %v6411_v50 = vpop.permute.xlu0 %6410  ;;  %v6923_v23 = vpack.c.bf16 %v6461_v40, %v6460_v52  ;;  %v15558_v40 = vld [vmem:[#allocation34_spill] sm:$0xff] }
0x1213   : > { %v6583_v17 = vsel %vm4126_vm7, %v6541_v53, %v6565_v2 }
0x1214   : > { %8415 = vmatpush3.bf16.msra.mxu1 %v6927_v4  ;;  %v6591_v0 = vmul.f32 %v6583_v17, %v12675_v29  ;;  %v15552_v4 = vpack.c.bf16 %v14376_v20, %v14373_v5  ;;  %v9030_v17 = vld [vmem:[#allocation11] ss:$20 sps:$4 sm:$0xff]   ;;  %v6844_v5 = vsel %vm4676_vm6, %v14263_v34, %v14271_v43  ;;  %v6716_v34 = vsel %vm892_vm11, %v14279_v56, %v14287_v37 }
0x1215   : > { %8416 = vmatprep.subr.bf16.mxu1 %v15548_v42  ;;  %v6845_v42 = vsel %vm4676_vm6, %v14269_v9, %v14277_v26  ;;  %v6717_v9 = vsel %vm892_vm11, %v14285_v51, %v14293_v41  ;;  %v6724_v54 = vmul.f32 %v6716_v34, %v15292_v19  ;;  %v15554_v56 = vpack.c.bf16 %v14412_v30, %v14409_v32  ;;  %v15562_v30 = vld [vmem:[#allocation147_spill] sm:$0xff] }
0x1216   : > { %v6413_v12 = vpop.permute.xlu1 %6412  ;;  %v6435_v24 = vpop.permute.xlu0 %6434  ;;  %v6932_v28 = vpack.c.bf16 %v6591_v0, %v6590_v8  ;;  %v6853_v21 = vmul.f32 %v6845_v42, %v15382_v6  ;;  %v6725_v43 = vmul.f32 %v6717_v9, %v15292_v19  ;;  %v6664_v52 = vmul.f32 %v15562_v30, %v15491_v11  ;;  %v9054_v30 = vld [vmem:[#allocation11 + $0x88] ss:$20 sps:$4 sm:$0xff]  }
0x1217   : > { %v6454_v33 = vsel %vm3860_vm5, %v6411_v50, %v6435_v24  ;;  %v6957_v50 = vpack.c.bf16 %v6921_v38, %v6920_v46  ;;  %v15567_v46 = vld [vmem:[#allocation149_spill] sm:$0xff] }
0x1218   : > { %8417 = vmatpush3.bf16.msra.mxu1 %v15549_v3  ;;  %v6462_v60 = vmul.f32 %v6454_v33, %v12645_v14  ;;  %v6852_v3 = vmul.f32 %v6844_v5, %v15382_v6  ;;  %v15570_v5 = vld [vmem:[#allocation119_spill] sm:$0xff] }
0x1219   : > { %8418 = vmatprep.subr.bf16.mxu1 %v15550_v31  ;;  %v9035_v31 = vld [vmem:[#allocation11 + $0x28] ss:$20 sps:$4 sm:$0xff]  }
0x121a   : > { %v6437_v22 = vpop.permute.xlu1 %6436  ;;  %v6803_v39 = vpop.permute.xlu0 %6802  ;;  %v6951_v41 = vpack.c.bf16 %v6853_v21, %v6852_v3  ;;  %v15571_v21 = vld [vmem:[#allocation56_spill] sm:$0xff] }
0x121b   : > { %v6455_v16 = vsel %vm3860_vm5, %v6413_v12, %v6437_v22  ;;  %v9033_v12 = vld [vmem:[#allocation11 + $0x2c] ss:$20 sps:$4 sm:$0xff]   ;;  %v9036_v22 = vld [vmem:[#allocation11 + $0x54] ss:$20 sps:$4 sm:$0xff]  }
0x121c   : > { %v6463_v1 = vmul.f32 %v6455_v16, %v12645_v14  ;;  %8419 = vmatpush3.bf16.msra.mxu1 %v15551_v47  ;;  %v15556_v47 = vld [vmem:[#allocation170_spill] sm:$0xff] }
0x121d   : > { %8420 = vmatprep.subr.bf16.mxu1 %v6932_v28  ;;  %v15555_v28 = vld [vmem:[#allocation146_spill] sm:$0xff]  ;;  %v6781_v15 = vsel %vm4543_vm10, %v15557_v49, %v15556_v47 }
0x121e   : > { %v6924_v13 = vpack.c.bf16 %v6463_v1, %v6462_v60  ;;  %v6805_v61 = vpop.permute.xlu1 %6804  ;;  %v6827_v59 = vpop.permute.xlu0 %6826  ;;  %v9038_v1 = vld [vmem:[#allocation11 + $0x50] ss:$20 sps:$4 sm:$0xff]   ;;  %v9042_v49 = vld [vmem:[#allocation11 + $0x8] ss:$20 sps:$4 sm:$0xff]  }
0x121f   : > { %v6846_v29 = vsel %vm4676_vm6, %v6803_v39, %v6827_v59  ;;  %v6943_v39 = vpack.c.bf16 %v6725_v43, %v6724_v54  ;;  %v15559_v59 = vld [vmem:[#allocation168_spill] sm:$0xff] }
0x1220   : > { %8421 = vmatpush3.bf16.msra.mxu1 %v6924_v13  ;;  %v6854_v36 = vmul.f32 %v6846_v29, %v15382_v6  ;;  %v15563_v29 = vld [vmem:[#allocation99_spill] sm:$0xff] }
0x1221   : > { %8422 = vmatprep.subr.bf16.mxu1 %v6931_v18  ;;  %v15560_v18 = vld [vmem:[#allocation169_spill] sm:$0xff] }
0x1222   : > { %v6829_v7 = vpop.permute.xlu1 %6828  ;;  %v6675_v53 = vpop.permute.xlu0 %6674  ;;  %v15561_v32 = vpack.c.bf16 %v15559_v59, %v15560_v18  ;;  %v9053_v59 = vld [vmem:[#allocation11 + $0x60] ss:$20 sps:$4 sm:$0xff]   ;;  %v9047_v18 = vld [vmem:[#allocation11 + $0x30] ss:$20 sps:$4 sm:$0xff]  }
0x1223   : > { %v6847_v14 = vsel %vm4676_vm6, %v6805_v61, %v6829_v7  ;;  %v15566_v7 = vld [vmem:[#allocation154_spill] sm:$0xff] }
0x1224   : > { %v6855_v45 = vmul.f32 %v6847_v14, %v15382_v6  ;;  %8423 = vmatpush3.bf16.msra.mxu1 %v6923_v23  ;;  %v15564_v23 = vpack.c.bf16 %v14522_v57, %v15563_v29  ;;  %v9055_v29 = vld [vmem:[#allocation11 + $0x80] ss:$20 sps:$4 sm:$0xff]  }
0x1225   : > { %8424 = vmatprep.subr.bf16.mxu1 %v15552_v4  ;;  %v6663_v4 = vmul.f32 %v15567_v46, %v15491_v11 }
0x1226   : > { %v6677_v25 = vpop.permute.xlu1 %6676  ;;  %v6699_v10 = vpop.permute.xlu0 %6698  ;;  %v6952_v2 = vpack.c.bf16 %v6855_v45, %v6854_v36 }
0x1227   : > { %v6718_v24 = vsel %vm892_vm11, %v6675_v53, %v6699_v10  ;;  %v6780_v53 = vsel %vm4543_vm10, %v15566_v7, %v15565_v58  ;;  %v15568_v10 = vld [vmem:[#allocation151_spill] sm:$0xff]  ;;  %v9060_v58 = vld [vmem:[%s15579_s22 + $0x4] ss:$8 sps:$4 sm:$0xff]  }
0x1228   : > { %8425 = vmatpush3.bf16.msra.mxu1 %v15553_v62  ;;  %8452 = vmatprep.subr.bf16.mxu0 %v6952_v2  ;;  %v6726_v63 = vmul.f32 %v6718_v24, %v15292_v19  ;;  %v6662_v2 = vmul.f32 %v15568_v10, %v15491_v11  ;;  %v6788_v57 = vmul.f32 %v6780_v53, %v15558_v40 }
0x1229   : > { %8582 = vmatprep.subr.bf16.mxu1 %v6957_v50 }
0x122a   : > { %v6701_v20 = vpop.permute.xlu1 %6700  ;;  %v6887_v0 = vpop.permute.xlu0 %6886  ;;  %v6940_v24 = vpack.c.bf16 %v6663_v4, %v6662_v2 }
0x122b   : > { %v6719_v26 = vsel %vm892_vm11, %v6677_v25, %v6701_v20  ;;  %7103 = vmatmul.mubr.bf16.vlgmr.msra.gmra.mxu1 %v9030_v17  ;;  %v6789_v25 = vmul.f32 %v6781_v15, %v15558_v40  ;;  %v6661_v20 = vmul.f32 %v15570_v5, %v15491_v11  ;;  %v6908_v9 = vsel %vm4809_vm12, %v15571_v21, %v6887_v0 }
0x122c   : > { %v6727_v35 = vmul.f32 %v6719_v26, %v15292_v19  ;;  %8583 = vmatpush3.bf16.msra.mxu1 %v6957_v50  ;;  %7110 = vmatprep.mubr.bf16.mxu1 %v9033_v12  ;;  %v6665_v19 = vmul.f32 %v15555_v28, %v15491_v11  ;;  %v15569_v50 = vld [vmem:[#allocation86_spill] sm:$0xff]  ;;  %v15576_v28 = vld [vmem:[#allocation176_spill] sm:$0xff] }
0x122e   : > { %v6944_v8 = vpack.c.bf16 %v6727_v35, %v6726_v63  ;;  %v6889_v33 = vpop.permute.xlu1 %6888  ;;  %v6739_v51 = vpop.permute.xlu0 %6738  ;;  %v6941_v36 = vpack.c.bf16 %v6665_v19, %v6664_v52  ;;  %v6947_v63 = vpack.c.bf16 %v6789_v25, %v6788_v57  ;;  %v9041_v35 = vld [vmem:[#allocation11 + $0x78] ss:$20 sps:$4 sm:$0xff]  }
0x122f   : > { %v6909_v17 = vsel %vm4809_vm12, %v15569_v50, %v6889_v33  ;;  %v9057_v52 = vld [vmem:[#allocation11 + $0x84] ss:$20 sps:$4 sm:$0xff]  }
0x1230   : > { %8453 = vmatpush3.bf16.msra.mxu0 %v6944_v8  ;;  %v6917_v3 = vmul.f32 %v14599_v48, %v6909_v17  ;;  %v15572_v8 = vld [vmem:[#allocation121_spill] sm:$0xff] }
0x1231   : > { %8454 = vmatprep.subr.bf16.mxu0 %v6951_v41  ;;  %v6660_v33 = vmul.f32 %v15572_v8, %v15491_v11 }
0x1232   : > { %v6741_v44 = vpop.permute.xlu1 %6740  ;;  %v6763_v27 = vpop.permute.xlu0 %6762 }
0x1233   : > { %7111 = vmatmul.mubr.bf16.gmra.mxu1 %v9035_v31  ;;  %v6782_v6 = vsel %vm4543_vm10, %v6739_v51, %v6763_v27  ;;  %v6916_v51 = vmul.f32 %v14599_v48, %v6908_v9  ;;  %v6939_v0 = vpack.c.bf16 %v6661_v20, %v6660_v33 }
0x1234   : > { %8455 = vmatpush3.bf16.msra.mxu0 %v6943_v39  ;;  %7118 = vmatprep.mubr.bf16.mxu1 %v9036_v22  ;;  %v6790_v13 = vmul.f32 %v6782_v6, %v15558_v40  ;;  %v15573_v22 = vld [vmem:[#allocation59_spill] sm:$0xff]  ;;  %v15574_v6 = vld [vmem:[#allocation88_spill] sm:$0xff] }
0x1235   : > { %8456 = vmatprep.subr.bf16.mxu0 %v15554_v56  ;;  %v6659_v39 = vmul.f32 %v15573_v22, %v15491_v11  ;;  %v6955_v27 = vpack.c.bf16 %v6917_v3, %v6916_v51  ;;  %v6658_v56 = vmul.f32 %v15574_v6, %v15491_v11  ;;  %v9049_v11 = vld [vmem:[#allocation11 + $0x34] ss:$20 sps:$4 sm:$0xff]  }
0x1236   : > { %v6765_v37 = vpop.permute.xlu1 %6764  ;;  %v6867_v16 = vpop.permute.xlu0 %6866 }
0x1237   : > { %v6783_v60 = vsel %vm4543_vm10, %v6741_v44, %v6765_v37  ;;  %v9045_v44 = vld [vmem:[#allocation11 + $0x10] ss:$20 sps:$4 sm:$0xff]  }
0x1238   : > { %v6791_v61 = vmul.f32 %v6783_v60, %v15558_v40  ;;  %8457 = vmatpush3.bf16.msra.mxu0 %v15561_v32  ;;  %v9052_v32 = vld [vmem:[#allocation11 + $0x5c] ss:$20 sps:$4 sm:$0xff]  }
0x1239   : > { %8458 = vmatprep.subr.bf16.mxu0 %v15564_v23  ;;  %v9058_v23 = vld [vmem:[%s15579_s22] ss:$8 sps:$4 sm:$0xff]  }
0x123a   : > { %v6869_v38 = vpop.permute.xlu1 %6868  ;;  %v6891_v14 = vpop.permute.xlu0 %6890  ;;  %v6948_v45 = vpack.c.bf16 %v6791_v61, %v6790_v13  ;;  %v9046_v61 = vld [vmem:[#allocation11 + $0x38] ss:$20 sps:$4 sm:$0xff]  }
0x123b   : > { %7119 = vmatmul.mubr.bf16.gmra.mxu1 %v9038_v1  ;;  %v6910_v42 = vsel %vm4809_vm12, %v6867_v16, %v6891_v14  ;;  %v15575_v16 = vld [vmem:[#allocation174_spill] sm:$0xff]  ;;  %v6938_v1 = vpack.c.bf16 %v6659_v39, %v6658_v56 }
0x123c   : > { %8459 = vmatpush3.bf16.msra.mxu0 %v6941_v36  ;;  %7126 = vmatprep.mubr.bf16.mxu1 %v9039_v55  ;;  %v6918_v34 = vmul.f32 %v14599_v48, %v6910_v42  ;;  %v15577_v19 = vpack.c.bf16 %v15575_v16, %v15576_v28  ;;  %v15578_v55 = vmov 0  }
0x123d   : > { %8460 = vmatprep.subr.bf16.mxu0 %v6948_v45 }
0x123e   : > { %v6893_v62 = vpop.permute.xlu1 %6892  ;;  %v6859_v12 = vpop.permute.xlu0 %6858 }
0x123f   : > { %v6911_v26 = vsel %vm4809_vm12, %v6869_v38, %v6893_v62 }
0x1240   : > { %v6919_v43 = vmul.f32 %v14599_v48, %v6911_v26  ;;  %8461 = vmatpush3.bf16.msra.mxu0 %v6940_v24 }
0x1241   : > { %8462 = vmatprep.subr.bf16.mxu0 %v6947_v63 }
0x1242   : > { %v6861_v41 = vpop.permute.xlu1 %6860  ;;  %v6883_v31 = vpop.permute.xlu0 %6882  ;;  %v6956_v54 = vpack.c.bf16 %v6919_v43, %v6918_v34 }
0x1243   : > { %7127 = vmatmul.mubr.bf16.gmra.mxu1 %v9041_v35  ;;  %v6906_v37 = vsel %vm4809_vm12, %v6859_v12, %v6883_v31 }
0x1244   : > { %8463 = vmatpush3.bf16.msra.mxu0 %v6939_v0  ;;  %8584 = vmatprep.subr.bf16.mxu1 %v6956_v54  ;;  %v6914_v15 = vmul.f32 %v14599_v48, %v6906_v37 }
0x1245   : > { %8464 = vmatprep.subr.bf16.mxu0 %v15577_v19  ;;  %8585 = vmatpush3.bf16.msra.mxu1 %v6956_v54 }
0x1246   : > { %v6885_v60 = vpop.permute.xlu1 %6884  ;;  %8586 = vmatprep.subr.bf16.mxu1 %v6955_v27  ;;  %8590 = vmatprep.mubr.msk.bf16.mxu1 %vm2531_vm4, %v9045_v44 }
0x1247   : > { %v6907_v47 = vsel %vm4809_vm12, %v6861_v41, %v6885_v60 }
0x1248   : > { %v6915_v40 = vmul.f32 %v14599_v48, %v6907_v47  ;;  %8465 = vmatpush3.bf16.msra.mxu0 %v6938_v1  ;;  %v9050_v48 = vld [vmem:[#allocation11 + $0x58] ss:$20 sps:$4 sm:$0xff]  }
0x1249   : > { %8587 = vmatpush3.bf16.msra.mxu1 %v6955_v27  ;;  %7331 = vmatprep.subr.bf16.mxu0 %v9060_v58 }
0x124a   : > { %v6954_v13 = vpack.c.bf16 %v6915_v40, %v6914_v15 }
0x124b   : > { %7168 = vmatmul.mubr.bf16.vlgmr.msra.gmra.mxu0 %v9042_v49 }
0x124c   : > { %8588 = vmatprep.subr.bf16.mxu1 %v6954_v13  ;;  %7175 = vmatprep.mubr.bf16.mxu0 %v9049_v11 }
0x124d   : > { %8589 = vmatpush3.bf16.msra.mxu1 %v6954_v13  ;;  %7332 = vmatpush1.bf16.msra.mxu0 %v9058_v23 }
0x1250   : > { %8591 = vmatmul.mubr.msk.bf16.vlgmr.msra.gmra.mxu1 %vm2531_vm4, %v9046_v61 }
0x1251   : > { %8594 = vmatprep.mubr.msk.bf16.mxu1 %vm2531_vm4, %v9053_v59 }
0x1253   : > { %7176 = vmatmul.mubr.bf16.gmra.mxu0 %v9047_v18 }
0x1254   : > { %7183 = vmatprep.mubr.bf16.mxu0 %v9052_v32 }
0x1258   : > { %8595 = vmatmul.mubr.msk.bf16.gmra.mxu1 %vm2531_vm4, %v9054_v30  ;;  %vm15580_vm4 = vcmask 130048  }
0x1259   : > { %7446 = vmatprep.mubr.bf16.mxu1 %v15578_v55  ;;  %vm15581_vm7 = vmmov %vm15580_vm4 }
0x125a   : > { %vm15582_vm12 = vmmov %vm15580_vm4 }
0x125b   : > { %7184 = vmatmul.mubr.bf16.gmra.mxu0 %v9050_v48  ;;  %vm15583_vm14 = vmmov %vm15580_vm4 }
0x125c   : > { %7191 = vmatprep.mubr.bf16.mxu0 %v9057_v52 }
0x1263   : > { %7192 = vmatmul.mubr.bf16.gmra.mxu0 %v9055_v29 }
0x1264   : > { %7349 = vmatprep.mubr.bf16.mxu0 %v15578_v55 }
0x12eb   : > { %v8426_v7 = vpop.f32.mrf.mxu1 }
0x12ed   : > { %v8427_v53 = vpop.f32.mrf.mxu1 }
0x12ee   : > { %v8428_v24 = vadd.f32 %v8427_v53, %v8426_v7 }
0x12ef   : > { %v8429_v38 = vpop.f32.mrf.mxu1 }
0x12f1   : > { %v8430_v14 = vpop.f32.mrf.mxu1 }
0x12f2   : > { %v8431_v35 = vadd.f32 %v8430_v14, %v8429_v38 }
0x12f3   : > { %v8432_v36 = vpop.f32.mrf.mxu1 }
0x12f5   : > { %v8433_v45 = vpop.f32.mrf.mxu1 }
0x12f6   : > { %v8434_v31 = vadd.f32 %v8433_v45, %v8432_v36 }
0x12f7   : > { %v8435_v46 = vpop.f32.mrf.mxu1 }
0x12f9   : > { %v8436_v4 = vpop.f32.mrf.mxu1 }
0x12fa   : > { %v8437_v16 = vadd.f32 %v8436_v4, %v8435_v46 }
0x12fb   : > { %v8438_v25 = vpop.f32.mrf.mxu1 }
0x12fd   : > { %v8439_v10 = vpop.f32.mrf.mxu1 }
0x12fe   : > { %v8440_v13 = vadd.f32 %v8439_v10, %v8438_v25 }
0x12ff   : > { %v8441_v2 = vpop.f32.mrf.mxu1 }
0x1301   : > { %v8442_v57 = vpop.f32.mrf.mxu1 }
0x1302   : > { %v8443_v52 = vadd.f32 %v8442_v57, %v8441_v2 }
0x1303   : > { %v14698_v50 = vpop.f32.mrf.mxu1 }
0x1305   : > { %v14700_v17 = vpop.f32.mrf.mxu1 }
0x1306   : > { %v8446_v25 = vadd.f32 %v14700_v17, %v14698_v50 }
0x1307   : > { %v14702_v42 = vpop.f32.mrf.mxu1 }
0x1309   : > { %v14704_v20 = vpop.f32.mrf.mxu1 }
0x130b   : > { %v8466_v62 = vpop.f32.mrf.mxu0 }
0x130d   : > { %v8467_v12 = vpop.f32.mrf.mxu0 }
0x130e   : > { %v8468_v5 = vadd.f32 %v8467_v12, %v8466_v62 }
0x130f   : > { %v8469_v21 = vpop.f32.mrf.mxu0 }
0x1310   : > { %v8592_v9 = vpop.f32.mrf.mxu1  ;;  %v7170_v26 = vadd.f32 %v8468_v5, %v8428_v24  ;;  %v8449_v5 = vadd.f32 %v14704_v20, %v14702_v42 }
0x1311   : > { %v8470_v63 = vpop.f32.mrf.mxu0 }
0x1312   : > { %v8471_v3 = vadd.f32 %v8470_v63, %v8469_v21  ;;  %v7234_v34 = vpop.f32.mrf.mxu1 }
0x1313   : > { %v7235_v43 = vadd.f32 %v7234_v34, %v7170_v26  ;;  %v8472_v8 = vpop.f32.mrf.mxu0 }
0x1314   : > { %v8593_v33 = vpop.f32.mrf.mxu1  ;;  %v7173_v51 = vadd.f32 %v8471_v3, %v8431_v35 }
0x1315   : > { %v8473_v41 = vpop.f32.mrf.mxu0  ;;  %v7273_v22 = vmul.f32 0.2, %v7235_v43  ;;  %vm7265_vm9 = vcmp.gt.f32.partialorder %v7235_v43, 0.0 }
0x1316   : > { %v8474_v0 = vadd.f32 %v8473_v41, %v8472_v8  ;;  %v7237_v54 = vpop.f32.mrf.mxu1 }
0x1317   : > { %v7238_v39 = vadd.f32 %v7237_v54, %v7173_v51  ;;  %v8475_v44 = vpop.f32.mrf.mxu0  ;;  %v7281_v60 = vsel %vm7265_vm9, %v7235_v43, %v7273_v22 }
0x1318   : > { %v7178_v27 = vadd.f32 %v8474_v0, %v8434_v31  ;;  %v8596_v37 = vpop.f32.mrf.mxu1 }
0x1319   : > { %vm7266_vm11 = vcmp.gt.f32.partialorder %v7238_v39, 0.0  ;;  %v7274_v6 = vmul.f32 0.2, %v7238_v39  ;;  %v8476_v56 = vpop.f32.mrf.mxu0 }
0x131a   : > { %v7243_v28 = vadd.f32 %v8592_v9, %v7178_v27  ;;  %v8477_v19 = vadd.f32 %v8476_v56, %v8475_v44  ;;  %v7250_v11 = vpop.f32.mrf.mxu1 }
0x131b   : > { %v7282_v1 = vsel %vm7266_vm11, %v7238_v39, %v7274_v6  ;;  %v8478_v47 = vpop.f32.mrf.mxu0 }
0x131c   : > { %v7289_v49 = vpack.c.bf16 %v7282_v1, %v7281_v60  ;;  %v7181_v15 = vadd.f32 %v8477_v19, %v8437_v16  ;;  %v7275_v61 = vmul.f32 0.2, %v7243_v28  ;;  %vm7267_vm13 = vcmp.gt.f32.partialorder %v7243_v28, 0.0  ;;  %v8597_v23 = vpop.f32.mrf.mxu1 }
0x131d   : > { %v8479_v40 = vpop.f32.mrf.mxu0 }
0x131e   : > { %v7246_v59 = vadd.f32 %v8593_v33, %v7181_v15  ;;  %v8480_v18 = vadd.f32 %v8479_v40, %v8478_v47  ;;  %7987 = vmatmul.mubr.msk.bf16.vlgmr.msra.gmra.mxu0 %vm15580_vm4, %v7289_v49  ;;  %v7283_v58 = vsel %vm7267_vm13, %v7243_v28, %v7275_v61  ;;  %v7253_v4 = vpop.f32.mrf.mxu1  ;;  %v15584_v61 = vld [vmem:[#allocation79_spill] sm:$0xff] }
0x131f   : > { %v8481_v32 = vpop.f32.mrf.mxu0  ;;  %7359 = vmatprep.mubr.bf16.mxu0 %v15578_v55 }
0x1320   : > { %vm7268_vm5 = vcmp.gt.f32.partialorder %v7246_v59, 0.0  ;;  %v7276_v30 = vmul.f32 0.2, %v7246_v59  ;;  %v7186_v48 = vadd.f32 %v8480_v18, %v8440_v13 }
0x1321   : > { %v8482_v29 = vpop.f32.mrf.mxu0 }
0x1322   : > { %v7284_v7 = vsel %vm7268_vm5, %v7246_v59, %v7276_v30  ;;  %v8483_v53 = vadd.f32 %v8482_v29, %v8481_v32  ;;  %v7251_v38 = vadd.f32 %v7250_v11, %v7186_v48  ;;  %v15585_v59 = vld [vmem:[#allocation73_spill] sm:$0xff]  ;;  %v15586_v32 = vld [vmem:[#allocation31_spill] sm:$0xff] }
0x1323   : > { %v7290_v14 = vpack.c.bf16 %v7284_v7, %v7283_v58  ;;  %v8484_v36 = vpop.f32.mrf.mxu0  ;;  %v7397_v18 = vpack.c.bf16 %v15585_v59, %v15584_v61  ;;  %v15587_v30 = vld [vmem:[#allocation81_spill] sm:$0xff]  ;;  %v15592_v58 = vld [vmem:[#allocation39_spill] sm:$0xff] }
0x1324   : > { %v7189_v45 = vadd.f32 %v8483_v53, %v8443_v52  ;;  %v7277_v10 = vmul.f32 0.2, %v7251_v38  ;;  %vm7269_vm6 = vcmp.gt.f32.partialorder %v7251_v38, 0.0  ;;  %v15588_v48 = vpack.c.bf16 %v15586_v32, %v15587_v30  ;;  %v15589_v52 = vld [vmem:[#allocation48_spill] sm:$0xff]  ;;  %v15590_v29 = vld [vmem:[#allocation49_spill] sm:$0xff] }
0x1325   : > { %v8485_v46 = vpop.f32.mrf.mxu0  ;;  %v15593_v7 = vld [vmem:[#allocation41_spill] sm:$0xff] }
0x1326   : > { %v8486_v62 = vadd.f32 %v8485_v46, %v8484_v36  ;;  %v7254_v12 = vadd.f32 %v7253_v4, %v7189_v45  ;;  %7988 = vmatmul.mubr.msk.bf16.gmra.mxu0 %vm15581_vm7, %v7290_v14  ;;  %v7285_v9 = vsel %vm7269_vm6, %v7251_v38, %v7277_v10  ;;  %v7393_v53 = vpack.c.bf16 %v15593_v7, %v15592_v58  ;;  %v15594_v38 = vld [vmem:[#allocation50_spill] sm:$0xff]  ;;  %v15595_v14 = vld [vmem:[#allocation51_spill] sm:$0xff]  ;;  %v15598_v46 = vld [vmem:[#allocation40_spill] sm:$0xff] }
0x1327   : > { %v8487_v2 = vpop.f32.mrf.mxu0  ;;  %7369 = vmatprep.mubr.bf16.mxu0 %v15578_v55  ;;  %v15596_v36 = vpack.c.bf16 %v15594_v38, %v15595_v14  ;;  %v15597_v45 = vld [vmem:[#allocation38_spill] sm:$0xff]  ;;  %vm15600_vm7 = vcmask 1043456  }
0x1328   : > { %v7194_v57 = vadd.f32 %v8486_v62, %v8446_v25  ;;  %vm7270_vm10 = vcmp.gt.f32.partialorder %v7254_v12, 0.0  ;;  %v7278_v24 = vmul.f32 0.2, %v7254_v12  ;;  %v7392_v4 = vpack.c.bf16 %v15598_v46, %v15597_v45  ;;  %v9061_v25 = vld [vmem:[#allocation13] sm:$0xff]   ;;  %vm15601_vm6 = vmmov %vm15600_vm7 }
0x1329   : > { %v8488_v21 = vpop.f32.mrf.mxu0 }
0x132a   : > { %v7259_v26 = vadd.f32 %v8596_v37, %v7194_v57  ;;  %v7286_v63 = vsel %vm7270_vm10, %v7254_v12, %v7278_v24  ;;  %v8489_v50 = vadd.f32 %v8488_v21, %v8487_v2 }
0x132b   : > { %v7291_v17 = vpack.c.bf16 %v7286_v63, %v7285_v9 }
0x132c   : > { %v7197_v35 = vadd.f32 %v8489_v50, %v8449_v5  ;;  %v7279_v3 = vmul.f32 0.2, %v7259_v26  ;;  %vm7271_vm2 = vcmp.gt.f32.partialorder %v7259_v26, 0.0 }
0x132e   : > { %v7262_v34 = vadd.f32 %v8597_v23, %v7197_v35  ;;  %7989 = vmatmul.mubr.msk.bf16.gmra.mxu0 %vm15582_vm12, %v7291_v17  ;;  %v7287_v8 = vsel %vm7271_vm2, %v7259_v26, %v7279_v3  ;;  %v15591_v23 = vpack.c.bf16 %v15589_v52, %v15590_v29  ;;  %v7469_v3 = vld [vmem:[#allocation14] sm:$0xf] }
0x132f   : > { %7379 = vmatprep.mubr.bf16.mxu0 %v15578_v55 }
0x1330   : > { %vm7272_vm3 = vcmp.gt.f32.partialorder %v7262_v34, 0.0  ;;  %v7280_v43 = vmul.f32 0.2, %v7262_v34 }
0x1332   : > { %v7288_v33 = vsel %vm7272_vm3, %v7262_v34, %v7280_v43 }
0x1333   : > { %v7292_v51 = vpack.c.bf16 %v7288_v33, %v7287_v8 }
0x1336   : > { %7990 = vmatmul.mubr.msk.bf16.gmra.mxu0 %vm15583_vm14, %v7292_v51 }
0x13de   : > { %v7351_v42 = vpop.f32.mrf.mxu0 }
0x13e0   : > { %v7353_v20 = vpop.f32.mrf.mxu0 }
0x13e2   : > { %v7355_v41 = vpop.f32.mrf.mxu0 }
0x13e3   : > { %v7398_v13 = vpack.c.bf16 %v7355_v41, %v7351_v42 }
0x13e4   : > { %v7357_v31 = vpop.f32.mrf.mxu0 }
0x13e5   : > { %v7399_v11 = vpack.c.bf16 %v7357_v31, %v7353_v20 }
0x13e6   : > { %v7361_v0 = vpop.f32.mrf.mxu0 }
0x13e8   : > { %v7363_v54 = vpop.f32.mrf.mxu0 }
0x13ea   : > { %v7365_v22 = vpop.f32.mrf.mxu0 }
0x13eb   : > { %v7400_v40 = vpack.c.bf16 %v7365_v22, %v7361_v0 }
0x13ec   : > { %v7367_v39 = vpop.f32.mrf.mxu0 }
0x13ed   : > { %v7401_v15 = vpack.c.bf16 %v7367_v39, %v7363_v54 }
0x13ee   : > { %v7371_v44 = vpop.f32.mrf.mxu0 }
0x13f0   : > { %v7373_v27 = vpop.f32.mrf.mxu0 }
0x13f2   : > { %v7375_v6 = vpop.f32.mrf.mxu0 }
0x13f3   : > { %v7402_v49 = vpack.c.bf16 %v7375_v6, %v7371_v44 }
0x13f4   : > { %v7377_v56 = vpop.f32.mrf.mxu0 }
0x13f5   : > { %v7403_v47 = vpack.c.bf16 %v7377_v56, %v7373_v27 }
0x13f6   : > { %v7381_v37 = vpop.f32.mrf.mxu0 }
0x13f8   : > { %v7383_v16 = vpop.f32.mrf.mxu0 }
0x13fa   : > { %v7385_v28 = vpop.f32.mrf.mxu0 }
0x13fb   : > { %v7404_v1 = vpack.c.bf16 %v7385_v28, %v7381_v37 }
0x13fc   : > { %v7387_v19 = vpop.f32.mrf.mxu0 }
0x13fd   : > { %v7405_v60 = vpack.c.bf16 %v7387_v19, %v7383_v16 }
0x13ff   : > { %7416 = vmatprep.subr.bf16.mxu1 %v7405_v60 }
0x1400   : > { %7417 = vmatpush1.bf16.msra.mxu1 %v7404_v1 }
0x1401   : > { %7418 = vmatprep.subr.bf16.mxu1 %v7403_v47 }
0x1404   : > { %7419 = vmatpush1.bf16.msra.mxu1 %v7402_v49 }
0x1405   : > { %7420 = vmatprep.subr.bf16.mxu1 %v7401_v15 }
0x1408   : > { %7421 = vmatpush1.bf16.msra.mxu1 %v7400_v40 }
0x1409   : > { %7422 = vmatprep.subr.bf16.mxu1 %v7399_v11 }
0x140c   : > { %7423 = vmatpush1.bf16.msra.mxu1 %v7398_v13 }
0x140d   : > { %7424 = vmatprep.subr.bf16.mxu1 %v7397_v18 }
0x1410   : > { %7425 = vmatpush1.bf16.msra.mxu1 %v15588_v48 }
0x1411   : > { %7426 = vmatprep.subr.bf16.mxu1 %v15591_v23 }
0x1414   : > { %7427 = vmatpush1.bf16.msra.mxu1 %v15596_v36 }
0x1415   : > { %7428 = vmatprep.subr.bf16.mxu1 %v7393_v53 }
0x1418   : > { %7429 = vmatpush1.bf16.msra.mxu1 %v7392_v4 }
0x141b   : > { %7992 = vmatmul.mubr.msk.bf16.vlgmr.msra.gmra.mxu1 %vm15599_vm15, %v9061_v25 }
0x141c   : > { %7507 = vmatprep.mubr.bf16.mxu1 %v15578_v55 }
0x14db   : > { %v7448_v10 = vpop.f32.mrf.mxu1 }
0x14dc   : > { %v7461_v24 = vmul.f32 0.2, %v7448_v10  ;;  %vm7457_vm9 = vcmp.gt.f32.partialorder %v7448_v10, 0.0 }
0x14dd   : > { %v7450_v62 = vpop.f32.mrf.mxu1 }
0x14de   : > { %v7462_v2 = vmul.f32 0.2, %v7450_v62  ;;  %vm7458_vm8 = vcmp.gt.f32.partialorder %v7450_v62, 0.0  ;;  %v7465_v50 = vsel %vm7457_vm9, %v7448_v10, %v7461_v24 }
0x14df   : > { %v7452_v12 = vpop.f32.mrf.mxu1 }
0x14e0   : > { %vm7459_vm0 = vcmp.gt.f32.partialorder %v7452_v12, 0.0  ;;  %v7463_v57 = vmul.f32 0.2, %v7452_v12  ;;  %v7466_v26 = vsel %vm7458_vm8, %v7450_v62, %v7462_v2 }
0x14e1   : > { %v7454_v5 = vpop.f32.mrf.mxu1 }
0x14e2   : > { %vm7460_vm11 = vcmp.gt.f32.partialorder %v7454_v5, 0.0  ;;  %v7464_v21 = vmul.f32 0.2, %v7454_v5  ;;  %v7467_v9 = vsel %vm7459_vm0, %v7452_v12, %v7463_v57 }
0x14e3   : > { %v7470_v35 = vpack.c.bf16 %v7467_v9, %v7465_v50 }
0x14e4   : > { %v7468_v63 = vsel %vm7460_vm11, %v7454_v5, %v7464_v21 }
0x14e5   : > { %v7471_v17 = vpack.c.bf16 %v7468_v63, %v7466_v26 }
0x14e7   : > { %7489 = vmatprep.subr.bf16.mxu1 %v7471_v17 }
0x14e8   : > { %7490 = vmatpush1.bf16.msra.mxu1 %v7470_v35 }
0x14eb   : > { %7993 = vmatmul.mubr.msk.bf16.vlgmr.msra.gmra.mxu1 %vm15580_vm4, %v7469_v3 }
0x14ec   : > { %7566 = vmatprep.mubr.bf16.mxu1 %v15578_v55  ;;  %v7522_v55 = vld [vmem:[#allocation16] sm:$0xf] }
0x15ab   : > { %v7509_v34 = vpop.f32.mrf.mxu1 }
0x15ac   : > { %vm7516_vm13 = vcmp.gt.f32.partialorder %v7509_v34, 0.0  ;;  %v7518_v43 = vmul.f32 0.2, %v7509_v34 }
0x15ad   : > { %v7511_v8 = vpop.f32.mrf.mxu1 }
0x15ae   : > { %v7520_v33 = vsel %vm7516_vm13, %v7509_v34, %v7518_v43  ;;  %vm7517_vm5 = vcmp.gt.f32.partialorder %v7511_v8, 0.0  ;;  %v7519_v51 = vmul.f32 0.2, %v7511_v8 }
0x15af   : > { %v7523_v42 = vpack.c.bf16 %v7520_v33, %v7520_v33  ;;  %v7513_v20 = vpop.f32.mrf.mxu1 }
0x15b0   : > { %v7521_v41 = vsel %vm7517_vm5, %v7511_v8, %v7519_v51 }
0x15b1   : > { %v7524_v31 = vpack.c.bf16 %v7521_v41, %v7521_v41  ;;  %v7514_v0 = vpop.f32.mrf.mxu1  ;;  %v7529_v54 = vsel %vm15601_vm6, %v7523_v42, 0 }
0x15b3   : > { %7994 = vmatprep.subr.msk.bf16.mxu1 %vm15600_vm7, %v7524_v31 }
0x15b4   : > { %7549 = vmatpush1.bf16.msra.mxu1 %v7529_v54 }
0x15b7   : > { %7995 = vmatmul.mubr.msk.bf16.vlgmr.msra.gmra.mxu1 %vm1999_vm1, %v7522_v55 }
0x1677   : > { %v7568_v22 = vpop.f32.mrf.mxu1 }
0x1678   : > { %9064 = vtanh.f32 %v7568_v22 }
0x1679   : > { %v7570_v39 = vpop.f32.mrf.mxu1 }
0x167a   : > { %9066 = vtanh.f32 %v7570_v39 }
0x167b   : > { %v7572_v44 = vpop.f32.mrf.mxu1 }
0x167d   : > { %v7573_v27 = vpop.f32.mrf.mxu1 }
0x1685   : > { %v9065_v6 = vpop.eup %9064 }
0x1686   : > { %7577 = vst [vmem:[%s789_s23] sm:$0xff] %v9065_v6 }
0x1687   : > { %v9067_v56 = vpop.eup %9066 }
0x1688   : > { %7578 = vst [vmem:[%s789_s23 + $0x8] sm:$0xff] %v9067_v56 }
0x1689   : > { %9398 = shalt.err (!%p9395_p2)
}
0x168a   : > { %s9399_s15 = scalar_lea.hbm %s14744_s17, 256  ;;  %s9403_s4 = scalar_lea.hbm %s15602_s7, 512 }
0x168b   : > { %p9400_p8 = scmp.ne.s32.totalorder %s14744_s17, %s9399_s15  ;;  %p9404_p13 = scmp.lt.s32.totalorder %s14744_s17, %s15602_s7 }
0x168c   : > { %p9405_p0 = scmp.lt.s32.totalorder %s9403_s4, %s9399_s15 }
0x168d   : > { %p9401_p11 = pnand %p9400_p8, %p15603_p3 }
0x168e   : > { %p9406_p5 = por %p9405_p0, %p9404_p13 }
0x168f   : > { %p9402_p10 = pneg %p9401_p11 }
0x1691   : > { %p9407_p1 = pnand %p9406_p5, %p9402_p10 }
0x1693   : > { %9410 = shalt.err (!%p9407_p1)
}
0x1694   : > { %8644 = dma.vmem_to_hbm [thread:$0]  (%p15603_p3), %s7595_s13, 256, %s14744_s17, %s7580_s24  }
0x1695 PF: > { %s7606_s1 = sand.u32 1, %s9461_s0   ;;  %p15604_p4 = scmp.ne.s32.totalorder %s14971_s29, 0 }
0x1696   : > { %p15605_p9 = scmp.ge.s32.totalorder %s9473_s21, 2  ;;  %s7607_s27 = scalar_lea.sflag [#allocation4], %s7606_s1 }
0x1698   : > { %p8685_p6 = pnand %p15605_p9, %p15604_p4 }
0x169a   : > { %p8686_p12 = pneg %p8685_p6 }
0x169c   : > { %9456 = dma.done.wait (%p8686_p12), %s7607_s27, 256  }
0x169d   : > { %9458 = vsyncadd (%p8686_p12), %s7607_s27, 4294967040  ;;  %p38_p7 = scmp.ge.s32.totalorder %s9786_s28, 4   ;;  %s15606_s0 = smov %s9465_s30 }
0x169e   : > { %s15607_s30 = smov %s9469_s20  ;;  %s15608_s20 = smov %s9798_s18 }
0x169f   : > { %s15609_s21 = smov %s9786_s28  ;;  %40 = sbr.rel (!%p38_p7) target bundleno = 32 (0x20), region = 188 }
0x16a4   :  { %7612 = vsyncpa [#allocation3], 1 }
0x16a5   :  { %7614 = vsyncpa [#allocation3 + $0x1], 1 }
0x16a6   :  { %7615 = vsyncpa [#allocation6], 1 }
0x16a7   :  { %7616 = vsyncpa [#allocation9], 1 }
0x16a8   :  { %7617 = vsyncpa [#allocation12], 1 }
0x16a9   :  { %7618 = vsyncpa [#allocation15], 1 }
0x16aa   :  { %7619 = vsyncpa [#allocation18], 1 }
0x16ab   :  { %7620 = vsyncpa [#allocation21], 1 }
0x16ac   :  { %7621 = vsyncpa [#allocation4], 1 }
0x16ad   :  { %7623 = vsyncpa [#allocation4 + $0x1], 1 }

</bundles_post_ra>
